<compile_context>
chip_gen: v6e
topology: v6e:2x2x1
jax: 0.10.0
libtpu: 0.0.40
codegen_flags: <defaults>
</compile_context>

<pallas_src>
import numpy as np
import jax
import jax.numpy as jnp
from jax.experimental import pallas as pl
from jax.experimental.pallas import tpu as pltpu


# ----------------------------------------------------------------------------
# helpers (glue, plain numpy / python)
# ----------------------------------------------------------------------------
def _bilinear_matrix(n_in: int, n_out: int) -> np.ndarray:
    """Interpolation matrix matching F.interpolate(mode='bilinear', align_corners=True)."""
    U = np.zeros((n_out, n_in), dtype=np.float32)
    if n_out == 1:
        U[0, 0] = 1.0
        return U
    for i in range(n_out):
        src = i * (n_in - 1) / (n_out - 1)
        i0 = min(int(np.floor(src)), n_in - 1)
        i1 = min(i0 + 1, n_in - 1)
        w = src - i0
        U[i, i0] += 1.0 - w
        U[i, i1] += w
    return U


def _padded_bytes(shape, itemsize=4):
    """VMEM footprint of one f32 buffer with (8, 128) tile padding."""
    shape = tuple(int(s) for s in shape)
    if len(shape) < 2:
        shape = (1,) * (2 - len(shape)) + shape
    lead = 1
    for s in shape[:-2]:
        lead *= s
    sub = -(-shape[-2] // 8) * 8
    lane = -(-shape[-1] // 128) * 128
    return lead * sub * lane * itemsize


def _vmem_limit_bytes(block_shapes, scratch_shapes):
    """Right-sized VMEM request: double-buffered pipeline blocks + scratch."""
    need = 2 * sum(_padded_bytes(s) for s in block_shapes)
    need += sum(_padded_bytes(s) for s in scratch_shapes)
    return int(min(max(2 * need, 8 << 20), 48 << 20))


# ----------------------------------------------------------------------------
# in-kernel helpers
# ----------------------------------------------------------------------------
def _conv3x3_bands(p_ref, w_ref, out_ref, stat_ref, cin, cout, H, W):
    """3x3 'same' cross-correlation, band-tiled over 8 output rows.

    p_ref   : VMEM (cin, H+2, W) planes; rows [1, H+1) are the image, rows 0
              and H+1 are the zero conv halo.  Lane axis kept un-padded (W).
    w_ref   : SMEM flat f32 weights, layout (ci, ky, kx, co).
    out_ref : (1, cout, H, W) output block (pre-BN conv result).
    stat_ref: (1, 2*cout, W) per-channel column sums of out and out^2
              (batch-norm statistics, avoids an XLA-side HBM re-read).

    The +/-1 column taps use pltpu.roll (XLU slot) + edge masks, so there is
    no lane-offset scratch and no masked stores; band accumulators are (8, W)
    so register pressure stays bounded at real image widths.
    """
    col = jax.lax.broadcasted_iota(jnp.int32, (8, W), 1)
    valid_left = col >= 1          # tap dx=0 reads column j-1 -> invalid at j=0
    valid_right = col < (W - 1)    # tap dx=2 reads column j+1 -> invalid at j=W-1

    def band(b, carry):
        r0 = pl.multiple_of(b * 8, 8)
        accs = [jnp.zeros((8, W), jnp.float32) for _ in range(cout)]
        for ci in range(cin):
            for dy in range(3):
                rows = p_ref[ci, pl.ds(r0 + dy, 8), :]           # (8, W)
                for dx in range(3):
                    if dx == 1:
                        win = rows
                    elif dx == 0:    # source column j-1, zero-fill at j=0
                        win = jnp.where(valid_left,
                                        pltpu.roll(rows, 1, axis=1), 0.0)
                    else:            # source column j+1, zero-fill at j=W-1
                        win = jnp.where(valid_right,
                                        pltpu.roll(rows, W - 1, axis=1), 0.0)
                    base = ((ci * 3 + dy) * 3 + dx) * cout
                    for co in range(cout):
                        accs[co] = accs[co] + w_ref[base + co] * win
        for co in range(cout):
            out_ref[0, co, pl.ds(r0, 8), :] = accs[co]
        return carry

    jax.lax.fori_loop(0, H // 8, band, 0)

    # Per-channel sum / sum-of-squares (lane-dense column partials) re-read
    # from the VMEM output block; cheap vld + XLU reductions.
    rows_s, rows_q = [], []
    for co in range(cout):
        y = out_ref[0, co]
        rows_s.append(jnp.sum(y, axis=0, keepdims=True))          # (1, W)
        rows_q.append(jnp.sum(y * y, axis=0, keepdims=True))      # (1, W)
    stat_ref[0] = jnp.concatenate(rows_s + rows_q, axis=0)        # (2*cout, W)


# ----------------------------------------------------------------------------
# Pallas kernels (each runs once per batch element, grid=(N,), "parallel")
# ----------------------------------------------------------------------------
def _up_concat_conv1_kernel(x1_ref, x2_ref, uh_ref, uwT_ref, w_ref,
                            out_ref, stat_ref, p_ref):
    """upsample(x1)+pad, concat with x2, 3x3 conv (no bias) -> h1 + BN stats."""
    _, C2, H2, W2 = x2_ref.shape
    Cmid = out_ref.shape[1]
    Cin = p_ref.shape[0]
    C1 = Cin - C2
    H1 = x1_ref.shape[1] // C1

    zrow = jnp.zeros((1, W2), jnp.float32)

    # skip connection x2 -> scratch channels [0, C2): one lane-aligned
    # full-plane store per channel incl. the 1-row zero halo (no memset).
    for c in range(C2):
        p_ref[c] = jnp.concatenate([zrow, x2_ref[0, c], zrow], axis=0)

    # separable bilinear 2x upsample of x1.  F.pad columns are folded into Uw;
    # F.pad rows + the 1-row conv halo are folded into Uh as zero rows, so the
    # matmuls write the full padded planes directly (no memset, no copies).
    # The W-stage matmul is batched over channels (single MXU call).
    t = jnp.dot(x1_ref[0], uwT_ref[...],
                preferred_element_type=jnp.float32)      # (C1*H1, W2)
    uh = uh_ref[...]                                     # (H2+2, H1)
    for c in range(C1):
        p_ref[C2 + c] = jnp.dot(uh, t[c * H1:(c + 1) * H1, :],
                                preferred_element_type=jnp.float32)

    # conv1 (bias omitted: exactly cancelled by training-mode BN mean subtract)
    _conv3x3_bands(p_ref, w_ref, out_ref, stat_ref, Cin, Cmid, H2, W2)


def _bn_relu_conv2_kernel(h1_ref, s_ref, b_ref, w_ref, out_ref, stat_ref, p_ref):
    """BN1 (precomputed scale/shift) + ReLU, 3x3 conv (no bias) -> h2 + stats."""
    _, Cmid, H2, W2 = h1_ref.shape
    Cout = out_ref.shape[1]

    zrow = jnp.zeros((1, W2), jnp.float32)
    # BN+ReLU is materialised exactly once per channel into the row-halo
    # scratch (lane-aligned full-plane store; no memset, no offset-(1,1) copy).
    for c in range(Cmid):
        y = jnp.maximum(h1_ref[0, c] * s_ref[c] + b_ref[c], 0.0)
        p_ref[c] = jnp.concatenate([zrow, y, zrow], axis=0)

    _conv3x3_bands(p_ref, w_ref, out_ref, stat_ref, Cmid, Cout, H2, W2)


def _bn_relu_kernel(h_ref, s_ref, b_ref, out_ref):
    """apply BN2 (precomputed scale/shift) + ReLU (memory-bound elementwise)."""
    C = out_ref.shape[1]
    for c in range(C):   # each statement is a full lane-dense plane load/store
        out_ref[0, c] = jnp.maximum(h_ref[0, c] * s_ref[c] + b_ref[c], 0.0)


# ----------------------------------------------------------------------------
# wrapper (NCHW in/out, like the PyTorch module; training-mode BatchNorm)
# ----------------------------------------------------------------------------
def up_forward(x1_nchw, x2_nchw, params):
    N, C1, H1, W1 = x1_nchw.shape
    N2, C2, H2, W2 = x2_nchw.shape
    assert N == N2
    Cin = C1 + C2
    Cmid = params["w1"].shape[0]
    Cout = params["w2"].shape[0]
    assert params["w1"].shape[1] == Cin
    eps = 1e-5

    diffX = H2 - 2 * H1
    diffY = W2 - 2 * W1
    # TODO(synk): negative diffX/diffY (crop case) never occurs for U-Net shapes.
    assert diffX >= 0 and diffY >= 0
    # band-tiled conv assumes whole 8-row bands (U-Net decoder sizes satisfy it)
    assert H2 % 8 == 0 and H2 >= 8 and W2 >= 2

    # Separable bilinear (align_corners=True) matrices.  F.pad columns are
    # folded into Uw; F.pad rows plus the 1-row conv halo into Uh (zero rows).
    Uh = np.pad(_bilinear_matrix(H1, 2 * H1),
                ((1 + diffX // 2, 1 + (diffX - diffX // 2)), (0, 0)))
    Uw = np.pad(_bilinear_matrix(W1, 2 * W1),
                ((diffY // 2, diffY - diffY // 2), (0, 0)))
    uh = jnp.asarray(Uh)                         # (H2+2, H1)
    uwT = jnp.asarray(Uw.T)                      # (W1, W2)

    x1_flat = x1_nchw.astype(jnp.float32).reshape(N, C1 * H1, W1)
    x2 = x2_nchw.astype(jnp.float32)
    # PyTorch OIHW -> flat (ci, ky, kx, co); read as SMEM scalars in-kernel
    w1_flat = jnp.transpose(params["w1"], (1, 2, 3, 0)).reshape(-1).astype(jnp.float32)
    w2_flat = jnp.transpose(params["w2"], (1, 2, 3, 0)).reshape(-1).astype(jnp.float32)

    smem_spec = pl.BlockSpec(memory_space=pltpu.MemorySpace.SMEM)
    cnt = float(N * H2 * W2)

    # ---- stage 1: upsample + pad + concat + conv1 (+ BN1 stats) -------------
    vmem1 = _vmem_limit_bytes(
        [(1, C1 * H1, W1), (1, C2, H2, W2), (H2 + 2, H1), (W1, W2),
         (1, Cmid, H2, W2), (1, 2 * Cmid, W2)],
        [(Cin, H2 + 2, W2)])
    h1, stats1 = pl.pallas_call(
        _up_concat_conv1_kernel,
        out_shape=(jax.ShapeDtypeStruct((N, Cmid, H2, W2), jnp.float32),
                   jax.ShapeDtypeStruct((N, 2 * Cmid, W2), jnp.float32)),
        grid=(N,),
        in_specs=[
            pl.BlockSpec((1, C1 * H1, W1), lambda n: (n, 0, 0)),
            pl.BlockSpec((1, C2, H2, W2), lambda n: (n, 0, 0, 0)),
            pl.BlockSpec((H2 + 2, H1), lambda n: (0, 0)),
            pl.BlockSpec((W1, W2), lambda n: (0, 0)),
            smem_spec,
        ],
        out_specs=(pl.BlockSpec((1, Cmid, H2, W2), lambda n: (n, 0, 0, 0)),
                   pl.BlockSpec((1, 2 * Cmid, W2), lambda n: (n, 0, 0))),
        scratch_shapes=[pltpu.VMEM((Cin, H2 + 2, W2), jnp.float32)],
        compiler_params=pltpu.CompilerParams(
            dimension_semantics=("parallel",), vmem_limit_bytes=vmem1),
    )(x1_flat, x2, uh, uwT, w1_flat)

    # BN1 scale/shift from in-kernel sums (training mode, biased variance).
    st1 = jnp.sum(stats1, axis=(0, 2))                  # (2*Cmid,)
    mean1 = st1[:Cmid] / cnt
    var1 = jnp.maximum(st1[Cmid:] / cnt - mean1 * mean1, 0.0)
    scale1 = params["g1"].astype(jnp.float32) / jnp.sqrt(var1 + eps)
    shift1 = params["be1"].astype(jnp.float32) - mean1 * scale1

    # ---- stage 2: BN1 + ReLU + conv2 (+ BN2 stats) ---------------------------
    vmem2 = _vmem_limit_bytes(
        [(1, Cmid, H2, W2), (1, Cout, H2, W2), (1, 2 * Cout, W2)],
        [(Cmid, H2 + 2, W2)])
    h2, stats2 = pl.pallas_call(
        _bn_relu_conv2_kernel,
        out_shape=(jax.ShapeDtypeStruct((N, Cout, H2, W2), jnp.float32),
                   jax.ShapeDtypeStruct((N, 2 * Cout, W2), jnp.float32)),
        grid=(N,),
        in_specs=[
            pl.BlockSpec((1, Cmid, H2, W2), lambda n: (n, 0, 0, 0)),
            smem_spec, smem_spec, smem_spec,
        ],
        out_specs=(pl.BlockSpec((1, Cout, H2, W2), lambda n: (n, 0, 0, 0)),
                   pl.BlockSpec((1, 2 * Cout, W2), lambda n: (n, 0, 0))),
        scratch_shapes=[pltpu.VMEM((Cmid, H2 + 2, W2), jnp.float32)],
        compiler_params=pltpu.CompilerParams(
            dimension_semantics=("parallel",), vmem_limit_bytes=vmem2),
    )(h1, scale1, shift1, w2_flat)

    st2 = jnp.sum(stats2, axis=(0, 2))                  # (2*Cout,)
    mean2 = st2[:Cout] / cnt
    var2 = jnp.maximum(st2[Cout:] / cnt - mean2 * mean2, 0.0)
    scale2 = params["g2"].astype(jnp.float32) / jnp.sqrt(var2 + eps)
    shift2 = params["be2"].astype(jnp.float32) - mean2 * scale2

    # ---- stage 3: BN2 + ReLU -------------------------------------------------
    vmem3 = _vmem_limit_bytes([(1, Cout, H2, W2), (1, Cout, H2, W2)], [])
    out = pl.pallas_call(
        _bn_relu_kernel,
        out_shape=jax.ShapeDtypeStruct((N, Cout, H2, W2), jnp.float32),
        grid=(N,),
        in_specs=[
            pl.BlockSpec((1, Cout, H2, W2), lambda n: (n, 0, 0, 0)),
            smem_spec, smem_spec,
        ],
        out_specs=pl.BlockSpec((1, Cout, H2, W2), lambda n: (n, 0, 0, 0)),
        compiler_params=pltpu.CompilerParams(
            dimension_semantics=("parallel",), vmem_limit_bytes=vmem3),
    )(h2, scale2, shift2)

    return out                                   # NCHW


# ----------------------------------------------------------------------------
# pure-JAX reference (mirrors the PyTorch module, NCHW)
# ----------------------------------------------------------------------------
def up_reference(x1, x2, params):
    _, _, H1, W1 = x1.shape
    _, _, H2, W2 = x2.shape
    Uh = jnp.asarray(_bilinear_matrix(H1, 2 * H1))
    Uw = jnp.asarray(_bilinear_matrix(W1, 2 * W1))
    up = jnp.einsum("Hh,Ww,nchw->ncHW", Uh, Uw, x1,
                    precision=jax.lax.Precision.HIGHEST)
    diffX = H2 - up.shape[-2]
    diffY = W2 - up.shape[-1]
    up = jnp.pad(up, ((0, 0), (0, 0),
                      (diffX // 2, diffX - diffX // 2),
                      (diffY // 2, diffY - diffY // 2)))
    x = jnp.concatenate([x2, up], axis=1)

    def conv_bn_relu(x, w, b, g, beta):
        y = jax.lax.conv_general_dilated(
            x, w, (1, 1), ((1, 1), (1, 1)),
            dimension_numbers=("NCHW", "OIHW", "NCHW"),
            precision=jax.lax.Precision.HIGHEST)
        y = y + b[None, :, None, None]
        mean = jnp.mean(y, axis=(0, 2, 3), keepdims=True)
        var = jnp.var(y, axis=(0, 2, 3), keepdims=True)
        y = (y - mean) / jnp.sqrt(var + 1e-5) * g[None, :, None, None] \
            + beta[None, :, None, None]
        return jnp.maximum(y, 0.0)

    x = conv_bn_relu(x, params["w1"], params["b1"], params["g1"], params["be1"])
    x = conv_bn_relu(x, params["w2"], params["b2"], params["g2"], params["be2"])
    return x


# ----------------------------------------------------------------------------
if __name__ == "__main__":
    # up(in_ch=8, out_ch=4, bilinear=True); concat channels C1 + C2 == in_ch
    in_ch, out_ch = 8, 4
    N, H1, W1 = 2, 8, 8
    C1 = in_ch // 2          # x1 (deep feature, upsampled 2x)
    C2 = in_ch - C1          # x2 (skip connection)
    H2, W2 = 2 * H1, 2 * W1

    key = jax.random.PRNGKey(0)
    k = jax.random.split(key, 10)
    x1 = jax.random.normal(k[0], (N, C1, H1, W1), jnp.float32)
    x2 = jax.random.normal(k[1], (N, C2, H2, W2), jnp.float32)

    params = dict(
        w1=0.2 * jax.random.normal(k[2], (out_ch, in_ch, 3, 3), jnp.float32),
        b1=0.1 * jax.random.normal(k[3], (out_ch,), jnp.float32),
        g1=1.0 + 0.1 * jax.random.normal(k[4], (out_ch,), jnp.float32),
        be1=0.1 * jax.random.normal(k[5], (out_ch,), jnp.float32),
        w2=0.2 * jax.random.normal(k[6], (out_ch, out_ch, 3, 3), jnp.float32),
        b2=0.1 * jax.random.normal(k[7], (out_ch,), jnp.float32),
        g2=1.0 + 0.1 * jax.random.normal(k[8], (out_ch,), jnp.float32),
        be2=0.1 * jax.random.normal(k[9], (out_ch,), jnp.float32),
    )

    out = jax.jit(up_forward)(x1, x2, params)
    out = jax.block_until_ready(out)

    ref = up_reference(x1, x2, params)
    assert out.shape == (N, out_ch, H2, W2), out.shape
    err = float(jnp.max(jnp.abs(out - ref)))
    assert err < 1e-3, f"max abs err {err}"
    print("KERNEL_OK")
</pallas_src>

<mosaic_0001>
module attributes {stable_mosaic.version = 11 : i64} {
  func.func @_bn_relu_kernel(%arg0: i32, %arg1: memref<1x4x16x16xf32, #tpu.memory_space<vmem>>, %arg2: memref<4xf32, #tpu.memory_space<smem>>, %arg3: memref<4xf32, #tpu.memory_space<smem>>, %arg4: memref<1x4x16x16xf32, #tpu.memory_space<vmem>>) attributes {dimension_semantics = [#tpu.dimension_semantics<parallel>], iteration_bounds = array<i64: 2>, scalar_prefetch = 0 : i64, scratch_operands = 0 : i64, tpu.core_type = #tpu.core_type<tc>, window_params = [{transform_indices = @transform_0, window_bounds = array<i64: 1, 4, 16, 16>}, {transform_indices = @transform_1, window_bounds = array<i64: 4>}, {transform_indices = @transform_2, window_bounds = array<i64: 4>}, {transform_indices = @transform_3, window_bounds = array<i64: 1, 4, 16, 16>}]} {
    %c0 = arith.constant 0 : index
    %c0_0 = arith.constant 0 : index
    %c0_1 = arith.constant 0 : index
    %c0_2 = arith.constant 0 : index
    %0 = vector.load %arg1[%c0, %c0_0, %c0_1, %c0_2] : memref<1x4x16x16xf32, #tpu.memory_space<vmem>>, vector<1x1x16x16xf32>
    %1 = vector.shape_cast %0 : vector<1x1x16x16xf32> to vector<16x16xf32>
    %c0_3 = arith.constant 0 : index
    %2 = memref.load %arg2[%c0_3] : memref<4xf32, #tpu.memory_space<smem>>
    %3 = vector.broadcast %2 : f32 to vector<16x16xf32>
    %4 = arith.mulf %1, %3 : vector<16x16xf32>
    %c0_4 = arith.constant 0 : index
    %5 = memref.load %arg3[%c0_4] : memref<4xf32, #tpu.memory_space<smem>>
    %6 = vector.broadcast %5 : f32 to vector<16x16xf32>
    %7 = arith.addf %4, %6 : vector<16x16xf32>
    %cst = arith.constant 0.000000e+00 : f32
    %8 = vector.broadcast %cst : f32 to vector<16x16xf32>
    %9 = arith.maximumf %7, %8 : vector<16x16xf32>
    %c0_5 = arith.constant 0 : index
    %c0_6 = arith.constant 0 : index
    %c0_7 = arith.constant 0 : index
    %c0_8 = arith.constant 0 : index
    %10 = vector.load %arg4[%c0_5, %c0_6, %c0_7, %c0_8] : memref<1x4x16x16xf32, #tpu.memory_space<vmem>>, vector<1x1x16x16xf32>
    %11 = vector.shape_cast %10 : vector<1x1x16x16xf32> to vector<16x16xf32>
    %12 = vector.shape_cast %9 : vector<16x16xf32> to vector<1x1x16x16xf32>
    tpu.vector_store %arg4[%c0_5, %c0_6, %c0_7, %c0_8], %12 {strides = array<i32>} : memref<1x4x16x16xf32, #tpu.memory_space<vmem>>, vector<1x1x16x16xf32>,
    %c0_9 = arith.constant 0 : index
    %c1 = arith.constant 1 : index
    %c0_10 = arith.constant 0 : index
    %c0_11 = arith.constant 0 : index
    %13 = vector.load %arg1[%c0_9, %c1, %c0_10, %c0_11] : memref<1x4x16x16xf32, #tpu.memory_space<vmem>>, vector<1x1x16x16xf32>
    %14 = vector.shape_cast %13 : vector<1x1x16x16xf32> to vector<16x16xf32>
    %c1_12 = arith.constant 1 : index
    %15 = memref.load %arg2[%c1_12] : memref<4xf32, #tpu.memory_space<smem>>
    %16 = vector.broadcast %15 : f32 to vector<16x16xf32>
    %17 = arith.mulf %14, %16 : vector<16x16xf32>
    %c1_13 = arith.constant 1 : index
    %18 = memref.load %arg3[%c1_13] : memref<4xf32, #tpu.memory_space<smem>>
    %19 = vector.broadcast %18 : f32 to vector<16x16xf32>
    %20 = arith.addf %17, %19 : vector<16x16xf32>
    %cst_14 = arith.constant 0.000000e+00 : f32
    %21 = vector.broadcast %cst_14 : f32 to vector<16x16xf32>
    %22 = arith.maximumf %20, %21 : vector<16x16xf32>
    %c0_15 = arith.constant 0 : index
    %c1_16 = arith.constant 1 : index
    %c0_17 = arith.constant 0 : index
    %c0_18 = arith.constant 0 : index
    %23 = vector.load %arg4[%c0_15, %c1_16, %c0_17, %c0_18] : memref<1x4x16x16xf32, #tpu.memory_space<vmem>>, vector<1x1x16x16xf32>
    %24 = vector.shape_cast %23 : vector<1x1x16x16xf32> to vector<16x16xf32>
    %25 = vector.shape_cast %22 : vector<16x16xf32> to vector<1x1x16x16xf32>
    tpu.vector_store %arg4[%c0_15, %c1_16, %c0_17, %c0_18], %25 {strides = array<i32>} : memref<1x4x16x16xf32, #tpu.memory_space<vmem>>, vector<1x1x16x16xf32>,
    %c0_19 = arith.constant 0 : index
    %c2 = arith.constant 2 : index
    %c0_20 = arith.constant 0 : index
    %c0_21 = arith.constant 0 : index
    %26 = vector.load %arg1[%c0_19, %c2, %c0_20, %c0_21] : memref<1x4x16x16xf32, #tpu.memory_space<vmem>>, vector<1x1x16x16xf32>
    %27 = vector.shape_cast %26 : vector<1x1x16x16xf32> to vector<16x16xf32>
    %c2_22 = arith.constant 2 : index
    %28 = memref.load %arg2[%c2_22] : memref<4xf32, #tpu.memory_space<smem>>
    %29 = vector.broadcast %28 : f32 to vector<16x16xf32>
    %30 = arith.mulf %27, %29 : vector<16x16xf32>
    %c2_23 = arith.constant 2 : index
    %31 = memref.load %arg3[%c2_23] : memref<4xf32, #tpu.memory_space<smem>>
    %32 = vector.broadcast %31 : f32 to vector<16x16xf32>
    %33 = arith.addf %30, %32 : vector<16x16xf32>
    %cst_24 = arith.constant 0.000000e+00 : f32
    %34 = vector.broadcast %cst_24 : f32 to vector<16x16xf32>
    %35 = arith.maximumf %33, %34 : vector<16x16xf32>
    %c0_25 = arith.constant 0 : index
    %c2_26 = arith.constant 2 : index
    %c0_27 = arith.constant 0 : index
    %c0_28 = arith.constant 0 : index
    %36 = vector.load %arg4[%c0_25, %c2_26, %c0_27, %c0_28] : memref<1x4x16x16xf32, #tpu.memory_space<vmem>>, vector<1x1x16x16xf32>
    %37 = vector.shape_cast %36 : vector<1x1x16x16xf32> to vector<16x16xf32>
    %38 = vector.shape_cast %35 : vector<16x16xf32> to vector<1x1x16x16xf32>
    tpu.vector_store %arg4[%c0_25, %c2_26, %c0_27, %c0_28], %38 {strides = array<i32>} : memref<1x4x16x16xf32, #tpu.memory_space<vmem>>, vector<1x1x16x16xf32>,
    %c0_29 = arith.constant 0 : index
    %c3 = arith.constant 3 : index
    %c0_30 = arith.constant 0 : index
    %c0_31 = arith.constant 0 : index
    %39 = vector.load %arg1[%c0_29, %c3, %c0_30, %c0_31] : memref<1x4x16x16xf32, #tpu.memory_space<vmem>>, vector<1x1x16x16xf32>
    %40 = vector.shape_cast %39 : vector<1x1x16x16xf32> to vector<16x16xf32>
    %c3_32 = arith.constant 3 : index
    %41 = memref.load %arg2[%c3_32] : memref<4xf32, #tpu.memory_space<smem>>
    %42 = vector.broadcast %41 : f32 to vector<16x16xf32>
    %43 = arith.mulf %40, %42 : vector<16x16xf32>
    %c3_33 = arith.constant 3 : index
    %44 = memref.load %arg3[%c3_33] : memref<4xf32, #tpu.memory_space<smem>>
    %45 = vector.broadcast %44 : f32 to vector<16x16xf32>
    %46 = arith.addf %43, %45 : vector<16x16xf32>
    %cst_34 = arith.constant 0.000000e+00 : f32
    %47 = vector.broadcast %cst_34 : f32 to vector<16x16xf32>
    %48 = arith.maximumf %46, %47 : vector<16x16xf32>
    %c0_35 = arith.constant 0 : index
    %c3_36 = arith.constant 3 : index
    %c0_37 = arith.constant 0 : index
    %c0_38 = arith.constant 0 : index
    %49 = vector.load %arg4[%c0_35, %c3_36, %c0_37, %c0_38] : memref<1x4x16x16xf32, #tpu.memory_space<vmem>>, vector<1x1x16x16xf32>
    %50 = vector.shape_cast %49 : vector<1x1x16x16xf32> to vector<16x16xf32>
    %51 = vector.shape_cast %48 : vector<16x16xf32> to vector<1x1x16x16xf32>
    tpu.vector_store %arg4[%c0_35, %c3_36, %c0_37, %c0_38], %51 {strides = array<i32>} : memref<1x4x16x16xf32, #tpu.memory_space<vmem>>, vector<1x1x16x16xf32>,
    return
  }
  func.func @transform_0(%arg0: i32) -> (i32, i32, i32, i32) {
    %c0_i32 = arith.constant 0 : i32
    %c0_i32_0 = arith.constant 0 : i32
    %c0_i32_1 = arith.constant 0 : i32
    %c0_i32_2 = arith.constant 0 : i32
    return %arg0, %c0_i32, %c0_i32_0, %c0_i32_1 : i32, i32, i32, i32
  }
  func.func @transform_1(%arg0: i32) -> i32 {
    %c0_i32 = arith.constant 0 : i32
    %c0_i32_0 = arith.constant 0 : i32
    return %c0_i32 : i32
  }
  func.func @transform_2(%arg0: i32) -> i32 {
    %c0_i32 = arith.constant 0 : i32
    %c0_i32_0 = arith.constant 0 : i32
    return %c0_i32 : i32
  }
  func.func @transform_3(%arg0: i32) -> (i32, i32, i32, i32) {
    %c0_i32 = arith.constant 0 : i32
    %c0_i32_0 = arith.constant 0 : i32
    %c0_i32_1 = arith.constant 0 : i32
    %c0_i32_2 = arith.constant 0 : i32
    return %arg0, %c0_i32, %c0_i32_0, %c0_i32_1 : i32, i32, i32, i32
  }
}

module attributes {stable_mosaic.version = 11 : i64} {
  func.func @_bn_relu_conv2_kernel(%arg0: i32, %arg1: memref<1x4x16x16xf32, #tpu.memory_space<vmem>>, %arg2: memref<4xf32, #tpu.memory_space<smem>>, %arg3: memref<4xf32, #tpu.memory_space<smem>>, %arg4: memref<144xf32, #tpu.memory_space<smem>>, %arg5: memref<1x4x16x16xf32, #tpu.memory_space<vmem>>, %arg6: memref<1x8x16xf32, #tpu.memory_space<vmem>>, %arg7: memref<4x18x16xf32, #tpu.memory_space<vmem>>) attributes {dimension_semantics = [#tpu.dimension_semantics<parallel>], iteration_bounds = array<i64: 2>, scalar_prefetch = 0 : i64, scratch_operands = 1 : i64, tpu.core_type = #tpu.core_type<tc>, window_params = [{transform_indices = @transform_0, window_bounds = array<i64: 1, 4, 16, 16>}, {transform_indices = @transform_1, window_bounds = array<i64: 4>}, {transform_indices = @transform_2, window_bounds = array<i64: 4>}, {transform_indices = @transform_3, window_bounds = array<i64: 144>}, {transform_indices = @transform_4, window_bounds = array<i64: 1, 4, 16, 16>}, {transform_indices = @transform_5, window_bounds = array<i64: 1, 8, 16>}]} {
    %cst = arith.constant 0.000000e+00 : f32
    %0 = vector.broadcast %cst : f32 to vector<1x16xf32>
    %c0 = arith.constant 0 : index
    %c0_0 = arith.constant 0 : index
    %c0_1 = arith.constant 0 : index
    %c0_2 = arith.constant 0 : index
    %1 = vector.load %arg1[%c0, %c0_0, %c0_1, %c0_2] : memref<1x4x16x16xf32, #tpu.memory_space<vmem>>, vector<1x1x16x16xf32>
    %2 = vector.shape_cast %1 : vector<1x1x16x16xf32> to vector<16x16xf32>
    %c0_3 = arith.constant 0 : index
    %3 = memref.load %arg2[%c0_3] : memref<4xf32, #tpu.memory_space<smem>>
    %4 = vector.broadcast %3 : f32 to vector<16x16xf32>
    %5 = arith.mulf %2, %4 : vector<16x16xf32>
    %c0_4 = arith.constant 0 : index
    %6 = memref.load %arg3[%c0_4] : memref<4xf32, #tpu.memory_space<smem>>
    %7 = vector.broadcast %6 : f32 to vector<16x16xf32>
    %8 = arith.addf %5, %7 : vector<16x16xf32>
    %cst_5 = arith.constant 0.000000e+00 : f32
    %9 = vector.broadcast %cst_5 : f32 to vector<16x16xf32>
    %10 = arith.maximumf %8, %9 : vector<16x16xf32>
    %11 = tpu.concatenate %0, %10, %0 in 0 : vector<1x16xf32>, vector<16x16xf32>, vector<1x16xf32> -> vector<18x16xf32>
    %c0_6 = arith.constant 0 : index
    %c0_7 = arith.constant 0 : index
    %c0_8 = arith.constant 0 : index
    %12 = vector.load %arg7[%c0_6, %c0_7, %c0_8] : memref<4x18x16xf32, #tpu.memory_space<vmem>>, vector<1x18x16xf32>
    %13 = vector.shape_cast %12 : vector<1x18x16xf32> to vector<18x16xf32>
    %14 = vector.shape_cast %11 : vector<18x16xf32> to vector<1x18x16xf32>
    tpu.vector_store %arg7[%c0_6, %c0_7, %c0_8], %14 {strides = array<i32>} : memref<4x18x16xf32, #tpu.memory_space<vmem>>, vector<1x18x16xf32>,
    %c0_9 = arith.constant 0 : index
    %c1 = arith.constant 1 : index
    %c0_10 = arith.constant 0 : index
    %c0_11 = arith.constant 0 : index
    %15 = vector.load %arg1[%c0_9, %c1, %c0_10, %c0_11] : memref<1x4x16x16xf32, #tpu.memory_space<vmem>>, vector<1x1x16x16xf32>
    %16 = vector.shape_cast %15 : vector<1x1x16x16xf32> to vector<16x16xf32>
    %c1_12 = arith.constant 1 : index
    %17 = memref.load %arg2[%c1_12] : memref<4xf32, #tpu.memory_space<smem>>
    %18 = vector.broadcast %17 : f32 to vector<16x16xf32>
    %19 = arith.mulf %16, %18 : vector<16x16xf32>
    %c1_13 = arith.constant 1 : index
    %20 = memref.load %arg3[%c1_13] : memref<4xf32, #tpu.memory_space<smem>>
    %21 = vector.broadcast %20 : f32 to vector<16x16xf32>
    %22 = arith.addf %19, %21 : vector<16x16xf32>
    %cst_14 = arith.constant 0.000000e+00 : f32
    %23 = vector.broadcast %cst_14 : f32 to vector<16x16xf32>
    %24 = arith.maximumf %22, %23 : vector<16x16xf32>
    %25 = tpu.concatenate %0, %24, %0 in 0 : vector<1x16xf32>, vector<16x16xf32>, vector<1x16xf32> -> vector<18x16xf32>
    %c1_15 = arith.constant 1 : index
    %c0_16 = arith.constant 0 : index
    %c0_17 = arith.constant 0 : index
    %26 = vector.load %arg7[%c1_15, %c0_16, %c0_17] : memref<4x18x16xf32, #tpu.memory_space<vmem>>, vector<1x18x16xf32>
    %27 = vector.shape_cast %26 : vector<1x18x16xf32> to vector<18x16xf32>
    %28 = vector.shape_cast %25 : vector<18x16xf32> to vector<1x18x16xf32>
    tpu.vector_store %arg7[%c1_15, %c0_16, %c0_17], %28 {strides = array<i32>} : memref<4x18x16xf32, #tpu.memory_space<vmem>>, vector<1x18x16xf32>,
    %c0_18 = arith.constant 0 : index
    %c2 = arith.constant 2 : index
    %c0_19 = arith.constant 0 : index
    %c0_20 = arith.constant 0 : index
    %29 = vector.load %arg1[%c0_18, %c2, %c0_19, %c0_20] : memref<1x4x16x16xf32, #tpu.memory_space<vmem>>, vector<1x1x16x16xf32>
    %30 = vector.shape_cast %29 : vector<1x1x16x16xf32> to vector<16x16xf32>
    %c2_21 = arith.constant 2 : index
    %31 = memref.load %arg2[%c2_21] : memref<4xf32, #tpu.memory_space<smem>>
    %32 = vector.broadcast %31 : f32 to vector<16x16xf32>
    %33 = arith.mulf %30, %32 : vector<16x16xf32>
    %c2_22 = arith.constant 2 : index
    %34 = memref.load %arg3[%c2_22] : memref<4xf32, #tpu.memory_space<smem>>
    %35 = vector.broadcast %34 : f32 to vector<16x16xf32>
    %36 = arith.addf %33, %35 : vector<16x16xf32>
    %cst_23 = arith.constant 0.000000e+00 : f32
    %37 = vector.broadcast %cst_23 : f32 to vector<16x16xf32>
    %38 = arith.maximumf %36, %37 : vector<16x16xf32>
    %39 = tpu.concatenate %0, %38, %0 in 0 : vector<1x16xf32>, vector<16x16xf32>, vector<1x16xf32> -> vector<18x16xf32>
    %c2_24 = arith.constant 2 : index
    %c0_25 = arith.constant 0 : index
    %c0_26 = arith.constant 0 : index
    %40 = vector.load %arg7[%c2_24, %c0_25, %c0_26] : memref<4x18x16xf32, #tpu.memory_space<vmem>>, vector<1x18x16xf32>
    %41 = vector.shape_cast %40 : vector<1x18x16xf32> to vector<18x16xf32>
    %42 = vector.shape_cast %39 : vector<18x16xf32> to vector<1x18x16xf32>
    tpu.vector_store %arg7[%c2_24, %c0_25, %c0_26], %42 {strides = array<i32>} : memref<4x18x16xf32, #tpu.memory_space<vmem>>, vector<1x18x16xf32>,
    %c0_27 = arith.constant 0 : index
    %c3 = arith.constant 3 : index
    %c0_28 = arith.constant 0 : index
    %c0_29 = arith.constant 0 : index
    %43 = vector.load %arg1[%c0_27, %c3, %c0_28, %c0_29] : memref<1x4x16x16xf32, #tpu.memory_space<vmem>>, vector<1x1x16x16xf32>
    %44 = vector.shape_cast %43 : vector<1x1x16x16xf32> to vector<16x16xf32>
    %c3_30 = arith.constant 3 : index
    %45 = memref.load %arg2[%c3_30] : memref<4xf32, #tpu.memory_space<smem>>
    %46 = vector.broadcast %45 : f32 to vector<16x16xf32>
    %47 = arith.mulf %44, %46 : vector<16x16xf32>
    %c3_31 = arith.constant 3 : index
    %48 = memref.load %arg3[%c3_31] : memref<4xf32, #tpu.memory_space<smem>>
    %49 = vector.broadcast %48 : f32 to vector<16x16xf32>
    %50 = arith.addf %47, %49 : vector<16x16xf32>
    %cst_32 = arith.constant 0.000000e+00 : f32
    %51 = vector.broadcast %cst_32 : f32 to vector<16x16xf32>
    %52 = arith.maximumf %50, %51 : vector<16x16xf32>
    %53 = tpu.concatenate %0, %52, %0 in 0 : vector<1x16xf32>, vector<16x16xf32>, vector<1x16xf32> -> vector<18x16xf32>
    %c3_33 = arith.constant 3 : index
    %c0_34 = arith.constant 0 : index
    %c0_35 = arith.constant 0 : index
    %54 = vector.load %arg7[%c3_33, %c0_34, %c0_35] : memref<4x18x16xf32, #tpu.memory_space<vmem>>, vector<1x18x16xf32>
    %55 = vector.shape_cast %54 : vector<1x18x16xf32> to vector<18x16xf32>
    %56 = vector.shape_cast %53 : vector<18x16xf32> to vector<1x18x16xf32>
    tpu.vector_store %arg7[%c3_33, %c0_34, %c0_35], %56 {strides = array<i32>} : memref<4x18x16xf32, #tpu.memory_space<vmem>>, vector<1x18x16xf32>,
    %57 = tpu.iota {dimensions = array<i32: 1>} : vector<8x16xi32>
    %c1_i32 = arith.constant 1 : i32
    %58 = vector.broadcast %c1_i32 : i32 to vector<8x16xi32>
    %59 = arith.cmpi sge, %57, %58 : vector<8x16xi32>
    %c15_i32 = arith.constant 15 : i32
    %60 = vector.broadcast %c15_i32 : i32 to vector<8x16xi32>
    %61 = arith.cmpi slt, %57, %60 : vector<8x16xi32>
    %c0_i32 = arith.constant 0 : i32
    %c2_i32 = arith.constant 2 : i32
    %62 = arith.addi %c0_i32, %c2_i32 : i32
    %c1_i32_36 = arith.constant 1 : i32
    scf.for %arg8 = %c0_i32 to %62 step %c1_i32_36  : i32 {
      %c8_i32 = arith.constant 8 : i32
      %95 = arith.muli %arg8, %c8_i32 : i32
      %96 = tpu.assume_multiple %95, 8 : i32
      %cst_65 = arith.constant 0.000000e+00 : f32
      %97 = vector.broadcast %cst_65 : f32 to vector<8x16xf32>
      %cst_66 = arith.constant 0.000000e+00 : f32
      %98 = vector.broadcast %cst_66 : f32 to vector<8x16xf32>
      %cst_67 = arith.constant 0.000000e+00 : f32
      %99 = vector.broadcast %cst_67 : f32 to vector<8x16xf32>
      %cst_68 = arith.constant 0.000000e+00 : f32
      %100 = vector.broadcast %cst_68 : f32 to vector<8x16xf32>
      %c0_i32_69 = arith.constant 0 : i32
      %101 = arith.addi %96, %c0_i32_69 : i32
      %c0_70 = arith.constant 0 : index
      %102 = arith.index_cast %101 : i32 to index
      %c0_71 = arith.constant 0 : index
      %103 = vector.load %arg7[%c0_70, %102, %c0_71] : memref<4x18x16xf32, #tpu.memory_space<vmem>>, vector<1x8x16xf32>
      %104 = vector.shape_cast %103 : vector<1x8x16xf32> to vector<8x16xf32>
      %c1_i32_72 = arith.constant 1 : i32
      %105 = tpu.dynamic_rotate %104 by %c1_i32_72 dim 1 : vector<8x16xf32>, i32 -> vector<8x16xf32>
      %cst_73 = arith.constant 0.000000e+00 : f32
      %106 = vector.broadcast %cst_73 : f32 to vector<8x16xf32>
      %107 = arith.select %59, %105, %106 : vector<8x16xi1>, vector<8x16xf32>
      %c0_74 = arith.constant 0 : index
      %108 = memref.load %arg4[%c0_74] : memref<144xf32, #tpu.memory_space<smem>>
      %109 = vector.broadcast %108 : f32 to vector<8x16xf32>
      %110 = arith.mulf %109, %107 : vector<8x16xf32>
      %111 = arith.addf %97, %110 : vector<8x16xf32>
      %c1_75 = arith.constant 1 : index
      %112 = memref.load %arg4[%c1_75] : memref<144xf32, #tpu.memory_space<smem>>
      %113 = vector.broadcast %112 : f32 to vector<8x16xf32>
      %114 = arith.mulf %113, %107 : vector<8x16xf32>
      %115 = arith.addf %98, %114 : vector<8x16xf32>
      %c2_76 = arith.constant 2 : index
      %116 = memref.load %arg4[%c2_76] : memref<144xf32, #tpu.memory_space<smem>>
      %117 = vector.broadcast %116 : f32 to vector<8x16xf32>
      %118 = arith.mulf %117, %107 : vector<8x16xf32>
      %119 = arith.addf %99, %118 : vector<8x16xf32>
      %c3_77 = arith.constant 3 : index
      %120 = memref.load %arg4[%c3_77] : memref<144xf32, #tpu.memory_space<smem>>
      %121 = vector.broadcast %120 : f32 to vector<8x16xf32>
      %122 = arith.mulf %121, %107 : vector<8x16xf32>
      %123 = arith.addf %100, %122 : vector<8x16xf32>
      %c4 = arith.constant 4 : index
      %124 = memref.load %arg4[%c4] : memref<144xf32, #tpu.memory_space<smem>>
      %125 = vector.broadcast %124 : f32 to vector<8x16xf32>
      %126 = arith.mulf %125, %104 : vector<8x16xf32>
      %127 = arith.addf %111, %126 : vector<8x16xf32>
      %c5 = arith.constant 5 : index
      %128 = memref.load %arg4[%c5] : memref<144xf32, #tpu.memory_space<smem>>
      %129 = vector.broadcast %128 : f32 to vector<8x16xf32>
      %130 = arith.mulf %129, %104 : vector<8x16xf32>
      %131 = arith.addf %115, %130 : vector<8x16xf32>
      %c6 = arith.constant 6 : index
      %132 = memref.load %arg4[%c6] : memref<144xf32, #tpu.memory_space<smem>>
      %133 = vector.broadcast %132 : f32 to vector<8x16xf32>
      %134 = arith.mulf %133, %104 : vector<8x16xf32>
      %135 = arith.addf %119, %134 : vector<8x16xf32>
      %c7 = arith.constant 7 : index
      %136 = memref.load %arg4[%c7] : memref<144xf32, #tpu.memory_space<smem>>
      %137 = vector.broadcast %136 : f32 to vector<8x16xf32>
      %138 = arith.mulf %137, %104 : vector<8x16xf32>
      %139 = arith.addf %123, %138 : vector<8x16xf32>
      %c15_i32_78 = arith.constant 15 : i32
      %140 = tpu.dynamic_rotate %104 by %c15_i32_78 dim 1 : vector<8x16xf32>, i32 -> vector<8x16xf32>
      %cst_79 = arith.constant 0.000000e+00 : f32
      %141 = vector.broadcast %cst_79 : f32 to vector<8x16xf32>
      %142 = arith.select %61, %140, %141 : vector<8x16xi1>, vector<8x16xf32>
      %c8 = arith.constant 8 : index
      %143 = memref.load %arg4[%c8] : memref<144xf32, #tpu.memory_space<smem>>
      %144 = vector.broadcast %143 : f32 to vector<8x16xf32>
      %145 = arith.mulf %144, %142 : vector<8x16xf32>
      %146 = arith.addf %127, %145 : vector<8x16xf32>
      %c9 = arith.constant 9 : index
      %147 = memref.load %arg4[%c9] : memref<144xf32, #tpu.memory_space<smem>>
      %148 = vector.broadcast %147 : f32 to vector<8x16xf32>
      %149 = arith.mulf %148, %142 : vector<8x16xf32>
      %150 = arith.addf %131, %149 : vector<8x16xf32>
      %c10 = arith.constant 10 : index
      %151 = memref.load %arg4[%c10] : memref<144xf32, #tpu.memory_space<smem>>
      %152 = vector.broadcast %151 : f32 to vector<8x16xf32>
      %153 = arith.mulf %152, %142 : vector<8x16xf32>
      %154 = arith.addf %135, %153 : vector<8x16xf32>
      %c11 = arith.constant 11 : index
      %155 = memref.load %arg4[%c11] : memref<144xf32, #tpu.memory_space<smem>>
      %156 = vector.broadcast %155 : f32 to vector<8x16xf32>
      %157 = arith.mulf %156, %142 : vector<8x16xf32>
      %158 = arith.addf %139, %157 : vector<8x16xf32>
      %c1_i32_80 = arith.constant 1 : i32
      %159 = arith.addi %96, %c1_i32_80 : i32
      %c0_81 = arith.constant 0 : index
      %160 = arith.index_cast %159 : i32 to index
      %c0_82 = arith.constant 0 : index
      %161 = vector.load %arg7[%c0_81, %160, %c0_82] : memref<4x18x16xf32, #tpu.memory_space<vmem>>, vector<1x8x16xf32>
      %162 = vector.shape_cast %161 : vector<1x8x16xf32> to vector<8x16xf32>
      %c1_i32_83 = arith.constant 1 : i32
      %163 = tpu.dynamic_rotate %162 by %c1_i32_83 dim 1 : vector<8x16xf32>, i32 -> vector<8x16xf32>
      %cst_84 = arith.constant 0.000000e+00 : f32
      %164 = vector.broadcast %cst_84 : f32 to vector<8x16xf32>
      %165 = arith.select %59, %163, %164 : vector<8x16xi1>, vector<8x16xf32>
      %c12 = arith.constant 12 : index
      %166 = memref.load %arg4[%c12] : memref<144xf32, #tpu.memory_space<smem>>
      %167 = vector.broadcast %166 : f32 to vector<8x16xf32>
      %168 = arith.mulf %167, %165 : vector<8x16xf32>
      %169 = arith.addf %146, %168 : vector<8x16xf32>
      %c13 = arith.constant 13 : index
      %170 = memref.load %arg4[%c13] : memref<144xf32, #tpu.memory_space<smem>>
      %171 = vector.broadcast %170 : f32 to vector<8x16xf32>
      %172 = arith.mulf %171, %165 : vector<8x16xf32>
      %173 = arith.addf %150, %172 : vector<8x16xf32>
      %c14 = arith.constant 14 : index
      %174 = memref.load %arg4[%c14] : memref<144xf32, #tpu.memory_space<smem>>
      %175 = vector.broadcast %174 : f32 to vector<8x16xf32>
      %176 = arith.mulf %175, %165 : vector<8x16xf32>
      %177 = arith.addf %154, %176 : vector<8x16xf32>
      %c15 = arith.constant 15 : index
      %178 = memref.load %arg4[%c15] : memref<144xf32, #tpu.memory_space<smem>>
      %179 = vector.broadcast %178 : f32 to vector<8x16xf32>
      %180 = arith.mulf %179, %165 : vector<8x16xf32>
      %181 = arith.addf %158, %180 : vector<8x16xf32>
      %c16 = arith.constant 16 : index
      %182 = memref.load %arg4[%c16] : memref<144xf32, #tpu.memory_space<smem>>
      %183 = vector.broadcast %182 : f32 to vector<8x16xf32>
      %184 = arith.mulf %183, %162 : vector<8x16xf32>
      %185 = arith.addf %169, %184 : vector<8x16xf32>
      %c17 = arith.constant 17 : index
      %186 = memref.load %arg4[%c17] : memref<144xf32, #tpu.memory_space<smem>>
      %187 = vector.broadcast %186 : f32 to vector<8x16xf32>
      %188 = arith.mulf %187, %162 : vector<8x16xf32>
      %189 = arith.addf %173, %188 : vector<8x16xf32>
      %c18 = arith.constant 18 : index
      %190 = memref.load %arg4[%c18] : memref<144xf32, #tpu.memory_space<smem>>
      %191 = vector.broadcast %190 : f32 to vector<8x16xf32>
      %192 = arith.mulf %191, %162 : vector<8x16xf32>
      %193 = arith.addf %177, %192 : vector<8x16xf32>
      %c19 = arith.constant 19 : index
      %194 = memref.load %arg4[%c19] : memref<144xf32, #tpu.memory_space<smem>>
      %195 = vector.broadcast %194 : f32 to vector<8x16xf32>
      %196 = arith.mulf %195, %162 : vector<8x16xf32>
      %197 = arith.addf %181, %196 : vector<8x16xf32>
      %c15_i32_85 = arith.constant 15 : i32
      %198 = tpu.dynamic_rotate %162 by %c15_i32_85 dim 1 : vector<8x16xf32>, i32 -> vector<8x16xf32>
      %cst_86 = arith.constant 0.000000e+00 : f32
      %199 = vector.broadcast %cst_86 : f32 to vector<8x16xf32>
      %200 = arith.select %61, %198, %199 : vector<8x16xi1>, vector<8x16xf32>
      %c20 = arith.constant 20 : index
      %201 = memref.load %arg4[%c20] : memref<144xf32, #tpu.memory_space<smem>>
      %202 = vector.broadcast %201 : f32 to vector<8x16xf32>
      %203 = arith.mulf %202, %200 : vector<8x16xf32>
      %204 = arith.addf %185, %203 : vector<8x16xf32>
      %c21 = arith.constant 21 : index
      %205 = memref.load %arg4[%c21] : memref<144xf32, #tpu.memory_space<smem>>
      %206 = vector.broadcast %205 : f32 to vector<8x16xf32>
      %207 = arith.mulf %206, %200 : vector<8x16xf32>
      %208 = arith.addf %189, %207 : vector<8x16xf32>
      %c22 = arith.constant 22 : index
      %209 = memref.load %arg4[%c22] : memref<144xf32, #tpu.memory_space<smem>>
      %210 = vector.broadcast %209 : f32 to vector<8x16xf32>
      %211 = arith.mulf %210, %200 : vector<8x16xf32>
      %212 = arith.addf %193, %211 : vector<8x16xf32>
      %c23 = arith.constant 23 : index
      %213 = memref.load %arg4[%c23] : memref<144xf32, #tpu.memory_space<smem>>
      %214 = vector.broadcast %213 : f32 to vector<8x16xf32>
      %215 = arith.mulf %214, %200 : vector<8x16xf32>
      %216 = arith.addf %197, %215 : vector<8x16xf32>
      %c2_i32_87 = arith.constant 2 : i32
      %217 = arith.addi %96, %c2_i32_87 : i32
      %c0_88 = arith.constant 0 : index
      %218 = arith.index_cast %217 : i32 to index
      %c0_89 = arith.constant 0 : index
      %219 = vector.load %arg7[%c0_88, %218, %c0_89] : memref<4x18x16xf32, #tpu.memory_space<vmem>>, vector<1x8x16xf32>
      %220 = vector.shape_cast %219 : vector<1x8x16xf32> to vector<8x16xf32>
      %c1_i32_90 = arith.constant 1 : i32
      %221 = tpu.dynamic_rotate %220 by %c1_i32_90 dim 1 : vector<8x16xf32>, i32 -> vector<8x16xf32>
      %cst_91 = arith.constant 0.000000e+00 : f32
      %222 = vector.broadcast %cst_91 : f32 to vector<8x16xf32>
      %223 = arith.select %59, %221, %222 : vector<8x16xi1>, vector<8x16xf32>
      %c24 = arith.constant 24 : index
      %224 = memref.load %arg4[%c24] : memref<144xf32, #tpu.memory_space<smem>>
      %225 = vector.broadcast %224 : f32 to vector<8x16xf32>
      %226 = arith.mulf %225, %223 : vector<8x16xf32>
      %227 = arith.addf %204, %226 : vector<8x16xf32>
      %c25 = arith.constant 25 : index
      %228 = memref.load %arg4[%c25] : memref<144xf32, #tpu.memory_space<smem>>
      %229 = vector.broadcast %228 : f32 to vector<8x16xf32>
      %230 = arith.mulf %229, %223 : vector<8x16xf32>
      %231 = arith.addf %208, %230 : vector<8x16xf32>
      %c26 = arith.constant 26 : index
      %232 = memref.load %arg4[%c26] : memref<144xf32, #tpu.memory_space<smem>>
      %233 = vector.broadcast %232 : f32 to vector<8x16xf32>
      %234 = arith.mulf %233, %223 : vector<8x16xf32>
      %235 = arith.addf %212, %234 : vector<8x16xf32>
      %c27 = arith.constant 27 : index
      %236 = memref.load %arg4[%c27] : memref<144xf32, #tpu.memory_space<smem>>
      %237 = vector.broadcast %236 : f32 to vector<8x16xf32>
      %238 = arith.mulf %237, %223 : vector<8x16xf32>
      %239 = arith.addf %216, %238 : vector<8x16xf32>
      %c28 = arith.constant 28 : index
      %240 = memref.load %arg4[%c28] : memref<144xf32, #tpu.memory_space<smem>>
      %241 = vector.broadcast %240 : f32 to vector<8x16xf32>
      %242 = arith.mulf %241, %220 : vector<8x16xf32>
      %243 = arith.addf %227, %242 : vector<8x16xf32>
      %c29 = arith.constant 29 : index
      %244 = memref.load %arg4[%c29] : memref<144xf32, #tpu.memory_space<smem>>
      %245 = vector.broadcast %244 : f32 to vector<8x16xf32>
      %246 = arith.mulf %245, %220 : vector<8x16xf32>
      %247 = arith.addf %231, %246 : vector<8x16xf32>
      %c30 = arith.constant 30 : index
      %248 = memref.load %arg4[%c30] : memref<144xf32, #tpu.memory_space<smem>>
      %249 = vector.broadcast %248 : f32 to vector<8x16xf32>
      %250 = arith.mulf %249, %220 : vector<8x16xf32>
      %251 = arith.addf %235, %250 : vector<8x16xf32>
      %c31 = arith.constant 31 : index
      %252 = memref.load %arg4[%c31] : memref<144xf32, #tpu.memory_space<smem>>
      %253 = vector.broadcast %252 : f32 to vector<8x16xf32>
      %254 = arith.mulf %253, %220 : vector<8x16xf32>
      %255 = arith.addf %239, %254 : vector<8x16xf32>
      %c15_i32_92 = arith.constant 15 : i32
      %256 = tpu.dynamic_rotate %220 by %c15_i32_92 dim 1 : vector<8x16xf32>, i32 -> vector<8x16xf32>
      %cst_93 = arith.constant 0.000000e+00 : f32
      %257 = vector.broadcast %cst_93 : f32 to vector<8x16xf32>
      %258 = arith.select %61, %256, %257 : vector<8x16xi1>, vector<8x16xf32>
      %c32 = arith.constant 32 : index
      %259 = memref.load %arg4[%c32] : memref<144xf32, #tpu.memory_space<smem>>
      %260 = vector.broadcast %259 : f32 to vector<8x16xf32>
      %261 = arith.mulf %260, %258 : vector<8x16xf32>
      %262 = arith.addf %243, %261 : vector<8x16xf32>
      %c33 = arith.constant 33 : index
      %263 = memref.load %arg4[%c33] : memref<144xf32, #tpu.memory_space<smem>>
      %264 = vector.broadcast %263 : f32 to vector<8x16xf32>
      %265 = arith.mulf %264, %258 : vector<8x16xf32>
      %266 = arith.addf %247, %265 : vector<8x16xf32>
      %c34 = arith.constant 34 : index
      %267 = memref.load %arg4[%c34] : memref<144xf32, #tpu.memory_space<smem>>
      %268 = vector.broadcast %267 : f32 to vector<8x16xf32>
      %269 = arith.mulf %268, %258 : vector<8x16xf32>
      %270 = arith.addf %251, %269 : vector<8x16xf32>
      %c35 = arith.constant 35 : index
      %271 = memref.load %arg4[%c35] : memref<144xf32, #tpu.memory_space<smem>>
      %272 = vector.broadcast %271 : f32 to vector<8x16xf32>
      %273 = arith.mulf %272, %258 : vector<8x16xf32>
      %274 = arith.addf %255, %273 : vector<8x16xf32>
      %c0_i32_94 = arith.constant 0 : i32
      %275 = arith.addi %96, %c0_i32_94 : i32
      %c1_95 = arith.constant 1 : index
      %276 = arith.index_cast %275 : i32 to index
      %c0_96 = arith.constant 0 : index
      %277 = vector.load %arg7[%c1_95, %276, %c0_96] : memref<4x18x16xf32, #tpu.memory_space<vmem>>, vector<1x8x16xf32>
      %278 = vector.shape_cast %277 : vector<1x8x16xf32> to vector<8x16xf32>
      %c1_i32_97 = arith.constant 1 : i32
      %279 = tpu.dynamic_rotate %278 by %c1_i32_97 dim 1 : vector<8x16xf32>, i32 -> vector<8x16xf32>
      %cst_98 = arith.constant 0.000000e+00 : f32
      %280 = vector.broadcast %cst_98 : f32 to vector<8x16xf32>
      %281 = arith.select %59, %279, %280 : vector<8x16xi1>, vector<8x16xf32>
      %c36 = arith.constant 36 : index
      %282 = memref.load %arg4[%c36] : memref<144xf32, #tpu.memory_space<smem>>
      %283 = vector.broadcast %282 : f32 to vector<8x16xf32>
      %284 = arith.mulf %283, %281 : vector<8x16xf32>
      %285 = arith.addf %262, %284 : vector<8x16xf32>
      %c37 = arith.constant 37 : index
      %286 = memref.load %arg4[%c37] : memref<144xf32, #tpu.memory_space<smem>>
      %287 = vector.broadcast %286 : f32 to vector<8x16xf32>
      %288 = arith.mulf %287, %281 : vector<8x16xf32>
      %289 = arith.addf %266, %288 : vector<8x16xf32>
      %c38 = arith.constant 38 : index
      %290 = memref.load %arg4[%c38] : memref<144xf32, #tpu.memory_space<smem>>
      %291 = vector.broadcast %290 : f32 to vector<8x16xf32>
      %292 = arith.mulf %291, %281 : vector<8x16xf32>
      %293 = arith.addf %270, %292 : vector<8x16xf32>
      %c39 = arith.constant 39 : index
      %294 = memref.load %arg4[%c39] : memref<144xf32, #tpu.memory_space<smem>>
      %295 = vector.broadcast %294 : f32 to vector<8x16xf32>
      %296 = arith.mulf %295, %281 : vector<8x16xf32>
      %297 = arith.addf %274, %296 : vector<8x16xf32>
      %c40 = arith.constant 40 : index
      %298 = memref.load %arg4[%c40] : memref<144xf32, #tpu.memory_space<smem>>
      %299 = vector.broadcast %298 : f32 to vector<8x16xf32>
      %300 = arith.mulf %299, %278 : vector<8x16xf32>
      %301 = arith.addf %285, %300 : vector<8x16xf32>
      %c41 = arith.constant 41 : index
      %302 = memref.load %arg4[%c41] : memref<144xf32, #tpu.memory_space<smem>>
      %303 = vector.broadcast %302 : f32 to vector<8x16xf32>
      %304 = arith.mulf %303, %278 : vector<8x16xf32>
      %305 = arith.addf %289, %304 : vector<8x16xf32>
      %c42 = arith.constant 42 : index
      %306 = memref.load %arg4[%c42] : memref<144xf32, #tpu.memory_space<smem>>
      %307 = vector.broadcast %306 : f32 to vector<8x16xf32>
      %308 = arith.mulf %307, %278 : vector<8x16xf32>
      %309 = arith.addf %293, %308 : vector<8x16xf32>
      %c43 = arith.constant 43 : index
      %310 = memref.load %arg4[%c43] : memref<144xf32, #tpu.memory_space<smem>>
      %311 = vector.broadcast %310 : f32 to vector<8x16xf32>
      %312 = arith.mulf %311, %278 : vector<8x16xf32>
      %313 = arith.addf %297, %312 : vector<8x16xf32>
      %c15_i32_99 = arith.constant 15 : i32
      %314 = tpu.dynamic_rotate %278 by %c15_i32_99 dim 1 : vector<8x16xf32>, i32 -> vector<8x16xf32>
      %cst_100 = arith.constant 0.000000e+00 : f32
      %315 = vector.broadcast %cst_100 : f32 to vector<8x16xf32>
      %316 = arith.select %61, %314, %315 : vector<8x16xi1>, vector<8x16xf32>
      %c44 = arith.constant 44 : index
      %317 = memref.load %arg4[%c44] : memref<144xf32, #tpu.memory_space<smem>>
      %318 = vector.broadcast %317 : f32 to vector<8x16xf32>
      %319 = arith.mulf %318, %316 : vector<8x16xf32>
      %320 = arith.addf %301, %319 : vector<8x16xf32>
      %c45 = arith.constant 45 : index
      %321 = memref.load %arg4[%c45] : memref<144xf32, #tpu.memory_space<smem>>
      %322 = vector.broadcast %321 : f32 to vector<8x16xf32>
      %323 = arith.mulf %322, %316 : vector<8x16xf32>
      %324 = arith.addf %305, %323 : vector<8x16xf32>
      %c46 = arith.constant 46 : index
      %325 = memref.load %arg4[%c46] : memref<144xf32, #tpu.memory_space<smem>>
      %326 = vector.broadcast %325 : f32 to vector<8x16xf32>
      %327 = arith.mulf %326, %316 : vector<8x16xf32>
      %328 = arith.addf %309, %327 : vector<8x16xf32>
      %c47 = arith.constant 47 : index
      %329 = memref.load %arg4[%c47] : memref<144xf32, #tpu.memory_space<smem>>
      %330 = vector.broadcast %329 : f32 to vector<8x16xf32>
      %331 = arith.mulf %330, %316 : vector<8x16xf32>
      %332 = arith.addf %313, %331 : vector<8x16xf32>
      %c1_i32_101 = arith.constant 1 : i32
      %333 = arith.addi %96, %c1_i32_101 : i32
      %c1_102 = arith.constant 1 : index
      %334 = arith.index_cast %333 : i32 to index
      %c0_103 = arith.constant 0 : index
      %335 = vector.load %arg7[%c1_102, %334, %c0_103] : memref<4x18x16xf32, #tpu.memory_space<vmem>>, vector<1x8x16xf32>
      %336 = vector.shape_cast %335 : vector<1x8x16xf32> to vector<8x16xf32>
      %c1_i32_104 = arith.constant 1 : i32
      %337 = tpu.dynamic_rotate %336 by %c1_i32_104 dim 1 : vector<8x16xf32>, i32 -> vector<8x16xf32>
      %cst_105 = arith.constant 0.000000e+00 : f32
      %338 = vector.broadcast %cst_105 : f32 to vector<8x16xf32>
      %339 = arith.select %59, %337, %338 : vector<8x16xi1>, vector<8x16xf32>
      %c48 = arith.constant 48 : index
      %340 = memref.load %arg4[%c48] : memref<144xf32, #tpu.memory_space<smem>>
      %341 = vector.broadcast %340 : f32 to vector<8x16xf32>
      %342 = arith.mulf %341, %339 : vector<8x16xf32>
      %343 = arith.addf %320, %342 : vector<8x16xf32>
      %c49 = arith.constant 49 : index
      %344 = memref.load %arg4[%c49] : memref<144xf32, #tpu.memory_space<smem>>
      %345 = vector.broadcast %344 : f32 to vector<8x16xf32>
      %346 = arith.mulf %345, %339 : vector<8x16xf32>
      %347 = arith.addf %324, %346 : vector<8x16xf32>
      %c50 = arith.constant 50 : index
      %348 = memref.load %arg4[%c50] : memref<144xf32, #tpu.memory_space<smem>>
      %349 = vector.broadcast %348 : f32 to vector<8x16xf32>
      %350 = arith.mulf %349, %339 : vector<8x16xf32>
      %351 = arith.addf %328, %350 : vector<8x16xf32>
      %c51 = arith.constant 51 : index
      %352 = memref.load %arg4[%c51] : memref<144xf32, #tpu.memory_space<smem>>
      %353 = vector.broadcast %352 : f32 to vector<8x16xf32>
      %354 = arith.mulf %353, %339 : vector<8x16xf32>
      %355 = arith.addf %332, %354 : vector<8x16xf32>
      %c52 = arith.constant 52 : index
      %356 = memref.load %arg4[%c52] : memref<144xf32, #tpu.memory_space<smem>>
      %357 = vector.broadcast %356 : f32 to vector<8x16xf32>
      %358 = arith.mulf %357, %336 : vector<8x16xf32>
      %359 = arith.addf %343, %358 : vector<8x16xf32>
      %c53 = arith.constant 53 : index
      %360 = memref.load %arg4[%c53] : memref<144xf32, #tpu.memory_space<smem>>
      %361 = vector.broadcast %360 : f32 to vector<8x16xf32>
      %362 = arith.mulf %361, %336 : vector<8x16xf32>
      %363 = arith.addf %347, %362 : vector<8x16xf32>
      %c54 = arith.constant 54 : index
      %364 = memref.load %arg4[%c54] : memref<144xf32, #tpu.memory_space<smem>>
      %365 = vector.broadcast %364 : f32 to vector<8x16xf32>
      %366 = arith.mulf %365, %336 : vector<8x16xf32>
      %367 = arith.addf %351, %366 : vector<8x16xf32>
      %c55 = arith.constant 55 : index
      %368 = memref.load %arg4[%c55] : memref<144xf32, #tpu.memory_space<smem>>
      %369 = vector.broadcast %368 : f32 to vector<8x16xf32>
      %370 = arith.mulf %369, %336 : vector<8x16xf32>
      %371 = arith.addf %355, %370 : vector<8x16xf32>
      %c15_i32_106 = arith.constant 15 : i32
      %372 = tpu.dynamic_rotate %336 by %c15_i32_106 dim 1 : vector<8x16xf32>, i32 -> vector<8x16xf32>
      %cst_107 = arith.constant 0.000000e+00 : f32
      %373 = vector.broadcast %cst_107 : f32 to vector<8x16xf32>
      %374 = arith.select %61, %372, %373 : vector<8x16xi1>, vector<8x16xf32>
      %c56 = arith.constant 56 : index
      %375 = memref.load %arg4[%c56] : memref<144xf32, #tpu.memory_space<smem>>
      %376 = vector.broadcast %375 : f32 to vector<8x16xf32>
      %377 = arith.mulf %376, %374 : vector<8x16xf32>
      %378 = arith.addf %359, %377 : vector<8x16xf32>
      %c57 = arith.constant 57 : index
      %379 = memref.load %arg4[%c57] : memref<144xf32, #tpu.memory_space<smem>>
      %380 = vector.broadcast %379 : f32 to vector<8x16xf32>
      %381 = arith.mulf %380, %374 : vector<8x16xf32>
      %382 = arith.addf %363, %381 : vector<8x16xf32>
      %c58 = arith.constant 58 : index
      %383 = memref.load %arg4[%c58] : memref<144xf32, #tpu.memory_space<smem>>
      %384 = vector.broadcast %383 : f32 to vector<8x16xf32>
      %385 = arith.mulf %384, %374 : vector<8x16xf32>
      %386 = arith.addf %367, %385 : vector<8x16xf32>
      %c59 = arith.constant 59 : index
      %387 = memref.load %arg4[%c59] : memref<144xf32, #tpu.memory_space<smem>>
      %388 = vector.broadcast %387 : f32 to vector<8x16xf32>
      %389 = arith.mulf %388, %374 : vector<8x16xf32>
      %390 = arith.addf %371, %389 : vector<8x16xf32>
      %c2_i32_108 = arith.constant 2 : i32
      %391 = arith.addi %96, %c2_i32_108 : i32
      %c1_109 = arith.constant 1 : index
      %392 = arith.index_cast %391 : i32 to index
      %c0_110 = arith.constant 0 : index
      %393 = vector.load %arg7[%c1_109, %392, %c0_110] : memref<4x18x16xf32, #tpu.memory_space<vmem>>, vector<1x8x16xf32>
      %394 = vector.shape_cast %393 : vector<1x8x16xf32> to vector<8x16xf32>
      %c1_i32_111 = arith.constant 1 : i32
      %395 = tpu.dynamic_rotate %394 by %c1_i32_111 dim 1 : vector<8x16xf32>, i32 -> vector<8x16xf32>
      %cst_112 = arith.constant 0.000000e+00 : f32
      %396 = vector.broadcast %cst_112 : f32 to vector<8x16xf32>
      %397 = arith.select %59, %395, %396 : vector<8x16xi1>, vector<8x16xf32>
      %c60 = arith.constant 60 : index
      %398 = memref.load %arg4[%c60] : memref<144xf32, #tpu.memory_space<smem>>
      %399 = vector.broadcast %398 : f32 to vector<8x16xf32>
      %400 = arith.mulf %399, %397 : vector<8x16xf32>
      %401 = arith.addf %378, %400 : vector<8x16xf32>
      %c61 = arith.constant 61 : index
      %402 = memref.load %arg4[%c61] : memref<144xf32, #tpu.memory_space<smem>>
      %403 = vector.broadcast %402 : f32 to vector<8x16xf32>
      %404 = arith.mulf %403, %397 : vector<8x16xf32>
      %405 = arith.addf %382, %404 : vector<8x16xf32>
      %c62 = arith.constant 62 : index
      %406 = memref.load %arg4[%c62] : memref<144xf32, #tpu.memory_space<smem>>
      %407 = vector.broadcast %406 : f32 to vector<8x16xf32>
      %408 = arith.mulf %407, %397 : vector<8x16xf32>
      %409 = arith.addf %386, %408 : vector<8x16xf32>
      %c63 = arith.constant 63 : index
      %410 = memref.load %arg4[%c63] : memref<144xf32, #tpu.memory_space<smem>>
      %411 = vector.broadcast %410 : f32 to vector<8x16xf32>
      %412 = arith.mulf %411, %397 : vector<8x16xf32>
      %413 = arith.addf %390, %412 : vector<8x16xf32>
      %c64 = arith.constant 64 : index
      %414 = memref.load %arg4[%c64] : memref<144xf32, #tpu.memory_space<smem>>
      %415 = vector.broadcast %414 : f32 to vector<8x16xf32>
      %416 = arith.mulf %415, %394 : vector<8x16xf32>
      %417 = arith.addf %401, %416 : vector<8x16xf32>
      %c65 = arith.constant 65 : index
      %418 = memref.load %arg4[%c65] : memref<144xf32, #tpu.memory_space<smem>>
      %419 = vector.broadcast %418 : f32 to vector<8x16xf32>
      %420 = arith.mulf %419, %394 : vector<8x16xf32>
      %421 = arith.addf %405, %420 : vector<8x16xf32>
      %c66 = arith.constant 66 : index
      %422 = memref.load %arg4[%c66] : memref<144xf32, #tpu.memory_space<smem>>
      %423 = vector.broadcast %422 : f32 to vector<8x16xf32>
      %424 = arith.mulf %423, %394 : vector<8x16xf32>
      %425 = arith.addf %409, %424 : vector<8x16xf32>
      %c67 = arith.constant 67 : index
      %426 = memref.load %arg4[%c67] : memref<144xf32, #tpu.memory_space<smem>>
      %427 = vector.broadcast %426 : f32 to vector<8x16xf32>
      %428 = arith.mulf %427, %394 : vector<8x16xf32>
      %429 = arith.addf %413, %428 : vector<8x16xf32>
      %c15_i32_113 = arith.constant 15 : i32
      %430 = tpu.dynamic_rotate %394 by %c15_i32_113 dim 1 : vector<8x16xf32>, i32 -> vector<8x16xf32>
      %cst_114 = arith.constant 0.000000e+00 : f32
      %431 = vector.broadcast %cst_114 : f32 to vector<8x16xf32>
      %432 = arith.select %61, %430, %431 : vector<8x16xi1>, vector<8x16xf32>
      %c68 = arith.constant 68 : index
      %433 = memref.load %arg4[%c68] : memref<144xf32, #tpu.memory_space<smem>>
      %434 = vector.broadcast %433 : f32 to vector<8x16xf32>
      %435 = arith.mulf %434, %432 : vector<8x16xf32>
      %436 = arith.addf %417, %435 : vector<8x16xf32>
      %c69 = arith.constant 69 : index
      %437 = memref.load %arg4[%c69] : memref<144xf32, #tpu.memory_space<smem>>
      %438 = vector.broadcast %437 : f32 to vector<8x16xf32>
      %439 = arith.mulf %438, %432 : vector<8x16xf32>
      %440 = arith.addf %421, %439 : vector<8x16xf32>
      %c70 = arith.constant 70 : index
      %441 = memref.load %arg4[%c70] : memref<144xf32, #tpu.memory_space<smem>>
      %442 = vector.broadcast %441 : f32 to vector<8x16xf32>
      %443 = arith.mulf %442, %432 : vector<8x16xf32>
      %444 = arith.addf %425, %443 : vector<8x16xf32>
      %c71 = arith.constant 71 : index
      %445 = memref.load %arg4[%c71] : memref<144xf32, #tpu.memory_space<smem>>
      %446 = vector.broadcast %445 : f32 to vector<8x16xf32>
      %447 = arith.mulf %446, %432 : vector<8x16xf32>
      %448 = arith.addf %429, %447 : vector<8x16xf32>
      %c0_i32_115 = arith.constant 0 : i32
      %449 = arith.addi %96, %c0_i32_115 : i32
      %c2_116 = arith.constant 2 : index
      %450 = arith.index_cast %449 : i32 to index
      %c0_117 = arith.constant 0 : index
      %451 = vector.load %arg7[%c2_116, %450, %c0_117] : memref<4x18x16xf32, #tpu.memory_space<vmem>>, vector<1x8x16xf32>
      %452 = vector.shape_cast %451 : vector<1x8x16xf32> to vector<8x16xf32>
      %c1_i32_118 = arith.constant 1 : i32
      %453 = tpu.dynamic_rotate %452 by %c1_i32_118 dim 1 : vector<8x16xf32>, i32 -> vector<8x16xf32>
      %cst_119 = arith.constant 0.000000e+00 : f32
      %454 = vector.broadcast %cst_119 : f32 to vector<8x16xf32>
      %455 = arith.select %59, %453, %454 : vector<8x16xi1>, vector<8x16xf32>
      %c72 = arith.constant 72 : index
      %456 = memref.load %arg4[%c72] : memref<144xf32, #tpu.memory_space<smem>>
      %457 = vector.broadcast %456 : f32 to vector<8x16xf32>
      %458 = arith.mulf %457, %455 : vector<8x16xf32>
      %459 = arith.addf %436, %458 : vector<8x16xf32>
      %c73 = arith.constant 73 : index
      %460 = memref.load %arg4[%c73] : memref<144xf32, #tpu.memory_space<smem>>
      %461 = vector.broadcast %460 : f32 to vector<8x16xf32>
      %462 = arith.mulf %461, %455 : vector<8x16xf32>
      %463 = arith.addf %440, %462 : vector<8x16xf32>
      %c74 = arith.constant 74 : index
      %464 = memref.load %arg4[%c74] : memref<144xf32, #tpu.memory_space<smem>>
      %465 = vector.broadcast %464 : f32 to vector<8x16xf32>
      %466 = arith.mulf %465, %455 : vector<8x16xf32>
      %467 = arith.addf %444, %466 : vector<8x16xf32>
      %c75 = arith.constant 75 : index
      %468 = memref.load %arg4[%c75] : memref<144xf32, #tpu.memory_space<smem>>
      %469 = vector.broadcast %468 : f32 to vector<8x16xf32>
      %470 = arith.mulf %469, %455 : vector<8x16xf32>
      %471 = arith.addf %448, %470 : vector<8x16xf32>
      %c76 = arith.constant 76 : index
      %472 = memref.load %arg4[%c76] : memref<144xf32, #tpu.memory_space<smem>>
      %473 = vector.broadcast %472 : f32 to vector<8x16xf32>
      %474 = arith.mulf %473, %452 : vector<8x16xf32>
      %475 = arith.addf %459, %474 : vector<8x16xf32>
      %c77 = arith.constant 77 : index
      %476 = memref.load %arg4[%c77] : memref<144xf32, #tpu.memory_space<smem>>
      %477 = vector.broadcast %476 : f32 to vector<8x16xf32>
      %478 = arith.mulf %477, %452 : vector<8x16xf32>
      %479 = arith.addf %463, %478 : vector<8x16xf32>
      %c78 = arith.constant 78 : index
      %480 = memref.load %arg4[%c78] : memref<144xf32, #tpu.memory_space<smem>>
      %481 = vector.broadcast %480 : f32 to vector<8x16xf32>
      %482 = arith.mulf %481, %452 : vector<8x16xf32>
      %483 = arith.addf %467, %482 : vector<8x16xf32>
      %c79 = arith.constant 79 : index
      %484 = memref.load %arg4[%c79] : memref<144xf32, #tpu.memory_space<smem>>
      %485 = vector.broadcast %484 : f32 to vector<8x16xf32>
      %486 = arith.mulf %485, %452 : vector<8x16xf32>
      %487 = arith.addf %471, %486 : vector<8x16xf32>
      %c15_i32_120 = arith.constant 15 : i32
      %488 = tpu.dynamic_rotate %452 by %c15_i32_120 dim 1 : vector<8x16xf32>, i32 -> vector<8x16xf32>
      %cst_121 = arith.constant 0.000000e+00 : f32
      %489 = vector.broadcast %cst_121 : f32 to vector<8x16xf32>
      %490 = arith.select %61, %488, %489 : vector<8x16xi1>, vector<8x16xf32>
      %c80 = arith.constant 80 : index
      %491 = memref.load %arg4[%c80] : memref<144xf32, #tpu.memory_space<smem>>
      %492 = vector.broadcast %491 : f32 to vector<8x16xf32>
      %493 = arith.mulf %492, %490 : vector<8x16xf32>
      %494 = arith.addf %475, %493 : vector<8x16xf32>
      %c81 = arith.constant 81 : index
      %495 = memref.load %arg4[%c81] : memref<144xf32, #tpu.memory_space<smem>>
      %496 = vector.broadcast %495 : f32 to vector<8x16xf32>
      %497 = arith.mulf %496, %490 : vector<8x16xf32>
      %498 = arith.addf %479, %497 : vector<8x16xf32>
      %c82 = arith.constant 82 : index
      %499 = memref.load %arg4[%c82] : memref<144xf32, #tpu.memory_space<smem>>
      %500 = vector.broadcast %499 : f32 to vector<8x16xf32>
      %501 = arith.mulf %500, %490 : vector<8x16xf32>
      %502 = arith.addf %483, %501 : vector<8x16xf32>
      %c83 = arith.constant 83 : index
      %503 = memref.load %arg4[%c83] : memref<144xf32, #tpu.memory_space<smem>>
      %504 = vector.broadcast %503 : f32 to vector<8x16xf32>
      %505 = arith.mulf %504, %490 : vector<8x16xf32>
      %506 = arith.addf %487, %505 : vector<8x16xf32>
      %c1_i32_122 = arith.constant 1 : i32
      %507 = arith.addi %96, %c1_i32_122 : i32
      %c2_123 = arith.constant 2 : index
      %508 = arith.index_cast %507 : i32 to index
      %c0_124 = arith.constant 0 : index
      %509 = vector.load %arg7[%c2_123, %508, %c0_124] : memref<4x18x16xf32, #tpu.memory_space<vmem>>, vector<1x8x16xf32>
      %510 = vector.shape_cast %509 : vector<1x8x16xf32> to vector<8x16xf32>
      %c1_i32_125 = arith.constant 1 : i32
      %511 = tpu.dynamic_rotate %510 by %c1_i32_125 dim 1 : vector<8x16xf32>, i32 -> vector<8x16xf32>
      %cst_126 = arith.constant 0.000000e+00 : f32
      %512 = vector.broadcast %cst_126 : f32 to vector<8x16xf32>
      %513 = arith.select %59, %511, %512 : vector<8x16xi1>, vector<8x16xf32>
      %c84 = arith.constant 84 : index
      %514 = memref.load %arg4[%c84] : memref<144xf32, #tpu.memory_space<smem>>
      %515 = vector.broadcast %514 : f32 to vector<8x16xf32>
      %516 = arith.mulf %515, %513 : vector<8x16xf32>
      %517 = arith.addf %494, %516 : vector<8x16xf32>
      %c85 = arith.constant 85 : index
      %518 = memref.load %arg4[%c85] : memref<144xf32, #tpu.memory_space<smem>>
      %519 = vector.broadcast %518 : f32 to vector<8x16xf32>
      %520 = arith.mulf %519, %513 : vector<8x16xf32>
      %521 = arith.addf %498, %520 : vector<8x16xf32>
      %c86 = arith.constant 86 : index
      %522 = memref.load %arg4[%c86] : memref<144xf32, #tpu.memory_space<smem>>
      %523 = vector.broadcast %522 : f32 to vector<8x16xf32>
      %524 = arith.mulf %523, %513 : vector<8x16xf32>
      %525 = arith.addf %502, %524 : vector<8x16xf32>
      %c87 = arith.constant 87 : index
      %526 = memref.load %arg4[%c87] : memref<144xf32, #tpu.memory_space<smem>>
      %527 = vector.broadcast %526 : f32 to vector<8x16xf32>
      %528 = arith.mulf %527, %513 : vector<8x16xf32>
      %529 = arith.addf %506, %528 : vector<8x16xf32>
      %c88 = arith.constant 88 : index
      %530 = memref.load %arg4[%c88] : memref<144xf32, #tpu.memory_space<smem>>
      %531 = vector.broadcast %530 : f32 to vector<8x16xf32>
      %532 = arith.mulf %531, %510 : vector<8x16xf32>
      %533 = arith.addf %517, %532 : vector<8x16xf32>
      %c89 = arith.constant 89 : index
      %534 = memref.load %arg4[%c89] : memref<144xf32, #tpu.memory_space<smem>>
      %535 = vector.broadcast %534 : f32 to vector<8x16xf32>
      %536 = arith.mulf %535, %510 : vector<8x16xf32>
      %537 = arith.addf %521, %536 : vector<8x16xf32>
      %c90 = arith.constant 90 : index
      %538 = memref.load %arg4[%c90] : memref<144xf32, #tpu.memory_space<smem>>
      %539 = vector.broadcast %538 : f32 to vector<8x16xf32>
      %540 = arith.mulf %539, %510 : vector<8x16xf32>
      %541 = arith.addf %525, %540 : vector<8x16xf32>
      %c91 = arith.constant 91 : index
      %542 = memref.load %arg4[%c91] : memref<144xf32, #tpu.memory_space<smem>>
      %543 = vector.broadcast %542 : f32 to vector<8x16xf32>
      %544 = arith.mulf %543, %510 : vector<8x16xf32>
      %545 = arith.addf %529, %544 : vector<8x16xf32>
      %c15_i32_127 = arith.constant 15 : i32
      %546 = tpu.dynamic_rotate %510 by %c15_i32_127 dim 1 : vector<8x16xf32>, i32 -> vector<8x16xf32>
      %cst_128 = arith.constant 0.000000e+00 : f32
      %547 = vector.broadcast %cst_128 : f32 to vector<8x16xf32>
      %548 = arith.select %61, %546, %547 : vector<8x16xi1>, vector<8x16xf32>
      %c92 = arith.constant 92 : index
      %549 = memref.load %arg4[%c92] : memref<144xf32, #tpu.memory_space<smem>>
      %550 = vector.broadcast %549 : f32 to vector<8x16xf32>
      %551 = arith.mulf %550, %548 : vector<8x16xf32>
      %552 = arith.addf %533, %551 : vector<8x16xf32>
      %c93 = arith.constant 93 : index
      %553 = memref.load %arg4[%c93] : memref<144xf32, #tpu.memory_space<smem>>
      %554 = vector.broadcast %553 : f32 to vector<8x16xf32>
      %555 = arith.mulf %554, %548 : vector<8x16xf32>
      %556 = arith.addf %537, %555 : vector<8x16xf32>
      %c94 = arith.constant 94 : index
      %557 = memref.load %arg4[%c94] : memref<144xf32, #tpu.memory_space<smem>>
      %558 = vector.broadcast %557 : f32 to vector<8x16xf32>
      %559 = arith.mulf %558, %548 : vector<8x16xf32>
      %560 = arith.addf %541, %559 : vector<8x16xf32>
      %c95 = arith.constant 95 : index
      %561 = memref.load %arg4[%c95] : memref<144xf32, #tpu.memory_space<smem>>
      %562 = vector.broadcast %561 : f32 to vector<8x16xf32>
      %563 = arith.mulf %562, %548 : vector<8x16xf32>
      %564 = arith.addf %545, %563 : vector<8x16xf32>
      %c2_i32_129 = arith.constant 2 : i32
      %565 = arith.addi %96, %c2_i32_129 : i32
      %c2_130 = arith.constant 2 : index
      %566 = arith.index_cast %565 : i32 to index
      %c0_131 = arith.constant 0 : index
      %567 = vector.load %arg7[%c2_130, %566, %c0_131] : memref<4x18x16xf32, #tpu.memory_space<vmem>>, vector<1x8x16xf32>
      %568 = vector.shape_cast %567 : vector<1x8x16xf32> to vector<8x16xf32>
      %c1_i32_132 = arith.constant 1 : i32
      %569 = tpu.dynamic_rotate %568 by %c1_i32_132 dim 1 : vector<8x16xf32>, i32 -> vector<8x16xf32>
      %cst_133 = arith.constant 0.000000e+00 : f32
      %570 = vector.broadcast %cst_133 : f32 to vector<8x16xf32>
      %571 = arith.select %59, %569, %570 : vector<8x16xi1>, vector<8x16xf32>
      %c96 = arith.constant 96 : index
      %572 = memref.load %arg4[%c96] : memref<144xf32, #tpu.memory_space<smem>>
      %573 = vector.broadcast %572 : f32 to vector<8x16xf32>
      %574 = arith.mulf %573, %571 : vector<8x16xf32>
      %575 = arith.addf %552, %574 : vector<8x16xf32>
      %c97 = arith.constant 97 : index
      %576 = memref.load %arg4[%c97] : memref<144xf32, #tpu.memory_space<smem>>
      %577 = vector.broadcast %576 : f32 to vector<8x16xf32>
      %578 = arith.mulf %577, %571 : vector<8x16xf32>
      %579 = arith.addf %556, %578 : vector<8x16xf32>
      %c98 = arith.constant 98 : index
      %580 = memref.load %arg4[%c98] : memref<144xf32, #tpu.memory_space<smem>>
      %581 = vector.broadcast %580 : f32 to vector<8x16xf32>
      %582 = arith.mulf %581, %571 : vector<8x16xf32>
      %583 = arith.addf %560, %582 : vector<8x16xf32>
      %c99 = arith.constant 99 : index
      %584 = memref.load %arg4[%c99] : memref<144xf32, #tpu.memory_space<smem>>
      %585 = vector.broadcast %584 : f32 to vector<8x16xf32>
      %586 = arith.mulf %585, %571 : vector<8x16xf32>
      %587 = arith.addf %564, %586 : vector<8x16xf32>
      %c100 = arith.constant 100 : index
      %588 = memref.load %arg4[%c100] : memref<144xf32, #tpu.memory_space<smem>>
      %589 = vector.broadcast %588 : f32 to vector<8x16xf32>
      %590 = arith.mulf %589, %568 : vector<8x16xf32>
      %591 = arith.addf %575, %590 : vector<8x16xf32>
      %c101 = arith.constant 101 : index
      %592 = memref.load %arg4[%c101] : memref<144xf32, #tpu.memory_space<smem>>
      %593 = vector.broadcast %592 : f32 to vector<8x16xf32>
      %594 = arith.mulf %593, %568 : vector<8x16xf32>
      %595 = arith.addf %579, %594 : vector<8x16xf32>
      %c102 = arith.constant 102 : index
      %596 = memref.load %arg4[%c102] : memref<144xf32, #tpu.memory_space<smem>>
      %597 = vector.broadcast %596 : f32 to vector<8x16xf32>
      %598 = arith.mulf %597, %568 : vector<8x16xf32>
      %599 = arith.addf %583, %598 : vector<8x16xf32>
      %c103 = arith.constant 103 : index
      %600 = memref.load %arg4[%c103] : memref<144xf32, #tpu.memory_space<smem>>
      %601 = vector.broadcast %600 : f32 to vector<8x16xf32>
      %602 = arith.mulf %601, %568 : vector<8x16xf32>
      %603 = arith.addf %587, %602 : vector<8x16xf32>
      %c15_i32_134 = arith.constant 15 : i32
      %604 = tpu.dynamic_rotate %568 by %c15_i32_134 dim 1 : vector<8x16xf32>, i32 -> vector<8x16xf32>
      %cst_135 = arith.constant 0.000000e+00 : f32
      %605 = vector.broadcast %cst_135 : f32 to vector<8x16xf32>
      %606 = arith.select %61, %604, %605 : vector<8x16xi1>, vector<8x16xf32>
      %c104 = arith.constant 104 : index
      %607 = memref.load %arg4[%c104] : memref<144xf32, #tpu.memory_space<smem>>
      %608 = vector.broadcast %607 : f32 to vector<8x16xf32>
      %609 = arith.mulf %608, %606 : vector<8x16xf32>
      %610 = arith.addf %591, %609 : vector<8x16xf32>
      %c105 = arith.constant 105 : index
      %611 = memref.load %arg4[%c105] : memref<144xf32, #tpu.memory_space<smem>>
      %612 = vector.broadcast %611 : f32 to vector<8x16xf32>
      %613 = arith.mulf %612, %606 : vector<8x16xf32>
      %614 = arith.addf %595, %613 : vector<8x16xf32>
      %c106 = arith.constant 106 : index
      %615 = memref.load %arg4[%c106] : memref<144xf32, #tpu.memory_space<smem>>
      %616 = vector.broadcast %615 : f32 to vector<8x16xf32>
      %617 = arith.mulf %616, %606 : vector<8x16xf32>
      %618 = arith.addf %599, %617 : vector<8x16xf32>
      %c107 = arith.constant 107 : index
      %619 = memref.load %arg4[%c107] : memref<144xf32, #tpu.memory_space<smem>>
      %620 = vector.broadcast %619 : f32 to vector<8x16xf32>
      %621 = arith.mulf %620, %606 : vector<8x16xf32>
      %622 = arith.addf %603, %621 : vector<8x16xf32>
      %c0_i32_136 = arith.constant 0 : i32
      %623 = arith.addi %96, %c0_i32_136 : i32
      %c3_137 = arith.constant 3 : index
      %624 = arith.index_cast %623 : i32 to index
      %c0_138 = arith.constant 0 : index
      %625 = vector.load %arg7[%c3_137, %624, %c0_138] : memref<4x18x16xf32, #tpu.memory_space<vmem>>, vector<1x8x16xf32>
      %626 = vector.shape_cast %625 : vector<1x8x16xf32> to vector<8x16xf32>
      %c1_i32_139 = arith.constant 1 : i32
      %627 = tpu.dynamic_rotate %626 by %c1_i32_139 dim 1 : vector<8x16xf32>, i32 -> vector<8x16xf32>
      %cst_140 = arith.constant 0.000000e+00 : f32
      %628 = vector.broadcast %cst_140 : f32 to vector<8x16xf32>
      %629 = arith.select %59, %627, %628 : vector<8x16xi1>, vector<8x16xf32>
      %c108 = arith.constant 108 : index
      %630 = memref.load %arg4[%c108] : memref<144xf32, #tpu.memory_space<smem>>
      %631 = vector.broadcast %630 : f32 to vector<8x16xf32>
      %632 = arith.mulf %631, %629 : vector<8x16xf32>
      %633 = arith.addf %610, %632 : vector<8x16xf32>
      %c109 = arith.constant 109 : index
      %634 = memref.load %arg4[%c109] : memref<144xf32, #tpu.memory_space<smem>>
      %635 = vector.broadcast %634 : f32 to vector<8x16xf32>
      %636 = arith.mulf %635, %629 : vector<8x16xf32>
      %637 = arith.addf %614, %636 : vector<8x16xf32>
      %c110 = arith.constant 110 : index
      %638 = memref.load %arg4[%c110] : memref<144xf32, #tpu.memory_space<smem>>
      %639 = vector.broadcast %638 : f32 to vector<8x16xf32>
      %640 = arith.mulf %639, %629 : vector<8x16xf32>
      %641 = arith.addf %618, %640 : vector<8x16xf32>
      %c111 = arith.constant 111 : index
      %642 = memref.load %arg4[%c111] : memref<144xf32, #tpu.memory_space<smem>>
      %643 = vector.broadcast %642 : f32 to vector<8x16xf32>
      %644 = arith.mulf %643, %629 : vector<8x16xf32>
      %645 = arith.addf %622, %644 : vector<8x16xf32>
      %c112 = arith.constant 112 : index
      %646 = memref.load %arg4[%c112] : memref<144xf32, #tpu.memory_space<smem>>
      %647 = vector.broadcast %646 : f32 to vector<8x16xf32>
      %648 = arith.mulf %647, %626 : vector<8x16xf32>
      %649 = arith.addf %633, %648 : vector<8x16xf32>
      %c113 = arith.constant 113 : index
      %650 = memref.load %arg4[%c113] : memref<144xf32, #tpu.memory_space<smem>>
      %651 = vector.broadcast %650 : f32 to vector<8x16xf32>
      %652 = arith.mulf %651, %626 : vector<8x16xf32>
      %653 = arith.addf %637, %652 : vector<8x16xf32>
      %c114 = arith.constant 114 : index
      %654 = memref.load %arg4[%c114] : memref<144xf32, #tpu.memory_space<smem>>
      %655 = vector.broadcast %654 : f32 to vector<8x16xf32>
      %656 = arith.mulf %655, %626 : vector<8x16xf32>
      %657 = arith.addf %641, %656 : vector<8x16xf32>
      %c115 = arith.constant 115 : index
      %658 = memref.load %arg4[%c115] : memref<144xf32, #tpu.memory_space<smem>>
      %659 = vector.broadcast %658 : f32 to vector<8x16xf32>
      %660 = arith.mulf %659, %626 : vector<8x16xf32>
      %661 = arith.addf %645, %660 : vector<8x16xf32>
      %c15_i32_141 = arith.constant 15 : i32
      %662 = tpu.dynamic_rotate %626 by %c15_i32_141 dim 1 : vector<8x16xf32>, i32 -> vector<8x16xf32>
      %cst_142 = arith.constant 0.000000e+00 : f32
      %663 = vector.broadcast %cst_142 : f32 to vector<8x16xf32>
      %664 = arith.select %61, %662, %663 : vector<8x16xi1>, vector<8x16xf32>
      %c116 = arith.constant 116 : index
      %665 = memref.load %arg4[%c116] : memref<144xf32, #tpu.memory_space<smem>>
      %666 = vector.broadcast %665 : f32 to vector<8x16xf32>
      %667 = arith.mulf %666, %664 : vector<8x16xf32>
      %668 = arith.addf %649, %667 : vector<8x16xf32>
      %c117 = arith.constant 117 : index
      %669 = memref.load %arg4[%c117] : memref<144xf32, #tpu.memory_space<smem>>
      %670 = vector.broadcast %669 : f32 to vector<8x16xf32>
      %671 = arith.mulf %670, %664 : vector<8x16xf32>
      %672 = arith.addf %653, %671 : vector<8x16xf32>
      %c118 = arith.constant 118 : index
      %673 = memref.load %arg4[%c118] : memref<144xf32, #tpu.memory_space<smem>>
      %674 = vector.broadcast %673 : f32 to vector<8x16xf32>
      %675 = arith.mulf %674, %664 : vector<8x16xf32>
      %676 = arith.addf %657, %675 : vector<8x16xf32>
      %c119 = arith.constant 119 : index
      %677 = memref.load %arg4[%c119] : memref<144xf32, #tpu.memory_space<smem>>
      %678 = vector.broadcast %677 : f32 to vector<8x16xf32>
      %679 = arith.mulf %678, %664 : vector<8x16xf32>
      %680 = arith.addf %661, %679 : vector<8x16xf32>
      %c1_i32_143 = arith.constant 1 : i32
      %681 = arith.addi %96, %c1_i32_143 : i32
      %c3_144 = arith.constant 3 : index
      %682 = arith.index_cast %681 : i32 to index
      %c0_145 = arith.constant 0 : index
      %683 = vector.load %arg7[%c3_144, %682, %c0_145] : memref<4x18x16xf32, #tpu.memory_space<vmem>>, vector<1x8x16xf32>
      %684 = vector.shape_cast %683 : vector<1x8x16xf32> to vector<8x16xf32>
      %c1_i32_146 = arith.constant 1 : i32
      %685 = tpu.dynamic_rotate %684 by %c1_i32_146 dim 1 : vector<8x16xf32>, i32 -> vector<8x16xf32>
      %cst_147 = arith.constant 0.000000e+00 : f32
      %686 = vector.broadcast %cst_147 : f32 to vector<8x16xf32>
      %687 = arith.select %59, %685, %686 : vector<8x16xi1>, vector<8x16xf32>
      %c120 = arith.constant 120 : index
      %688 = memref.load %arg4[%c120] : memref<144xf32, #tpu.memory_space<smem>>
      %689 = vector.broadcast %688 : f32 to vector<8x16xf32>
      %690 = arith.mulf %689, %687 : vector<8x16xf32>
      %691 = arith.addf %668, %690 : vector<8x16xf32>
      %c121 = arith.constant 121 : index
      %692 = memref.load %arg4[%c121] : memref<144xf32, #tpu.memory_space<smem>>
      %693 = vector.broadcast %692 : f32 to vector<8x16xf32>
      %694 = arith.mulf %693, %687 : vector<8x16xf32>
      %695 = arith.addf %672, %694 : vector<8x16xf32>
      %c122 = arith.constant 122 : index
      %696 = memref.load %arg4[%c122] : memref<144xf32, #tpu.memory_space<smem>>
      %697 = vector.broadcast %696 : f32 to vector<8x16xf32>
      %698 = arith.mulf %697, %687 : vector<8x16xf32>
      %699 = arith.addf %676, %698 : vector<8x16xf32>
      %c123 = arith.constant 123 : index
      %700 = memref.load %arg4[%c123] : memref<144xf32, #tpu.memory_space<smem>>
      %701 = vector.broadcast %700 : f32 to vector<8x16xf32>
      %702 = arith.mulf %701, %687 : vector<8x16xf32>
      %703 = arith.addf %680, %702 : vector<8x16xf32>
      %c124 = arith.constant 124 : index
      %704 = memref.load %arg4[%c124] : memref<144xf32, #tpu.memory_space<smem>>
      %705 = vector.broadcast %704 : f32 to vector<8x16xf32>
      %706 = arith.mulf %705, %684 : vector<8x16xf32>
      %707 = arith.addf %691, %706 : vector<8x16xf32>
      %c125 = arith.constant 125 : index
      %708 = memref.load %arg4[%c125] : memref<144xf32, #tpu.memory_space<smem>>
      %709 = vector.broadcast %708 : f32 to vector<8x16xf32>
      %710 = arith.mulf %709, %684 : vector<8x16xf32>
      %711 = arith.addf %695, %710 : vector<8x16xf32>
      %c126 = arith.constant 126 : index
      %712 = memref.load %arg4[%c126] : memref<144xf32, #tpu.memory_space<smem>>
      %713 = vector.broadcast %712 : f32 to vector<8x16xf32>
      %714 = arith.mulf %713, %684 : vector<8x16xf32>
      %715 = arith.addf %699, %714 : vector<8x16xf32>
      %c127 = arith.constant 127 : index
      %716 = memref.load %arg4[%c127] : memref<144xf32, #tpu.memory_space<smem>>
      %717 = vector.broadcast %716 : f32 to vector<8x16xf32>
      %718 = arith.mulf %717, %684 : vector<8x16xf32>
      %719 = arith.addf %703, %718 : vector<8x16xf32>
      %c15_i32_148 = arith.constant 15 : i32
      %720 = tpu.dynamic_rotate %684 by %c15_i32_148 dim 1 : vector<8x16xf32>, i32 -> vector<8x16xf32>
      %cst_149 = arith.constant 0.000000e+00 : f32
      %721 = vector.broadcast %cst_149 : f32 to vector<8x16xf32>
      %722 = arith.select %61, %720, %721 : vector<8x16xi1>, vector<8x16xf32>
      %c128 = arith.constant 128 : index
      %723 = memref.load %arg4[%c128] : memref<144xf32, #tpu.memory_space<smem>>
      %724 = vector.broadcast %723 : f32 to vector<8x16xf32>
      %725 = arith.mulf %724, %722 : vector<8x16xf32>
      %726 = arith.addf %707, %725 : vector<8x16xf32>
      %c129 = arith.constant 129 : index
      %727 = memref.load %arg4[%c129] : memref<144xf32, #tpu.memory_space<smem>>
      %728 = vector.broadcast %727 : f32 to vector<8x16xf32>
      %729 = arith.mulf %728, %722 : vector<8x16xf32>
      %730 = arith.addf %711, %729 : vector<8x16xf32>
      %c130 = arith.constant 130 : index
      %731 = memref.load %arg4[%c130] : memref<144xf32, #tpu.memory_space<smem>>
      %732 = vector.broadcast %731 : f32 to vector<8x16xf32>
      %733 = arith.mulf %732, %722 : vector<8x16xf32>
      %734 = arith.addf %715, %733 : vector<8x16xf32>
      %c131 = arith.constant 131 : index
      %735 = memref.load %arg4[%c131] : memref<144xf32, #tpu.memory_space<smem>>
      %736 = vector.broadcast %735 : f32 to vector<8x16xf32>
      %737 = arith.mulf %736, %722 : vector<8x16xf32>
      %738 = arith.addf %719, %737 : vector<8x16xf32>
      %c2_i32_150 = arith.constant 2 : i32
      %739 = arith.addi %96, %c2_i32_150 : i32
      %c3_151 = arith.constant 3 : index
      %740 = arith.index_cast %739 : i32 to index
      %c0_152 = arith.constant 0 : index
      %741 = vector.load %arg7[%c3_151, %740, %c0_152] : memref<4x18x16xf32, #tpu.memory_space<vmem>>, vector<1x8x16xf32>
      %742 = vector.shape_cast %741 : vector<1x8x16xf32> to vector<8x16xf32>
      %c1_i32_153 = arith.constant 1 : i32
      %743 = tpu.dynamic_rotate %742 by %c1_i32_153 dim 1 : vector<8x16xf32>, i32 -> vector<8x16xf32>
      %cst_154 = arith.constant 0.000000e+00 : f32
      %744 = vector.broadcast %cst_154 : f32 to vector<8x16xf32>
      %745 = arith.select %59, %743, %744 : vector<8x16xi1>, vector<8x16xf32>
      %c132 = arith.constant 132 : index
      %746 = memref.load %arg4[%c132] : memref<144xf32, #tpu.memory_space<smem>>
      %747 = vector.broadcast %746 : f32 to vector<8x16xf32>
      %748 = arith.mulf %747, %745 : vector<8x16xf32>
      %749 = arith.addf %726, %748 : vector<8x16xf32>
      %c133 = arith.constant 133 : index
      %750 = memref.load %arg4[%c133] : memref<144xf32, #tpu.memory_space<smem>>
      %751 = vector.broadcast %750 : f32 to vector<8x16xf32>
      %752 = arith.mulf %751, %745 : vector<8x16xf32>
      %753 = arith.addf %730, %752 : vector<8x16xf32>
      %c134 = arith.constant 134 : index
      %754 = memref.load %arg4[%c134] : memref<144xf32, #tpu.memory_space<smem>>
      %755 = vector.broadcast %754 : f32 to vector<8x16xf32>
      %756 = arith.mulf %755, %745 : vector<8x16xf32>
      %757 = arith.addf %734, %756 : vector<8x16xf32>
      %c135 = arith.constant 135 : index
      %758 = memref.load %arg4[%c135] : memref<144xf32, #tpu.memory_space<smem>>
      %759 = vector.broadcast %758 : f32 to vector<8x16xf32>
      %760 = arith.mulf %759, %745 : vector<8x16xf32>
      %761 = arith.addf %738, %760 : vector<8x16xf32>
      %c136 = arith.constant 136 : index
      %762 = memref.load %arg4[%c136] : memref<144xf32, #tpu.memory_space<smem>>
      %763 = vector.broadcast %762 : f32 to vector<8x16xf32>
      %764 = arith.mulf %763, %742 : vector<8x16xf32>
      %765 = arith.addf %749, %764 : vector<8x16xf32>
      %c137 = arith.constant 137 : index
      %766 = memref.load %arg4[%c137] : memref<144xf32, #tpu.memory_space<smem>>
      %767 = vector.broadcast %766 : f32 to vector<8x16xf32>
      %768 = arith.mulf %767, %742 : vector<8x16xf32>
      %769 = arith.addf %753, %768 : vector<8x16xf32>
      %c138 = arith.constant 138 : index
      %770 = memref.load %arg4[%c138] : memref<144xf32, #tpu.memory_space<smem>>
      %771 = vector.broadcast %770 : f32 to vector<8x16xf32>
      %772 = arith.mulf %771, %742 : vector<8x16xf32>
      %773 = arith.addf %757, %772 : vector<8x16xf32>
      %c139 = arith.constant 139 : index
      %774 = memref.load %arg4[%c139] : memref<144xf32, #tpu.memory_space<smem>>
      %775 = vector.broadcast %774 : f32 to vector<8x16xf32>
      %776 = arith.mulf %775, %742 : vector<8x16xf32>
      %777 = arith.addf %761, %776 : vector<8x16xf32>
      %c15_i32_155 = arith.constant 15 : i32
      %778 = tpu.dynamic_rotate %742 by %c15_i32_155 dim 1 : vector<8x16xf32>, i32 -> vector<8x16xf32>
      %cst_156 = arith.constant 0.000000e+00 : f32
      %779 = vector.broadcast %cst_156 : f32 to vector<8x16xf32>
      %780 = arith.select %61, %778, %779 : vector<8x16xi1>, vector<8x16xf32>
      %c140 = arith.constant 140 : index
      %781 = memref.load %arg4[%c140] : memref<144xf32, #tpu.memory_space<smem>>
      %782 = vector.broadcast %781 : f32 to vector<8x16xf32>
      %783 = arith.mulf %782, %780 : vector<8x16xf32>
      %784 = arith.addf %765, %783 : vector<8x16xf32>
      %c141 = arith.constant 141 : index
      %785 = memref.load %arg4[%c141] : memref<144xf32, #tpu.memory_space<smem>>
      %786 = vector.broadcast %785 : f32 to vector<8x16xf32>
      %787 = arith.mulf %786, %780 : vector<8x16xf32>
      %788 = arith.addf %769, %787 : vector<8x16xf32>
      %c142 = arith.constant 142 : index
      %789 = memref.load %arg4[%c142] : memref<144xf32, #tpu.memory_space<smem>>
      %790 = vector.broadcast %789 : f32 to vector<8x16xf32>
      %791 = arith.mulf %790, %780 : vector<8x16xf32>
      %792 = arith.addf %773, %791 : vector<8x16xf32>
      %c143 = arith.constant 143 : index
      %793 = memref.load %arg4[%c143] : memref<144xf32, #tpu.memory_space<smem>>
      %794 = vector.broadcast %793 : f32 to vector<8x16xf32>
      %795 = arith.mulf %794, %780 : vector<8x16xf32>
      %796 = arith.addf %777, %795 : vector<8x16xf32>
      %c0_157 = arith.constant 0 : index
      %c0_158 = arith.constant 0 : index
      %797 = arith.index_cast %96 : i32 to index
      %c0_159 = arith.constant 0 : index
      %798 = vector.load %arg5[%c0_157, %c0_158, %797, %c0_159] : memref<1x4x16x16xf32, #tpu.memory_space<vmem>>, vector<1x1x8x16xf32>
      %799 = vector.shape_cast %798 : vector<1x1x8x16xf32> to vector<8x16xf32>
      %800 = vector.shape_cast %784 : vector<8x16xf32> to vector<1x1x8x16xf32>
      tpu.vector_store %arg5[%c0_157, %c0_158, %797, %c0_159], %800 {strides = array<i32>} : memref<1x4x16x16xf32, #tpu.memory_space<vmem>>, vector<1x1x8x16xf32>,
      %c0_160 = arith.constant 0 : index
      %c1_161 = arith.constant 1 : index
      %801 = arith.index_cast %96 : i32 to index
      %c0_162 = arith.constant 0 : index
      %802 = vector.load %arg5[%c0_160, %c1_161, %801, %c0_162] : memref<1x4x16x16xf32, #tpu.memory_space<vmem>>, vector<1x1x8x16xf32>
      %803 = vector.shape_cast %802 : vector<1x1x8x16xf32> to vector<8x16xf32>
      %804 = vector.shape_cast %788 : vector<8x16xf32> to vector<1x1x8x16xf32>
      tpu.vector_store %arg5[%c0_160, %c1_161, %801, %c0_162], %804 {strides = array<i32>} : memref<1x4x16x16xf32, #tpu.memory_space<vmem>>, vector<1x1x8x16xf32>,
      %c0_163 = arith.constant 0 : index
      %c2_164 = arith.constant 2 : index
      %805 = arith.index_cast %96 : i32 to index
      %c0_165 = arith.constant 0 : index
      %806 = vector.load %arg5[%c0_163, %c2_164, %805, %c0_165] : memref<1x4x16x16xf32, #tpu.memory_space<vmem>>, vector<1x1x8x16xf32>
      %807 = vector.shape_cast %806 : vector<1x1x8x16xf32> to vector<8x16xf32>
      %808 = vector.shape_cast %792 : vector<8x16xf32> to vector<1x1x8x16xf32>
      tpu.vector_store %arg5[%c0_163, %c2_164, %805, %c0_165], %808 {strides = array<i32>} : memref<1x4x16x16xf32, #tpu.memory_space<vmem>>, vector<1x1x8x16xf32>,
      %c0_166 = arith.constant 0 : index
      %c3_167 = arith.constant 3 : index
      %809 = arith.index_cast %96 : i32 to index
      %c0_168 = arith.constant 0 : index
      %810 = vector.load %arg5[%c0_166, %c3_167, %809, %c0_168] : memref<1x4x16x16xf32, #tpu.memory_space<vmem>>, vector<1x1x8x16xf32>
      %811 = vector.shape_cast %810 : vector<1x1x8x16xf32> to vector<8x16xf32>
      %812 = vector.shape_cast %796 : vector<8x16xf32> to vector<1x1x8x16xf32>
      tpu.vector_store %arg5[%c0_166, %c3_167, %809, %c0_168], %812 {strides = array<i32>} : memref<1x4x16x16xf32, #tpu.memory_space<vmem>>, vector<1x1x8x16xf32>,
    }
    %c2_i32_37 = arith.constant 2 : i32
    %c0_38 = arith.constant 0 : index
    %c0_39 = arith.constant 0 : index
    %c0_40 = arith.constant 0 : index
    %c0_41 = arith.constant 0 : index
    %63 = vector.load %arg5[%c0_38, %c0_39, %c0_40, %c0_41] : memref<1x4x16x16xf32, #tpu.memory_space<vmem>>, vector<1x1x16x16xf32>
    %64 = vector.shape_cast %63 : vector<1x1x16x16xf32> to vector<16x16xf32>
    %cst_42 = arith.constant dense<0.000000e+00> : vector<16xf32>
    %65 = vector.multi_reduction <add>, %64, %cst_42 [0] : vector<16x16xf32> to vector<16xf32>
    %66 = vector.shape_cast %65 : vector<16xf32> to vector<1x16xf32>
    %67 = arith.mulf %64, %64 : vector<16x16xf32>
    %cst_43 = arith.constant dense<0.000000e+00> : vector<16xf32>
    %68 = vector.multi_reduction <add>, %67, %cst_43 [0] : vector<16x16xf32> to vector<16xf32>
    %69 = vector.shape_cast %68 : vector<16xf32> to vector<1x16xf32>
    %c0_44 = arith.constant 0 : index
    %c1_45 = arith.constant 1 : index
    %c0_46 = arith.constant 0 : index
    %c0_47 = arith.constant 0 : index
    %70 = vector.load %arg5[%c0_44, %c1_45, %c0_46, %c0_47] : memref<1x4x16x16xf32, #tpu.memory_space<vmem>>, vector<1x1x16x16xf32>
    %71 = vector.shape_cast %70 : vector<1x1x16x16xf32> to vector<16x16xf32>
    %cst_48 = arith.constant dense<0.000000e+00> : vector<16xf32>
    %72 = vector.multi_reduction <add>, %71, %cst_48 [0] : vector<16x16xf32> to vector<16xf32>
    %73 = vector.shape_cast %72 : vector<16xf32> to vector<1x16xf32>
    %74 = arith.mulf %71, %71 : vector<16x16xf32>
    %cst_49 = arith.constant dense<0.000000e+00> : vector<16xf32>
    %75 = vector.multi_reduction <add>, %74, %cst_49 [0] : vector<16x16xf32> to vector<16xf32>
    %76 = vector.shape_cast %75 : vector<16xf32> to vector<1x16xf32>
    %c0_50 = arith.constant 0 : index
    %c2_51 = arith.constant 2 : index
    %c0_52 = arith.constant 0 : index
    %c0_53 = arith.constant 0 : index
    %77 = vector.load %arg5[%c0_50, %c2_51, %c0_52, %c0_53] : memref<1x4x16x16xf32, #tpu.memory_space<vmem>>, vector<1x1x16x16xf32>
    %78 = vector.shape_cast %77 : vector<1x1x16x16xf32> to vector<16x16xf32>
    %cst_54 = arith.constant dense<0.000000e+00> : vector<16xf32>
    %79 = vector.multi_reduction <add>, %78, %cst_54 [0] : vector<16x16xf32> to vector<16xf32>
    %80 = vector.shape_cast %79 : vector<16xf32> to vector<1x16xf32>
    %81 = arith.mulf %78, %78 : vector<16x16xf32>
    %cst_55 = arith.constant dense<0.000000e+00> : vector<16xf32>
    %82 = vector.multi_reduction <add>, %81, %cst_55 [0] : vector<16x16xf32> to vector<16xf32>
    %83 = vector.shape_cast %82 : vector<16xf32> to vector<1x16xf32>
    %c0_56 = arith.constant 0 : index
    %c3_57 = arith.constant 3 : index
    %c0_58 = arith.constant 0 : index
    %c0_59 = arith.constant 0 : index
    %84 = vector.load %arg5[%c0_56, %c3_57, %c0_58, %c0_59] : memref<1x4x16x16xf32, #tpu.memory_space<vmem>>, vector<1x1x16x16xf32>
    %85 = vector.shape_cast %84 : vector<1x1x16x16xf32> to vector<16x16xf32>
    %cst_60 = arith.constant dense<0.000000e+00> : vector<16xf32>
    %86 = vector.multi_reduction <add>, %85, %cst_60 [0] : vector<16x16xf32> to vector<16xf32>
    %87 = vector.shape_cast %86 : vector<16xf32> to vector<1x16xf32>
    %88 = arith.mulf %85, %85 : vector<16x16xf32>
    %cst_61 = arith.constant dense<0.000000e+00> : vector<16xf32>
    %89 = vector.multi_reduction <add>, %88, %cst_61 [0] : vector<16x16xf32> to vector<16xf32>
    %90 = vector.shape_cast %89 : vector<16xf32> to vector<1x16xf32>
    %91 = tpu.concatenate %66, %73, %80, %87, %69, %76, %83, %90 in 0 : vector<1x16xf32>, vector<1x16xf32>, vector<1x16xf32>, vector<1x16xf32>, vector<1x16xf32>, vector<1x16xf32>, vector<1x16xf32>, vector<1x16xf32> -> vector<8x16xf32>
    %c0_62 = arith.constant 0 : index
    %c0_63 = arith.constant 0 : index
    %c0_64 = arith.constant 0 : index
    %92 = vector.load %arg6[%c0_62, %c0_63, %c0_64] : memref<1x8x16xf32, #tpu.memory_space<vmem>>, vector<1x8x16xf32>
    %93 = vector.shape_cast %92 : vector<1x8x16xf32> to vector<8x16xf32>
    %94 = vector.shape_cast %91 : vector<8x16xf32> to vector<1x8x16xf32>
    tpu.vector_store %arg6[%c0_62, %c0_63, %c0_64], %94 {strides = array<i32>} : memref<1x8x16xf32, #tpu.memory_space<vmem>>, vector<1x8x16xf32>,
    return
  }
  func.func @transform_0(%arg0: i32) -> (i32, i32, i32, i32) {
    %c0_i32 = arith.constant 0 : i32
    %c0_i32_0 = arith.constant 0 : i32
    %c0_i32_1 = arith.constant 0 : i32
    %c0_i32_2 = arith.constant 0 : i32
    return %arg0, %c0_i32, %c0_i32_0, %c0_i32_1 : i32, i32, i32, i32
  }
  func.func @transform_1(%arg0: i32) -> i32 {
    %c0_i32 = arith.constant 0 : i32
    %c0_i32_0 = arith.constant 0 : i32
    return %c0_i32 : i32
  }
  func.func @transform_2(%arg0: i32) -> i32 {
    %c0_i32 = arith.constant 0 : i32
    %c0_i32_0 = arith.constant 0 : i32
    return %c0_i32 : i32
  }
  func.func @transform_3(%arg0: i32) -> i32 {
    %c0_i32 = arith.constant 0 : i32
    %c0_i32_0 = arith.constant 0 : i32
    return %c0_i32 : i32
  }
  func.func @transform_4(%arg0: i32) -> (i32, i32, i32, i32) {
    %c0_i32 = arith.constant 0 : i32
    %c0_i32_0 = arith.constant 0 : i32
    %c0_i32_1 = arith.constant 0 : i32
    %c0_i32_2 = arith.constant 0 : i32
    return %arg0, %c0_i32, %c0_i32_0, %c0_i32_1 : i32, i32, i32, i32
  }
  func.func @transform_5(%arg0: i32) -> (i32, i32, i32) {
    %c0_i32 = arith.constant 0 : i32
    %c0_i32_0 = arith.constant 0 : i32
    %c0_i32_1 = arith.constant 0 : i32
    return %arg0, %c0_i32, %c0_i32_0 : i32, i32, i32
  }
}

module attributes {stable_mosaic.version = 11 : i64} {
  func.func @_up_concat_conv1_kernel(%arg0: i32, %arg1: memref<1x32x8xf32, #tpu.memory_space<vmem>>, %arg2: memref<1x4x16x16xf32, #tpu.memory_space<vmem>>, %arg3: memref<18x8xf32, #tpu.memory_space<vmem>>, %arg4: memref<8x16xf32, #tpu.memory_space<vmem>>, %arg5: memref<288xf32, #tpu.memory_space<smem>>, %arg6: memref<1x4x16x16xf32, #tpu.memory_space<vmem>>, %arg7: memref<1x8x16xf32, #tpu.memory_space<vmem>>, %arg8: memref<8x18x16xf32, #tpu.memory_space<vmem>>) attributes {dimension_semantics = [#tpu.dimension_semantics<parallel>], iteration_bounds = array<i64: 2>, scalar_prefetch = 0 : i64, scratch_operands = 1 : i64, tpu.core_type = #tpu.core_type<tc>, window_params = [{transform_indices = @transform_0, window_bounds = array<i64: 1, 32, 8>}, {transform_indices = @transform_1, window_bounds = array<i64: 1, 4, 16, 16>}, {pipeline_mode = #tpu.pipeline_mode<synchronous>, transform_indices = @transform_2, window_bounds = array<i64: 18, 8>}, {pipeline_mode = #tpu.pipeline_mode<synchronous>, transform_indices = @transform_3, window_bounds = array<i64: 8, 16>}, {transform_indices = @transform_4, window_bounds = array<i64: 288>}, {transform_indices = @transform_5, window_bounds = array<i64: 1, 4, 16, 16>}, {transform_indices = @transform_6, window_bounds = array<i64: 1, 8, 16>}]} {
    %cst = arith.constant 0.000000e+00 : f32
    %0 = vector.broadcast %cst : f32 to vector<1x16xf32>
    %c0 = arith.constant 0 : index
    %c0_0 = arith.constant 0 : index
    %c0_1 = arith.constant 0 : index
    %c0_2 = arith.constant 0 : index
    %1 = vector.load %arg2[%c0, %c0_0, %c0_1, %c0_2] : memref<1x4x16x16xf32, #tpu.memory_space<vmem>>, vector<1x1x16x16xf32>
    %2 = vector.shape_cast %1 : vector<1x1x16x16xf32> to vector<16x16xf32>
    %3 = tpu.concatenate %0, %2, %0 in 0 : vector<1x16xf32>, vector<16x16xf32>, vector<1x16xf32> -> vector<18x16xf32>
    %c0_3 = arith.constant 0 : index
    %c0_4 = arith.constant 0 : index
    %c0_5 = arith.constant 0 : index
    %4 = vector.load %arg8[%c0_3, %c0_4, %c0_5] : memref<8x18x16xf32, #tpu.memory_space<vmem>>, vector<1x18x16xf32>
    %5 = vector.shape_cast %4 : vector<1x18x16xf32> to vector<18x16xf32>
    %6 = vector.shape_cast %3 : vector<18x16xf32> to vector<1x18x16xf32>
    tpu.vector_store %arg8[%c0_3, %c0_4, %c0_5], %6 {strides = array<i32>} : memref<8x18x16xf32, #tpu.memory_space<vmem>>, vector<1x18x16xf32>,
    %c0_6 = arith.constant 0 : index
    %c1 = arith.constant 1 : index
    %c0_7 = arith.constant 0 : index
    %c0_8 = arith.constant 0 : index
    %7 = vector.load %arg2[%c0_6, %c1, %c0_7, %c0_8] : memref<1x4x16x16xf32, #tpu.memory_space<vmem>>, vector<1x1x16x16xf32>
    %8 = vector.shape_cast %7 : vector<1x1x16x16xf32> to vector<16x16xf32>
    %9 = tpu.concatenate %0, %8, %0 in 0 : vector<1x16xf32>, vector<16x16xf32>, vector<1x16xf32> -> vector<18x16xf32>
    %c1_9 = arith.constant 1 : index
    %c0_10 = arith.constant 0 : index
    %c0_11 = arith.constant 0 : index
    %10 = vector.load %arg8[%c1_9, %c0_10, %c0_11] : memref<8x18x16xf32, #tpu.memory_space<vmem>>, vector<1x18x16xf32>
    %11 = vector.shape_cast %10 : vector<1x18x16xf32> to vector<18x16xf32>
    %12 = vector.shape_cast %9 : vector<18x16xf32> to vector<1x18x16xf32>
    tpu.vector_store %arg8[%c1_9, %c0_10, %c0_11], %12 {strides = array<i32>} : memref<8x18x16xf32, #tpu.memory_space<vmem>>, vector<1x18x16xf32>,
    %c0_12 = arith.constant 0 : index
    %c2 = arith.constant 2 : index
    %c0_13 = arith.constant 0 : index
    %c0_14 = arith.constant 0 : index
    %13 = vector.load %arg2[%c0_12, %c2, %c0_13, %c0_14] : memref<1x4x16x16xf32, #tpu.memory_space<vmem>>, vector<1x1x16x16xf32>
    %14 = vector.shape_cast %13 : vector<1x1x16x16xf32> to vector<16x16xf32>
    %15 = tpu.concatenate %0, %14, %0 in 0 : vector<1x16xf32>, vector<16x16xf32>, vector<1x16xf32> -> vector<18x16xf32>
    %c2_15 = arith.constant 2 : index
    %c0_16 = arith.constant 0 : index
    %c0_17 = arith.constant 0 : index
    %16 = vector.load %arg8[%c2_15, %c0_16, %c0_17] : memref<8x18x16xf32, #tpu.memory_space<vmem>>, vector<1x18x16xf32>
    %17 = vector.shape_cast %16 : vector<1x18x16xf32> to vector<18x16xf32>
    %18 = vector.shape_cast %15 : vector<18x16xf32> to vector<1x18x16xf32>
    tpu.vector_store %arg8[%c2_15, %c0_16, %c0_17], %18 {strides = array<i32>} : memref<8x18x16xf32, #tpu.memory_space<vmem>>, vector<1x18x16xf32>,
    %c0_18 = arith.constant 0 : index
    %c3 = arith.constant 3 : index
    %c0_19 = arith.constant 0 : index
    %c0_20 = arith.constant 0 : index
    %19 = vector.load %arg2[%c0_18, %c3, %c0_19, %c0_20] : memref<1x4x16x16xf32, #tpu.memory_space<vmem>>, vector<1x1x16x16xf32>
    %20 = vector.shape_cast %19 : vector<1x1x16x16xf32> to vector<16x16xf32>
    %21 = tpu.concatenate %0, %20, %0 in 0 : vector<1x16xf32>, vector<16x16xf32>, vector<1x16xf32> -> vector<18x16xf32>
    %c3_21 = arith.constant 3 : index
    %c0_22 = arith.constant 0 : index
    %c0_23 = arith.constant 0 : index
    %22 = vector.load %arg8[%c3_21, %c0_22, %c0_23] : memref<8x18x16xf32, #tpu.memory_space<vmem>>, vector<1x18x16xf32>
    %23 = vector.shape_cast %22 : vector<1x18x16xf32> to vector<18x16xf32>
    %24 = vector.shape_cast %21 : vector<18x16xf32> to vector<1x18x16xf32>
    tpu.vector_store %arg8[%c3_21, %c0_22, %c0_23], %24 {strides = array<i32>} : memref<8x18x16xf32, #tpu.memory_space<vmem>>, vector<1x18x16xf32>,
    %c0_24 = arith.constant 0 : index
    %c0_25 = arith.constant 0 : index
    %c0_26 = arith.constant 0 : index
    %25 = vector.load %arg1[%c0_24, %c0_25, %c0_26] : memref<1x32x8xf32, #tpu.memory_space<vmem>>, vector<1x32x8xf32>
    %26 = vector.shape_cast %25 : vector<1x32x8xf32> to vector<32x8xf32>
    %c0_27 = arith.constant 0 : index
    %c0_28 = arith.constant 0 : index
    %27 = vector.load %arg4[%c0_27, %c0_28] : memref<8x16xf32, #tpu.memory_space<vmem>>, vector<8x16xf32>
    %cst_29 = arith.constant dense<0.000000e+00> : vector<32x16xf32>
    %28 = tpu.matmul %26, %27, %cst_29 {dimension_numbers = #tpu.dot_dimension_numbers<[1], [0], [0], [1], [0, 0, 1, 1], [], []>} : vector<32x8xf32>, vector<8x16xf32>, vector<32x16xf32> -> vector<32x16xf32>
    %c0_30 = arith.constant 0 : index
    %c0_31 = arith.constant 0 : index
    %29 = vector.load %arg3[%c0_30, %c0_31] : memref<18x8xf32, #tpu.memory_space<vmem>>, vector<18x8xf32>
    %30 = vector.extract_strided_slice %28 {offsets = [0, 0], sizes = [8, 16], strides = [1, 1]} : vector<32x16xf32> to vector<8x16xf32>
    %cst_32 = arith.constant dense<0.000000e+00> : vector<18x16xf32>
    %31 = tpu.matmul %29, %30, %cst_32 {dimension_numbers = #tpu.dot_dimension_numbers<[1], [0], [0], [1], [0, 0, 1, 1], [], []>} : vector<18x8xf32>, vector<8x16xf32>, vector<18x16xf32> -> vector<18x16xf32>
    %c4 = arith.constant 4 : index
    %c0_33 = arith.constant 0 : index
    %c0_34 = arith.constant 0 : index
    %32 = vector.load %arg8[%c4, %c0_33, %c0_34] : memref<8x18x16xf32, #tpu.memory_space<vmem>>, vector<1x18x16xf32>
    %33 = vector.shape_cast %32 : vector<1x18x16xf32> to vector<18x16xf32>
    %34 = vector.shape_cast %31 : vector<18x16xf32> to vector<1x18x16xf32>
    tpu.vector_store %arg8[%c4, %c0_33, %c0_34], %34 {strides = array<i32>} : memref<8x18x16xf32, #tpu.memory_space<vmem>>, vector<1x18x16xf32>,
    %35 = vector.extract_strided_slice %28 {offsets = [8, 0], sizes = [8, 16], strides = [1, 1]} : vector<32x16xf32> to vector<8x16xf32>
    %cst_35 = arith.constant dense<0.000000e+00> : vector<18x16xf32>
    %36 = tpu.matmul %29, %35, %cst_35 {dimension_numbers = #tpu.dot_dimension_numbers<[1], [0], [0], [1], [0, 0, 1, 1], [], []>} : vector<18x8xf32>, vector<8x16xf32>, vector<18x16xf32> -> vector<18x16xf32>
    %c5 = arith.constant 5 : index
    %c0_36 = arith.constant 0 : index
    %c0_37 = arith.constant 0 : index
    %37 = vector.load %arg8[%c5, %c0_36, %c0_37] : memref<8x18x16xf32, #tpu.memory_space<vmem>>, vector<1x18x16xf32>
    %38 = vector.shape_cast %37 : vector<1x18x16xf32> to vector<18x16xf32>
    %39 = vector.shape_cast %36 : vector<18x16xf32> to vector<1x18x16xf32>
    tpu.vector_store %arg8[%c5, %c0_36, %c0_37], %39 {strides = array<i32>} : memref<8x18x16xf32, #tpu.memory_space<vmem>>, vector<1x18x16xf32>,
    %40 = vector.extract_strided_slice %28 {offsets = [16, 0], sizes = [8, 16], strides = [1, 1]} : vector<32x16xf32> to vector<8x16xf32>
    %cst_38 = arith.constant dense<0.000000e+00> : vector<18x16xf32>
    %41 = tpu.matmul %29, %40, %cst_38 {dimension_numbers = #tpu.dot_dimension_numbers<[1], [0], [0], [1], [0, 0, 1, 1], [], []>} : vector<18x8xf32>, vector<8x16xf32>, vector<18x16xf32> -> vector<18x16xf32>
    %c6 = arith.constant 6 : index
    %c0_39 = arith.constant 0 : index
    %c0_40 = arith.constant 0 : index
    %42 = vector.load %arg8[%c6, %c0_39, %c0_40] : memref<8x18x16xf32, #tpu.memory_space<vmem>>, vector<1x18x16xf32>
    %43 = vector.shape_cast %42 : vector<1x18x16xf32> to vector<18x16xf32>
    %44 = vector.shape_cast %41 : vector<18x16xf32> to vector<1x18x16xf32>
    tpu.vector_store %arg8[%c6, %c0_39, %c0_40], %44 {strides = array<i32>} : memref<8x18x16xf32, #tpu.memory_space<vmem>>, vector<1x18x16xf32>,
    %45 = vector.extract_strided_slice %28 {offsets = [24, 0], sizes = [8, 16], strides = [1, 1]} : vector<32x16xf32> to vector<8x16xf32>
    %cst_41 = arith.constant dense<0.000000e+00> : vector<18x16xf32>
    %46 = tpu.matmul %29, %45, %cst_41 {dimension_numbers = #tpu.dot_dimension_numbers<[1], [0], [0], [1], [0, 0, 1, 1], [], []>} : vector<18x8xf32>, vector<8x16xf32>, vector<18x16xf32> -> vector<18x16xf32>
    %c7 = arith.constant 7 : index
    %c0_42 = arith.constant 0 : index
    %c0_43 = arith.constant 0 : index
    %47 = vector.load %arg8[%c7, %c0_42, %c0_43] : memref<8x18x16xf32, #tpu.memory_space<vmem>>, vector<1x18x16xf32>
    %48 = vector.shape_cast %47 : vector<1x18x16xf32> to vector<18x16xf32>
    %49 = vector.shape_cast %46 : vector<18x16xf32> to vector<1x18x16xf32>
    tpu.vector_store %arg8[%c7, %c0_42, %c0_43], %49 {strides = array<i32>} : memref<8x18x16xf32, #tpu.memory_space<vmem>>, vector<1x18x16xf32>,
    %50 = tpu.iota {dimensions = array<i32: 1>} : vector<8x16xi32>
    %c1_i32 = arith.constant 1 : i32
    %51 = vector.broadcast %c1_i32 : i32 to vector<8x16xi32>
    %52 = arith.cmpi sge, %50, %51 : vector<8x16xi32>
    %c15_i32 = arith.constant 15 : i32
    %53 = vector.broadcast %c15_i32 : i32 to vector<8x16xi32>
    %54 = arith.cmpi slt, %50, %53 : vector<8x16xi32>
    %c0_i32 = arith.constant 0 : i32
    %c2_i32 = arith.constant 2 : i32
    %55 = arith.addi %c0_i32, %c2_i32 : i32
    %c1_i32_44 = arith.constant 1 : i32
    scf.for %arg9 = %c0_i32 to %55 step %c1_i32_44  : i32 {
      %c8_i32 = arith.constant 8 : i32
      %88 = arith.muli %arg9, %c8_i32 : i32
      %89 = tpu.assume_multiple %88, 8 : i32
      %cst_73 = arith.constant 0.000000e+00 : f32
      %90 = vector.broadcast %cst_73 : f32 to vector<8x16xf32>
      %cst_74 = arith.constant 0.000000e+00 : f32
      %91 = vector.broadcast %cst_74 : f32 to vector<8x16xf32>
      %cst_75 = arith.constant 0.000000e+00 : f32
      %92 = vector.broadcast %cst_75 : f32 to vector<8x16xf32>
      %cst_76 = arith.constant 0.000000e+00 : f32
      %93 = vector.broadcast %cst_76 : f32 to vector<8x16xf32>
      %c0_i32_77 = arith.constant 0 : i32
      %94 = arith.addi %89, %c0_i32_77 : i32
      %c0_78 = arith.constant 0 : index
      %95 = arith.index_cast %94 : i32 to index
      %c0_79 = arith.constant 0 : index
      %96 = vector.load %arg8[%c0_78, %95, %c0_79] : memref<8x18x16xf32, #tpu.memory_space<vmem>>, vector<1x8x16xf32>
      %97 = vector.shape_cast %96 : vector<1x8x16xf32> to vector<8x16xf32>
      %c1_i32_80 = arith.constant 1 : i32
      %98 = tpu.dynamic_rotate %97 by %c1_i32_80 dim 1 : vector<8x16xf32>, i32 -> vector<8x16xf32>
      %cst_81 = arith.constant 0.000000e+00 : f32
      %99 = vector.broadcast %cst_81 : f32 to vector<8x16xf32>
      %100 = arith.select %52, %98, %99 : vector<8x16xi1>, vector<8x16xf32>
      %c0_82 = arith.constant 0 : index
      %101 = memref.load %arg5[%c0_82] : memref<288xf32, #tpu.memory_space<smem>>
      %102 = vector.broadcast %101 : f32 to vector<8x16xf32>
      %103 = arith.mulf %102, %100 : vector<8x16xf32>
      %104 = arith.addf %90, %103 : vector<8x16xf32>
      %c1_83 = arith.constant 1 : index
      %105 = memref.load %arg5[%c1_83] : memref<288xf32, #tpu.memory_space<smem>>
      %106 = vector.broadcast %105 : f32 to vector<8x16xf32>
      %107 = arith.mulf %106, %100 : vector<8x16xf32>
      %108 = arith.addf %91, %107 : vector<8x16xf32>
      %c2_84 = arith.constant 2 : index
      %109 = memref.load %arg5[%c2_84] : memref<288xf32, #tpu.memory_space<smem>>
      %110 = vector.broadcast %109 : f32 to vector<8x16xf32>
      %111 = arith.mulf %110, %100 : vector<8x16xf32>
      %112 = arith.addf %92, %111 : vector<8x16xf32>
      %c3_85 = arith.constant 3 : index
      %113 = memref.load %arg5[%c3_85] : memref<288xf32, #tpu.memory_space<smem>>
      %114 = vector.broadcast %113 : f32 to vector<8x16xf32>
      %115 = arith.mulf %114, %100 : vector<8x16xf32>
      %116 = arith.addf %93, %115 : vector<8x16xf32>
      %c4_86 = arith.constant 4 : index
      %117 = memref.load %arg5[%c4_86] : memref<288xf32, #tpu.memory_space<smem>>
      %118 = vector.broadcast %117 : f32 to vector<8x16xf32>
      %119 = arith.mulf %118, %97 : vector<8x16xf32>
      %120 = arith.addf %104, %119 : vector<8x16xf32>
      %c5_87 = arith.constant 5 : index
      %121 = memref.load %arg5[%c5_87] : memref<288xf32, #tpu.memory_space<smem>>
      %122 = vector.broadcast %121 : f32 to vector<8x16xf32>
      %123 = arith.mulf %122, %97 : vector<8x16xf32>
      %124 = arith.addf %108, %123 : vector<8x16xf32>
      %c6_88 = arith.constant 6 : index
      %125 = memref.load %arg5[%c6_88] : memref<288xf32, #tpu.memory_space<smem>>
      %126 = vector.broadcast %125 : f32 to vector<8x16xf32>
      %127 = arith.mulf %126, %97 : vector<8x16xf32>
      %128 = arith.addf %112, %127 : vector<8x16xf32>
      %c7_89 = arith.constant 7 : index
      %129 = memref.load %arg5[%c7_89] : memref<288xf32, #tpu.memory_space<smem>>
      %130 = vector.broadcast %129 : f32 to vector<8x16xf32>
      %131 = arith.mulf %130, %97 : vector<8x16xf32>
      %132 = arith.addf %116, %131 : vector<8x16xf32>
      %c15_i32_90 = arith.constant 15 : i32
      %133 = tpu.dynamic_rotate %97 by %c15_i32_90 dim 1 : vector<8x16xf32>, i32 -> vector<8x16xf32>
      %cst_91 = arith.constant 0.000000e+00 : f32
      %134 = vector.broadcast %cst_91 : f32 to vector<8x16xf32>
      %135 = arith.select %54, %133, %134 : vector<8x16xi1>, vector<8x16xf32>
      %c8 = arith.constant 8 : index
      %136 = memref.load %arg5[%c8] : memref<288xf32, #tpu.memory_space<smem>>
      %137 = vector.broadcast %136 : f32 to vector<8x16xf32>
      %138 = arith.mulf %137, %135 : vector<8x16xf32>
      %139 = arith.addf %120, %138 : vector<8x16xf32>
      %c9 = arith.constant 9 : index
      %140 = memref.load %arg5[%c9] : memref<288xf32, #tpu.memory_space<smem>>
      %141 = vector.broadcast %140 : f32 to vector<8x16xf32>
      %142 = arith.mulf %141, %135 : vector<8x16xf32>
      %143 = arith.addf %124, %142 : vector<8x16xf32>
      %c10 = arith.constant 10 : index
      %144 = memref.load %arg5[%c10] : memref<288xf32, #tpu.memory_space<smem>>
      %145 = vector.broadcast %144 : f32 to vector<8x16xf32>
      %146 = arith.mulf %145, %135 : vector<8x16xf32>
      %147 = arith.addf %128, %146 : vector<8x16xf32>
      %c11 = arith.constant 11 : index
      %148 = memref.load %arg5[%c11] : memref<288xf32, #tpu.memory_space<smem>>
      %149 = vector.broadcast %148 : f32 to vector<8x16xf32>
      %150 = arith.mulf %149, %135 : vector<8x16xf32>
      %151 = arith.addf %132, %150 : vector<8x16xf32>
      %c1_i32_92 = arith.constant 1 : i32
      %152 = arith.addi %89, %c1_i32_92 : i32
      %c0_93 = arith.constant 0 : index
      %153 = arith.index_cast %152 : i32 to index
      %c0_94 = arith.constant 0 : index
      %154 = vector.load %arg8[%c0_93, %153, %c0_94] : memref<8x18x16xf32, #tpu.memory_space<vmem>>, vector<1x8x16xf32>
      %155 = vector.shape_cast %154 : vector<1x8x16xf32> to vector<8x16xf32>
      %c1_i32_95 = arith.constant 1 : i32
      %156 = tpu.dynamic_rotate %155 by %c1_i32_95 dim 1 : vector<8x16xf32>, i32 -> vector<8x16xf32>
      %cst_96 = arith.constant 0.000000e+00 : f32
      %157 = vector.broadcast %cst_96 : f32 to vector<8x16xf32>
      %158 = arith.select %52, %156, %157 : vector<8x16xi1>, vector<8x16xf32>
      %c12 = arith.constant 12 : index
      %159 = memref.load %arg5[%c12] : memref<288xf32, #tpu.memory_space<smem>>
      %160 = vector.broadcast %159 : f32 to vector<8x16xf32>
      %161 = arith.mulf %160, %158 : vector<8x16xf32>
      %162 = arith.addf %139, %161 : vector<8x16xf32>
      %c13 = arith.constant 13 : index
      %163 = memref.load %arg5[%c13] : memref<288xf32, #tpu.memory_space<smem>>
      %164 = vector.broadcast %163 : f32 to vector<8x16xf32>
      %165 = arith.mulf %164, %158 : vector<8x16xf32>
      %166 = arith.addf %143, %165 : vector<8x16xf32>
      %c14 = arith.constant 14 : index
      %167 = memref.load %arg5[%c14] : memref<288xf32, #tpu.memory_space<smem>>
      %168 = vector.broadcast %167 : f32 to vector<8x16xf32>
      %169 = arith.mulf %168, %158 : vector<8x16xf32>
      %170 = arith.addf %147, %169 : vector<8x16xf32>
      %c15 = arith.constant 15 : index
      %171 = memref.load %arg5[%c15] : memref<288xf32, #tpu.memory_space<smem>>
      %172 = vector.broadcast %171 : f32 to vector<8x16xf32>
      %173 = arith.mulf %172, %158 : vector<8x16xf32>
      %174 = arith.addf %151, %173 : vector<8x16xf32>
      %c16 = arith.constant 16 : index
      %175 = memref.load %arg5[%c16] : memref<288xf32, #tpu.memory_space<smem>>
      %176 = vector.broadcast %175 : f32 to vector<8x16xf32>
      %177 = arith.mulf %176, %155 : vector<8x16xf32>
      %178 = arith.addf %162, %177 : vector<8x16xf32>
      %c17 = arith.constant 17 : index
      %179 = memref.load %arg5[%c17] : memref<288xf32, #tpu.memory_space<smem>>
      %180 = vector.broadcast %179 : f32 to vector<8x16xf32>
      %181 = arith.mulf %180, %155 : vector<8x16xf32>
      %182 = arith.addf %166, %181 : vector<8x16xf32>
      %c18 = arith.constant 18 : index
      %183 = memref.load %arg5[%c18] : memref<288xf32, #tpu.memory_space<smem>>
      %184 = vector.broadcast %183 : f32 to vector<8x16xf32>
      %185 = arith.mulf %184, %155 : vector<8x16xf32>
      %186 = arith.addf %170, %185 : vector<8x16xf32>
      %c19 = arith.constant 19 : index
      %187 = memref.load %arg5[%c19] : memref<288xf32, #tpu.memory_space<smem>>
      %188 = vector.broadcast %187 : f32 to vector<8x16xf32>
      %189 = arith.mulf %188, %155 : vector<8x16xf32>
      %190 = arith.addf %174, %189 : vector<8x16xf32>
      %c15_i32_97 = arith.constant 15 : i32
      %191 = tpu.dynamic_rotate %155 by %c15_i32_97 dim 1 : vector<8x16xf32>, i32 -> vector<8x16xf32>
      %cst_98 = arith.constant 0.000000e+00 : f32
      %192 = vector.broadcast %cst_98 : f32 to vector<8x16xf32>
      %193 = arith.select %54, %191, %192 : vector<8x16xi1>, vector<8x16xf32>
      %c20 = arith.constant 20 : index
      %194 = memref.load %arg5[%c20] : memref<288xf32, #tpu.memory_space<smem>>
      %195 = vector.broadcast %194 : f32 to vector<8x16xf32>
      %196 = arith.mulf %195, %193 : vector<8x16xf32>
      %197 = arith.addf %178, %196 : vector<8x16xf32>
      %c21 = arith.constant 21 : index
      %198 = memref.load %arg5[%c21] : memref<288xf32, #tpu.memory_space<smem>>
      %199 = vector.broadcast %198 : f32 to vector<8x16xf32>
      %200 = arith.mulf %199, %193 : vector<8x16xf32>
      %201 = arith.addf %182, %200 : vector<8x16xf32>
      %c22 = arith.constant 22 : index
      %202 = memref.load %arg5[%c22] : memref<288xf32, #tpu.memory_space<smem>>
      %203 = vector.broadcast %202 : f32 to vector<8x16xf32>
      %204 = arith.mulf %203, %193 : vector<8x16xf32>
      %205 = arith.addf %186, %204 : vector<8x16xf32>
      %c23 = arith.constant 23 : index
      %206 = memref.load %arg5[%c23] : memref<288xf32, #tpu.memory_space<smem>>
      %207 = vector.broadcast %206 : f32 to vector<8x16xf32>
      %208 = arith.mulf %207, %193 : vector<8x16xf32>
      %209 = arith.addf %190, %208 : vector<8x16xf32>
      %c2_i32_99 = arith.constant 2 : i32
      %210 = arith.addi %89, %c2_i32_99 : i32
      %c0_100 = arith.constant 0 : index
      %211 = arith.index_cast %210 : i32 to index
      %c0_101 = arith.constant 0 : index
      %212 = vector.load %arg8[%c0_100, %211, %c0_101] : memref<8x18x16xf32, #tpu.memory_space<vmem>>, vector<1x8x16xf32>
      %213 = vector.shape_cast %212 : vector<1x8x16xf32> to vector<8x16xf32>
      %c1_i32_102 = arith.constant 1 : i32
      %214 = tpu.dynamic_rotate %213 by %c1_i32_102 dim 1 : vector<8x16xf32>, i32 -> vector<8x16xf32>
      %cst_103 = arith.constant 0.000000e+00 : f32
      %215 = vector.broadcast %cst_103 : f32 to vector<8x16xf32>
      %216 = arith.select %52, %214, %215 : vector<8x16xi1>, vector<8x16xf32>
      %c24 = arith.constant 24 : index
      %217 = memref.load %arg5[%c24] : memref<288xf32, #tpu.memory_space<smem>>
      %218 = vector.broadcast %217 : f32 to vector<8x16xf32>
      %219 = arith.mulf %218, %216 : vector<8x16xf32>
      %220 = arith.addf %197, %219 : vector<8x16xf32>
      %c25 = arith.constant 25 : index
      %221 = memref.load %arg5[%c25] : memref<288xf32, #tpu.memory_space<smem>>
      %222 = vector.broadcast %221 : f32 to vector<8x16xf32>
      %223 = arith.mulf %222, %216 : vector<8x16xf32>
      %224 = arith.addf %201, %223 : vector<8x16xf32>
      %c26 = arith.constant 26 : index
      %225 = memref.load %arg5[%c26] : memref<288xf32, #tpu.memory_space<smem>>
      %226 = vector.broadcast %225 : f32 to vector<8x16xf32>
      %227 = arith.mulf %226, %216 : vector<8x16xf32>
      %228 = arith.addf %205, %227 : vector<8x16xf32>
      %c27 = arith.constant 27 : index
      %229 = memref.load %arg5[%c27] : memref<288xf32, #tpu.memory_space<smem>>
      %230 = vector.broadcast %229 : f32 to vector<8x16xf32>
      %231 = arith.mulf %230, %216 : vector<8x16xf32>
      %232 = arith.addf %209, %231 : vector<8x16xf32>
      %c28 = arith.constant 28 : index
      %233 = memref.load %arg5[%c28] : memref<288xf32, #tpu.memory_space<smem>>
      %234 = vector.broadcast %233 : f32 to vector<8x16xf32>
      %235 = arith.mulf %234, %213 : vector<8x16xf32>
      %236 = arith.addf %220, %235 : vector<8x16xf32>
      %c29 = arith.constant 29 : index
      %237 = memref.load %arg5[%c29] : memref<288xf32, #tpu.memory_space<smem>>
      %238 = vector.broadcast %237 : f32 to vector<8x16xf32>
      %239 = arith.mulf %238, %213 : vector<8x16xf32>
      %240 = arith.addf %224, %239 : vector<8x16xf32>
      %c30 = arith.constant 30 : index
      %241 = memref.load %arg5[%c30] : memref<288xf32, #tpu.memory_space<smem>>
      %242 = vector.broadcast %241 : f32 to vector<8x16xf32>
      %243 = arith.mulf %242, %213 : vector<8x16xf32>
      %244 = arith.addf %228, %243 : vector<8x16xf32>
      %c31 = arith.constant 31 : index
      %245 = memref.load %arg5[%c31] : memref<288xf32, #tpu.memory_space<smem>>
      %246 = vector.broadcast %245 : f32 to vector<8x16xf32>
      %247 = arith.mulf %246, %213 : vector<8x16xf32>
      %248 = arith.addf %232, %247 : vector<8x16xf32>
      %c15_i32_104 = arith.constant 15 : i32
      %249 = tpu.dynamic_rotate %213 by %c15_i32_104 dim 1 : vector<8x16xf32>, i32 -> vector<8x16xf32>
      %cst_105 = arith.constant 0.000000e+00 : f32
      %250 = vector.broadcast %cst_105 : f32 to vector<8x16xf32>
      %251 = arith.select %54, %249, %250 : vector<8x16xi1>, vector<8x16xf32>
      %c32 = arith.constant 32 : index
      %252 = memref.load %arg5[%c32] : memref<288xf32, #tpu.memory_space<smem>>
      %253 = vector.broadcast %252 : f32 to vector<8x16xf32>
      %254 = arith.mulf %253, %251 : vector<8x16xf32>
      %255 = arith.addf %236, %254 : vector<8x16xf32>
      %c33 = arith.constant 33 : index
      %256 = memref.load %arg5[%c33] : memref<288xf32, #tpu.memory_space<smem>>
      %257 = vector.broadcast %256 : f32 to vector<8x16xf32>
      %258 = arith.mulf %257, %251 : vector<8x16xf32>
      %259 = arith.addf %240, %258 : vector<8x16xf32>
      %c34 = arith.constant 34 : index
      %260 = memref.load %arg5[%c34] : memref<288xf32, #tpu.memory_space<smem>>
      %261 = vector.broadcast %260 : f32 to vector<8x16xf32>
      %262 = arith.mulf %261, %251 : vector<8x16xf32>
      %263 = arith.addf %244, %262 : vector<8x16xf32>
      %c35 = arith.constant 35 : index
      %264 = memref.load %arg5[%c35] : memref<288xf32, #tpu.memory_space<smem>>
      %265 = vector.broadcast %264 : f32 to vector<8x16xf32>
      %266 = arith.mulf %265, %251 : vector<8x16xf32>
      %267 = arith.addf %248, %266 : vector<8x16xf32>
      %c0_i32_106 = arith.constant 0 : i32
      %268 = arith.addi %89, %c0_i32_106 : i32
      %c1_107 = arith.constant 1 : index
      %269 = arith.index_cast %268 : i32 to index
      %c0_108 = arith.constant 0 : index
      %270 = vector.load %arg8[%c1_107, %269, %c0_108] : memref<8x18x16xf32, #tpu.memory_space<vmem>>, vector<1x8x16xf32>
      %271 = vector.shape_cast %270 : vector<1x8x16xf32> to vector<8x16xf32>
      %c1_i32_109 = arith.constant 1 : i32
      %272 = tpu.dynamic_rotate %271 by %c1_i32_109 dim 1 : vector<8x16xf32>, i32 -> vector<8x16xf32>
      %cst_110 = arith.constant 0.000000e+00 : f32
      %273 = vector.broadcast %cst_110 : f32 to vector<8x16xf32>
      %274 = arith.select %52, %272, %273 : vector<8x16xi1>, vector<8x16xf32>
      %c36 = arith.constant 36 : index
      %275 = memref.load %arg5[%c36] : memref<288xf32, #tpu.memory_space<smem>>
      %276 = vector.broadcast %275 : f32 to vector<8x16xf32>
      %277 = arith.mulf %276, %274 : vector<8x16xf32>
      %278 = arith.addf %255, %277 : vector<8x16xf32>
      %c37 = arith.constant 37 : index
      %279 = memref.load %arg5[%c37] : memref<288xf32, #tpu.memory_space<smem>>
      %280 = vector.broadcast %279 : f32 to vector<8x16xf32>
      %281 = arith.mulf %280, %274 : vector<8x16xf32>
      %282 = arith.addf %259, %281 : vector<8x16xf32>
      %c38 = arith.constant 38 : index
      %283 = memref.load %arg5[%c38] : memref<288xf32, #tpu.memory_space<smem>>
      %284 = vector.broadcast %283 : f32 to vector<8x16xf32>
      %285 = arith.mulf %284, %274 : vector<8x16xf32>
      %286 = arith.addf %263, %285 : vector<8x16xf32>
      %c39 = arith.constant 39 : index
      %287 = memref.load %arg5[%c39] : memref<288xf32, #tpu.memory_space<smem>>
      %288 = vector.broadcast %287 : f32 to vector<8x16xf32>
      %289 = arith.mulf %288, %274 : vector<8x16xf32>
      %290 = arith.addf %267, %289 : vector<8x16xf32>
      %c40 = arith.constant 40 : index
      %291 = memref.load %arg5[%c40] : memref<288xf32, #tpu.memory_space<smem>>
      %292 = vector.broadcast %291 : f32 to vector<8x16xf32>
      %293 = arith.mulf %292, %271 : vector<8x16xf32>
      %294 = arith.addf %278, %293 : vector<8x16xf32>
      %c41 = arith.constant 41 : index
      %295 = memref.load %arg5[%c41] : memref<288xf32, #tpu.memory_space<smem>>
      %296 = vector.broadcast %295 : f32 to vector<8x16xf32>
      %297 = arith.mulf %296, %271 : vector<8x16xf32>
      %298 = arith.addf %282, %297 : vector<8x16xf32>
      %c42 = arith.constant 42 : index
      %299 = memref.load %arg5[%c42] : memref<288xf32, #tpu.memory_space<smem>>
      %300 = vector.broadcast %299 : f32 to vector<8x16xf32>
      %301 = arith.mulf %300, %271 : vector<8x16xf32>
      %302 = arith.addf %286, %301 : vector<8x16xf32>
      %c43 = arith.constant 43 : index
      %303 = memref.load %arg5[%c43] : memref<288xf32, #tpu.memory_space<smem>>
      %304 = vector.broadcast %303 : f32 to vector<8x16xf32>
      %305 = arith.mulf %304, %271 : vector<8x16xf32>
      %306 = arith.addf %290, %305 : vector<8x16xf32>
      %c15_i32_111 = arith.constant 15 : i32
      %307 = tpu.dynamic_rotate %271 by %c15_i32_111 dim 1 : vector<8x16xf32>, i32 -> vector<8x16xf32>
      %cst_112 = arith.constant 0.000000e+00 : f32
      %308 = vector.broadcast %cst_112 : f32 to vector<8x16xf32>
      %309 = arith.select %54, %307, %308 : vector<8x16xi1>, vector<8x16xf32>
      %c44 = arith.constant 44 : index
      %310 = memref.load %arg5[%c44] : memref<288xf32, #tpu.memory_space<smem>>
      %311 = vector.broadcast %310 : f32 to vector<8x16xf32>
      %312 = arith.mulf %311, %309 : vector<8x16xf32>
      %313 = arith.addf %294, %312 : vector<8x16xf32>
      %c45 = arith.constant 45 : index
      %314 = memref.load %arg5[%c45] : memref<288xf32, #tpu.memory_space<smem>>
      %315 = vector.broadcast %314 : f32 to vector<8x16xf32>
      %316 = arith.mulf %315, %309 : vector<8x16xf32>
      %317 = arith.addf %298, %316 : vector<8x16xf32>
      %c46 = arith.constant 46 : index
      %318 = memref.load %arg5[%c46] : memref<288xf32, #tpu.memory_space<smem>>
      %319 = vector.broadcast %318 : f32 to vector<8x16xf32>
      %320 = arith.mulf %319, %309 : vector<8x16xf32>
      %321 = arith.addf %302, %320 : vector<8x16xf32>
      %c47 = arith.constant 47 : index
      %322 = memref.load %arg5[%c47] : memref<288xf32, #tpu.memory_space<smem>>
      %323 = vector.broadcast %322 : f32 to vector<8x16xf32>
      %324 = arith.mulf %323, %309 : vector<8x16xf32>
      %325 = arith.addf %306, %324 : vector<8x16xf32>
      %c1_i32_113 = arith.constant 1 : i32
      %326 = arith.addi %89, %c1_i32_113 : i32
      %c1_114 = arith.constant 1 : index
      %327 = arith.index_cast %326 : i32 to index
      %c0_115 = arith.constant 0 : index
      %328 = vector.load %arg8[%c1_114, %327, %c0_115] : memref<8x18x16xf32, #tpu.memory_space<vmem>>, vector<1x8x16xf32>
      %329 = vector.shape_cast %328 : vector<1x8x16xf32> to vector<8x16xf32>
      %c1_i32_116 = arith.constant 1 : i32
      %330 = tpu.dynamic_rotate %329 by %c1_i32_116 dim 1 : vector<8x16xf32>, i32 -> vector<8x16xf32>
      %cst_117 = arith.constant 0.000000e+00 : f32
      %331 = vector.broadcast %cst_117 : f32 to vector<8x16xf32>
      %332 = arith.select %52, %330, %331 : vector<8x16xi1>, vector<8x16xf32>
      %c48 = arith.constant 48 : index
      %333 = memref.load %arg5[%c48] : memref<288xf32, #tpu.memory_space<smem>>
      %334 = vector.broadcast %333 : f32 to vector<8x16xf32>
      %335 = arith.mulf %334, %332 : vector<8x16xf32>
      %336 = arith.addf %313, %335 : vector<8x16xf32>
      %c49 = arith.constant 49 : index
      %337 = memref.load %arg5[%c49] : memref<288xf32, #tpu.memory_space<smem>>
      %338 = vector.broadcast %337 : f32 to vector<8x16xf32>
      %339 = arith.mulf %338, %332 : vector<8x16xf32>
      %340 = arith.addf %317, %339 : vector<8x16xf32>
      %c50 = arith.constant 50 : index
      %341 = memref.load %arg5[%c50] : memref<288xf32, #tpu.memory_space<smem>>
      %342 = vector.broadcast %341 : f32 to vector<8x16xf32>
      %343 = arith.mulf %342, %332 : vector<8x16xf32>
      %344 = arith.addf %321, %343 : vector<8x16xf32>
      %c51 = arith.constant 51 : index
      %345 = memref.load %arg5[%c51] : memref<288xf32, #tpu.memory_space<smem>>
      %346 = vector.broadcast %345 : f32 to vector<8x16xf32>
      %347 = arith.mulf %346, %332 : vector<8x16xf32>
      %348 = arith.addf %325, %347 : vector<8x16xf32>
      %c52 = arith.constant 52 : index
      %349 = memref.load %arg5[%c52] : memref<288xf32, #tpu.memory_space<smem>>
      %350 = vector.broadcast %349 : f32 to vector<8x16xf32>
      %351 = arith.mulf %350, %329 : vector<8x16xf32>
      %352 = arith.addf %336, %351 : vector<8x16xf32>
      %c53 = arith.constant 53 : index
      %353 = memref.load %arg5[%c53] : memref<288xf32, #tpu.memory_space<smem>>
      %354 = vector.broadcast %353 : f32 to vector<8x16xf32>
      %355 = arith.mulf %354, %329 : vector<8x16xf32>
      %356 = arith.addf %340, %355 : vector<8x16xf32>
      %c54 = arith.constant 54 : index
      %357 = memref.load %arg5[%c54] : memref<288xf32, #tpu.memory_space<smem>>
      %358 = vector.broadcast %357 : f32 to vector<8x16xf32>
      %359 = arith.mulf %358, %329 : vector<8x16xf32>
      %360 = arith.addf %344, %359 : vector<8x16xf32>
      %c55 = arith.constant 55 : index
      %361 = memref.load %arg5[%c55] : memref<288xf32, #tpu.memory_space<smem>>
      %362 = vector.broadcast %361 : f32 to vector<8x16xf32>
      %363 = arith.mulf %362, %329 : vector<8x16xf32>
      %364 = arith.addf %348, %363 : vector<8x16xf32>
      %c15_i32_118 = arith.constant 15 : i32
      %365 = tpu.dynamic_rotate %329 by %c15_i32_118 dim 1 : vector<8x16xf32>, i32 -> vector<8x16xf32>
      %cst_119 = arith.constant 0.000000e+00 : f32
      %366 = vector.broadcast %cst_119 : f32 to vector<8x16xf32>
      %367 = arith.select %54, %365, %366 : vector<8x16xi1>, vector<8x16xf32>
      %c56 = arith.constant 56 : index
      %368 = memref.load %arg5[%c56] : memref<288xf32, #tpu.memory_space<smem>>
      %369 = vector.broadcast %368 : f32 to vector<8x16xf32>
      %370 = arith.mulf %369, %367 : vector<8x16xf32>
      %371 = arith.addf %352, %370 : vector<8x16xf32>
      %c57 = arith.constant 57 : index
      %372 = memref.load %arg5[%c57] : memref<288xf32, #tpu.memory_space<smem>>
      %373 = vector.broadcast %372 : f32 to vector<8x16xf32>
      %374 = arith.mulf %373, %367 : vector<8x16xf32>
      %375 = arith.addf %356, %374 : vector<8x16xf32>
      %c58 = arith.constant 58 : index
      %376 = memref.load %arg5[%c58] : memref<288xf32, #tpu.memory_space<smem>>
      %377 = vector.broadcast %376 : f32 to vector<8x16xf32>
      %378 = arith.mulf %377, %367 : vector<8x16xf32>
      %379 = arith.addf %360, %378 : vector<8x16xf32>
      %c59 = arith.constant 59 : index
      %380 = memref.load %arg5[%c59] : memref<288xf32, #tpu.memory_space<smem>>
      %381 = vector.broadcast %380 : f32 to vector<8x16xf32>
      %382 = arith.mulf %381, %367 : vector<8x16xf32>
      %383 = arith.addf %364, %382 : vector<8x16xf32>
      %c2_i32_120 = arith.constant 2 : i32
      %384 = arith.addi %89, %c2_i32_120 : i32
      %c1_121 = arith.constant 1 : index
      %385 = arith.index_cast %384 : i32 to index
      %c0_122 = arith.constant 0 : index
      %386 = vector.load %arg8[%c1_121, %385, %c0_122] : memref<8x18x16xf32, #tpu.memory_space<vmem>>, vector<1x8x16xf32>
      %387 = vector.shape_cast %386 : vector<1x8x16xf32> to vector<8x16xf32>
      %c1_i32_123 = arith.constant 1 : i32
      %388 = tpu.dynamic_rotate %387 by %c1_i32_123 dim 1 : vector<8x16xf32>, i32 -> vector<8x16xf32>
      %cst_124 = arith.constant 0.000000e+00 : f32
      %389 = vector.broadcast %cst_124 : f32 to vector<8x16xf32>
      %390 = arith.select %52, %388, %389 : vector<8x16xi1>, vector<8x16xf32>
      %c60 = arith.constant 60 : index
      %391 = memref.load %arg5[%c60] : memref<288xf32, #tpu.memory_space<smem>>
      %392 = vector.broadcast %391 : f32 to vector<8x16xf32>
      %393 = arith.mulf %392, %390 : vector<8x16xf32>
      %394 = arith.addf %371, %393 : vector<8x16xf32>
      %c61 = arith.constant 61 : index
      %395 = memref.load %arg5[%c61] : memref<288xf32, #tpu.memory_space<smem>>
      %396 = vector.broadcast %395 : f32 to vector<8x16xf32>
      %397 = arith.mulf %396, %390 : vector<8x16xf32>
      %398 = arith.addf %375, %397 : vector<8x16xf32>
      %c62 = arith.constant 62 : index
      %399 = memref.load %arg5[%c62] : memref<288xf32, #tpu.memory_space<smem>>
      %400 = vector.broadcast %399 : f32 to vector<8x16xf32>
      %401 = arith.mulf %400, %390 : vector<8x16xf32>
      %402 = arith.addf %379, %401 : vector<8x16xf32>
      %c63 = arith.constant 63 : index
      %403 = memref.load %arg5[%c63] : memref<288xf32, #tpu.memory_space<smem>>
      %404 = vector.broadcast %403 : f32 to vector<8x16xf32>
      %405 = arith.mulf %404, %390 : vector<8x16xf32>
      %406 = arith.addf %383, %405 : vector<8x16xf32>
      %c64 = arith.constant 64 : index
      %407 = memref.load %arg5[%c64] : memref<288xf32, #tpu.memory_space<smem>>
      %408 = vector.broadcast %407 : f32 to vector<8x16xf32>
      %409 = arith.mulf %408, %387 : vector<8x16xf32>
      %410 = arith.addf %394, %409 : vector<8x16xf32>
      %c65 = arith.constant 65 : index
      %411 = memref.load %arg5[%c65] : memref<288xf32, #tpu.memory_space<smem>>
      %412 = vector.broadcast %411 : f32 to vector<8x16xf32>
      %413 = arith.mulf %412, %387 : vector<8x16xf32>
      %414 = arith.addf %398, %413 : vector<8x16xf32>
      %c66 = arith.constant 66 : index
      %415 = memref.load %arg5[%c66] : memref<288xf32, #tpu.memory_space<smem>>
      %416 = vector.broadcast %415 : f32 to vector<8x16xf32>
      %417 = arith.mulf %416, %387 : vector<8x16xf32>
      %418 = arith.addf %402, %417 : vector<8x16xf32>
      %c67 = arith.constant 67 : index
      %419 = memref.load %arg5[%c67] : memref<288xf32, #tpu.memory_space<smem>>
      %420 = vector.broadcast %419 : f32 to vector<8x16xf32>
      %421 = arith.mulf %420, %387 : vector<8x16xf32>
      %422 = arith.addf %406, %421 : vector<8x16xf32>
      %c15_i32_125 = arith.constant 15 : i32
      %423 = tpu.dynamic_rotate %387 by %c15_i32_125 dim 1 : vector<8x16xf32>, i32 -> vector<8x16xf32>
      %cst_126 = arith.constant 0.000000e+00 : f32
      %424 = vector.broadcast %cst_126 : f32 to vector<8x16xf32>
      %425 = arith.select %54, %423, %424 : vector<8x16xi1>, vector<8x16xf32>
      %c68 = arith.constant 68 : index
      %426 = memref.load %arg5[%c68] : memref<288xf32, #tpu.memory_space<smem>>
      %427 = vector.broadcast %426 : f32 to vector<8x16xf32>
      %428 = arith.mulf %427, %425 : vector<8x16xf32>
      %429 = arith.addf %410, %428 : vector<8x16xf32>
      %c69 = arith.constant 69 : index
      %430 = memref.load %arg5[%c69] : memref<288xf32, #tpu.memory_space<smem>>
      %431 = vector.broadcast %430 : f32 to vector<8x16xf32>
      %432 = arith.mulf %431, %425 : vector<8x16xf32>
      %433 = arith.addf %414, %432 : vector<8x16xf32>
      %c70 = arith.constant 70 : index
      %434 = memref.load %arg5[%c70] : memref<288xf32, #tpu.memory_space<smem>>
      %435 = vector.broadcast %434 : f32 to vector<8x16xf32>
      %436 = arith.mulf %435, %425 : vector<8x16xf32>
      %437 = arith.addf %418, %436 : vector<8x16xf32>
      %c71 = arith.constant 71 : index
      %438 = memref.load %arg5[%c71] : memref<288xf32, #tpu.memory_space<smem>>
      %439 = vector.broadcast %438 : f32 to vector<8x16xf32>
      %440 = arith.mulf %439, %425 : vector<8x16xf32>
      %441 = arith.addf %422, %440 : vector<8x16xf32>
      %c0_i32_127 = arith.constant 0 : i32
      %442 = arith.addi %89, %c0_i32_127 : i32
      %c2_128 = arith.constant 2 : index
      %443 = arith.index_cast %442 : i32 to index
      %c0_129 = arith.constant 0 : index
      %444 = vector.load %arg8[%c2_128, %443, %c0_129] : memref<8x18x16xf32, #tpu.memory_space<vmem>>, vector<1x8x16xf32>
      %445 = vector.shape_cast %444 : vector<1x8x16xf32> to vector<8x16xf32>
      %c1_i32_130 = arith.constant 1 : i32
      %446 = tpu.dynamic_rotate %445 by %c1_i32_130 dim 1 : vector<8x16xf32>, i32 -> vector<8x16xf32>
      %cst_131 = arith.constant 0.000000e+00 : f32
      %447 = vector.broadcast %cst_131 : f32 to vector<8x16xf32>
      %448 = arith.select %52, %446, %447 : vector<8x16xi1>, vector<8x16xf32>
      %c72 = arith.constant 72 : index
      %449 = memref.load %arg5[%c72] : memref<288xf32, #tpu.memory_space<smem>>
      %450 = vector.broadcast %449 : f32 to vector<8x16xf32>
      %451 = arith.mulf %450, %448 : vector<8x16xf32>
      %452 = arith.addf %429, %451 : vector<8x16xf32>
      %c73 = arith.constant 73 : index
      %453 = memref.load %arg5[%c73] : memref<288xf32, #tpu.memory_space<smem>>
      %454 = vector.broadcast %453 : f32 to vector<8x16xf32>
      %455 = arith.mulf %454, %448 : vector<8x16xf32>
      %456 = arith.addf %433, %455 : vector<8x16xf32>
      %c74 = arith.constant 74 : index
      %457 = memref.load %arg5[%c74] : memref<288xf32, #tpu.memory_space<smem>>
      %458 = vector.broadcast %457 : f32 to vector<8x16xf32>
      %459 = arith.mulf %458, %448 : vector<8x16xf32>
      %460 = arith.addf %437, %459 : vector<8x16xf32>
      %c75 = arith.constant 75 : index
      %461 = memref.load %arg5[%c75] : memref<288xf32, #tpu.memory_space<smem>>
      %462 = vector.broadcast %461 : f32 to vector<8x16xf32>
      %463 = arith.mulf %462, %448 : vector<8x16xf32>
      %464 = arith.addf %441, %463 : vector<8x16xf32>
      %c76 = arith.constant 76 : index
      %465 = memref.load %arg5[%c76] : memref<288xf32, #tpu.memory_space<smem>>
      %466 = vector.broadcast %465 : f32 to vector<8x16xf32>
      %467 = arith.mulf %466, %445 : vector<8x16xf32>
      %468 = arith.addf %452, %467 : vector<8x16xf32>
      %c77 = arith.constant 77 : index
      %469 = memref.load %arg5[%c77] : memref<288xf32, #tpu.memory_space<smem>>
      %470 = vector.broadcast %469 : f32 to vector<8x16xf32>
      %471 = arith.mulf %470, %445 : vector<8x16xf32>
      %472 = arith.addf %456, %471 : vector<8x16xf32>
      %c78 = arith.constant 78 : index
      %473 = memref.load %arg5[%c78] : memref<288xf32, #tpu.memory_space<smem>>
      %474 = vector.broadcast %473 : f32 to vector<8x16xf32>
      %475 = arith.mulf %474, %445 : vector<8x16xf32>
      %476 = arith.addf %460, %475 : vector<8x16xf32>
      %c79 = arith.constant 79 : index
      %477 = memref.load %arg5[%c79] : memref<288xf32, #tpu.memory_space<smem>>
      %478 = vector.broadcast %477 : f32 to vector<8x16xf32>
      %479 = arith.mulf %478, %445 : vector<8x16xf32>
      %480 = arith.addf %464, %479 : vector<8x16xf32>
      %c15_i32_132 = arith.constant 15 : i32
      %481 = tpu.dynamic_rotate %445 by %c15_i32_132 dim 1 : vector<8x16xf32>, i32 -> vector<8x16xf32>
      %cst_133 = arith.constant 0.000000e+00 : f32
      %482 = vector.broadcast %cst_133 : f32 to vector<8x16xf32>
      %483 = arith.select %54, %481, %482 : vector<8x16xi1>, vector<8x16xf32>
      %c80 = arith.constant 80 : index
      %484 = memref.load %arg5[%c80] : memref<288xf32, #tpu.memory_space<smem>>
      %485 = vector.broadcast %484 : f32 to vector<8x16xf32>
      %486 = arith.mulf %485, %483 : vector<8x16xf32>
      %487 = arith.addf %468, %486 : vector<8x16xf32>
      %c81 = arith.constant 81 : index
      %488 = memref.load %arg5[%c81] : memref<288xf32, #tpu.memory_space<smem>>
      %489 = vector.broadcast %488 : f32 to vector<8x16xf32>
      %490 = arith.mulf %489, %483 : vector<8x16xf32>
      %491 = arith.addf %472, %490 : vector<8x16xf32>
      %c82 = arith.constant 82 : index
      %492 = memref.load %arg5[%c82] : memref<288xf32, #tpu.memory_space<smem>>
      %493 = vector.broadcast %492 : f32 to vector<8x16xf32>
      %494 = arith.mulf %493, %483 : vector<8x16xf32>
      %495 = arith.addf %476, %494 : vector<8x16xf32>
      %c83 = arith.constant 83 : index
      %496 = memref.load %arg5[%c83] : memref<288xf32, #tpu.memory_space<smem>>
      %497 = vector.broadcast %496 : f32 to vector<8x16xf32>
      %498 = arith.mulf %497, %483 : vector<8x16xf32>
      %499 = arith.addf %480, %498 : vector<8x16xf32>
      %c1_i32_134 = arith.constant 1 : i32
      %500 = arith.addi %89, %c1_i32_134 : i32
      %c2_135 = arith.constant 2 : index
      %501 = arith.index_cast %500 : i32 to index
      %c0_136 = arith.constant 0 : index
      %502 = vector.load %arg8[%c2_135, %501, %c0_136] : memref<8x18x16xf32, #tpu.memory_space<vmem>>, vector<1x8x16xf32>
      %503 = vector.shape_cast %502 : vector<1x8x16xf32> to vector<8x16xf32>
      %c1_i32_137 = arith.constant 1 : i32
      %504 = tpu.dynamic_rotate %503 by %c1_i32_137 dim 1 : vector<8x16xf32>, i32 -> vector<8x16xf32>
      %cst_138 = arith.constant 0.000000e+00 : f32
      %505 = vector.broadcast %cst_138 : f32 to vector<8x16xf32>
      %506 = arith.select %52, %504, %505 : vector<8x16xi1>, vector<8x16xf32>
      %c84 = arith.constant 84 : index
      %507 = memref.load %arg5[%c84] : memref<288xf32, #tpu.memory_space<smem>>
      %508 = vector.broadcast %507 : f32 to vector<8x16xf32>
      %509 = arith.mulf %508, %506 : vector<8x16xf32>
      %510 = arith.addf %487, %509 : vector<8x16xf32>
      %c85 = arith.constant 85 : index
      %511 = memref.load %arg5[%c85] : memref<288xf32, #tpu.memory_space<smem>>
      %512 = vector.broadcast %511 : f32 to vector<8x16xf32>
      %513 = arith.mulf %512, %506 : vector<8x16xf32>
      %514 = arith.addf %491, %513 : vector<8x16xf32>
      %c86 = arith.constant 86 : index
      %515 = memref.load %arg5[%c86] : memref<288xf32, #tpu.memory_space<smem>>
      %516 = vector.broadcast %515 : f32 to vector<8x16xf32>
      %517 = arith.mulf %516, %506 : vector<8x16xf32>
      %518 = arith.addf %495, %517 : vector<8x16xf32>
      %c87 = arith.constant 87 : index
      %519 = memref.load %arg5[%c87] : memref<288xf32, #tpu.memory_space<smem>>
      %520 = vector.broadcast %519 : f32 to vector<8x16xf32>
      %521 = arith.mulf %520, %506 : vector<8x16xf32>
      %522 = arith.addf %499, %521 : vector<8x16xf32>
      %c88 = arith.constant 88 : index
      %523 = memref.load %arg5[%c88] : memref<288xf32, #tpu.memory_space<smem>>
      %524 = vector.broadcast %523 : f32 to vector<8x16xf32>
      %525 = arith.mulf %524, %503 : vector<8x16xf32>
      %526 = arith.addf %510, %525 : vector<8x16xf32>
      %c89 = arith.constant 89 : index
      %527 = memref.load %arg5[%c89] : memref<288xf32, #tpu.memory_space<smem>>
      %528 = vector.broadcast %527 : f32 to vector<8x16xf32>
      %529 = arith.mulf %528, %503 : vector<8x16xf32>
      %530 = arith.addf %514, %529 : vector<8x16xf32>
      %c90 = arith.constant 90 : index
      %531 = memref.load %arg5[%c90] : memref<288xf32, #tpu.memory_space<smem>>
      %532 = vector.broadcast %531 : f32 to vector<8x16xf32>
      %533 = arith.mulf %532, %503 : vector<8x16xf32>
      %534 = arith.addf %518, %533 : vector<8x16xf32>
      %c91 = arith.constant 91 : index
      %535 = memref.load %arg5[%c91] : memref<288xf32, #tpu.memory_space<smem>>
      %536 = vector.broadcast %535 : f32 to vector<8x16xf32>
      %537 = arith.mulf %536, %503 : vector<8x16xf32>
      %538 = arith.addf %522, %537 : vector<8x16xf32>
      %c15_i32_139 = arith.constant 15 : i32
      %539 = tpu.dynamic_rotate %503 by %c15_i32_139 dim 1 : vector<8x16xf32>, i32 -> vector<8x16xf32>
      %cst_140 = arith.constant 0.000000e+00 : f32
      %540 = vector.broadcast %cst_140 : f32 to vector<8x16xf32>
      %541 = arith.select %54, %539, %540 : vector<8x16xi1>, vector<8x16xf32>
      %c92 = arith.constant 92 : index
      %542 = memref.load %arg5[%c92] : memref<288xf32, #tpu.memory_space<smem>>
      %543 = vector.broadcast %542 : f32 to vector<8x16xf32>
      %544 = arith.mulf %543, %541 : vector<8x16xf32>
      %545 = arith.addf %526, %544 : vector<8x16xf32>
      %c93 = arith.constant 93 : index
      %546 = memref.load %arg5[%c93] : memref<288xf32, #tpu.memory_space<smem>>
      %547 = vector.broadcast %546 : f32 to vector<8x16xf32>
      %548 = arith.mulf %547, %541 : vector<8x16xf32>
      %549 = arith.addf %530, %548 : vector<8x16xf32>
      %c94 = arith.constant 94 : index
      %550 = memref.load %arg5[%c94] : memref<288xf32, #tpu.memory_space<smem>>
      %551 = vector.broadcast %550 : f32 to vector<8x16xf32>
      %552 = arith.mulf %551, %541 : vector<8x16xf32>
      %553 = arith.addf %534, %552 : vector<8x16xf32>
      %c95 = arith.constant 95 : index
      %554 = memref.load %arg5[%c95] : memref<288xf32, #tpu.memory_space<smem>>
      %555 = vector.broadcast %554 : f32 to vector<8x16xf32>
      %556 = arith.mulf %555, %541 : vector<8x16xf32>
      %557 = arith.addf %538, %556 : vector<8x16xf32>
      %c2_i32_141 = arith.constant 2 : i32
      %558 = arith.addi %89, %c2_i32_141 : i32
      %c2_142 = arith.constant 2 : index
      %559 = arith.index_cast %558 : i32 to index
      %c0_143 = arith.constant 0 : index
      %560 = vector.load %arg8[%c2_142, %559, %c0_143] : memref<8x18x16xf32, #tpu.memory_space<vmem>>, vector<1x8x16xf32>
      %561 = vector.shape_cast %560 : vector<1x8x16xf32> to vector<8x16xf32>
      %c1_i32_144 = arith.constant 1 : i32
      %562 = tpu.dynamic_rotate %561 by %c1_i32_144 dim 1 : vector<8x16xf32>, i32 -> vector<8x16xf32>
      %cst_145 = arith.constant 0.000000e+00 : f32
      %563 = vector.broadcast %cst_145 : f32 to vector<8x16xf32>
      %564 = arith.select %52, %562, %563 : vector<8x16xi1>, vector<8x16xf32>
      %c96 = arith.constant 96 : index
      %565 = memref.load %arg5[%c96] : memref<288xf32, #tpu.memory_space<smem>>
      %566 = vector.broadcast %565 : f32 to vector<8x16xf32>
      %567 = arith.mulf %566, %564 : vector<8x16xf32>
      %568 = arith.addf %545, %567 : vector<8x16xf32>
      %c97 = arith.constant 97 : index
      %569 = memref.load %arg5[%c97] : memref<288xf32, #tpu.memory_space<smem>>
      %570 = vector.broadcast %569 : f32 to vector<8x16xf32>
      %571 = arith.mulf %570, %564 : vector<8x16xf32>
      %572 = arith.addf %549, %571 : vector<8x16xf32>
      %c98 = arith.constant 98 : index
      %573 = memref.load %arg5[%c98] : memref<288xf32, #tpu.memory_space<smem>>
      %574 = vector.broadcast %573 : f32 to vector<8x16xf32>
      %575 = arith.mulf %574, %564 : vector<8x16xf32>
      %576 = arith.addf %553, %575 : vector<8x16xf32>
      %c99 = arith.constant 99 : index
      %577 = memref.load %arg5[%c99] : memref<288xf32, #tpu.memory_space<smem>>
      %578 = vector.broadcast %577 : f32 to vector<8x16xf32>
      %579 = arith.mulf %578, %564 : vector<8x16xf32>
      %580 = arith.addf %557, %579 : vector<8x16xf32>
      %c100 = arith.constant 100 : index
      %581 = memref.load %arg5[%c100] : memref<288xf32, #tpu.memory_space<smem>>
      %582 = vector.broadcast %581 : f32 to vector<8x16xf32>
      %583 = arith.mulf %582, %561 : vector<8x16xf32>
      %584 = arith.addf %568, %583 : vector<8x16xf32>
      %c101 = arith.constant 101 : index
      %585 = memref.load %arg5[%c101] : memref<288xf32, #tpu.memory_space<smem>>
      %586 = vector.broadcast %585 : f32 to vector<8x16xf32>
      %587 = arith.mulf %586, %561 : vector<8x16xf32>
      %588 = arith.addf %572, %587 : vector<8x16xf32>
      %c102 = arith.constant 102 : index
      %589 = memref.load %arg5[%c102] : memref<288xf32, #tpu.memory_space<smem>>
      %590 = vector.broadcast %589 : f32 to vector<8x16xf32>
      %591 = arith.mulf %590, %561 : vector<8x16xf32>
      %592 = arith.addf %576, %591 : vector<8x16xf32>
      %c103 = arith.constant 103 : index
      %593 = memref.load %arg5[%c103] : memref<288xf32, #tpu.memory_space<smem>>
      %594 = vector.broadcast %593 : f32 to vector<8x16xf32>
      %595 = arith.mulf %594, %561 : vector<8x16xf32>
      %596 = arith.addf %580, %595 : vector<8x16xf32>
      %c15_i32_146 = arith.constant 15 : i32
      %597 = tpu.dynamic_rotate %561 by %c15_i32_146 dim 1 : vector<8x16xf32>, i32 -> vector<8x16xf32>
      %cst_147 = arith.constant 0.000000e+00 : f32
      %598 = vector.broadcast %cst_147 : f32 to vector<8x16xf32>
      %599 = arith.select %54, %597, %598 : vector<8x16xi1>, vector<8x16xf32>
      %c104 = arith.constant 104 : index
      %600 = memref.load %arg5[%c104] : memref<288xf32, #tpu.memory_space<smem>>
      %601 = vector.broadcast %600 : f32 to vector<8x16xf32>
      %602 = arith.mulf %601, %599 : vector<8x16xf32>
      %603 = arith.addf %584, %602 : vector<8x16xf32>
      %c105 = arith.constant 105 : index
      %604 = memref.load %arg5[%c105] : memref<288xf32, #tpu.memory_space<smem>>
      %605 = vector.broadcast %604 : f32 to vector<8x16xf32>
      %606 = arith.mulf %605, %599 : vector<8x16xf32>
      %607 = arith.addf %588, %606 : vector<8x16xf32>
      %c106 = arith.constant 106 : index
      %608 = memref.load %arg5[%c106] : memref<288xf32, #tpu.memory_space<smem>>
      %609 = vector.broadcast %608 : f32 to vector<8x16xf32>
      %610 = arith.mulf %609, %599 : vector<8x16xf32>
      %611 = arith.addf %592, %610 : vector<8x16xf32>
      %c107 = arith.constant 107 : index
      %612 = memref.load %arg5[%c107] : memref<288xf32, #tpu.memory_space<smem>>
      %613 = vector.broadcast %612 : f32 to vector<8x16xf32>
      %614 = arith.mulf %613, %599 : vector<8x16xf32>
      %615 = arith.addf %596, %614 : vector<8x16xf32>
      %c0_i32_148 = arith.constant 0 : i32
      %616 = arith.addi %89, %c0_i32_148 : i32
      %c3_149 = arith.constant 3 : index
      %617 = arith.index_cast %616 : i32 to index
      %c0_150 = arith.constant 0 : index
      %618 = vector.load %arg8[%c3_149, %617, %c0_150] : memref<8x18x16xf32, #tpu.memory_space<vmem>>, vector<1x8x16xf32>
      %619 = vector.shape_cast %618 : vector<1x8x16xf32> to vector<8x16xf32>
      %c1_i32_151 = arith.constant 1 : i32
      %620 = tpu.dynamic_rotate %619 by %c1_i32_151 dim 1 : vector<8x16xf32>, i32 -> vector<8x16xf32>
      %cst_152 = arith.constant 0.000000e+00 : f32
      %621 = vector.broadcast %cst_152 : f32 to vector<8x16xf32>
      %622 = arith.select %52, %620, %621 : vector<8x16xi1>, vector<8x16xf32>
      %c108 = arith.constant 108 : index
      %623 = memref.load %arg5[%c108] : memref<288xf32, #tpu.memory_space<smem>>
      %624 = vector.broadcast %623 : f32 to vector<8x16xf32>
      %625 = arith.mulf %624, %622 : vector<8x16xf32>
      %626 = arith.addf %603, %625 : vector<8x16xf32>
      %c109 = arith.constant 109 : index
      %627 = memref.load %arg5[%c109] : memref<288xf32, #tpu.memory_space<smem>>
      %628 = vector.broadcast %627 : f32 to vector<8x16xf32>
      %629 = arith.mulf %628, %622 : vector<8x16xf32>
      %630 = arith.addf %607, %629 : vector<8x16xf32>
      %c110 = arith.constant 110 : index
      %631 = memref.load %arg5[%c110] : memref<288xf32, #tpu.memory_space<smem>>
      %632 = vector.broadcast %631 : f32 to vector<8x16xf32>
      %633 = arith.mulf %632, %622 : vector<8x16xf32>
      %634 = arith.addf %611, %633 : vector<8x16xf32>
      %c111 = arith.constant 111 : index
      %635 = memref.load %arg5[%c111] : memref<288xf32, #tpu.memory_space<smem>>
      %636 = vector.broadcast %635 : f32 to vector<8x16xf32>
      %637 = arith.mulf %636, %622 : vector<8x16xf32>
      %638 = arith.addf %615, %637 : vector<8x16xf32>
      %c112 = arith.constant 112 : index
      %639 = memref.load %arg5[%c112] : memref<288xf32, #tpu.memory_space<smem>>
      %640 = vector.broadcast %639 : f32 to vector<8x16xf32>
      %641 = arith.mulf %640, %619 : vector<8x16xf32>
      %642 = arith.addf %626, %641 : vector<8x16xf32>
      %c113 = arith.constant 113 : index
      %643 = memref.load %arg5[%c113] : memref<288xf32, #tpu.memory_space<smem>>
      %644 = vector.broadcast %643 : f32 to vector<8x16xf32>
      %645 = arith.mulf %644, %619 : vector<8x16xf32>
      %646 = arith.addf %630, %645 : vector<8x16xf32>
      %c114 = arith.constant 114 : index
      %647 = memref.load %arg5[%c114] : memref<288xf32, #tpu.memory_space<smem>>
      %648 = vector.broadcast %647 : f32 to vector<8x16xf32>
      %649 = arith.mulf %648, %619 : vector<8x16xf32>
      %650 = arith.addf %634, %649 : vector<8x16xf32>
      %c115 = arith.constant 115 : index
      %651 = memref.load %arg5[%c115] : memref<288xf32, #tpu.memory_space<smem>>
      %652 = vector.broadcast %651 : f32 to vector<8x16xf32>
      %653 = arith.mulf %652, %619 : vector<8x16xf32>
      %654 = arith.addf %638, %653 : vector<8x16xf32>
      %c15_i32_153 = arith.constant 15 : i32
      %655 = tpu.dynamic_rotate %619 by %c15_i32_153 dim 1 : vector<8x16xf32>, i32 -> vector<8x16xf32>
      %cst_154 = arith.constant 0.000000e+00 : f32
      %656 = vector.broadcast %cst_154 : f32 to vector<8x16xf32>
      %657 = arith.select %54, %655, %656 : vector<8x16xi1>, vector<8x16xf32>
      %c116 = arith.constant 116 : index
      %658 = memref.load %arg5[%c116] : memref<288xf32, #tpu.memory_space<smem>>
      %659 = vector.broadcast %658 : f32 to vector<8x16xf32>
      %660 = arith.mulf %659, %657 : vector<8x16xf32>
      %661 = arith.addf %642, %660 : vector<8x16xf32>
      %c117 = arith.constant 117 : index
      %662 = memref.load %arg5[%c117] : memref<288xf32, #tpu.memory_space<smem>>
      %663 = vector.broadcast %662 : f32 to vector<8x16xf32>
      %664 = arith.mulf %663, %657 : vector<8x16xf32>
      %665 = arith.addf %646, %664 : vector<8x16xf32>
      %c118 = arith.constant 118 : index
      %666 = memref.load %arg5[%c118] : memref<288xf32, #tpu.memory_space<smem>>
      %667 = vector.broadcast %666 : f32 to vector<8x16xf32>
      %668 = arith.mulf %667, %657 : vector<8x16xf32>
      %669 = arith.addf %650, %668 : vector<8x16xf32>
      %c119 = arith.constant 119 : index
      %670 = memref.load %arg5[%c119] : memref<288xf32, #tpu.memory_space<smem>>
      %671 = vector.broadcast %670 : f32 to vector<8x16xf32>
      %672 = arith.mulf %671, %657 : vector<8x16xf32>
      %673 = arith.addf %654, %672 : vector<8x16xf32>
      %c1_i32_155 = arith.constant 1 : i32
      %674 = arith.addi %89, %c1_i32_155 : i32
      %c3_156 = arith.constant 3 : index
      %675 = arith.index_cast %674 : i32 to index
      %c0_157 = arith.constant 0 : index
      %676 = vector.load %arg8[%c3_156, %675, %c0_157] : memref<8x18x16xf32, #tpu.memory_space<vmem>>, vector<1x8x16xf32>
      %677 = vector.shape_cast %676 : vector<1x8x16xf32> to vector<8x16xf32>
      %c1_i32_158 = arith.constant 1 : i32
      %678 = tpu.dynamic_rotate %677 by %c1_i32_158 dim 1 : vector<8x16xf32>, i32 -> vector<8x16xf32>
      %cst_159 = arith.constant 0.000000e+00 : f32
      %679 = vector.broadcast %cst_159 : f32 to vector<8x16xf32>
      %680 = arith.select %52, %678, %679 : vector<8x16xi1>, vector<8x16xf32>
      %c120 = arith.constant 120 : index
      %681 = memref.load %arg5[%c120] : memref<288xf32, #tpu.memory_space<smem>>
      %682 = vector.broadcast %681 : f32 to vector<8x16xf32>
      %683 = arith.mulf %682, %680 : vector<8x16xf32>
      %684 = arith.addf %661, %683 : vector<8x16xf32>
      %c121 = arith.constant 121 : index
      %685 = memref.load %arg5[%c121] : memref<288xf32, #tpu.memory_space<smem>>
      %686 = vector.broadcast %685 : f32 to vector<8x16xf32>
      %687 = arith.mulf %686, %680 : vector<8x16xf32>
      %688 = arith.addf %665, %687 : vector<8x16xf32>
      %c122 = arith.constant 122 : index
      %689 = memref.load %arg5[%c122] : memref<288xf32, #tpu.memory_space<smem>>
      %690 = vector.broadcast %689 : f32 to vector<8x16xf32>
      %691 = arith.mulf %690, %680 : vector<8x16xf32>
      %692 = arith.addf %669, %691 : vector<8x16xf32>
      %c123 = arith.constant 123 : index
      %693 = memref.load %arg5[%c123] : memref<288xf32, #tpu.memory_space<smem>>
      %694 = vector.broadcast %693 : f32 to vector<8x16xf32>
      %695 = arith.mulf %694, %680 : vector<8x16xf32>
      %696 = arith.addf %673, %695 : vector<8x16xf32>
      %c124 = arith.constant 124 : index
      %697 = memref.load %arg5[%c124] : memref<288xf32, #tpu.memory_space<smem>>
      %698 = vector.broadcast %697 : f32 to vector<8x16xf32>
      %699 = arith.mulf %698, %677 : vector<8x16xf32>
      %700 = arith.addf %684, %699 : vector<8x16xf32>
      %c125 = arith.constant 125 : index
      %701 = memref.load %arg5[%c125] : memref<288xf32, #tpu.memory_space<smem>>
      %702 = vector.broadcast %701 : f32 to vector<8x16xf32>
      %703 = arith.mulf %702, %677 : vector<8x16xf32>
      %704 = arith.addf %688, %703 : vector<8x16xf32>
      %c126 = arith.constant 126 : index
      %705 = memref.load %arg5[%c126] : memref<288xf32, #tpu.memory_space<smem>>
      %706 = vector.broadcast %705 : f32 to vector<8x16xf32>
      %707 = arith.mulf %706, %677 : vector<8x16xf32>
      %708 = arith.addf %692, %707 : vector<8x16xf32>
      %c127 = arith.constant 127 : index
      %709 = memref.load %arg5[%c127] : memref<288xf32, #tpu.memory_space<smem>>
      %710 = vector.broadcast %709 : f32 to vector<8x16xf32>
      %711 = arith.mulf %710, %677 : vector<8x16xf32>
      %712 = arith.addf %696, %711 : vector<8x16xf32>
      %c15_i32_160 = arith.constant 15 : i32
      %713 = tpu.dynamic_rotate %677 by %c15_i32_160 dim 1 : vector<8x16xf32>, i32 -> vector<8x16xf32>
      %cst_161 = arith.constant 0.000000e+00 : f32
      %714 = vector.broadcast %cst_161 : f32 to vector<8x16xf32>
      %715 = arith.select %54, %713, %714 : vector<8x16xi1>, vector<8x16xf32>
      %c128 = arith.constant 128 : index
      %716 = memref.load %arg5[%c128] : memref<288xf32, #tpu.memory_space<smem>>
      %717 = vector.broadcast %716 : f32 to vector<8x16xf32>
      %718 = arith.mulf %717, %715 : vector<8x16xf32>
      %719 = arith.addf %700, %718 : vector<8x16xf32>
      %c129 = arith.constant 129 : index
      %720 = memref.load %arg5[%c129] : memref<288xf32, #tpu.memory_space<smem>>
      %721 = vector.broadcast %720 : f32 to vector<8x16xf32>
      %722 = arith.mulf %721, %715 : vector<8x16xf32>
      %723 = arith.addf %704, %722 : vector<8x16xf32>
      %c130 = arith.constant 130 : index
      %724 = memref.load %arg5[%c130] : memref<288xf32, #tpu.memory_space<smem>>
      %725 = vector.broadcast %724 : f32 to vector<8x16xf32>
      %726 = arith.mulf %725, %715 : vector<8x16xf32>
      %727 = arith.addf %708, %726 : vector<8x16xf32>
      %c131 = arith.constant 131 : index
      %728 = memref.load %arg5[%c131] : memref<288xf32, #tpu.memory_space<smem>>
      %729 = vector.broadcast %728 : f32 to vector<8x16xf32>
      %730 = arith.mulf %729, %715 : vector<8x16xf32>
      %731 = arith.addf %712, %730 : vector<8x16xf32>
      %c2_i32_162 = arith.constant 2 : i32
      %732 = arith.addi %89, %c2_i32_162 : i32
      %c3_163 = arith.constant 3 : index
      %733 = arith.index_cast %732 : i32 to index
      %c0_164 = arith.constant 0 : index
      %734 = vector.load %arg8[%c3_163, %733, %c0_164] : memref<8x18x16xf32, #tpu.memory_space<vmem>>, vector<1x8x16xf32>
      %735 = vector.shape_cast %734 : vector<1x8x16xf32> to vector<8x16xf32>
      %c1_i32_165 = arith.constant 1 : i32
      %736 = tpu.dynamic_rotate %735 by %c1_i32_165 dim 1 : vector<8x16xf32>, i32 -> vector<8x16xf32>
      %cst_166 = arith.constant 0.000000e+00 : f32
      %737 = vector.broadcast %cst_166 : f32 to vector<8x16xf32>
      %738 = arith.select %52, %736, %737 : vector<8x16xi1>, vector<8x16xf32>
      %c132 = arith.constant 132 : index
      %739 = memref.load %arg5[%c132] : memref<288xf32, #tpu.memory_space<smem>>
      %740 = vector.broadcast %739 : f32 to vector<8x16xf32>
      %741 = arith.mulf %740, %738 : vector<8x16xf32>
      %742 = arith.addf %719, %741 : vector<8x16xf32>
      %c133 = arith.constant 133 : index
      %743 = memref.load %arg5[%c133] : memref<288xf32, #tpu.memory_space<smem>>
      %744 = vector.broadcast %743 : f32 to vector<8x16xf32>
      %745 = arith.mulf %744, %738 : vector<8x16xf32>
      %746 = arith.addf %723, %745 : vector<8x16xf32>
      %c134 = arith.constant 134 : index
      %747 = memref.load %arg5[%c134] : memref<288xf32, #tpu.memory_space<smem>>
      %748 = vector.broadcast %747 : f32 to vector<8x16xf32>
      %749 = arith.mulf %748, %738 : vector<8x16xf32>
      %750 = arith.addf %727, %749 : vector<8x16xf32>
      %c135 = arith.constant 135 : index
      %751 = memref.load %arg5[%c135] : memref<288xf32, #tpu.memory_space<smem>>
      %752 = vector.broadcast %751 : f32 to vector<8x16xf32>
      %753 = arith.mulf %752, %738 : vector<8x16xf32>
      %754 = arith.addf %731, %753 : vector<8x16xf32>
      %c136 = arith.constant 136 : index
      %755 = memref.load %arg5[%c136] : memref<288xf32, #tpu.memory_space<smem>>
      %756 = vector.broadcast %755 : f32 to vector<8x16xf32>
      %757 = arith.mulf %756, %735 : vector<8x16xf32>
      %758 = arith.addf %742, %757 : vector<8x16xf32>
      %c137 = arith.constant 137 : index
      %759 = memref.load %arg5[%c137] : memref<288xf32, #tpu.memory_space<smem>>
      %760 = vector.broadcast %759 : f32 to vector<8x16xf32>
      %761 = arith.mulf %760, %735 : vector<8x16xf32>
      %762 = arith.addf %746, %761 : vector<8x16xf32>
      %c138 = arith.constant 138 : index
      %763 = memref.load %arg5[%c138] : memref<288xf32, #tpu.memory_space<smem>>
      %764 = vector.broadcast %763 : f32 to vector<8x16xf32>
      %765 = arith.mulf %764, %735 : vector<8x16xf32>
      %766 = arith.addf %750, %765 : vector<8x16xf32>
      %c139 = arith.constant 139 : index
      %767 = memref.load %arg5[%c139] : memref<288xf32, #tpu.memory_space<smem>>
      %768 = vector.broadcast %767 : f32 to vector<8x16xf32>
      %769 = arith.mulf %768, %735 : vector<8x16xf32>
      %770 = arith.addf %754, %769 : vector<8x16xf32>
      %c15_i32_167 = arith.constant 15 : i32
      %771 = tpu.dynamic_rotate %735 by %c15_i32_167 dim 1 : vector<8x16xf32>, i32 -> vector<8x16xf32>
      %cst_168 = arith.constant 0.000000e+00 : f32
      %772 = vector.broadcast %cst_168 : f32 to vector<8x16xf32>
      %773 = arith.select %54, %771, %772 : vector<8x16xi1>, vector<8x16xf32>
      %c140 = arith.constant 140 : index
      %774 = memref.load %arg5[%c140] : memref<288xf32, #tpu.memory_space<smem>>
      %775 = vector.broadcast %774 : f32 to vector<8x16xf32>
      %776 = arith.mulf %775, %773 : vector<8x16xf32>
      %777 = arith.addf %758, %776 : vector<8x16xf32>
      %c141 = arith.constant 141 : index
      %778 = memref.load %arg5[%c141] : memref<288xf32, #tpu.memory_space<smem>>
      %779 = vector.broadcast %778 : f32 to vector<8x16xf32>
      %780 = arith.mulf %779, %773 : vector<8x16xf32>
      %781 = arith.addf %762, %780 : vector<8x16xf32>
      %c142 = arith.constant 142 : index
      %782 = memref.load %arg5[%c142] : memref<288xf32, #tpu.memory_space<smem>>
      %783 = vector.broadcast %782 : f32 to vector<8x16xf32>
      %784 = arith.mulf %783, %773 : vector<8x16xf32>
      %785 = arith.addf %766, %784 : vector<8x16xf32>
      %c143 = arith.constant 143 : index
      %786 = memref.load %arg5[%c143] : memref<288xf32, #tpu.memory_space<smem>>
      %787 = vector.broadcast %786 : f32 to vector<8x16xf32>
      %788 = arith.mulf %787, %773 : vector<8x16xf32>
      %789 = arith.addf %770, %788 : vector<8x16xf32>
      %c0_i32_169 = arith.constant 0 : i32
      %790 = arith.addi %89, %c0_i32_169 : i32
      %c4_170 = arith.constant 4 : index
      %791 = arith.index_cast %790 : i32 to index
      %c0_171 = arith.constant 0 : index
      %792 = vector.load %arg8[%c4_170, %791, %c0_171] : memref<8x18x16xf32, #tpu.memory_space<vmem>>, vector<1x8x16xf32>
      %793 = vector.shape_cast %792 : vector<1x8x16xf32> to vector<8x16xf32>
      %c1_i32_172 = arith.constant 1 : i32
      %794 = tpu.dynamic_rotate %793 by %c1_i32_172 dim 1 : vector<8x16xf32>, i32 -> vector<8x16xf32>
      %cst_173 = arith.constant 0.000000e+00 : f32
      %795 = vector.broadcast %cst_173 : f32 to vector<8x16xf32>
      %796 = arith.select %52, %794, %795 : vector<8x16xi1>, vector<8x16xf32>
      %c144 = arith.constant 144 : index
      %797 = memref.load %arg5[%c144] : memref<288xf32, #tpu.memory_space<smem>>
      %798 = vector.broadcast %797 : f32 to vector<8x16xf32>
      %799 = arith.mulf %798, %796 : vector<8x16xf32>
      %800 = arith.addf %777, %799 : vector<8x16xf32>
      %c145 = arith.constant 145 : index
      %801 = memref.load %arg5[%c145] : memref<288xf32, #tpu.memory_space<smem>>
      %802 = vector.broadcast %801 : f32 to vector<8x16xf32>
      %803 = arith.mulf %802, %796 : vector<8x16xf32>
      %804 = arith.addf %781, %803 : vector<8x16xf32>
      %c146 = arith.constant 146 : index
      %805 = memref.load %arg5[%c146] : memref<288xf32, #tpu.memory_space<smem>>
      %806 = vector.broadcast %805 : f32 to vector<8x16xf32>
      %807 = arith.mulf %806, %796 : vector<8x16xf32>
      %808 = arith.addf %785, %807 : vector<8x16xf32>
      %c147 = arith.constant 147 : index
      %809 = memref.load %arg5[%c147] : memref<288xf32, #tpu.memory_space<smem>>
      %810 = vector.broadcast %809 : f32 to vector<8x16xf32>
      %811 = arith.mulf %810, %796 : vector<8x16xf32>
      %812 = arith.addf %789, %811 : vector<8x16xf32>
      %c148 = arith.constant 148 : index
      %813 = memref.load %arg5[%c148] : memref<288xf32, #tpu.memory_space<smem>>
      %814 = vector.broadcast %813 : f32 to vector<8x16xf32>
      %815 = arith.mulf %814, %793 : vector<8x16xf32>
      %816 = arith.addf %800, %815 : vector<8x16xf32>
      %c149 = arith.constant 149 : index
      %817 = memref.load %arg5[%c149] : memref<288xf32, #tpu.memory_space<smem>>
      %818 = vector.broadcast %817 : f32 to vector<8x16xf32>
      %819 = arith.mulf %818, %793 : vector<8x16xf32>
      %820 = arith.addf %804, %819 : vector<8x16xf32>
      %c150 = arith.constant 150 : index
      %821 = memref.load %arg5[%c150] : memref<288xf32, #tpu.memory_space<smem>>
      %822 = vector.broadcast %821 : f32 to vector<8x16xf32>
      %823 = arith.mulf %822, %793 : vector<8x16xf32>
      %824 = arith.addf %808, %823 : vector<8x16xf32>
      %c151 = arith.constant 151 : index
      %825 = memref.load %arg5[%c151] : memref<288xf32, #tpu.memory_space<smem>>
      %826 = vector.broadcast %825 : f32 to vector<8x16xf32>
      %827 = arith.mulf %826, %793 : vector<8x16xf32>
      %828 = arith.addf %812, %827 : vector<8x16xf32>
      %c15_i32_174 = arith.constant 15 : i32
      %829 = tpu.dynamic_rotate %793 by %c15_i32_174 dim 1 : vector<8x16xf32>, i32 -> vector<8x16xf32>
      %cst_175 = arith.constant 0.000000e+00 : f32
      %830 = vector.broadcast %cst_175 : f32 to vector<8x16xf32>
      %831 = arith.select %54, %829, %830 : vector<8x16xi1>, vector<8x16xf32>
      %c152 = arith.constant 152 : index
      %832 = memref.load %arg5[%c152] : memref<288xf32, #tpu.memory_space<smem>>
      %833 = vector.broadcast %832 : f32 to vector<8x16xf32>
      %834 = arith.mulf %833, %831 : vector<8x16xf32>
      %835 = arith.addf %816, %834 : vector<8x16xf32>
      %c153 = arith.constant 153 : index
      %836 = memref.load %arg5[%c153] : memref<288xf32, #tpu.memory_space<smem>>
      %837 = vector.broadcast %836 : f32 to vector<8x16xf32>
      %838 = arith.mulf %837, %831 : vector<8x16xf32>
      %839 = arith.addf %820, %838 : vector<8x16xf32>
      %c154 = arith.constant 154 : index
      %840 = memref.load %arg5[%c154] : memref<288xf32, #tpu.memory_space<smem>>
      %841 = vector.broadcast %840 : f32 to vector<8x16xf32>
      %842 = arith.mulf %841, %831 : vector<8x16xf32>
      %843 = arith.addf %824, %842 : vector<8x16xf32>
      %c155 = arith.constant 155 : index
      %844 = memref.load %arg5[%c155] : memref<288xf32, #tpu.memory_space<smem>>
      %845 = vector.broadcast %844 : f32 to vector<8x16xf32>
      %846 = arith.mulf %845, %831 : vector<8x16xf32>
      %847 = arith.addf %828, %846 : vector<8x16xf32>
      %c1_i32_176 = arith.constant 1 : i32
      %848 = arith.addi %89, %c1_i32_176 : i32
      %c4_177 = arith.constant 4 : index
      %849 = arith.index_cast %848 : i32 to index
      %c0_178 = arith.constant 0 : index
      %850 = vector.load %arg8[%c4_177, %849, %c0_178] : memref<8x18x16xf32, #tpu.memory_space<vmem>>, vector<1x8x16xf32>
      %851 = vector.shape_cast %850 : vector<1x8x16xf32> to vector<8x16xf32>
      %c1_i32_179 = arith.constant 1 : i32
      %852 = tpu.dynamic_rotate %851 by %c1_i32_179 dim 1 : vector<8x16xf32>, i32 -> vector<8x16xf32>
      %cst_180 = arith.constant 0.000000e+00 : f32
      %853 = vector.broadcast %cst_180 : f32 to vector<8x16xf32>
      %854 = arith.select %52, %852, %853 : vector<8x16xi1>, vector<8x16xf32>
      %c156 = arith.constant 156 : index
      %855 = memref.load %arg5[%c156] : memref<288xf32, #tpu.memory_space<smem>>
      %856 = vector.broadcast %855 : f32 to vector<8x16xf32>
      %857 = arith.mulf %856, %854 : vector<8x16xf32>
      %858 = arith.addf %835, %857 : vector<8x16xf32>
      %c157 = arith.constant 157 : index
      %859 = memref.load %arg5[%c157] : memref<288xf32, #tpu.memory_space<smem>>
      %860 = vector.broadcast %859 : f32 to vector<8x16xf32>
      %861 = arith.mulf %860, %854 : vector<8x16xf32>
      %862 = arith.addf %839, %861 : vector<8x16xf32>
      %c158 = arith.constant 158 : index
      %863 = memref.load %arg5[%c158] : memref<288xf32, #tpu.memory_space<smem>>
      %864 = vector.broadcast %863 : f32 to vector<8x16xf32>
      %865 = arith.mulf %864, %854 : vector<8x16xf32>
      %866 = arith.addf %843, %865 : vector<8x16xf32>
      %c159 = arith.constant 159 : index
      %867 = memref.load %arg5[%c159] : memref<288xf32, #tpu.memory_space<smem>>
      %868 = vector.broadcast %867 : f32 to vector<8x16xf32>
      %869 = arith.mulf %868, %854 : vector<8x16xf32>
      %870 = arith.addf %847, %869 : vector<8x16xf32>
      %c160 = arith.constant 160 : index
      %871 = memref.load %arg5[%c160] : memref<288xf32, #tpu.memory_space<smem>>
      %872 = vector.broadcast %871 : f32 to vector<8x16xf32>
      %873 = arith.mulf %872, %851 : vector<8x16xf32>
      %874 = arith.addf %858, %873 : vector<8x16xf32>
      %c161 = arith.constant 161 : index
      %875 = memref.load %arg5[%c161] : memref<288xf32, #tpu.memory_space<smem>>
      %876 = vector.broadcast %875 : f32 to vector<8x16xf32>
      %877 = arith.mulf %876, %851 : vector<8x16xf32>
      %878 = arith.addf %862, %877 : vector<8x16xf32>
      %c162 = arith.constant 162 : index
      %879 = memref.load %arg5[%c162] : memref<288xf32, #tpu.memory_space<smem>>
      %880 = vector.broadcast %879 : f32 to vector<8x16xf32>
      %881 = arith.mulf %880, %851 : vector<8x16xf32>
      %882 = arith.addf %866, %881 : vector<8x16xf32>
      %c163 = arith.constant 163 : index
      %883 = memref.load %arg5[%c163] : memref<288xf32, #tpu.memory_space<smem>>
      %884 = vector.broadcast %883 : f32 to vector<8x16xf32>
      %885 = arith.mulf %884, %851 : vector<8x16xf32>
      %886 = arith.addf %870, %885 : vector<8x16xf32>
      %c15_i32_181 = arith.constant 15 : i32
      %887 = tpu.dynamic_rotate %851 by %c15_i32_181 dim 1 : vector<8x16xf32>, i32 -> vector<8x16xf32>
      %cst_182 = arith.constant 0.000000e+00 : f32
      %888 = vector.broadcast %cst_182 : f32 to vector<8x16xf32>
      %889 = arith.select %54, %887, %888 : vector<8x16xi1>, vector<8x16xf32>
      %c164 = arith.constant 164 : index
      %890 = memref.load %arg5[%c164] : memref<288xf32, #tpu.memory_space<smem>>
      %891 = vector.broadcast %890 : f32 to vector<8x16xf32>
      %892 = arith.mulf %891, %889 : vector<8x16xf32>
      %893 = arith.addf %874, %892 : vector<8x16xf32>
      %c165 = arith.constant 165 : index
      %894 = memref.load %arg5[%c165] : memref<288xf32, #tpu.memory_space<smem>>
      %895 = vector.broadcast %894 : f32 to vector<8x16xf32>
      %896 = arith.mulf %895, %889 : vector<8x16xf32>
      %897 = arith.addf %878, %896 : vector<8x16xf32>
      %c166 = arith.constant 166 : index
      %898 = memref.load %arg5[%c166] : memref<288xf32, #tpu.memory_space<smem>>
      %899 = vector.broadcast %898 : f32 to vector<8x16xf32>
      %900 = arith.mulf %899, %889 : vector<8x16xf32>
      %901 = arith.addf %882, %900 : vector<8x16xf32>
      %c167 = arith.constant 167 : index
      %902 = memref.load %arg5[%c167] : memref<288xf32, #tpu.memory_space<smem>>
      %903 = vector.broadcast %902 : f32 to vector<8x16xf32>
      %904 = arith.mulf %903, %889 : vector<8x16xf32>
      %905 = arith.addf %886, %904 : vector<8x16xf32>
      %c2_i32_183 = arith.constant 2 : i32
      %906 = arith.addi %89, %c2_i32_183 : i32
      %c4_184 = arith.constant 4 : index
      %907 = arith.index_cast %906 : i32 to index
      %c0_185 = arith.constant 0 : index
      %908 = vector.load %arg8[%c4_184, %907, %c0_185] : memref<8x18x16xf32, #tpu.memory_space<vmem>>, vector<1x8x16xf32>
      %909 = vector.shape_cast %908 : vector<1x8x16xf32> to vector<8x16xf32>
      %c1_i32_186 = arith.constant 1 : i32
      %910 = tpu.dynamic_rotate %909 by %c1_i32_186 dim 1 : vector<8x16xf32>, i32 -> vector<8x16xf32>
      %cst_187 = arith.constant 0.000000e+00 : f32
      %911 = vector.broadcast %cst_187 : f32 to vector<8x16xf32>
      %912 = arith.select %52, %910, %911 : vector<8x16xi1>, vector<8x16xf32>
      %c168 = arith.constant 168 : index
      %913 = memref.load %arg5[%c168] : memref<288xf32, #tpu.memory_space<smem>>
      %914 = vector.broadcast %913 : f32 to vector<8x16xf32>
      %915 = arith.mulf %914, %912 : vector<8x16xf32>
      %916 = arith.addf %893, %915 : vector<8x16xf32>
      %c169 = arith.constant 169 : index
      %917 = memref.load %arg5[%c169] : memref<288xf32, #tpu.memory_space<smem>>
      %918 = vector.broadcast %917 : f32 to vector<8x16xf32>
      %919 = arith.mulf %918, %912 : vector<8x16xf32>
      %920 = arith.addf %897, %919 : vector<8x16xf32>
      %c170 = arith.constant 170 : index
      %921 = memref.load %arg5[%c170] : memref<288xf32, #tpu.memory_space<smem>>
      %922 = vector.broadcast %921 : f32 to vector<8x16xf32>
      %923 = arith.mulf %922, %912 : vector<8x16xf32>
      %924 = arith.addf %901, %923 : vector<8x16xf32>
      %c171 = arith.constant 171 : index
      %925 = memref.load %arg5[%c171] : memref<288xf32, #tpu.memory_space<smem>>
      %926 = vector.broadcast %925 : f32 to vector<8x16xf32>
      %927 = arith.mulf %926, %912 : vector<8x16xf32>
      %928 = arith.addf %905, %927 : vector<8x16xf32>
      %c172 = arith.constant 172 : index
      %929 = memref.load %arg5[%c172] : memref<288xf32, #tpu.memory_space<smem>>
      %930 = vector.broadcast %929 : f32 to vector<8x16xf32>
      %931 = arith.mulf %930, %909 : vector<8x16xf32>
      %932 = arith.addf %916, %931 : vector<8x16xf32>
      %c173 = arith.constant 173 : index
      %933 = memref.load %arg5[%c173] : memref<288xf32, #tpu.memory_space<smem>>
      %934 = vector.broadcast %933 : f32 to vector<8x16xf32>
      %935 = arith.mulf %934, %909 : vector<8x16xf32>
      %936 = arith.addf %920, %935 : vector<8x16xf32>
      %c174 = arith.constant 174 : index
      %937 = memref.load %arg5[%c174] : memref<288xf32, #tpu.memory_space<smem>>
      %938 = vector.broadcast %937 : f32 to vector<8x16xf32>
      %939 = arith.mulf %938, %909 : vector<8x16xf32>
      %940 = arith.addf %924, %939 : vector<8x16xf32>
      %c175 = arith.constant 175 : index
      %941 = memref.load %arg5[%c175] : memref<288xf32, #tpu.memory_space<smem>>
      %942 = vector.broadcast %941 : f32 to vector<8x16xf32>
      %943 = arith.mulf %942, %909 : vector<8x16xf32>
      %944 = arith.addf %928, %943 : vector<8x16xf32>
      %c15_i32_188 = arith.constant 15 : i32
      %945 = tpu.dynamic_rotate %909 by %c15_i32_188 dim 1 : vector<8x16xf32>, i32 -> vector<8x16xf32>
      %cst_189 = arith.constant 0.000000e+00 : f32
      %946 = vector.broadcast %cst_189 : f32 to vector<8x16xf32>
      %947 = arith.select %54, %945, %946 : vector<8x16xi1>, vector<8x16xf32>
      %c176 = arith.constant 176 : index
      %948 = memref.load %arg5[%c176] : memref<288xf32, #tpu.memory_space<smem>>
      %949 = vector.broadcast %948 : f32 to vector<8x16xf32>
      %950 = arith.mulf %949, %947 : vector<8x16xf32>
      %951 = arith.addf %932, %950 : vector<8x16xf32>
      %c177 = arith.constant 177 : index
      %952 = memref.load %arg5[%c177] : memref<288xf32, #tpu.memory_space<smem>>
      %953 = vector.broadcast %952 : f32 to vector<8x16xf32>
      %954 = arith.mulf %953, %947 : vector<8x16xf32>
      %955 = arith.addf %936, %954 : vector<8x16xf32>
      %c178 = arith.constant 178 : index
      %956 = memref.load %arg5[%c178] : memref<288xf32, #tpu.memory_space<smem>>
      %957 = vector.broadcast %956 : f32 to vector<8x16xf32>
      %958 = arith.mulf %957, %947 : vector<8x16xf32>
      %959 = arith.addf %940, %958 : vector<8x16xf32>
      %c179 = arith.constant 179 : index
      %960 = memref.load %arg5[%c179] : memref<288xf32, #tpu.memory_space<smem>>
      %961 = vector.broadcast %960 : f32 to vector<8x16xf32>
      %962 = arith.mulf %961, %947 : vector<8x16xf32>
      %963 = arith.addf %944, %962 : vector<8x16xf32>
      %c0_i32_190 = arith.constant 0 : i32
      %964 = arith.addi %89, %c0_i32_190 : i32
      %c5_191 = arith.constant 5 : index
      %965 = arith.index_cast %964 : i32 to index
      %c0_192 = arith.constant 0 : index
      %966 = vector.load %arg8[%c5_191, %965, %c0_192] : memref<8x18x16xf32, #tpu.memory_space<vmem>>, vector<1x8x16xf32>
      %967 = vector.shape_cast %966 : vector<1x8x16xf32> to vector<8x16xf32>
      %c1_i32_193 = arith.constant 1 : i32
      %968 = tpu.dynamic_rotate %967 by %c1_i32_193 dim 1 : vector<8x16xf32>, i32 -> vector<8x16xf32>
      %cst_194 = arith.constant 0.000000e+00 : f32
      %969 = vector.broadcast %cst_194 : f32 to vector<8x16xf32>
      %970 = arith.select %52, %968, %969 : vector<8x16xi1>, vector<8x16xf32>
      %c180 = arith.constant 180 : index
      %971 = memref.load %arg5[%c180] : memref<288xf32, #tpu.memory_space<smem>>
      %972 = vector.broadcast %971 : f32 to vector<8x16xf32>
      %973 = arith.mulf %972, %970 : vector<8x16xf32>
      %974 = arith.addf %951, %973 : vector<8x16xf32>
      %c181 = arith.constant 181 : index
      %975 = memref.load %arg5[%c181] : memref<288xf32, #tpu.memory_space<smem>>
      %976 = vector.broadcast %975 : f32 to vector<8x16xf32>
      %977 = arith.mulf %976, %970 : vector<8x16xf32>
      %978 = arith.addf %955, %977 : vector<8x16xf32>
      %c182 = arith.constant 182 : index
      %979 = memref.load %arg5[%c182] : memref<288xf32, #tpu.memory_space<smem>>
      %980 = vector.broadcast %979 : f32 to vector<8x16xf32>
      %981 = arith.mulf %980, %970 : vector<8x16xf32>
      %982 = arith.addf %959, %981 : vector<8x16xf32>
      %c183 = arith.constant 183 : index
      %983 = memref.load %arg5[%c183] : memref<288xf32, #tpu.memory_space<smem>>
      %984 = vector.broadcast %983 : f32 to vector<8x16xf32>
      %985 = arith.mulf %984, %970 : vector<8x16xf32>
      %986 = arith.addf %963, %985 : vector<8x16xf32>
      %c184 = arith.constant 184 : index
      %987 = memref.load %arg5[%c184] : memref<288xf32, #tpu.memory_space<smem>>
      %988 = vector.broadcast %987 : f32 to vector<8x16xf32>
      %989 = arith.mulf %988, %967 : vector<8x16xf32>
      %990 = arith.addf %974, %989 : vector<8x16xf32>
      %c185 = arith.constant 185 : index
      %991 = memref.load %arg5[%c185] : memref<288xf32, #tpu.memory_space<smem>>
      %992 = vector.broadcast %991 : f32 to vector<8x16xf32>
      %993 = arith.mulf %992, %967 : vector<8x16xf32>
      %994 = arith.addf %978, %993 : vector<8x16xf32>
      %c186 = arith.constant 186 : index
      %995 = memref.load %arg5[%c186] : memref<288xf32, #tpu.memory_space<smem>>
      %996 = vector.broadcast %995 : f32 to vector<8x16xf32>
      %997 = arith.mulf %996, %967 : vector<8x16xf32>
      %998 = arith.addf %982, %997 : vector<8x16xf32>
      %c187 = arith.constant 187 : index
      %999 = memref.load %arg5[%c187] : memref<288xf32, #tpu.memory_space<smem>>
      %1000 = vector.broadcast %999 : f32 to vector<8x16xf32>
      %1001 = arith.mulf %1000, %967 : vector<8x16xf32>
      %1002 = arith.addf %986, %1001 : vector<8x16xf32>
      %c15_i32_195 = arith.constant 15 : i32
      %1003 = tpu.dynamic_rotate %967 by %c15_i32_195 dim 1 : vector<8x16xf32>, i32 -> vector<8x16xf32>
      %cst_196 = arith.constant 0.000000e+00 : f32
      %1004 = vector.broadcast %cst_196 : f32 to vector<8x16xf32>
      %1005 = arith.select %54, %1003, %1004 : vector<8x16xi1>, vector<8x16xf32>
      %c188 = arith.constant 188 : index
      %1006 = memref.load %arg5[%c188] : memref<288xf32, #tpu.memory_space<smem>>
      %1007 = vector.broadcast %1006 : f32 to vector<8x16xf32>
      %1008 = arith.mulf %1007, %1005 : vector<8x16xf32>
      %1009 = arith.addf %990, %1008 : vector<8x16xf32>
      %c189 = arith.constant 189 : index
      %1010 = memref.load %arg5[%c189] : memref<288xf32, #tpu.memory_space<smem>>
      %1011 = vector.broadcast %1010 : f32 to vector<8x16xf32>
      %1012 = arith.mulf %1011, %1005 : vector<8x16xf32>
      %1013 = arith.addf %994, %1012 : vector<8x16xf32>
      %c190 = arith.constant 190 : index
      %1014 = memref.load %arg5[%c190] : memref<288xf32, #tpu.memory_space<smem>>
      %1015 = vector.broadcast %1014 : f32 to vector<8x16xf32>
      %1016 = arith.mulf %1015, %1005 : vector<8x16xf32>
      %1017 = arith.addf %998, %1016 : vector<8x16xf32>
      %c191 = arith.constant 191 : index
      %1018 = memref.load %arg5[%c191] : memref<288xf32, #tpu.memory_space<smem>>
      %1019 = vector.broadcast %1018 : f32 to vector<8x16xf32>
      %1020 = arith.mulf %1019, %1005 : vector<8x16xf32>
      %1021 = arith.addf %1002, %1020 : vector<8x16xf32>
      %c1_i32_197 = arith.constant 1 : i32
      %1022 = arith.addi %89, %c1_i32_197 : i32
      %c5_198 = arith.constant 5 : index
      %1023 = arith.index_cast %1022 : i32 to index
      %c0_199 = arith.constant 0 : index
      %1024 = vector.load %arg8[%c5_198, %1023, %c0_199] : memref<8x18x16xf32, #tpu.memory_space<vmem>>, vector<1x8x16xf32>
      %1025 = vector.shape_cast %1024 : vector<1x8x16xf32> to vector<8x16xf32>
      %c1_i32_200 = arith.constant 1 : i32
      %1026 = tpu.dynamic_rotate %1025 by %c1_i32_200 dim 1 : vector<8x16xf32>, i32 -> vector<8x16xf32>
      %cst_201 = arith.constant 0.000000e+00 : f32
      %1027 = vector.broadcast %cst_201 : f32 to vector<8x16xf32>
      %1028 = arith.select %52, %1026, %1027 : vector<8x16xi1>, vector<8x16xf32>
      %c192 = arith.constant 192 : index
      %1029 = memref.load %arg5[%c192] : memref<288xf32, #tpu.memory_space<smem>>
      %1030 = vector.broadcast %1029 : f32 to vector<8x16xf32>
      %1031 = arith.mulf %1030, %1028 : vector<8x16xf32>
      %1032 = arith.addf %1009, %1031 : vector<8x16xf32>
      %c193 = arith.constant 193 : index
      %1033 = memref.load %arg5[%c193] : memref<288xf32, #tpu.memory_space<smem>>
      %1034 = vector.broadcast %1033 : f32 to vector<8x16xf32>
      %1035 = arith.mulf %1034, %1028 : vector<8x16xf32>
      %1036 = arith.addf %1013, %1035 : vector<8x16xf32>
      %c194 = arith.constant 194 : index
      %1037 = memref.load %arg5[%c194] : memref<288xf32, #tpu.memory_space<smem>>
      %1038 = vector.broadcast %1037 : f32 to vector<8x16xf32>
      %1039 = arith.mulf %1038, %1028 : vector<8x16xf32>
      %1040 = arith.addf %1017, %1039 : vector<8x16xf32>
      %c195 = arith.constant 195 : index
      %1041 = memref.load %arg5[%c195] : memref<288xf32, #tpu.memory_space<smem>>
      %1042 = vector.broadcast %1041 : f32 to vector<8x16xf32>
      %1043 = arith.mulf %1042, %1028 : vector<8x16xf32>
      %1044 = arith.addf %1021, %1043 : vector<8x16xf32>
      %c196 = arith.constant 196 : index
      %1045 = memref.load %arg5[%c196] : memref<288xf32, #tpu.memory_space<smem>>
      %1046 = vector.broadcast %1045 : f32 to vector<8x16xf32>
      %1047 = arith.mulf %1046, %1025 : vector<8x16xf32>
      %1048 = arith.addf %1032, %1047 : vector<8x16xf32>
      %c197 = arith.constant 197 : index
      %1049 = memref.load %arg5[%c197] : memref<288xf32, #tpu.memory_space<smem>>
      %1050 = vector.broadcast %1049 : f32 to vector<8x16xf32>
      %1051 = arith.mulf %1050, %1025 : vector<8x16xf32>
      %1052 = arith.addf %1036, %1051 : vector<8x16xf32>
      %c198 = arith.constant 198 : index
      %1053 = memref.load %arg5[%c198] : memref<288xf32, #tpu.memory_space<smem>>
      %1054 = vector.broadcast %1053 : f32 to vector<8x16xf32>
      %1055 = arith.mulf %1054, %1025 : vector<8x16xf32>
      %1056 = arith.addf %1040, %1055 : vector<8x16xf32>
      %c199 = arith.constant 199 : index
      %1057 = memref.load %arg5[%c199] : memref<288xf32, #tpu.memory_space<smem>>
      %1058 = vector.broadcast %1057 : f32 to vector<8x16xf32>
      %1059 = arith.mulf %1058, %1025 : vector<8x16xf32>
      %1060 = arith.addf %1044, %1059 : vector<8x16xf32>
      %c15_i32_202 = arith.constant 15 : i32
      %1061 = tpu.dynamic_rotate %1025 by %c15_i32_202 dim 1 : vector<8x16xf32>, i32 -> vector<8x16xf32>
      %cst_203 = arith.constant 0.000000e+00 : f32
      %1062 = vector.broadcast %cst_203 : f32 to vector<8x16xf32>
      %1063 = arith.select %54, %1061, %1062 : vector<8x16xi1>, vector<8x16xf32>
      %c200 = arith.constant 200 : index
      %1064 = memref.load %arg5[%c200] : memref<288xf32, #tpu.memory_space<smem>>
      %1065 = vector.broadcast %1064 : f32 to vector<8x16xf32>
      %1066 = arith.mulf %1065, %1063 : vector<8x16xf32>
      %1067 = arith.addf %1048, %1066 : vector<8x16xf32>
      %c201 = arith.constant 201 : index
      %1068 = memref.load %arg5[%c201] : memref<288xf32, #tpu.memory_space<smem>>
      %1069 = vector.broadcast %1068 : f32 to vector<8x16xf32>
      %1070 = arith.mulf %1069, %1063 : vector<8x16xf32>
      %1071 = arith.addf %1052, %1070 : vector<8x16xf32>
      %c202 = arith.constant 202 : index
      %1072 = memref.load %arg5[%c202] : memref<288xf32, #tpu.memory_space<smem>>
      %1073 = vector.broadcast %1072 : f32 to vector<8x16xf32>
      %1074 = arith.mulf %1073, %1063 : vector<8x16xf32>
      %1075 = arith.addf %1056, %1074 : vector<8x16xf32>
      %c203 = arith.constant 203 : index
      %1076 = memref.load %arg5[%c203] : memref<288xf32, #tpu.memory_space<smem>>
      %1077 = vector.broadcast %1076 : f32 to vector<8x16xf32>
      %1078 = arith.mulf %1077, %1063 : vector<8x16xf32>
      %1079 = arith.addf %1060, %1078 : vector<8x16xf32>
      %c2_i32_204 = arith.constant 2 : i32
      %1080 = arith.addi %89, %c2_i32_204 : i32
      %c5_205 = arith.constant 5 : index
      %1081 = arith.index_cast %1080 : i32 to index
      %c0_206 = arith.constant 0 : index
      %1082 = vector.load %arg8[%c5_205, %1081, %c0_206] : memref<8x18x16xf32, #tpu.memory_space<vmem>>, vector<1x8x16xf32>
      %1083 = vector.shape_cast %1082 : vector<1x8x16xf32> to vector<8x16xf32>
      %c1_i32_207 = arith.constant 1 : i32
      %1084 = tpu.dynamic_rotate %1083 by %c1_i32_207 dim 1 : vector<8x16xf32>, i32 -> vector<8x16xf32>
      %cst_208 = arith.constant 0.000000e+00 : f32
      %1085 = vector.broadcast %cst_208 : f32 to vector<8x16xf32>
      %1086 = arith.select %52, %1084, %1085 : vector<8x16xi1>, vector<8x16xf32>
      %c204 = arith.constant 204 : index
      %1087 = memref.load %arg5[%c204] : memref<288xf32, #tpu.memory_space<smem>>
      %1088 = vector.broadcast %1087 : f32 to vector<8x16xf32>
      %1089 = arith.mulf %1088, %1086 : vector<8x16xf32>
      %1090 = arith.addf %1067, %1089 : vector<8x16xf32>
      %c205 = arith.constant 205 : index
      %1091 = memref.load %arg5[%c205] : memref<288xf32, #tpu.memory_space<smem>>
      %1092 = vector.broadcast %1091 : f32 to vector<8x16xf32>
      %1093 = arith.mulf %1092, %1086 : vector<8x16xf32>
      %1094 = arith.addf %1071, %1093 : vector<8x16xf32>
      %c206 = arith.constant 206 : index
      %1095 = memref.load %arg5[%c206] : memref<288xf32, #tpu.memory_space<smem>>
      %1096 = vector.broadcast %1095 : f32 to vector<8x16xf32>
      %1097 = arith.mulf %1096, %1086 : vector<8x16xf32>
      %1098 = arith.addf %1075, %1097 : vector<8x16xf32>
      %c207 = arith.constant 207 : index
      %1099 = memref.load %arg5[%c207] : memref<288xf32, #tpu.memory_space<smem>>
      %1100 = vector.broadcast %1099 : f32 to vector<8x16xf32>
      %1101 = arith.mulf %1100, %1086 : vector<8x16xf32>
      %1102 = arith.addf %1079, %1101 : vector<8x16xf32>
      %c208 = arith.constant 208 : index
      %1103 = memref.load %arg5[%c208] : memref<288xf32, #tpu.memory_space<smem>>
      %1104 = vector.broadcast %1103 : f32 to vector<8x16xf32>
      %1105 = arith.mulf %1104, %1083 : vector<8x16xf32>
      %1106 = arith.addf %1090, %1105 : vector<8x16xf32>
      %c209 = arith.constant 209 : index
      %1107 = memref.load %arg5[%c209] : memref<288xf32, #tpu.memory_space<smem>>
      %1108 = vector.broadcast %1107 : f32 to vector<8x16xf32>
      %1109 = arith.mulf %1108, %1083 : vector<8x16xf32>
      %1110 = arith.addf %1094, %1109 : vector<8x16xf32>
      %c210 = arith.constant 210 : index
      %1111 = memref.load %arg5[%c210] : memref<288xf32, #tpu.memory_space<smem>>
      %1112 = vector.broadcast %1111 : f32 to vector<8x16xf32>
      %1113 = arith.mulf %1112, %1083 : vector<8x16xf32>
      %1114 = arith.addf %1098, %1113 : vector<8x16xf32>
      %c211 = arith.constant 211 : index
      %1115 = memref.load %arg5[%c211] : memref<288xf32, #tpu.memory_space<smem>>
      %1116 = vector.broadcast %1115 : f32 to vector<8x16xf32>
      %1117 = arith.mulf %1116, %1083 : vector<8x16xf32>
      %1118 = arith.addf %1102, %1117 : vector<8x16xf32>
      %c15_i32_209 = arith.constant 15 : i32
      %1119 = tpu.dynamic_rotate %1083 by %c15_i32_209 dim 1 : vector<8x16xf32>, i32 -> vector<8x16xf32>
      %cst_210 = arith.constant 0.000000e+00 : f32
      %1120 = vector.broadcast %cst_210 : f32 to vector<8x16xf32>
      %1121 = arith.select %54, %1119, %1120 : vector<8x16xi1>, vector<8x16xf32>
      %c212 = arith.constant 212 : index
      %1122 = memref.load %arg5[%c212] : memref<288xf32, #tpu.memory_space<smem>>
      %1123 = vector.broadcast %1122 : f32 to vector<8x16xf32>
      %1124 = arith.mulf %1123, %1121 : vector<8x16xf32>
      %1125 = arith.addf %1106, %1124 : vector<8x16xf32>
      %c213 = arith.constant 213 : index
      %1126 = memref.load %arg5[%c213] : memref<288xf32, #tpu.memory_space<smem>>
      %1127 = vector.broadcast %1126 : f32 to vector<8x16xf32>
      %1128 = arith.mulf %1127, %1121 : vector<8x16xf32>
      %1129 = arith.addf %1110, %1128 : vector<8x16xf32>
      %c214 = arith.constant 214 : index
      %1130 = memref.load %arg5[%c214] : memref<288xf32, #tpu.memory_space<smem>>
      %1131 = vector.broadcast %1130 : f32 to vector<8x16xf32>
      %1132 = arith.mulf %1131, %1121 : vector<8x16xf32>
      %1133 = arith.addf %1114, %1132 : vector<8x16xf32>
      %c215 = arith.constant 215 : index
      %1134 = memref.load %arg5[%c215] : memref<288xf32, #tpu.memory_space<smem>>
      %1135 = vector.broadcast %1134 : f32 to vector<8x16xf32>
      %1136 = arith.mulf %1135, %1121 : vector<8x16xf32>
      %1137 = arith.addf %1118, %1136 : vector<8x16xf32>
      %c0_i32_211 = arith.constant 0 : i32
      %1138 = arith.addi %89, %c0_i32_211 : i32
      %c6_212 = arith.constant 6 : index
      %1139 = arith.index_cast %1138 : i32 to index
      %c0_213 = arith.constant 0 : index
      %1140 = vector.load %arg8[%c6_212, %1139, %c0_213] : memref<8x18x16xf32, #tpu.memory_space<vmem>>, vector<1x8x16xf32>
      %1141 = vector.shape_cast %1140 : vector<1x8x16xf32> to vector<8x16xf32>
      %c1_i32_214 = arith.constant 1 : i32
      %1142 = tpu.dynamic_rotate %1141 by %c1_i32_214 dim 1 : vector<8x16xf32>, i32 -> vector<8x16xf32>
      %cst_215 = arith.constant 0.000000e+00 : f32
      %1143 = vector.broadcast %cst_215 : f32 to vector<8x16xf32>
      %1144 = arith.select %52, %1142, %1143 : vector<8x16xi1>, vector<8x16xf32>
      %c216 = arith.constant 216 : index
      %1145 = memref.load %arg5[%c216] : memref<288xf32, #tpu.memory_space<smem>>
      %1146 = vector.broadcast %1145 : f32 to vector<8x16xf32>
      %1147 = arith.mulf %1146, %1144 : vector<8x16xf32>
      %1148 = arith.addf %1125, %1147 : vector<8x16xf32>
      %c217 = arith.constant 217 : index
      %1149 = memref.load %arg5[%c217] : memref<288xf32, #tpu.memory_space<smem>>
      %1150 = vector.broadcast %1149 : f32 to vector<8x16xf32>
      %1151 = arith.mulf %1150, %1144 : vector<8x16xf32>
      %1152 = arith.addf %1129, %1151 : vector<8x16xf32>
      %c218 = arith.constant 218 : index
      %1153 = memref.load %arg5[%c218] : memref<288xf32, #tpu.memory_space<smem>>
      %1154 = vector.broadcast %1153 : f32 to vector<8x16xf32>
      %1155 = arith.mulf %1154, %1144 : vector<8x16xf32>
      %1156 = arith.addf %1133, %1155 : vector<8x16xf32>
      %c219 = arith.constant 219 : index
      %1157 = memref.load %arg5[%c219] : memref<288xf32, #tpu.memory_space<smem>>
      %1158 = vector.broadcast %1157 : f32 to vector<8x16xf32>
      %1159 = arith.mulf %1158, %1144 : vector<8x16xf32>
      %1160 = arith.addf %1137, %1159 : vector<8x16xf32>
      %c220 = arith.constant 220 : index
      %1161 = memref.load %arg5[%c220] : memref<288xf32, #tpu.memory_space<smem>>
      %1162 = vector.broadcast %1161 : f32 to vector<8x16xf32>
      %1163 = arith.mulf %1162, %1141 : vector<8x16xf32>
      %1164 = arith.addf %1148, %1163 : vector<8x16xf32>
      %c221 = arith.constant 221 : index
      %1165 = memref.load %arg5[%c221] : memref<288xf32, #tpu.memory_space<smem>>
      %1166 = vector.broadcast %1165 : f32 to vector<8x16xf32>
      %1167 = arith.mulf %1166, %1141 : vector<8x16xf32>
      %1168 = arith.addf %1152, %1167 : vector<8x16xf32>
      %c222 = arith.constant 222 : index
      %1169 = memref.load %arg5[%c222] : memref<288xf32, #tpu.memory_space<smem>>
      %1170 = vector.broadcast %1169 : f32 to vector<8x16xf32>
      %1171 = arith.mulf %1170, %1141 : vector<8x16xf32>
      %1172 = arith.addf %1156, %1171 : vector<8x16xf32>
      %c223 = arith.constant 223 : index
      %1173 = memref.load %arg5[%c223] : memref<288xf32, #tpu.memory_space<smem>>
      %1174 = vector.broadcast %1173 : f32 to vector<8x16xf32>
      %1175 = arith.mulf %1174, %1141 : vector<8x16xf32>
      %1176 = arith.addf %1160, %1175 : vector<8x16xf32>
      %c15_i32_216 = arith.constant 15 : i32
      %1177 = tpu.dynamic_rotate %1141 by %c15_i32_216 dim 1 : vector<8x16xf32>, i32 -> vector<8x16xf32>
      %cst_217 = arith.constant 0.000000e+00 : f32
      %1178 = vector.broadcast %cst_217 : f32 to vector<8x16xf32>
      %1179 = arith.select %54, %1177, %1178 : vector<8x16xi1>, vector<8x16xf32>
      %c224 = arith.constant 224 : index
      %1180 = memref.load %arg5[%c224] : memref<288xf32, #tpu.memory_space<smem>>
      %1181 = vector.broadcast %1180 : f32 to vector<8x16xf32>
      %1182 = arith.mulf %1181, %1179 : vector<8x16xf32>
      %1183 = arith.addf %1164, %1182 : vector<8x16xf32>
      %c225 = arith.constant 225 : index
      %1184 = memref.load %arg5[%c225] : memref<288xf32, #tpu.memory_space<smem>>
      %1185 = vector.broadcast %1184 : f32 to vector<8x16xf32>
      %1186 = arith.mulf %1185, %1179 : vector<8x16xf32>
      %1187 = arith.addf %1168, %1186 : vector<8x16xf32>
      %c226 = arith.constant 226 : index
      %1188 = memref.load %arg5[%c226] : memref<288xf32, #tpu.memory_space<smem>>
      %1189 = vector.broadcast %1188 : f32 to vector<8x16xf32>
      %1190 = arith.mulf %1189, %1179 : vector<8x16xf32>
      %1191 = arith.addf %1172, %1190 : vector<8x16xf32>
      %c227 = arith.constant 227 : index
      %1192 = memref.load %arg5[%c227] : memref<288xf32, #tpu.memory_space<smem>>
      %1193 = vector.broadcast %1192 : f32 to vector<8x16xf32>
      %1194 = arith.mulf %1193, %1179 : vector<8x16xf32>
      %1195 = arith.addf %1176, %1194 : vector<8x16xf32>
      %c1_i32_218 = arith.constant 1 : i32
      %1196 = arith.addi %89, %c1_i32_218 : i32
      %c6_219 = arith.constant 6 : index
      %1197 = arith.index_cast %1196 : i32 to index
      %c0_220 = arith.constant 0 : index
      %1198 = vector.load %arg8[%c6_219, %1197, %c0_220] : memref<8x18x16xf32, #tpu.memory_space<vmem>>, vector<1x8x16xf32>
      %1199 = vector.shape_cast %1198 : vector<1x8x16xf32> to vector<8x16xf32>
      %c1_i32_221 = arith.constant 1 : i32
      %1200 = tpu.dynamic_rotate %1199 by %c1_i32_221 dim 1 : vector<8x16xf32>, i32 -> vector<8x16xf32>
      %cst_222 = arith.constant 0.000000e+00 : f32
      %1201 = vector.broadcast %cst_222 : f32 to vector<8x16xf32>
      %1202 = arith.select %52, %1200, %1201 : vector<8x16xi1>, vector<8x16xf32>
      %c228 = arith.constant 228 : index
      %1203 = memref.load %arg5[%c228] : memref<288xf32, #tpu.memory_space<smem>>
      %1204 = vector.broadcast %1203 : f32 to vector<8x16xf32>
      %1205 = arith.mulf %1204, %1202 : vector<8x16xf32>
      %1206 = arith.addf %1183, %1205 : vector<8x16xf32>
      %c229 = arith.constant 229 : index
      %1207 = memref.load %arg5[%c229] : memref<288xf32, #tpu.memory_space<smem>>
      %1208 = vector.broadcast %1207 : f32 to vector<8x16xf32>
      %1209 = arith.mulf %1208, %1202 : vector<8x16xf32>
      %1210 = arith.addf %1187, %1209 : vector<8x16xf32>
      %c230 = arith.constant 230 : index
      %1211 = memref.load %arg5[%c230] : memref<288xf32, #tpu.memory_space<smem>>
      %1212 = vector.broadcast %1211 : f32 to vector<8x16xf32>
      %1213 = arith.mulf %1212, %1202 : vector<8x16xf32>
      %1214 = arith.addf %1191, %1213 : vector<8x16xf32>
      %c231 = arith.constant 231 : index
      %1215 = memref.load %arg5[%c231] : memref<288xf32, #tpu.memory_space<smem>>
      %1216 = vector.broadcast %1215 : f32 to vector<8x16xf32>
      %1217 = arith.mulf %1216, %1202 : vector<8x16xf32>
      %1218 = arith.addf %1195, %1217 : vector<8x16xf32>
      %c232 = arith.constant 232 : index
      %1219 = memref.load %arg5[%c232] : memref<288xf32, #tpu.memory_space<smem>>
      %1220 = vector.broadcast %1219 : f32 to vector<8x16xf32>
      %1221 = arith.mulf %1220, %1199 : vector<8x16xf32>
      %1222 = arith.addf %1206, %1221 : vector<8x16xf32>
      %c233 = arith.constant 233 : index
      %1223 = memref.load %arg5[%c233] : memref<288xf32, #tpu.memory_space<smem>>
      %1224 = vector.broadcast %1223 : f32 to vector<8x16xf32>
      %1225 = arith.mulf %1224, %1199 : vector<8x16xf32>
      %1226 = arith.addf %1210, %1225 : vector<8x16xf32>
      %c234 = arith.constant 234 : index
      %1227 = memref.load %arg5[%c234] : memref<288xf32, #tpu.memory_space<smem>>
      %1228 = vector.broadcast %1227 : f32 to vector<8x16xf32>
      %1229 = arith.mulf %1228, %1199 : vector<8x16xf32>
      %1230 = arith.addf %1214, %1229 : vector<8x16xf32>
      %c235 = arith.constant 235 : index
      %1231 = memref.load %arg5[%c235] : memref<288xf32, #tpu.memory_space<smem>>
      %1232 = vector.broadcast %1231 : f32 to vector<8x16xf32>
      %1233 = arith.mulf %1232, %1199 : vector<8x16xf32>
      %1234 = arith.addf %1218, %1233 : vector<8x16xf32>
      %c15_i32_223 = arith.constant 15 : i32
      %1235 = tpu.dynamic_rotate %1199 by %c15_i32_223 dim 1 : vector<8x16xf32>, i32 -> vector<8x16xf32>
      %cst_224 = arith.constant 0.000000e+00 : f32
      %1236 = vector.broadcast %cst_224 : f32 to vector<8x16xf32>
      %1237 = arith.select %54, %1235, %1236 : vector<8x16xi1>, vector<8x16xf32>
      %c236 = arith.constant 236 : index
      %1238 = memref.load %arg5[%c236] : memref<288xf32, #tpu.memory_space<smem>>
      %1239 = vector.broadcast %1238 : f32 to vector<8x16xf32>
      %1240 = arith.mulf %1239, %1237 : vector<8x16xf32>
      %1241 = arith.addf %1222, %1240 : vector<8x16xf32>
      %c237 = arith.constant 237 : index
      %1242 = memref.load %arg5[%c237] : memref<288xf32, #tpu.memory_space<smem>>
      %1243 = vector.broadcast %1242 : f32 to vector<8x16xf32>
      %1244 = arith.mulf %1243, %1237 : vector<8x16xf32>
      %1245 = arith.addf %1226, %1244 : vector<8x16xf32>
      %c238 = arith.constant 238 : index
      %1246 = memref.load %arg5[%c238] : memref<288xf32, #tpu.memory_space<smem>>
      %1247 = vector.broadcast %1246 : f32 to vector<8x16xf32>
      %1248 = arith.mulf %1247, %1237 : vector<8x16xf32>
      %1249 = arith.addf %1230, %1248 : vector<8x16xf32>
      %c239 = arith.constant 239 : index
      %1250 = memref.load %arg5[%c239] : memref<288xf32, #tpu.memory_space<smem>>
      %1251 = vector.broadcast %1250 : f32 to vector<8x16xf32>
      %1252 = arith.mulf %1251, %1237 : vector<8x16xf32>
      %1253 = arith.addf %1234, %1252 : vector<8x16xf32>
      %c2_i32_225 = arith.constant 2 : i32
      %1254 = arith.addi %89, %c2_i32_225 : i32
      %c6_226 = arith.constant 6 : index
      %1255 = arith.index_cast %1254 : i32 to index
      %c0_227 = arith.constant 0 : index
      %1256 = vector.load %arg8[%c6_226, %1255, %c0_227] : memref<8x18x16xf32, #tpu.memory_space<vmem>>, vector<1x8x16xf32>
      %1257 = vector.shape_cast %1256 : vector<1x8x16xf32> to vector<8x16xf32>
      %c1_i32_228 = arith.constant 1 : i32
      %1258 = tpu.dynamic_rotate %1257 by %c1_i32_228 dim 1 : vector<8x16xf32>, i32 -> vector<8x16xf32>
      %cst_229 = arith.constant 0.000000e+00 : f32
      %1259 = vector.broadcast %cst_229 : f32 to vector<8x16xf32>
      %1260 = arith.select %52, %1258, %1259 : vector<8x16xi1>, vector<8x16xf32>
      %c240 = arith.constant 240 : index
      %1261 = memref.load %arg5[%c240] : memref<288xf32, #tpu.memory_space<smem>>
      %1262 = vector.broadcast %1261 : f32 to vector<8x16xf32>
      %1263 = arith.mulf %1262, %1260 : vector<8x16xf32>
      %1264 = arith.addf %1241, %1263 : vector<8x16xf32>
      %c241 = arith.constant 241 : index
      %1265 = memref.load %arg5[%c241] : memref<288xf32, #tpu.memory_space<smem>>
      %1266 = vector.broadcast %1265 : f32 to vector<8x16xf32>
      %1267 = arith.mulf %1266, %1260 : vector<8x16xf32>
      %1268 = arith.addf %1245, %1267 : vector<8x16xf32>
      %c242 = arith.constant 242 : index
      %1269 = memref.load %arg5[%c242] : memref<288xf32, #tpu.memory_space<smem>>
      %1270 = vector.broadcast %1269 : f32 to vector<8x16xf32>
      %1271 = arith.mulf %1270, %1260 : vector<8x16xf32>
      %1272 = arith.addf %1249, %1271 : vector<8x16xf32>
      %c243 = arith.constant 243 : index
      %1273 = memref.load %arg5[%c243] : memref<288xf32, #tpu.memory_space<smem>>
      %1274 = vector.broadcast %1273 : f32 to vector<8x16xf32>
      %1275 = arith.mulf %1274, %1260 : vector<8x16xf32>
      %1276 = arith.addf %1253, %1275 : vector<8x16xf32>
      %c244 = arith.constant 244 : index
      %1277 = memref.load %arg5[%c244] : memref<288xf32, #tpu.memory_space<smem>>
      %1278 = vector.broadcast %1277 : f32 to vector<8x16xf32>
      %1279 = arith.mulf %1278, %1257 : vector<8x16xf32>
      %1280 = arith.addf %1264, %1279 : vector<8x16xf32>
      %c245 = arith.constant 245 : index
      %1281 = memref.load %arg5[%c245] : memref<288xf32, #tpu.memory_space<smem>>
      %1282 = vector.broadcast %1281 : f32 to vector<8x16xf32>
      %1283 = arith.mulf %1282, %1257 : vector<8x16xf32>
      %1284 = arith.addf %1268, %1283 : vector<8x16xf32>
      %c246 = arith.constant 246 : index
      %1285 = memref.load %arg5[%c246] : memref<288xf32, #tpu.memory_space<smem>>
      %1286 = vector.broadcast %1285 : f32 to vector<8x16xf32>
      %1287 = arith.mulf %1286, %1257 : vector<8x16xf32>
      %1288 = arith.addf %1272, %1287 : vector<8x16xf32>
      %c247 = arith.constant 247 : index
      %1289 = memref.load %arg5[%c247] : memref<288xf32, #tpu.memory_space<smem>>
      %1290 = vector.broadcast %1289 : f32 to vector<8x16xf32>
      %1291 = arith.mulf %1290, %1257 : vector<8x16xf32>
      %1292 = arith.addf %1276, %1291 : vector<8x16xf32>
      %c15_i32_230 = arith.constant 15 : i32
      %1293 = tpu.dynamic_rotate %1257 by %c15_i32_230 dim 1 : vector<8x16xf32>, i32 -> vector<8x16xf32>
      %cst_231 = arith.constant 0.000000e+00 : f32
      %1294 = vector.broadcast %cst_231 : f32 to vector<8x16xf32>
      %1295 = arith.select %54, %1293, %1294 : vector<8x16xi1>, vector<8x16xf32>
      %c248 = arith.constant 248 : index
      %1296 = memref.load %arg5[%c248] : memref<288xf32, #tpu.memory_space<smem>>
      %1297 = vector.broadcast %1296 : f32 to vector<8x16xf32>
      %1298 = arith.mulf %1297, %1295 : vector<8x16xf32>
      %1299 = arith.addf %1280, %1298 : vector<8x16xf32>
      %c249 = arith.constant 249 : index
      %1300 = memref.load %arg5[%c249] : memref<288xf32, #tpu.memory_space<smem>>
      %1301 = vector.broadcast %1300 : f32 to vector<8x16xf32>
      %1302 = arith.mulf %1301, %1295 : vector<8x16xf32>
      %1303 = arith.addf %1284, %1302 : vector<8x16xf32>
      %c250 = arith.constant 250 : index
      %1304 = memref.load %arg5[%c250] : memref<288xf32, #tpu.memory_space<smem>>
      %1305 = vector.broadcast %1304 : f32 to vector<8x16xf32>
      %1306 = arith.mulf %1305, %1295 : vector<8x16xf32>
      %1307 = arith.addf %1288, %1306 : vector<8x16xf32>
      %c251 = arith.constant 251 : index
      %1308 = memref.load %arg5[%c251] : memref<288xf32, #tpu.memory_space<smem>>
      %1309 = vector.broadcast %1308 : f32 to vector<8x16xf32>
      %1310 = arith.mulf %1309, %1295 : vector<8x16xf32>
      %1311 = arith.addf %1292, %1310 : vector<8x16xf32>
      %c0_i32_232 = arith.constant 0 : i32
      %1312 = arith.addi %89, %c0_i32_232 : i32
      %c7_233 = arith.constant 7 : index
      %1313 = arith.index_cast %1312 : i32 to index
      %c0_234 = arith.constant 0 : index
      %1314 = vector.load %arg8[%c7_233, %1313, %c0_234] : memref<8x18x16xf32, #tpu.memory_space<vmem>>, vector<1x8x16xf32>
      %1315 = vector.shape_cast %1314 : vector<1x8x16xf32> to vector<8x16xf32>
      %c1_i32_235 = arith.constant 1 : i32
      %1316 = tpu.dynamic_rotate %1315 by %c1_i32_235 dim 1 : vector<8x16xf32>, i32 -> vector<8x16xf32>
      %cst_236 = arith.constant 0.000000e+00 : f32
      %1317 = vector.broadcast %cst_236 : f32 to vector<8x16xf32>
      %1318 = arith.select %52, %1316, %1317 : vector<8x16xi1>, vector<8x16xf32>
      %c252 = arith.constant 252 : index
      %1319 = memref.load %arg5[%c252] : memref<288xf32, #tpu.memory_space<smem>>
      %1320 = vector.broadcast %1319 : f32 to vector<8x16xf32>
      %1321 = arith.mulf %1320, %1318 : vector<8x16xf32>
      %1322 = arith.addf %1299, %1321 : vector<8x16xf32>
      %c253 = arith.constant 253 : index
      %1323 = memref.load %arg5[%c253] : memref<288xf32, #tpu.memory_space<smem>>
      %1324 = vector.broadcast %1323 : f32 to vector<8x16xf32>
      %1325 = arith.mulf %1324, %1318 : vector<8x16xf32>
      %1326 = arith.addf %1303, %1325 : vector<8x16xf32>
      %c254 = arith.constant 254 : index
      %1327 = memref.load %arg5[%c254] : memref<288xf32, #tpu.memory_space<smem>>
      %1328 = vector.broadcast %1327 : f32 to vector<8x16xf32>
      %1329 = arith.mulf %1328, %1318 : vector<8x16xf32>
      %1330 = arith.addf %1307, %1329 : vector<8x16xf32>
      %c255 = arith.constant 255 : index
      %1331 = memref.load %arg5[%c255] : memref<288xf32, #tpu.memory_space<smem>>
      %1332 = vector.broadcast %1331 : f32 to vector<8x16xf32>
      %1333 = arith.mulf %1332, %1318 : vector<8x16xf32>
      %1334 = arith.addf %1311, %1333 : vector<8x16xf32>
      %c256 = arith.constant 256 : index
      %1335 = memref.load %arg5[%c256] : memref<288xf32, #tpu.memory_space<smem>>
      %1336 = vector.broadcast %1335 : f32 to vector<8x16xf32>
      %1337 = arith.mulf %1336, %1315 : vector<8x16xf32>
      %1338 = arith.addf %1322, %1337 : vector<8x16xf32>
      %c257 = arith.constant 257 : index
      %1339 = memref.load %arg5[%c257] : memref<288xf32, #tpu.memory_space<smem>>
      %1340 = vector.broadcast %1339 : f32 to vector<8x16xf32>
      %1341 = arith.mulf %1340, %1315 : vector<8x16xf32>
      %1342 = arith.addf %1326, %1341 : vector<8x16xf32>
      %c258 = arith.constant 258 : index
      %1343 = memref.load %arg5[%c258] : memref<288xf32, #tpu.memory_space<smem>>
      %1344 = vector.broadcast %1343 : f32 to vector<8x16xf32>
      %1345 = arith.mulf %1344, %1315 : vector<8x16xf32>
      %1346 = arith.addf %1330, %1345 : vector<8x16xf32>
      %c259 = arith.constant 259 : index
      %1347 = memref.load %arg5[%c259] : memref<288xf32, #tpu.memory_space<smem>>
      %1348 = vector.broadcast %1347 : f32 to vector<8x16xf32>
      %1349 = arith.mulf %1348, %1315 : vector<8x16xf32>
      %1350 = arith.addf %1334, %1349 : vector<8x16xf32>
      %c15_i32_237 = arith.constant 15 : i32
      %1351 = tpu.dynamic_rotate %1315 by %c15_i32_237 dim 1 : vector<8x16xf32>, i32 -> vector<8x16xf32>
      %cst_238 = arith.constant 0.000000e+00 : f32
      %1352 = vector.broadcast %cst_238 : f32 to vector<8x16xf32>
      %1353 = arith.select %54, %1351, %1352 : vector<8x16xi1>, vector<8x16xf32>
      %c260 = arith.constant 260 : index
      %1354 = memref.load %arg5[%c260] : memref<288xf32, #tpu.memory_space<smem>>
      %1355 = vector.broadcast %1354 : f32 to vector<8x16xf32>
      %1356 = arith.mulf %1355, %1353 : vector<8x16xf32>
      %1357 = arith.addf %1338, %1356 : vector<8x16xf32>
      %c261 = arith.constant 261 : index
      %1358 = memref.load %arg5[%c261] : memref<288xf32, #tpu.memory_space<smem>>
      %1359 = vector.broadcast %1358 : f32 to vector<8x16xf32>
      %1360 = arith.mulf %1359, %1353 : vector<8x16xf32>
      %1361 = arith.addf %1342, %1360 : vector<8x16xf32>
      %c262 = arith.constant 262 : index
      %1362 = memref.load %arg5[%c262] : memref<288xf32, #tpu.memory_space<smem>>
      %1363 = vector.broadcast %1362 : f32 to vector<8x16xf32>
      %1364 = arith.mulf %1363, %1353 : vector<8x16xf32>
      %1365 = arith.addf %1346, %1364 : vector<8x16xf32>
      %c263 = arith.constant 263 : index
      %1366 = memref.load %arg5[%c263] : memref<288xf32, #tpu.memory_space<smem>>
      %1367 = vector.broadcast %1366 : f32 to vector<8x16xf32>
      %1368 = arith.mulf %1367, %1353 : vector<8x16xf32>
      %1369 = arith.addf %1350, %1368 : vector<8x16xf32>
      %c1_i32_239 = arith.constant 1 : i32
      %1370 = arith.addi %89, %c1_i32_239 : i32
      %c7_240 = arith.constant 7 : index
      %1371 = arith.index_cast %1370 : i32 to index
      %c0_241 = arith.constant 0 : index
      %1372 = vector.load %arg8[%c7_240, %1371, %c0_241] : memref<8x18x16xf32, #tpu.memory_space<vmem>>, vector<1x8x16xf32>
      %1373 = vector.shape_cast %1372 : vector<1x8x16xf32> to vector<8x16xf32>
      %c1_i32_242 = arith.constant 1 : i32
      %1374 = tpu.dynamic_rotate %1373 by %c1_i32_242 dim 1 : vector<8x16xf32>, i32 -> vector<8x16xf32>
      %cst_243 = arith.constant 0.000000e+00 : f32
      %1375 = vector.broadcast %cst_243 : f32 to vector<8x16xf32>
      %1376 = arith.select %52, %1374, %1375 : vector<8x16xi1>, vector<8x16xf32>
      %c264 = arith.constant 264 : index
      %1377 = memref.load %arg5[%c264] : memref<288xf32, #tpu.memory_space<smem>>
      %1378 = vector.broadcast %1377 : f32 to vector<8x16xf32>
      %1379 = arith.mulf %1378, %1376 : vector<8x16xf32>
      %1380 = arith.addf %1357, %1379 : vector<8x16xf32>
      %c265 = arith.constant 265 : index
      %1381 = memref.load %arg5[%c265] : memref<288xf32, #tpu.memory_space<smem>>
      %1382 = vector.broadcast %1381 : f32 to vector<8x16xf32>
      %1383 = arith.mulf %1382, %1376 : vector<8x16xf32>
      %1384 = arith.addf %1361, %1383 : vector<8x16xf32>
      %c266 = arith.constant 266 : index
      %1385 = memref.load %arg5[%c266] : memref<288xf32, #tpu.memory_space<smem>>
      %1386 = vector.broadcast %1385 : f32 to vector<8x16xf32>
      %1387 = arith.mulf %1386, %1376 : vector<8x16xf32>
      %1388 = arith.addf %1365, %1387 : vector<8x16xf32>
      %c267 = arith.constant 267 : index
      %1389 = memref.load %arg5[%c267] : memref<288xf32, #tpu.memory_space<smem>>
      %1390 = vector.broadcast %1389 : f32 to vector<8x16xf32>
      %1391 = arith.mulf %1390, %1376 : vector<8x16xf32>
      %1392 = arith.addf %1369, %1391 : vector<8x16xf32>
      %c268 = arith.constant 268 : index
      %1393 = memref.load %arg5[%c268] : memref<288xf32, #tpu.memory_space<smem>>
      %1394 = vector.broadcast %1393 : f32 to vector<8x16xf32>
      %1395 = arith.mulf %1394, %1373 : vector<8x16xf32>
      %1396 = arith.addf %1380, %1395 : vector<8x16xf32>
      %c269 = arith.constant 269 : index
      %1397 = memref.load %arg5[%c269] : memref<288xf32, #tpu.memory_space<smem>>
      %1398 = vector.broadcast %1397 : f32 to vector<8x16xf32>
      %1399 = arith.mulf %1398, %1373 : vector<8x16xf32>
      %1400 = arith.addf %1384, %1399 : vector<8x16xf32>
      %c270 = arith.constant 270 : index
      %1401 = memref.load %arg5[%c270] : memref<288xf32, #tpu.memory_space<smem>>
      %1402 = vector.broadcast %1401 : f32 to vector<8x16xf32>
      %1403 = arith.mulf %1402, %1373 : vector<8x16xf32>
      %1404 = arith.addf %1388, %1403 : vector<8x16xf32>
      %c271 = arith.constant 271 : index
      %1405 = memref.load %arg5[%c271] : memref<288xf32, #tpu.memory_space<smem>>
      %1406 = vector.broadcast %1405 : f32 to vector<8x16xf32>
      %1407 = arith.mulf %1406, %1373 : vector<8x16xf32>
      %1408 = arith.addf %1392, %1407 : vector<8x16xf32>
      %c15_i32_244 = arith.constant 15 : i32
      %1409 = tpu.dynamic_rotate %1373 by %c15_i32_244 dim 1 : vector<8x16xf32>, i32 -> vector<8x16xf32>
      %cst_245 = arith.constant 0.000000e+00 : f32
      %1410 = vector.broadcast %cst_245 : f32 to vector<8x16xf32>
      %1411 = arith.select %54, %1409, %1410 : vector<8x16xi1>, vector<8x16xf32>
      %c272 = arith.constant 272 : index
      %1412 = memref.load %arg5[%c272] : memref<288xf32, #tpu.memory_space<smem>>
      %1413 = vector.broadcast %1412 : f32 to vector<8x16xf32>
      %1414 = arith.mulf %1413, %1411 : vector<8x16xf32>
      %1415 = arith.addf %1396, %1414 : vector<8x16xf32>
      %c273 = arith.constant 273 : index
      %1416 = memref.load %arg5[%c273] : memref<288xf32, #tpu.memory_space<smem>>
      %1417 = vector.broadcast %1416 : f32 to vector<8x16xf32>
      %1418 = arith.mulf %1417, %1411 : vector<8x16xf32>
      %1419 = arith.addf %1400, %1418 : vector<8x16xf32>
      %c274 = arith.constant 274 : index
      %1420 = memref.load %arg5[%c274] : memref<288xf32, #tpu.memory_space<smem>>
      %1421 = vector.broadcast %1420 : f32 to vector<8x16xf32>
      %1422 = arith.mulf %1421, %1411 : vector<8x16xf32>
      %1423 = arith.addf %1404, %1422 : vector<8x16xf32>
      %c275 = arith.constant 275 : index
      %1424 = memref.load %arg5[%c275] : memref<288xf32, #tpu.memory_space<smem>>
      %1425 = vector.broadcast %1424 : f32 to vector<8x16xf32>
      %1426 = arith.mulf %1425, %1411 : vector<8x16xf32>
      %1427 = arith.addf %1408, %1426 : vector<8x16xf32>
      %c2_i32_246 = arith.constant 2 : i32
      %1428 = arith.addi %89, %c2_i32_246 : i32
      %c7_247 = arith.constant 7 : index
      %1429 = arith.index_cast %1428 : i32 to index
      %c0_248 = arith.constant 0 : index
      %1430 = vector.load %arg8[%c7_247, %1429, %c0_248] : memref<8x18x16xf32, #tpu.memory_space<vmem>>, vector<1x8x16xf32>
      %1431 = vector.shape_cast %1430 : vector<1x8x16xf32> to vector<8x16xf32>
      %c1_i32_249 = arith.constant 1 : i32
      %1432 = tpu.dynamic_rotate %1431 by %c1_i32_249 dim 1 : vector<8x16xf32>, i32 -> vector<8x16xf32>
      %cst_250 = arith.constant 0.000000e+00 : f32
      %1433 = vector.broadcast %cst_250 : f32 to vector<8x16xf32>
      %1434 = arith.select %52, %1432, %1433 : vector<8x16xi1>, vector<8x16xf32>
      %c276 = arith.constant 276 : index
      %1435 = memref.load %arg5[%c276] : memref<288xf32, #tpu.memory_space<smem>>
      %1436 = vector.broadcast %1435 : f32 to vector<8x16xf32>
      %1437 = arith.mulf %1436, %1434 : vector<8x16xf32>
      %1438 = arith.addf %1415, %1437 : vector<8x16xf32>
      %c277 = arith.constant 277 : index
      %1439 = memref.load %arg5[%c277] : memref<288xf32, #tpu.memory_space<smem>>
      %1440 = vector.broadcast %1439 : f32 to vector<8x16xf32>
      %1441 = arith.mulf %1440, %1434 : vector<8x16xf32>
      %1442 = arith.addf %1419, %1441 : vector<8x16xf32>
      %c278 = arith.constant 278 : index
      %1443 = memref.load %arg5[%c278] : memref<288xf32, #tpu.memory_space<smem>>
      %1444 = vector.broadcast %1443 : f32 to vector<8x16xf32>
      %1445 = arith.mulf %1444, %1434 : vector<8x16xf32>
      %1446 = arith.addf %1423, %1445 : vector<8x16xf32>
      %c279 = arith.constant 279 : index
      %1447 = memref.load %arg5[%c279] : memref<288xf32, #tpu.memory_space<smem>>
      %1448 = vector.broadcast %1447 : f32 to vector<8x16xf32>
      %1449 = arith.mulf %1448, %1434 : vector<8x16xf32>
      %1450 = arith.addf %1427, %1449 : vector<8x16xf32>
      %c280 = arith.constant 280 : index
      %1451 = memref.load %arg5[%c280] : memref<288xf32, #tpu.memory_space<smem>>
      %1452 = vector.broadcast %1451 : f32 to vector<8x16xf32>
      %1453 = arith.mulf %1452, %1431 : vector<8x16xf32>
      %1454 = arith.addf %1438, %1453 : vector<8x16xf32>
      %c281 = arith.constant 281 : index
      %1455 = memref.load %arg5[%c281] : memref<288xf32, #tpu.memory_space<smem>>
      %1456 = vector.broadcast %1455 : f32 to vector<8x16xf32>
      %1457 = arith.mulf %1456, %1431 : vector<8x16xf32>
      %1458 = arith.addf %1442, %1457 : vector<8x16xf32>
      %c282 = arith.constant 282 : index
      %1459 = memref.load %arg5[%c282] : memref<288xf32, #tpu.memory_space<smem>>
      %1460 = vector.broadcast %1459 : f32 to vector<8x16xf32>
      %1461 = arith.mulf %1460, %1431 : vector<8x16xf32>
      %1462 = arith.addf %1446, %1461 : vector<8x16xf32>
      %c283 = arith.constant 283 : index
      %1463 = memref.load %arg5[%c283] : memref<288xf32, #tpu.memory_space<smem>>
      %1464 = vector.broadcast %1463 : f32 to vector<8x16xf32>
      %1465 = arith.mulf %1464, %1431 : vector<8x16xf32>
      %1466 = arith.addf %1450, %1465 : vector<8x16xf32>
      %c15_i32_251 = arith.constant 15 : i32
      %1467 = tpu.dynamic_rotate %1431 by %c15_i32_251 dim 1 : vector<8x16xf32>, i32 -> vector<8x16xf32>
      %cst_252 = arith.constant 0.000000e+00 : f32
      %1468 = vector.broadcast %cst_252 : f32 to vector<8x16xf32>
      %1469 = arith.select %54, %1467, %1468 : vector<8x16xi1>, vector<8x16xf32>
      %c284 = arith.constant 284 : index
      %1470 = memref.load %arg5[%c284] : memref<288xf32, #tpu.memory_space<smem>>
      %1471 = vector.broadcast %1470 : f32 to vector<8x16xf32>
      %1472 = arith.mulf %1471, %1469 : vector<8x16xf32>
      %1473 = arith.addf %1454, %1472 : vector<8x16xf32>
      %c285 = arith.constant 285 : index
      %1474 = memref.load %arg5[%c285] : memref<288xf32, #tpu.memory_space<smem>>
      %1475 = vector.broadcast %1474 : f32 to vector<8x16xf32>
      %1476 = arith.mulf %1475, %1469 : vector<8x16xf32>
      %1477 = arith.addf %1458, %1476 : vector<8x16xf32>
      %c286 = arith.constant 286 : index
      %1478 = memref.load %arg5[%c286] : memref<288xf32, #tpu.memory_space<smem>>
      %1479 = vector.broadcast %1478 : f32 to vector<8x16xf32>
      %1480 = arith.mulf %1479, %1469 : vector<8x16xf32>
      %1481 = arith.addf %1462, %1480 : vector<8x16xf32>
      %c287 = arith.constant 287 : index
      %1482 = memref.load %arg5[%c287] : memref<288xf32, #tpu.memory_space<smem>>
      %1483 = vector.broadcast %1482 : f32 to vector<8x16xf32>
      %1484 = arith.mulf %1483, %1469 : vector<8x16xf32>
      %1485 = arith.addf %1466, %1484 : vector<8x16xf32>
      %c0_253 = arith.constant 0 : index
      %c0_254 = arith.constant 0 : index
      %1486 = arith.index_cast %89 : i32 to index
      %c0_255 = arith.constant 0 : index
      %1487 = vector.load %arg6[%c0_253, %c0_254, %1486, %c0_255] : memref<1x4x16x16xf32, #tpu.memory_space<vmem>>, vector<1x1x8x16xf32>
      %1488 = vector.shape_cast %1487 : vector<1x1x8x16xf32> to vector<8x16xf32>
      %1489 = vector.shape_cast %1473 : vector<8x16xf32> to vector<1x1x8x16xf32>
      tpu.vector_store %arg6[%c0_253, %c0_254, %1486, %c0_255], %1489 {strides = array<i32>} : memref<1x4x16x16xf32, #tpu.memory_space<vmem>>, vector<1x1x8x16xf32>,
      %c0_256 = arith.constant 0 : index
      %c1_257 = arith.constant 1 : index
      %1490 = arith.index_cast %89 : i32 to index
      %c0_258 = arith.constant 0 : index
      %1491 = vector.load %arg6[%c0_256, %c1_257, %1490, %c0_258] : memref<1x4x16x16xf32, #tpu.memory_space<vmem>>, vector<1x1x8x16xf32>
      %1492 = vector.shape_cast %1491 : vector<1x1x8x16xf32> to vector<8x16xf32>
      %1493 = vector.shape_cast %1477 : vector<8x16xf32> to vector<1x1x8x16xf32>
      tpu.vector_store %arg6[%c0_256, %c1_257, %1490, %c0_258], %1493 {strides = array<i32>} : memref<1x4x16x16xf32, #tpu.memory_space<vmem>>, vector<1x1x8x16xf32>,
      %c0_259 = arith.constant 0 : index
      %c2_260 = arith.constant 2 : index
      %1494 = arith.index_cast %89 : i32 to index
      %c0_261 = arith.constant 0 : index
      %1495 = vector.load %arg6[%c0_259, %c2_260, %1494, %c0_261] : memref<1x4x16x16xf32, #tpu.memory_space<vmem>>, vector<1x1x8x16xf32>
      %1496 = vector.shape_cast %1495 : vector<1x1x8x16xf32> to vector<8x16xf32>
      %1497 = vector.shape_cast %1481 : vector<8x16xf32> to vector<1x1x8x16xf32>
      tpu.vector_store %arg6[%c0_259, %c2_260, %1494, %c0_261], %1497 {strides = array<i32>} : memref<1x4x16x16xf32, #tpu.memory_space<vmem>>, vector<1x1x8x16xf32>,
      %c0_262 = arith.constant 0 : index
      %c3_263 = arith.constant 3 : index
      %1498 = arith.index_cast %89 : i32 to index
      %c0_264 = arith.constant 0 : index
      %1499 = vector.load %arg6[%c0_262, %c3_263, %1498, %c0_264] : memref<1x4x16x16xf32, #tpu.memory_space<vmem>>, vector<1x1x8x16xf32>
      %1500 = vector.shape_cast %1499 : vector<1x1x8x16xf32> to vector<8x16xf32>
      %1501 = vector.shape_cast %1485 : vector<8x16xf32> to vector<1x1x8x16xf32>
      tpu.vector_store %arg6[%c0_262, %c3_263, %1498, %c0_264], %1501 {strides = array<i32>} : memref<1x4x16x16xf32, #tpu.memory_space<vmem>>, vector<1x1x8x16xf32>,
    }
    %c2_i32_45 = arith.constant 2 : i32
    %c0_46 = arith.constant 0 : index
    %c0_47 = arith.constant 0 : index
    %c0_48 = arith.constant 0 : index
    %c0_49 = arith.constant 0 : index
    %56 = vector.load %arg6[%c0_46, %c0_47, %c0_48, %c0_49] : memref<1x4x16x16xf32, #tpu.memory_space<vmem>>, vector<1x1x16x16xf32>
    %57 = vector.shape_cast %56 : vector<1x1x16x16xf32> to vector<16x16xf32>
    %cst_50 = arith.constant dense<0.000000e+00> : vector<16xf32>
    %58 = vector.multi_reduction <add>, %57, %cst_50 [0] : vector<16x16xf32> to vector<16xf32>
    %59 = vector.shape_cast %58 : vector<16xf32> to vector<1x16xf32>
    %60 = arith.mulf %57, %57 : vector<16x16xf32>
    %cst_51 = arith.constant dense<0.000000e+00> : vector<16xf32>
    %61 = vector.multi_reduction <add>, %60, %cst_51 [0] : vector<16x16xf32> to vector<16xf32>
    %62 = vector.shape_cast %61 : vector<16xf32> to vector<1x16xf32>
    %c0_52 = arith.constant 0 : index
    %c1_53 = arith.constant 1 : index
    %c0_54 = arith.constant 0 : index
    %c0_55 = arith.constant 0 : index
    %63 = vector.load %arg6[%c0_52, %c1_53, %c0_54, %c0_55] : memref<1x4x16x16xf32, #tpu.memory_space<vmem>>, vector<1x1x16x16xf32>
    %64 = vector.shape_cast %63 : vector<1x1x16x16xf32> to vector<16x16xf32>
    %cst_56 = arith.constant dense<0.000000e+00> : vector<16xf32>
    %65 = vector.multi_reduction <add>, %64, %cst_56 [0] : vector<16x16xf32> to vector<16xf32>
    %66 = vector.shape_cast %65 : vector<16xf32> to vector<1x16xf32>
    %67 = arith.mulf %64, %64 : vector<16x16xf32>
    %cst_57 = arith.constant dense<0.000000e+00> : vector<16xf32>
    %68 = vector.multi_reduction <add>, %67, %cst_57 [0] : vector<16x16xf32> to vector<16xf32>
    %69 = vector.shape_cast %68 : vector<16xf32> to vector<1x16xf32>
    %c0_58 = arith.constant 0 : index
    %c2_59 = arith.constant 2 : index
    %c0_60 = arith.constant 0 : index
    %c0_61 = arith.constant 0 : index
    %70 = vector.load %arg6[%c0_58, %c2_59, %c0_60, %c0_61] : memref<1x4x16x16xf32, #tpu.memory_space<vmem>>, vector<1x1x16x16xf32>
    %71 = vector.shape_cast %70 : vector<1x1x16x16xf32> to vector<16x16xf32>
    %cst_62 = arith.constant dense<0.000000e+00> : vector<16xf32>
    %72 = vector.multi_reduction <add>, %71, %cst_62 [0] : vector<16x16xf32> to vector<16xf32>
    %73 = vector.shape_cast %72 : vector<16xf32> to vector<1x16xf32>
    %74 = arith.mulf %71, %71 : vector<16x16xf32>
    %cst_63 = arith.constant dense<0.000000e+00> : vector<16xf32>
    %75 = vector.multi_reduction <add>, %74, %cst_63 [0] : vector<16x16xf32> to vector<16xf32>
    %76 = vector.shape_cast %75 : vector<16xf32> to vector<1x16xf32>
    %c0_64 = arith.constant 0 : index
    %c3_65 = arith.constant 3 : index
    %c0_66 = arith.constant 0 : index
    %c0_67 = arith.constant 0 : index
    %77 = vector.load %arg6[%c0_64, %c3_65, %c0_66, %c0_67] : memref<1x4x16x16xf32, #tpu.memory_space<vmem>>, vector<1x1x16x16xf32>
    %78 = vector.shape_cast %77 : vector<1x1x16x16xf32> to vector<16x16xf32>
    %cst_68 = arith.constant dense<0.000000e+00> : vector<16xf32>
    %79 = vector.multi_reduction <add>, %78, %cst_68 [0] : vector<16x16xf32> to vector<16xf32>
    %80 = vector.shape_cast %79 : vector<16xf32> to vector<1x16xf32>
    %81 = arith.mulf %78, %78 : vector<16x16xf32>
    %cst_69 = arith.constant dense<0.000000e+00> : vector<16xf32>
    %82 = vector.multi_reduction <add>, %81, %cst_69 [0] : vector<16x16xf32> to vector<16xf32>
    %83 = vector.shape_cast %82 : vector<16xf32> to vector<1x16xf32>
    %84 = tpu.concatenate %59, %66, %73, %80, %62, %69, %76, %83 in 0 : vector<1x16xf32>, vector<1x16xf32>, vector<1x16xf32>, vector<1x16xf32>, vector<1x16xf32>, vector<1x16xf32>, vector<1x16xf32>, vector<1x16xf32> -> vector<8x16xf32>
    %c0_70 = arith.constant 0 : index
    %c0_71 = arith.constant 0 : index
    %c0_72 = arith.constant 0 : index
    %85 = vector.load %arg7[%c0_70, %c0_71, %c0_72] : memref<1x8x16xf32, #tpu.memory_space<vmem>>, vector<1x8x16xf32>
    %86 = vector.shape_cast %85 : vector<1x8x16xf32> to vector<8x16xf32>
    %87 = vector.shape_cast %84 : vector<8x16xf32> to vector<1x8x16xf32>
    tpu.vector_store %arg7[%c0_70, %c0_71, %c0_72], %87 {strides = array<i32>} : memref<1x8x16xf32, #tpu.memory_space<vmem>>, vector<1x8x16xf32>,
    return
  }
  func.func @transform_0(%arg0: i32) -> (i32, i32, i32) {
    %c0_i32 = arith.constant 0 : i32
    %c0_i32_0 = arith.constant 0 : i32
    %c0_i32_1 = arith.constant 0 : i32
    return %arg0, %c0_i32, %c0_i32_0 : i32, i32, i32
  }
  func.func @transform_1(%arg0: i32) -> (i32, i32, i32, i32) {
    %c0_i32 = arith.constant 0 : i32
    %c0_i32_0 = arith.constant 0 : i32
    %c0_i32_1 = arith.constant 0 : i32
    %c0_i32_2 = arith.constant 0 : i32
    return %arg0, %c0_i32, %c0_i32_0, %c0_i32_1 : i32, i32, i32, i32
  }
  func.func @transform_2(%arg0: i32) -> (i32, i32) {
    %c0_i32 = arith.constant 0 : i32
    %c0_i32_0 = arith.constant 0 : i32
    %c0_i32_1 = arith.constant 0 : i32
    return %c0_i32, %c0_i32_0 : i32, i32
  }
  func.func @transform_3(%arg0: i32) -> (i32, i32) {
    %c0_i32 = arith.constant 0 : i32
    %c0_i32_0 = arith.constant 0 : i32
    %c0_i32_1 = arith.constant 0 : i32
    return %c0_i32, %c0_i32_0 : i32, i32
  }
  func.func @transform_4(%arg0: i32) -> i32 {
    %c0_i32 = arith.constant 0 : i32
    %c0_i32_0 = arith.constant 0 : i32
    return %c0_i32 : i32
  }
  func.func @transform_5(%arg0: i32) -> (i32, i32, i32, i32) {
    %c0_i32 = arith.constant 0 : i32
    %c0_i32_0 = arith.constant 0 : i32
    %c0_i32_1 = arith.constant 0 : i32
    %c0_i32_2 = arith.constant 0 : i32
    return %arg0, %c0_i32, %c0_i32_0, %c0_i32_1 : i32, i32, i32, i32
  }
  func.func @transform_6(%arg0: i32) -> (i32, i32, i32) {
    %c0_i32 = arith.constant 0 : i32
    %c0_i32_0 = arith.constant 0 : i32
    %c0_i32_1 = arith.constant 0 : i32
    return %arg0, %c0_i32, %c0_i32_0 : i32, i32, i32
  }
}

</mosaic_0001>

<bundles_post_ra>
// kernel: up_forward.5
= control target key start
LH: loop header
LB: loop body
LE: loop exit
PB: predicated region body
PF: predicated region fallthrough
CT: control target
= control target key end

     0   :  { %8 = vsyncpa [#allocation4], 0  ;;  %s759_s0 = inlined_call_operand.vmem [shape: f32[2,4,16,16], index: 0, kind: input, shape index: {}]   ;;  %s760_s1 = inlined_call_operand.vmem [shape: f32[4], index: 1, kind: input, shape index: {}]   ;;  %s761_s2 = inlined_call_operand.vmem [shape: f32[4], index: 2, kind: input, shape index: {}]   ;;  %s762_s3 = inlined_call_operand.hbm [shape: f32[2,4,16,16], index: 3, kind: output, shape index: {}]  }
   0x1   :  { %9 = vsyncpa [#allocation6], 0 }
   0x2   :  { %10 = vsyncpa [#allocation3], 0 }
   0x3   :  { %12 = vsyncpa [#allocation3 + $0x1], 0  ;;  %s580_s12 = smov 0   ;;  %s582_s13 = smov 0  }
   0x4   :  { %s584_s14 = smov 0   ;;  %s586_s15 = smov 0  }
   0x5 LB: > { %s601_s16 = sadd.s32 4294967295, %s553_s15   ;;  %s357_s17 = sadd.s32 4294967294, %s553_s15   ;;  %s553_s15 = sphi %s586_s15, %s780_s15   ;;  %s549_s14 = sphi %s584_s14, %s779_s14   ;;  %s545_s13 = sphi %s582_s13, %s778_s13   ;;  %s541_s12 = sphi %s580_s12, %s777_s12  }
   0x6   : > { %s605_s18 = sadd.s32 1, %s553_s15   ;;  %s93_s19 = sadd.s32 1, %s549_s14 }
   0x7   : > { %s90_s20 = ssub.s32 %s553_s15, %s605_s18  ;;  %p103_p0 = scmp.ne.s32.totalorder %s549_s14, %s545_s13 }
   0x8   : > { %p91_p1 = scmp.eq.s32.totalorder %s90_s20, 0  ;;  %p104_p2 = scmp.eq.s32.totalorder %s601_s16, 1 }
   0x9   : > { %p109_p3 = scmp.ne.s32.totalorder %s545_s13, %s541_s12  ;;  %p110_p4 = scmp.eq.s32.totalorder %s357_s17, 1 }
   0xa   : > { %s616_s21 = scalar_select %p91_p1, %s549_s14, %s93_s19  }
   0xb   : > { %p618_p5 = por %p104_p2, %p103_p0  ;;  %p622_p6 = por %p110_p4, %p109_p3 }
   0xc   : > { %p358_p7 = scmp.ge.s32.totalorder %s553_s15, 1  ;;  %p117_p8 = scmp.lt.s32.totalorder %s553_s15, 3 }
   0xd   : > { %s766_s22 = scalar_select %p618_p5, 1, 0 }
   0xe   : > { %s767_s23 = scalar_select %p622_p6, 1, 0 }
   0xf   : > { %p763_p9 = scmp.eq.s32.totalorder %s601_s16, 0  ;;  %p629_p10 = pnand %p358_p7, %p117_p8 }
  0x10   : > { %s130_s27 = sshll.u32 %s760_s1, 4  ;;  %s141_s30 = sshll.u32 %s761_s2, 4  ;;  %s131_s27 = int_to_ptr.vmem [resolvable:$true] %s130_s27  ;;  %s142_s30 = int_to_ptr.vmem [resolvable:$true] %s141_s30 }
  0x11   : > { %s768_s24 = scalar_select %p629_p10, 1, 0 }
  0x12   : > { %p403_p11 = pneg %p629_p10  ;;  %s455_s5 = scalar_lea.vmem %s131_s27, 16 }
  0x13   : > { %p456_p13 = scmp.ne.s32.totalorder %s131_s27, %s455_s5  ;;  %p463_p3 = scmp.lt.s32.totalorder %s131_s27, %s131_s27 }
  0x14   : > { %p643_p12 = pnand %p763_p9, %p403_p11  ;;  %p464_p4 = scmp.lt.s32.totalorder %s455_s5, %s455_s5 }
  0x16   : > { %p457_p0 = pneg %p643_p12  ;;  %p465_p7 = por %p464_p4, %p463_p3 }
  0x18   : > { %p458_p1 = pnand %p457_p0, %p456_p13 }
  0x1a   : > { %p459_p2 = pneg %p458_p1 }
  0x1c   : > { %p466_p8 = pnand %p465_p7, %p459_p2 }
  0x1e   : > { %469 = shalt.err (!%p466_p8)
}
  0x1f   : > { %s555_s6 = smov [#allocation2]   ;;  %s470_s7 = scalar_lea.vmem %s142_s30, 16 }
  0x20   : > { %406 = dma.vmem_to_smem (!%p643_p12), %s131_s27, 16, %s555_s6, [#allocation4]  }
  0x21   : > { %p471_p11 = scmp.ne.s32.totalorder %s142_s30, %s470_s7  ;;  %p478_p5 = scmp.lt.s32.totalorder %s142_s30, %s142_s30 }
  0x22   : > { %p479_p10 = scmp.lt.s32.totalorder %s470_s7, %s470_s7 }
  0x23   : > { %p473_p9 = pnand %p471_p11, %p457_p0 }
  0x24   : > { %p480_p13 = por %p479_p10, %p478_p5 }
  0x25   : > { %p474_p6 = pneg %p473_p9 }
  0x27   : > { %p481_p1 = pnand %p480_p13, %p474_p6 }
  0x29   : > { %484 = shalt.err (!%p481_p1)
}
  0x2a   : > { %s556_s8 = smov [#allocation5]   ;;  %p770_p2 = scmp.ne.s32.totalorder %s768_s24, 0 }
  0x2b   : > { %409 = dma.vmem_to_smem (!%p643_p12), %s142_s30, 16, %s556_s8, [#allocation6]  }
  0x2c   : > { %162 = sbr.rel (%p770_p2) target bundleno = 91 (0x5b), region = 32  ;;  %p771_p3 = scmp.eq.s32.totalorder (!%p770_p2), %s601_s16, 0 }
  0x31   : > { %528 = dma.done.wait (%p771_p3), [#allocation4], 16   ;;  %p772_p4 = pmov %p771_p3 }
  0x32   : > { %p773_p9 = pmov %p771_p3 }
  0x33   : > { %530 = vsyncadd (%p772_p4), [#allocation4], 4294967280 }
  0x34   : > { %532 = dma.done.wait (%p773_p9), [#allocation6], 16   ;;  %p774_p5 = pmov %p771_p3 }
  0x36   : > { %534 = vsyncadd (%p774_p5), [#allocation6], 4294967280 }
  0x37   : > { %172 = sfence }
  0x38   : > { %p191_p6 = scmp.lt.s32.totalorder %s601_s16, 1  ;;  %s198_s9 = sld [smem:[#allocation2]]  ;;  %vm208_vm0 = vcmask 130048  }
  0x39   : > { %s202_s10 = sld [smem:[#allocation5]]  ;;  %s188_s17 = sand.u32 1, %s545_s13  }
  0x3a   : > { %s192_s11 = scalar_select %p191_p6, %s601_s16, 1 }
  0x3b   : > { %s370_s26 = sld [smem:[#allocation2 + $0x1]]  ;;  %s365_s28 = sshll.u32 %s188_s17, 6 }
  0x3c   : > { %s391_s19 = sshll.u32 %s192_s11, 6  ;;  %s371_s27 = sld [smem:[#allocation5 + $0x1]] }
  0x3d   : > { %s669_s25 = scalar_lea.vmem %s759_s0, %s391_s19  ;;  %s376_s29 = sld [smem:[#allocation2 + $0x2]] }
  0x3e   : > { %v196_v0 = vld [vmem:[%s669_s25] sm:$0xff]  ;;  %v199_v1 = vstv %s198_s9  ;;  %v197_v2 = vld [vmem:[%s669_s25 + $0x8] sm:$0xff]  ;;  %s675_s30 = sld [smem:[#allocation5 + $0x2]]  ;;  %v368_v8 = vld [vmem:[%s669_s25 + $0x10] sm:$0xff]  ;;  %s685_s6 = scalar_lea.vmem [#allocation7], %s365_s28 }
  0x3f   : > { %v200_v3 = vmul.f32 %v199_v1, %v196_v0  ;;  %v203_v4 = vstv %s202_s10  ;;  %v201_v5 = vmul.f32 %v199_v1, %v197_v2  ;;  %v369_v9 = vld [vmem:[%s669_s25 + $0x18] sm:$0xff]  ;;  %s679_s4 = sld [smem:[#allocation2 + $0x3]]  ;;  %v374_v13 = vld [vmem:[%s669_s25 + $0x20] sm:$0xff]  ;;  %v375_v17 = vld [vmem:[%s669_s25 + $0x28] sm:$0xff]  ;;  %s273_s7 = sshll.u32 %s685_s6, 4  ;;  %s702_s7 = int_to_ptr.vmem [resolvable:$true] %s273_s7 }
  0x40   : > { %s681_s5 = sld [smem:[#allocation5 + $0x3]]  ;;  %v380_v19 = vld [vmem:[%s669_s25 + $0x30] sm:$0xff]  ;;  %v381_v24 = vld [vmem:[%s669_s25 + $0x38] sm:$0xff]  ;;  %s392_s8 = sshll.u32 %s601_s16, 10 }
  0x41   : > { %v204_v6 = vadd.f32 %v203_v4, %v200_v3  ;;  %v205_v7 = vadd.f32 %v203_v4, %v201_v5  ;;  %v215_v12 = vstv %s370_s26  ;;  %s709_s16 = scalar_lea.hbm %s762_s3, %s392_s8  ;;  %s719_s11 = scalar_lea.sflag [#allocation3], %s188_s17 }
  0x42   : > { %v216_v14 = vmul.f32 %v368_v8, %v215_v12  ;;  %v219_v15 = vstv %s371_s27  ;;  %v217_v16 = vmul.f32 %v369_v9, %v215_v12  ;;  %s485_s19 = scalar_lea.vmem %s702_s7, 1024  ;;  %p775_p12 = scmp.ne.s32.totalorder %s766_s22, 0 }
  0x43   : > { %v206_v10 = vmax.f32 %v204_v6, 0.0  ;;  %v207_v11 = vmax.f32 %v205_v7, 0.0  ;;  %v231_v18 = vstv %s376_s29  ;;  %p486_p10 = scmp.ne.s32.totalorder %s702_s7, %s485_s19  ;;  %s557_s20 = smov [#allocation7]  }
  0x44   : > { %v220_v20 = vadd.f32 %v219_v15, %v216_v14  ;;  %v221_v21 = vadd.f32 %v219_v15, %v217_v16  ;;  %v232_v22 = vmul.f32 %v374_v13, %v231_v18  ;;  %v235_v23 = vstv %s675_s30  ;;  %s489_s24 = sshll.u32 %s557_s20, 4  ;;  %s490_s24 = int_to_ptr.vmem [resolvable:$false] %s489_s24 }
  0x45   : > { %209 = vst.msk [vmem:[%s685_s6] sm:$0xff] %vm208_vm0, %v206_v10  ;;  %210 = vst.msk [vmem:[%s685_s6 + $0x8] sm:$0xff] %vm208_vm0, %v207_v11  ;;  %v233_v25 = vmul.f32 %v375_v17, %v231_v18  ;;  %v247_v26 = vstv %s679_s4  ;;  %p487_p0 = pnand %p486_p10, %p775_p12  ;;  %s491_s25 = scalar_lea.vmem %s490_s24, 2048 }
  0x46   : > { %v222_v27 = vmax.f32 %v220_v20, 0.0  ;;  %v223_v28 = vmax.f32 %v221_v21, 0.0  ;;  %v236_v29 = vadd.f32 %v235_v23, %v232_v22  ;;  %v248_v30 = vmul.f32 %v380_v19, %v247_v26  ;;  %p492_p8 = scmp.lt.s32.totalorder %s702_s7, %s490_s24  ;;  %p493_p11 = scmp.lt.s32.totalorder %s491_s25, %s485_s19 }
  0x47   : > { %v237_v31 = vadd.f32 %v235_v23, %v233_v25  ;;  %v251_v32 = vstv %s681_s5  ;;  %v249_v33 = vmul.f32 %v381_v24, %v247_v26  ;;  %p488_p7 = pneg %p487_p0 }
  0x48   : > { %372 = vst.msk [vmem:[%s685_s6 + $0x10] sm:$0xff] %vm208_vm0, %v222_v27  ;;  %373 = vst.msk [vmem:[%s685_s6 + $0x18] sm:$0xff] %vm208_vm0, %v223_v28  ;;  %v238_v34 = vmax.f32 %v236_v29, 0.0  ;;  %v252_v35 = vadd.f32 %v251_v32, %v248_v30  ;;  %p494_p13 = por %p493_p11, %p492_p8 }
  0x49   : > { %v239_v36 = vmax.f32 %v237_v31, 0.0  ;;  %v253_v37 = vadd.f32 %v251_v32, %v249_v33 }
  0x4a   : > { %378 = vst.msk [vmem:[%s685_s6 + $0x20] sm:$0xff] %vm208_vm0, %v238_v34  ;;  %v254_v38 = vmax.f32 %v252_v35, 0.0  ;;  %p495_p1 = pnand %p494_p13, %p488_p7 }
  0x4b   : > { %379 = vst.msk [vmem:[%s685_s6 + $0x28] sm:$0xff] %vm208_vm0, %v239_v36  ;;  %v255_v39 = vmax.f32 %v253_v37, 0.0 }
  0x4c   : > { %384 = vst.msk [vmem:[%s685_s6 + $0x30] sm:$0xff] %vm208_vm0, %v254_v38 }
  0x4d   : > { %385 = vst.msk [vmem:[%s685_s6 + $0x38] sm:$0xff] %vm208_vm0, %v255_v39 }
  0x4e   : > { %498 = shalt.err (!%p495_p1)
}
  0x4f   : > { %s499_s17 = scalar_lea.hbm %s709_s16, 1024  ;;  %s503_s28 = scalar_lea.hbm %s762_s3, 2048 }
  0x50   : > { %p500_p2 = scmp.ne.s32.totalorder %s709_s16, %s499_s17  ;;  %p504_p9 = scmp.lt.s32.totalorder %s709_s16, %s762_s3 }
  0x51   : > { %p505_p5 = scmp.lt.s32.totalorder %s503_s28, %s499_s17 }
  0x52   : > { %p501_p3 = pnand %p500_p2, %p775_p12 }
  0x53   : > { %p506_p6 = por %p505_p5, %p504_p9 }
  0x54   : > { %p502_p4 = pneg %p501_p3 }
  0x56   : > { %p507_p10 = pnand %p506_p6, %p502_p4 }
  0x58   : > { %510 = shalt.err (!%p507_p10)
}
  0x59   : > { %s558_s4 = smov 128   ;;  %s559_s5 = smov 8  }
  0x5a   : > { %401 = dma.vmem_to_hbm [thread:$0]  (%p775_p12), %s702_s7, 1024, %s709_s16, %s719_s11, %s558_s4, %s558_s4, %s559_s5  }
  0x5b PF: > { %p418_p0 = scmp.ge.s32.totalorder %s553_s15, 2  ;;  %s288_s6 = sand.u32 1, %s541_s12  }
  0x5c   : > { %p776_p7 = scmp.ne.s32.totalorder %s767_s23, 0  ;;  %s289_s8 = scalar_lea.sflag [#allocation3], %s288_s6 }
  0x5e   : > { %p411_p8 = pnand %p418_p0, %p776_p7 }
  0x60   : > { %p412_p11 = pneg %p411_p8 }
  0x62   : > { %536 = dma.done.wait (%p412_p11), %s289_s8, 1024  }
  0x63   : > { %538 = vsyncadd (%p412_p11), %s289_s8, 4294966272  ;;  %p15_p13 = scmp.ge.s32.totalorder %s605_s18, 4   ;;  %s777_s12 = smov %s545_s13 }
  0x64   : > { %s778_s13 = smov %s549_s14  ;;  %s779_s14 = smov %s616_s21 }
  0x65   : > { %s780_s15 = smov %s605_s18  ;;  %17 = sbr.rel (!%p15_p13) target bundleno = 5 (0x5), region = 82 }
  0x6a   :  { %294 = vsyncpa [#allocation3], 1 }
  0x6b   :  { %296 = vsyncpa [#allocation3 + $0x1], 1 }
  0x6c   :  { %297 = vsyncpa [#allocation4], 1 }
  0x6d   :  { %299 = vsyncpa [#allocation4 + $0x1], 1 }
  0x6e   :  { %300 = vsyncpa [#allocation6], 1 }

// kernel: up_forward.4
= control target key start
LH: loop header
LB: loop body
LE: loop exit
PB: predicated region body
PF: predicated region fallthrough
CT: control target
= control target key end

     0   :  { %s2680_s0 = inlined_call_operand.vmem [shape: f32[2,4,16,16], index: 0, kind: input, shape index: {}]   ;;  %s2681_s1 = inlined_call_operand.vmem [shape: f32[4], index: 1, kind: input, shape index: {}]   ;;  %s2682_s2 = inlined_call_operand.vmem [shape: f32[4], index: 2, kind: input, shape index: {}]   ;;  %s2683_s3 = inlined_call_operand.vmem [shape: f32[144], index: 3, kind: input, shape index: {}]   ;;  %s2684_s4 = inlined_call_operand.vmem [shape: f32[2,4,16,16], index: 4, kind: output, shape index: {0}]   ;;  %s2685_s5 = inlined_call_operand.vmem [shape: f32[2,8,16], index: 5, kind: output, shape index: {1}]  }
   0x1   :  { %2691 = sst [smem:[#allocation10_spill]] %s2680_s0 }
   0x2   :  { %2692 = sst [smem:[#allocation11_spill]] %s2681_s1 }
   0x3   :  { %2693 = sst [smem:[#allocation12_spill]] %s2682_s2 }
   0x4   :  { %2694 = sst [smem:[#allocation13_spill]] %s2683_s3 }
   0x5   :  { %2695 = sst [smem:[#allocation14_spill]] %s2684_s4 }
   0x6   :  { %2696 = sst [smem:[#allocation15_spill]] %s2685_s5 }
   0x7   :  { %11 = vsyncpa [#allocation4], 0 }
   0x8   :  { %12 = vsyncpa [#allocation6], 0  ;;  %s1839_s18 = smov 0  }
   0x9 LB: > { %s1845_s19 = sadd.s32 4294967295, %s1797_s18   ;;  %p1472_p0 = scmp.ge.s32.totalorder %s1797_s18, 1  ;;  %s1797_s18 = sphi %s1839_s18, %s18_s18  }
   0xa   : > { %p164_p1 = scmp.lt.s32.totalorder %s1797_s18, 3  ;;  %s2697_s2 = sld [smem:[#allocation12_spill]] }
   0xb   : > { %p2686_p3 = scmp.eq.s32.totalorder %s1845_s19, 0  ;;  %s2699_s1 = sld [smem:[#allocation11_spill]] }
   0xc   : > { %p1852_p2 = pnand %p1472_p0, %p164_p1  ;;  %s2700_s3 = sld [smem:[#allocation13_spill]] }
   0xe   : > { %s2698_s23 = scalar_select %p1852_p2, 1, 0 }
   0xf   : > { %p1692_p4 = pneg %p1852_p2 }
  0x10   : > { %s188_s22 = sshll.u32 %s2697_s2, 4  ;;  %s189_s22 = int_to_ptr.vmem [resolvable:$true] %s188_s22 }
  0x11   : > { %s177_s26 = sshll.u32 %s2699_s1, 4  ;;  %p1867_p5 = pnand %p2686_p3, %p1692_p4  ;;  %s178_s26 = int_to_ptr.vmem [resolvable:$true] %s177_s26 }
  0x12   : > { %s199_s29 = sshll.u32 %s2700_s3, 4  ;;  %s1734_s6 = scalar_lea.vmem %s189_s22, 16  ;;  %s1871_s29 = int_to_ptr.vmem [resolvable:$true] %s199_s29 }
  0x13   : > { %p1735_p6 = scmp.ne.s32.totalorder %s189_s22, %s1734_s6  ;;  %p1736_p7 = pneg %p1867_p5 }
  0x14   : > { %p1742_p10 = scmp.lt.s32.totalorder %s189_s22, %s189_s22  ;;  %p1743_p11 = scmp.lt.s32.totalorder %s1734_s6, %s1734_s6 }
  0x15   : > { %p1737_p8 = pnand %p1736_p7, %p1735_p6 }
  0x16   : > { %p1744_p12 = por %p1743_p11, %p1742_p10 }
  0x17   : > { %p1738_p9 = pneg %p1737_p8 }
  0x19   : > { %p1745_p13 = pnand %p1744_p12, %p1738_p9 }
  0x1b   : > { %1748 = shalt.err (!%p1745_p13)
}
  0x1c   : > { %s1803_s7 = smov [#allocation5]   ;;  %s1749_s8 = scalar_lea.vmem %s178_s26, 16 }
  0x1d   : > { %1698 = dma.vmem_to_smem (!%p1867_p5), %s189_s22, 16, %s1803_s7, [#allocation6]  }
  0x1e   : > { %p1750_p0 = scmp.ne.s32.totalorder %s178_s26, %s1749_s8  ;;  %p1757_p3 = scmp.lt.s32.totalorder %s178_s26, %s178_s26 }
  0x1f   : > { %p1758_p2 = scmp.lt.s32.totalorder %s1749_s8, %s1749_s8 }
  0x20   : > { %p1752_p1 = pnand %p1750_p0, %p1736_p7 }
  0x21   : > { %p1759_p6 = por %p1758_p2, %p1757_p3 }
  0x22   : > { %p1753_p4 = pneg %p1752_p1 }
  0x24   : > { %p1760_p8 = pnand %p1759_p6, %p1753_p4 }
  0x26   : > { %1763 = shalt.err (!%p1760_p8)
}
  0x27   : > { %s1804_s9 = smov [#allocation3]   ;;  %s1764_s10 = scalar_lea.vmem %s1871_s29, 32 }
  0x28   : > { %1695 = dma.vmem_to_smem (!%p1867_p5), %s178_s26, 16, %s1804_s9, [#allocation4]  }
  0x29   : > { %p1765_p9 = scmp.ne.s32.totalorder %s1871_s29, %s1764_s10  ;;  %p1772_p12 = scmp.lt.s32.totalorder %s1871_s29, %s1871_s29 }
  0x2a   : > { %p1773_p13 = scmp.lt.s32.totalorder %s1764_s10, %s1764_s10 }
  0x2b   : > { %p1767_p10 = pnand %p1765_p9, %p1736_p7 }
  0x2c   : > { %p1774_p2 = por %p1773_p13, %p1772_p12 }
  0x2d   : > { %p1768_p11 = pneg %p1767_p10 }
  0x2f   : > { %p1775_p3 = pnand %p1774_p2, %p1768_p11 }
  0x31   : > { %1778 = shalt.err (!%p1775_p3)
}
  0x32   : > { %s1805_s11 = smov [#allocation7]   ;;  %p2702_p0 = scmp.ne.s32.totalorder %s2698_s23, 0 }
  0x33   : > { %1701 = dma.vmem_to_smem (!%p1867_p5), %s1871_s29, 32, %s1805_s11, [#allocation6]  }
  0x34   : > { %220 = sbr.rel (%p2702_p0) target bundleno = 616 (0x268), region = 36  ;;  %p2703_p1 = scmp.eq.s32.totalorder (!%p2702_p0), %s1845_s19, 0 }
  0x39   : > { %1788 = dma.done.wait (%p2703_p1), [#allocation4], 16   ;;  %p2704_p7 = pmov %p2703_p1 }
  0x3a   : > { %p2705_p4 = pmov %p2703_p1 }
  0x3b   : > { %1790 = vsyncadd (%p2704_p7), [#allocation4], 4294967280 }
  0x3c   : > { %1792 = dma.done.wait (%p2705_p4), [#allocation6], 48   ;;  %p2706_p6 = pmov %p2703_p1 }
  0x3e   : > { %1794 = vsyncadd (%p2706_p6), [#allocation6], 4294967248 }
  0x3f   : > { %234 = sfence }
  0x40   : > { %p261_p8 = scmp.lt.s32.totalorder %s1845_s19, 1  ;;  %s277_s12 = sld [smem:[#allocation3]]  ;;  %v384_v0 = vlaneseq  ;;  %vm289_vm2 = vcmask 1040384   ;;  %vm298_vm3 = vcmask 130048   ;;  %vm301_vm4 = vcmask 123904  }
  0x41   : > { %s281_s13 = sld [smem:[#allocation5]]  ;;  %s1970_s7 = smov 0  }
  0x42   : > { %s2714_s19 = smov (!%p261_p8, %s1845_s19), 1  ;;  %v1907_v1 = vand.u32 127, %v384_v0  ;;  %s1488_s14 = sld [smem:[#allocation3 + $0x1]] }
  0x43   : > { %s1678_s15 = sshll.u32 %s2714_s19, 6  ;;  %s1485_s16 = sshll.u32 %s2714_s19, 3 }
  0x44   : > { %vm386_vm0 = vcmp.ge.s32.totalorder %v1907_v1, 1  ;;  %vm387_vm1 = vcmp.lt.s32.totalorder %v1907_v1, 15  ;;  %s2707_s0 = sld [smem:[#allocation10_spill]] }
  0x45   : > { %s2708_s4 = sld [smem:[#allocation14_spill]] }
  0x46   : > { %s2709_s5 = sld [smem:[#allocation15_spill]]  ;;  %v278_v4 = vstv %s277_s12 }
  0x47   : > { %s1489_s27 = sld [smem:[#allocation5 + $0x1]]  ;;  %v282_v7 = vstv %s281_s13 }
  0x48   : > { %s1930_s28 = sld [smem:[#allocation3 + $0x2]]  ;;  %v307_v12 = vstv %s1488_s14 }
  0x49   : > { %s1932_s29 = sld [smem:[#allocation5 + $0x2]] }
  0x4a   : > { %s1914_s21 = scalar_lea.vmem %s2707_s0, %s1678_s15  ;;  %s1934_s30 = sld [smem:[#allocation3 + $0x3]] }
  0x4b   : > { %s1919_s24 = scalar_lea.vmem %s2708_s4, %s1678_s15  ;;  %v275_v2 = vld [vmem:[%s1914_s21] sm:$0xff]  ;;  %v276_v3 = vld [vmem:[%s1914_s21 + $0x8] sm:$0xff]  ;;  %v1486_v8 = vld [vmem:[%s1914_s21 + $0x10] sm:$0xff]  ;;  %s1936_s6 = sld [smem:[#allocation5 + $0x3]] }
  0x4c   : > { %s1924_s26 = scalar_lea.vmem %s2709_s5, %s1485_s16  ;;  %v279_v5 = vmul.f32 %v278_v4, %v275_v2  ;;  %v280_v6 = vmul.f32 %v278_v4, %v276_v3  ;;  %v1487_v9 = vld [vmem:[%s1914_s21 + $0x18] sm:$0xff]  ;;  %v308_v13 = vmul.f32 %v1486_v8, %v307_v12  ;;  %v1490_v22 = vld [vmem:[%s1914_s21 + $0x20] sm:$0xff]  ;;  %v1491_v23 = vld [vmem:[%s1914_s21 + $0x28] sm:$0xff] }
  0x4d   : > { %v309_v14 = vmul.f32 %v1487_v9, %v307_v12  ;;  %v311_v17 = vstv %s1489_s27  ;;  %v1494_v26 = vld [vmem:[%s1914_s21 + $0x30] sm:$0xff]  ;;  %v1495_v27 = vld [vmem:[%s1914_s21 + $0x38] sm:$0xff] }
  0x4e   : > { %v283_v10 = vadd.f32 %v282_v7, %v279_v5  ;;  %v284_v11 = vadd.f32 %v282_v7, %v280_v6  ;;  %v312_v20 = vadd.f32 %v311_v17, %v308_v13  ;;  %v334_v24 = vstv %s1930_s28 }
  0x4f   : > { %v313_v21 = vadd.f32 %v311_v17, %v309_v14  ;;  %v338_v25 = vstv %s1932_s29  ;;  %v335_v33 = vmul.f32 %v1490_v22, %v334_v24  ;;  %v336_v34 = vmul.f32 %v1491_v23, %v334_v24 }
  0x50   : > { %v285_v15 = vmax.f32 %v283_v10, 0.0  ;;  %v286_v16 = vmax.f32 %v284_v11, 0.0  ;;  %v314_v31 = vmax.f32 %v312_v20, 0.0  ;;  %v361_v35 = vstv %s1934_s30 }
  0x51   : > { %v315_v32 = vmax.f32 %v313_v21, 0.0  ;;  %v362_v37 = vmul.f32 %v1494_v26, %v361_v35  ;;  %v363_v38 = vmul.f32 %v1495_v27, %v361_v35  ;;  %v365_v39 = vstv %s1936_s6 }
  0x52   : > { %v290_v18 = vrot.slane %v285_v15, 7  ;;  %v291_v19 = vrot.slane %v286_v16, 7  ;;  %v318_v36 = vrot.slane %v314_v31, 7  ;;  %v339_v41 = vadd.f32 %v338_v25, %v335_v33 }
  0x53   : > { %v319_v40 = vrot.slane %v315_v32, 7  ;;  %v340_v42 = vadd.f32 %v338_v25, %v336_v34  ;;  %v366_v44 = vadd.f32 %v365_v39, %v362_v37  ;;  %v367_v45 = vadd.f32 %v365_v39, %v363_v38 }
  0x54   : > { %v296_v28 = vsel %vm289_vm2, 0.0, %v290_v18  ;;  %v292_v29 = vsel %vm289_vm2, %v290_v18, %v291_v19  ;;  %v297_v30 = vsel %vm289_vm2, %v291_v19, 0.0  ;;  %v324_v43 = vsel %vm289_vm2, 0.0, %v318_v36 }
  0x55   : > { %299 = vst.msk [vmem:[#allocation2] sm:$0xff] %vm298_vm3, %v296_v28  ;;  %300 = vst.msk [vmem:[#allocation2 + $0x8] sm:$0xff] %vm298_vm3, %v292_v29  ;;  %v320_v46 = vsel %vm289_vm2, %v318_v36, %v319_v40  ;;  %v325_v47 = vsel %vm289_vm2, %v319_v40, 0.0  ;;  %v341_v48 = vmax.f32 %v339_v41, 0.0  ;;  %v342_v49 = vmax.f32 %v340_v42, 0.0 }
  0x56   : > { %302 = vst.msk [vmem:[#allocation2 + $0x10] sm:$0x3] %vm301_vm4, %v297_v30  ;;  %329 = vst.msk [vmem:[#allocation2 + $0x28] sm:$0x3] %vm301_vm4, %v325_v47  ;;  %v368_v50 = vmax.f32 %v366_v44, 0.0  ;;  %v369_v51 = vmax.f32 %v367_v45, 0.0 }
  0x57   : > { %327 = vst.msk [vmem:[#allocation2 + $0x18] sm:$0xff] %vm298_vm3, %v324_v43  ;;  %328 = vst.msk [vmem:[#allocation2 + $0x20] sm:$0xff] %vm298_vm3, %v320_v46  ;;  %v345_v52 = vrot.slane %v341_v48, 7  ;;  %v346_v53 = vrot.slane %v342_v49, 7 }
  0x58   : > { %v372_v54 = vrot.slane %v368_v50, 7  ;;  %v373_v55 = vrot.slane %v369_v51, 7 }
  0x59   : > { %v351_v56 = vsel %vm289_vm2, 0.0, %v345_v52  ;;  %v347_v57 = vsel %vm289_vm2, %v345_v52, %v346_v53  ;;  %v352_v58 = vsel %vm289_vm2, %v346_v53, 0.0 }
  0x5a   : > { %354 = vst.msk [vmem:[#allocation2 + $0x30] sm:$0xff] %vm298_vm3, %v351_v56  ;;  %355 = vst.msk [vmem:[#allocation2 + $0x38] sm:$0xff] %vm298_vm3, %v347_v57  ;;  %v378_v59 = vsel %vm289_vm2, 0.0, %v372_v54  ;;  %v374_v60 = vsel %vm289_vm2, %v372_v54, %v373_v55  ;;  %v379_v61 = vsel %vm289_vm2, %v373_v55, 0.0 }
  0x5b   : > { %356 = vst.msk [vmem:[#allocation2 + $0x40] sm:$0x3] %vm301_vm4, %v352_v58  ;;  %383 = vst.msk [vmem:[#allocation2 + $0x58] sm:$0x3] %vm301_vm4, %v379_v61 }
  0x5c   : > { %381 = vst.msk [vmem:[#allocation2 + $0x48] sm:$0xff] %vm298_vm3, %v378_v59  ;;  %382 = vst.msk [vmem:[#allocation2 + $0x50] sm:$0xff] %vm298_vm3, %v374_v60 }
  0x5d LB: >> { %s2688_s8 = sshll.u32 %s1801_s7, 3  ;;  %s1806_s10 = smov 16   ;;  %vm397_vm5 = vcmask 1047680   ;;  %s1801_s7 = sphi %s1970_s7, %s393_s7  }
  0x5e   : >> { %s1978_s9 = scalar_lea.vmem [#allocation2], %s2688_s8  ;;  %s2689_s11 = smov 113  }
  0x5f   : >> { %s2690_s12 = smov 127   ;;  %s2120_s13 = sld [smem:[#allocation7]] }
  0x60   : >> { %s2122_s14 = sld [smem:[#allocation7 + $0x1]] }
  0x61   : >> { %s2124_s15 = sld [smem:[#allocation7 + $0x2]] }
  0x62   : >> { %s2126_s16 = sld [smem:[#allocation7 + $0x3]] }
  0x63   : >> { %v1981_v62 = vld [vmem:[%s1978_s9] sm:$0xff]  ;;  %v1994_v2 = vld [vmem:[%s1978_s9 + $0x18] sm:$0xff]  ;;  %v2011_v5 = vld [vmem:[%s1978_s9 + $0x30] sm:$0xff]  ;;  %s2128_s17 = sld [smem:[#allocation7 + $0x4]] }
  0x64   : >> { %v1984_v63 = vld [vmem:[%s1978_s9 + $0x2] sm:$0xff]  ;;  %398 = vrot.lane.b32.xlu0 %v1981_v62, %s1806_s10  ;;  %v2001_v3 = vld [vmem:[%s1978_s9 + $0x19] sm:$0xff]  ;;  %v2014_v6 = vld [vmem:[%s1978_s9 + $0x31] sm:$0xff]  ;;  %s2130_s20 = sld [smem:[#allocation7 + $0x5]] }
  0x65   : >> { %530 = vrot.lane.b32.xlu1 %v1984_v63, %s1806_s10  ;;  %v1991_v0 = vld [vmem:[%s1978_s9 + $0x1] sm:$0xff]  ;;  %v2021_v7 = vld [vmem:[%s1978_s9 + $0x32] sm:$0xff]  ;;  %v2031_v9 = vld [vmem:[%s1978_s9 + $0x49] sm:$0xff]  ;;  %s2132_s21 = sld [smem:[#allocation7 + $0x6]] }
  0x66   : >> { %v2004_v4 = vld [vmem:[%s1978_s9 + $0x1a] sm:$0xff]  ;;  %v2024_v8 = vld [vmem:[%s1978_s9 + $0x48] sm:$0xff]  ;;  %s2134_s22 = sld [smem:[#allocation7 + $0x7]]  ;;  %v410_v60 = vstv %s2120_s13  ;;  %v414_v61 = vstv %s2122_s14 }
  0x67   : >> { %v2039_v13 = vld [vmem:[%s1978_s9 + $0x4a] sm:$0xff]  ;;  %s2136_s23 = sld [smem:[#allocation7 + $0x8]] }
  0x68   : >> { %464 = vrot.lane.b32.xlu0 %v1991_v0, %s1806_s10  ;;  %s2138_s25 = sld [smem:[#allocation7 + $0x9]] }
  0x69   : >> { %596 = vrot.lane.b32.xlu1 %v1994_v2, %s1806_s10  ;;  %s2140_s19 = sld [smem:[#allocation7 + $0xa]]  ;;  %v426_v57 = vstv %s2128_s17 }
  0x6a   : >> { %s2142_s27 = sld [smem:[#allocation7 + $0xb]]  ;;  %v430_v58 = vstv %s2130_s20 }
  0x6b   : >> { %s2144_s28 = sld [smem:[#allocation7 + $0xc]]  ;;  %v434_v59 = vstv %s2132_s21 }
  0x6c   : >> { %662 = vrot.lane.b32.xlu0 %v2001_v3, %s1806_s10  ;;  %s2146_s29 = sld [smem:[#allocation7 + $0xd]] }
  0x6d   : >> { %728 = vrot.lane.b32.xlu1 %v2004_v4, %s1806_s10  ;;  %s2148_s30 = sld [smem:[#allocation7 + $0xe]] }
  0x6e   : >> { %s2150_s6 = sld [smem:[#allocation7 + $0xf]] }
  0x6f   : >> { %s2154_s8 = sld [smem:[#allocation7 + $0x11]] }
  0x70   : >> { %794 = vrot.lane.b32.xlu0 %v2011_v5, %s1806_s10  ;;  %s2160_s0 = sld [smem:[#allocation7 + $0x14]] }
  0x71   : >> { %860 = vrot.lane.b32.xlu1 %v2014_v6, %s1806_s10  ;;  %s2162_s1 = sld [smem:[#allocation7 + $0x15]] }
  0x72   : >> { %s2164_s2 = sld [smem:[#allocation7 + $0x16]] }
  0x73   : >> { %s2167_s3 = sld [smem:[#allocation7 + $0x17]] }
  0x74   : >> { %926 = vrot.lane.b32.xlu0 %v2021_v7, %s1806_s10  ;;  %s2171_s4 = sld [smem:[#allocation7 + $0x18]] }
  0x75   : >> { %992 = vrot.lane.b32.xlu1 %v2024_v8, %s1806_s10  ;;  %s2176_s5 = sld [smem:[#allocation7 + $0x19]] }
  0x76   : >> { %s2182_s17 = sld [smem:[#allocation7 + $0x1a]] }
  0x77   : >> { %s2188_s13 = sld [smem:[#allocation7 + $0x1b]] }
  0x78   : >> { %1058 = vrot.lane.b32.xlu0 %v2031_v9, %s1806_s10  ;;  %s2194_s14 = sld [smem:[#allocation7 + $0x1c]] }
  0x79   : >> { %s2220_s20 = sld [smem:[#allocation7 + $0x22]] }
  0x7a   : >> { %s2228_s21 = sld [smem:[#allocation7 + $0x23]] }
  0xd6   : >> { %v399_v10 = vpop.permute.xlu0 %398 }
  0xd7   : >> { %v531_v11 = vpop.permute.xlu1 %530  ;;  %v400_v12 = vsel %vm397_vm5, %v399_v10, %v1981_v62  ;;  %v427_v10 = vmul.f32 %v426_v57, %v1981_v62 }
  0xd8   : >> { %401 = vrot.lane.b32.xlu1 %v400_v12, %s1806_s10  ;;  %v532_v17 = vsel %vm397_vm5, %v531_v11, %v1984_v63  ;;  %v446_v11 = vstv %s2136_s23  ;;  %v431_v12 = vmul.f32 %v430_v58, %v1981_v62  ;;  %s2231_s23 = sld [smem:[#allocation7 + $0x24]]  ;;  %v520_v58 = vstv %s2164_s2 }
  0xd9   : >> { %s2250_s2 = sld [smem:[#allocation7 + $0x28]] }
  0xda   : >> { %v465_v14 = vpop.permute.xlu0 %464 }
  0xdb   : >> { %v597_v15 = vpop.permute.xlu1 %596  ;;  %v466_v16 = vsel %vm397_vm5, %v465_v14, %v1991_v0  ;;  %v435_v14 = vmul.f32 %v434_v59, %v1981_v62  ;;  %v524_v59 = vstv %s2167_s3  ;;  %s2252_s3 = sld [smem:[#allocation7 + $0x29]] }
  0xdc   : >> { %1124 = vrot.lane.b32.xlu1 %v2039_v13, %s1806_s10  ;;  %467 = vrot.lane.b32.xlu0 %v466_v16, %s1806_s10  ;;  %v598_v18 = vsel %vm397_vm5, %v597_v15, %v1994_v2  ;;  %v496_v16 = vstv %s2154_s8  ;;  %s2206_s8 = sld [smem:[#allocation7 + $0x1e]] }
  0xde   : >> { %v663_v19 = vpop.permute.xlu0 %662 }
  0xdf   : >> { %v729_v20 = vpop.permute.xlu1 %728  ;;  %v664_v21 = vsel %vm397_vm5, %v663_v19, %v2001_v3 }
  0xe0   : >> { %533 = vrot.lane.b32.xlu0 %v532_v17, %s1806_s10  ;;  %599 = vrot.lane.b32.xlu1 %v598_v18, %s1806_s10  ;;  %v730_v22 = vsel %vm397_vm5, %v729_v20, %v2004_v4  ;;  %v450_v18 = vstv %s2138_s25  ;;  %s2711_s25 = smov 113  }
  0xe2   : >> { %v795_v23 = vpop.permute.xlu0 %794 }
  0xe3   : >> { %v861_v24 = vpop.permute.xlu1 %860  ;;  %v796_v25 = vsel %vm397_vm5, %v795_v23, %v2011_v5  ;;  %v476_v23 = vstv %s2144_s28  ;;  %s2264_s28 = sld [smem:[#allocation7 + $0x2d]] }
  0xe4   : >> { %665 = vrot.lane.b32.xlu0 %v664_v21, %s1806_s10  ;;  %731 = vrot.lane.b32.xlu1 %v730_v22, %s1806_s10  ;;  %v862_v26 = vsel %vm397_vm5, %v861_v24, %v2014_v6  ;;  %v454_v21 = vstv %s2140_s19  ;;  %v458_v22 = vstv %s2142_s27  ;;  %s2242_s19 = sld [smem:[#allocation7 + $0x27]] }
  0xe5   : >> { %v480_v24 = vstv %s2146_s29  ;;  %s2262_s27 = sld [smem:[#allocation7 + $0x2c]] }
  0xe6   : >> { %v927_v27 = vpop.permute.xlu0 %926  ;;  %s2266_s29 = sld [smem:[#allocation7 + $0x2e]] }
  0xe7   : >> { %v993_v28 = vpop.permute.xlu1 %992  ;;  %v928_v29 = vsel %vm397_vm5, %v927_v27, %v2021_v7  ;;  %v484_v27 = vstv %s2148_s30  ;;  %s2271_s30 = sld [smem:[#allocation7 + $0x2f]] }
  0xe8   : >> { %797 = vrot.lane.b32.xlu0 %v796_v25, %s1806_s10  ;;  %863 = vrot.lane.b32.xlu1 %v862_v26, %s1806_s10  ;;  %v994_v30 = vsel %vm397_vm5, %v993_v28, %v2024_v8  ;;  %v488_v28 = vstv %s2150_s6  ;;  %s2275_s6 = sld [smem:[#allocation7 + $0x30]] }
  0xea   : >> { %v1059_v31 = vpop.permute.xlu0 %1058 }
  0xeb   : >> { %v1060_v32 = vsel %vm397_vm5, %v1059_v31, %v2031_v9 }
  0xec   : >> { %929 = vrot.lane.b32.xlu0 %v928_v29, %s1806_s10  ;;  %995 = vrot.lane.b32.xlu1 %v994_v30, %s1806_s10  ;;  %v497_v30 = vmul.f32 %v1991_v0, %v496_v16  ;;  %v554_v16 = vstv %s2188_s13  ;;  %s2290_s13 = sld [smem:[#allocation7 + $0x33]] }
  0xf0   : >> { %1061 = vrot.lane.b32.xlu0 %v1060_v32, %s1806_s10 }
 0x14a   : >> { %v402_v33 = vpop.permute.xlu1 %401 }
 0x14b   : >> { %v403_v34 = vsel %vm397_vm5, %v402_v33, %v1981_v62 }
 0x14c   : >> { %405 = vrot.lane.b32.xlu1 %v403_v34, %s2689_s11  ;;  %441 = vrot.lane.b32.xlu0 %v403_v34, %s2690_s12 }
 0x14e   : >> { %v1125_v35 = vpop.permute.xlu1 %1124  ;;  %v468_v36 = vpop.permute.xlu0 %467 }
 0x14f   : >> { %v1126_v37 = vsel %vm397_vm5, %v1125_v35, %v2039_v13  ;;  %v469_v38 = vsel %vm397_vm5, %v468_v36, %v1991_v0 }
 0x150   : >> { %1127 = vrot.lane.b32.xlu0 %v1126_v37, %s1806_s10  ;;  %471 = vrot.lane.b32.xlu1 %v469_v38, %s2689_s11  ;;  %s2152_s10 = sld [smem:[#allocation7 + $0x10]] }
 0x152   : >> { %v534_v39 = vpop.permute.xlu0 %533  ;;  %v600_v40 = vpop.permute.xlu1 %599 }
 0x153   : >> { %v535_v41 = vsel %vm397_vm5, %v534_v39, %v1984_v63  ;;  %v601_v42 = vsel %vm397_vm5, %v600_v40, %v1994_v2 }
 0x154   : >> { %507 = vrot.lane.b32.xlu1 %v469_v38, %s2690_s12  ;;  %537 = vrot.lane.b32.xlu0 %v535_v41, %s2689_s11 }
 0x156   : >> { %v666_v43 = vpop.permute.xlu0 %665  ;;  %v732_v45 = vpop.permute.xlu1 %731  ;;  %v492_v15 = vstv %s2152_s10  ;;  %s2280_s10 = sld [smem:[#allocation7 + $0x31]] }
 0x157   : >> { %v667_v44 = vsel %vm397_vm5, %v666_v43, %v2001_v3  ;;  %v733_v46 = vsel %vm397_vm5, %v732_v45, %v2004_v4  ;;  %v493_v29 = vmul.f32 %v1991_v0, %v492_v15  ;;  %v550_v15 = vstv %s2182_s17  ;;  %s2284_s17 = sld [smem:[#allocation7 + $0x32]] }
 0x158   : >> { %573 = vrot.lane.b32.xlu1 %v535_v41, %s2690_s12  ;;  %603 = vrot.lane.b32.xlu0 %v601_v42, %s2689_s11 }
 0x15a   : >> { %v798_v47 = vpop.permute.xlu0 %797  ;;  %v864_v49 = vpop.permute.xlu1 %863 }
 0x15b   : >> { %v799_v48 = vsel %vm397_vm5, %v798_v47, %v2011_v5  ;;  %v865_v50 = vsel %vm397_vm5, %v864_v49, %v2014_v6  ;;  %v512_v49 = vstv %s2160_s0  ;;  %s2234_s0 = sld [smem:[#allocation7 + $0x25]] }
 0x15c   : >> { %639 = vrot.lane.b32.xlu1 %v601_v42, %s2690_s12  ;;  %669 = vrot.lane.b32.xlu0 %v667_v44, %s2689_s11 }
 0x15e   : >> { %v930_v51 = vpop.permute.xlu0 %929  ;;  %v996_v53 = vpop.permute.xlu1 %995 }
 0x15f   : >> { %v931_v52 = vsel %vm397_vm5, %v930_v51, %v2021_v7  ;;  %v997_v54 = vsel %vm397_vm5, %v996_v53, %v2024_v8  ;;  %v438_v7 = vstv %s2134_s22  ;;  %v418_v8 = vstv %s2124_s15  ;;  %s2200_s15 = sld [smem:[#allocation7 + $0x1d]]  ;;  %s2710_s22 = smov 127  }
 0x160   : >> { %705 = vrot.lane.b32.xlu1 %v667_v44, %s2690_s12  ;;  %735 = vrot.lane.b32.xlu0 %v733_v46, %s2689_s11  ;;  %v439_v17 = vmul.f32 %v438_v7, %v1981_v62  ;;  %v546_v7 = vstv %s2176_s5  ;;  %s2260_s5 = sld [smem:[#allocation7 + $0x2b]] }
 0x162   : >> { %v1062_v55 = vpop.permute.xlu0 %1061 }
 0x163   : >> { %v1063_v56 = vsel %vm397_vm5, %v1062_v55, %v2031_v9  ;;  %v422_v9 = vstv %s2126_s16  ;;  %s2218_s16 = sld [smem:[#allocation7 + $0x21]] }
 0x164   : >> { %771 = vrot.lane.b32.xlu1 %v733_v46, %s2690_s12  ;;  %801 = vrot.lane.b32.xlu0 %v799_v48, %s2689_s11 }
 0x168   : >> { %837 = vrot.lane.b32.xlu1 %v799_v48, %s2690_s12  ;;  %867 = vrot.lane.b32.xlu0 %v865_v50, %s2689_s11 }
 0x16c   : >> { %903 = vrot.lane.b32.xlu1 %v865_v50, %s2690_s12  ;;  %933 = vrot.lane.b32.xlu0 %v931_v52, %s2689_s11  ;;  %v516_v50 = vstv %s2162_s1  ;;  %s2240_s1 = sld [smem:[#allocation7 + $0x26]] }
 0x170   : >> { %969 = vrot.lane.b32.xlu1 %v931_v52, %s2690_s12  ;;  %999 = vrot.lane.b32.xlu0 %v997_v54, %s2689_s11 }
 0x174   : >> { %1035 = vrot.lane.b32.xlu1 %v997_v54, %s2690_s12  ;;  %1065 = vrot.lane.b32.xlu0 %v1063_v56, %s2689_s11  ;;  %s2156_s11 = sld [smem:[#allocation7 + $0x12]] }
 0x178   : >> { %1101 = vrot.lane.b32.xlu1 %v1063_v56, %s2690_s12  ;;  %s2158_s12 = sld [smem:[#allocation7 + $0x13]] }
 0x17a   : >> { %v500_v19 = vstv %s2156_s11  ;;  %s2214_s11 = sld [smem:[#allocation7 + $0x1f]] }
 0x17b   : >> { %v501_v32 = vmul.f32 %v1991_v0, %v500_v19 }
 0x17e   : >> { %v504_v20 = vstv %s2158_s12  ;;  %s2216_s12 = sld [smem:[#allocation7 + $0x20]] }
 0x17f   : >> { %v505_v33 = vmul.f32 %v1991_v0, %v504_v20 }
 0x1be   : >> { %v406_v25 = vpop.permute.xlu1 %405  ;;  %v442_v26 = vpop.permute.xlu0 %441 }
 0x1bf   : >> { %v408_v62 = vsel %vm386_vm0, %v406_v25, 0.0  ;;  %v444_v31 = vsel %vm387_vm1, %v442_v26, 0.0  ;;  %v558_v26 = vstv %s2194_s14  ;;  %s2292_s14 = sld [smem:[#allocation7 + $0x34]] }
 0x1c0   : >> { %v411_v34 = vmul.f32 %v410_v60, %v408_v62  ;;  %v415_v35 = vmul.f32 %v414_v61, %v408_v62  ;;  %v419_v36 = vmul.f32 %v418_v8, %v408_v62  ;;  %v423_v37 = vmul.f32 %v422_v9, %v408_v62 }
 0x1c1   : >> { %v447_v38 = vmul.f32 %v446_v11, %v444_v31  ;;  %v451_v39 = vmul.f32 %v450_v18, %v444_v31  ;;  %v455_v40 = vmul.f32 %v454_v21, %v444_v31  ;;  %v459_v41 = vmul.f32 %v458_v22, %v444_v31 }
 0x1c2   : >> { %v428_v42 = vadd.f32 %v427_v10, %v411_v34  ;;  %v432_v43 = vadd.f32 %v431_v12, %v415_v35  ;;  %v436_v44 = vadd.f32 %v435_v14, %v419_v36  ;;  %v440_v0 = vadd.f32 %v439_v17, %v423_v37  ;;  %v472_v45 = vpop.permute.xlu1 %471  ;;  %v1128_v46 = vpop.permute.xlu0 %1127 }
 0x1c3   : >> { %v474_v47 = vsel %vm386_vm0, %v472_v45, 0.0  ;;  %v1129_v48 = vsel %vm397_vm5, %v1128_v46, %v2039_v13  ;;  %v542_v61 = vstv %s2171_s4  ;;  %s2254_s4 = sld [smem:[#allocation7 + $0x2a]]  ;;  %v570_v62 = vstv %s2214_s11 }
 0x1c4   : >> { %v448_v51 = vadd.f32 %v447_v38, %v428_v42  ;;  %v452_v52 = vadd.f32 %v451_v39, %v432_v43  ;;  %v456_v53 = vadd.f32 %v455_v40, %v436_v44  ;;  %v460_v54 = vadd.f32 %v459_v41, %v440_v0  ;;  %1167 = vrot.lane.b32.xlu1 %v1129_v48, %s2710_s22  ;;  %s2304_s11 = sld [smem:[#allocation7 + $0x37]] }
 0x1c5   : >> { %v477_v55 = vmul.f32 %v476_v23, %v474_v47  ;;  %v481_v56 = vmul.f32 %v480_v24, %v474_v47  ;;  %v485_v57 = vmul.f32 %v484_v27, %v474_v47  ;;  %v489_v13 = vmul.f32 %v488_v28, %v474_v47  ;;  %1131 = vrot.lane.b32.xlu0 %v1129_v48, %s2711_s25  ;;  %s2319_s22 = sld [smem:[#allocation7 + $0x3c]] }
 0x1c6   : >> { %v508_v60 = vpop.permute.xlu1 %507  ;;  %v538_v8 = vpop.permute.xlu0 %537  ;;  %v562_v27 = vstv %s2200_s15  ;;  %v566_v28 = vstv %s2206_s8  ;;  %v559_v38 = vmul.f32 %v1984_v63, %v558_v26  ;;  %v571_v43 = vmul.f32 %v1984_v63, %v570_v62  ;;  %s2294_s15 = sld [smem:[#allocation7 + $0x35]] }
 0x1c7   : >> { %v478_v9 = vadd.f32 %v477_v55, %v448_v51  ;;  %v482_v10 = vadd.f32 %v481_v56, %v452_v52  ;;  %v486_v11 = vadd.f32 %v485_v57, %v456_v53  ;;  %v490_v12 = vadd.f32 %v489_v13, %v460_v54  ;;  %s2298_s8 = sld [smem:[#allocation7 + $0x36]] }
 0x1c8   : >> { %v510_v14 = vsel %vm387_vm1, %v508_v60, 0.0  ;;  %v540_v17 = vsel %vm386_vm0, %v538_v8, 0.0  ;;  %v563_v39 = vmul.f32 %v1984_v63, %v562_v27  ;;  %v567_v40 = vmul.f32 %v1984_v63, %v566_v28  ;;  %s2328_s25 = sld [smem:[#allocation7 + $0x3e]] }
 0x1c9   : >> { %v494_v18 = vadd.f32 %v493_v29, %v478_v9  ;;  %v498_v19 = vadd.f32 %v497_v30, %v482_v10  ;;  %v502_v20 = vadd.f32 %v501_v32, %v486_v11  ;;  %v506_v21 = vadd.f32 %v505_v33, %v490_v12 }
 0x1ca   : >> { %v513_v22 = vmul.f32 %v512_v49, %v510_v14  ;;  %v517_v23 = vmul.f32 %v516_v50, %v510_v14  ;;  %v521_v24 = vmul.f32 %v520_v58, %v510_v14  ;;  %v525_v25 = vmul.f32 %v524_v59, %v510_v14  ;;  %v574_v37 = vpop.permute.xlu1 %573  ;;  %v604_v0 = vpop.permute.xlu0 %603 }
 0x1cb   : >> { %v543_v29 = vmul.f32 %v542_v61, %v540_v17  ;;  %v547_v30 = vmul.f32 %v546_v7, %v540_v17  ;;  %v551_v35 = vmul.f32 %v550_v15, %v540_v17  ;;  %v555_v36 = vmul.f32 %v554_v16, %v540_v17 }
 0x1cc   : >> { %v514_v31 = vadd.f32 %v513_v22, %v494_v18  ;;  %v518_v34 = vadd.f32 %v517_v23, %v498_v19  ;;  %v522_v32 = vadd.f32 %v521_v24, %v502_v20  ;;  %v526_v33 = vadd.f32 %v525_v25, %v506_v21 }
 0x1cd   : >> { %v578_v44 = vstv %s2216_s12  ;;  %v582_v47 = vstv %s2218_s16  ;;  %v576_v48 = vsel %vm387_vm1, %v574_v37, 0.0  ;;  %v586_v49 = vstv %s2220_s20  ;;  %s2306_s12 = sld [smem:[#allocation7 + $0x38]] }
 0x1ce   : >> { %v544_v41 = vadd.f32 %v543_v29, %v514_v31  ;;  %v548_v42 = vadd.f32 %v547_v30, %v518_v34  ;;  %v552_v45 = vadd.f32 %v551_v35, %v522_v32  ;;  %v556_v46 = vadd.f32 %v555_v36, %v526_v33  ;;  %s2308_s16 = sld [smem:[#allocation7 + $0x39]]  ;;  %v640_v20 = vpop.permute.xlu1 %639  ;;  %v670_v28 = vpop.permute.xlu0 %669 }
 0x1cf   : >> { %v590_v50 = vstv %s2228_s21  ;;  %v608_v51 = vstv %s2231_s23  ;;  %v612_v63 = vstv %s2234_s0  ;;  %v606_v52 = vsel %vm386_vm0, %v604_v0, 0.0  ;;  %s2310_s20 = sld [smem:[#allocation7 + $0x3a]] }
 0x1d0   : >> { %v560_v53 = vadd.f32 %v559_v38, %v544_v41  ;;  %v564_v54 = vadd.f32 %v563_v39, %v548_v42  ;;  %v579_v55 = vmul.f32 %v578_v44, %v576_v48  ;;  %v583_v56 = vmul.f32 %v582_v47, %v576_v48  ;;  %s2315_s21 = sld [smem:[#allocation7 + $0x3b]] }
 0x1d1   : >> { %v568_v57 = vadd.f32 %v567_v40, %v552_v45  ;;  %v572_v13 = vadd.f32 %v571_v43, %v556_v46  ;;  %v587_v58 = vmul.f32 %v586_v49, %v576_v48  ;;  %v591_v59 = vmul.f32 %v590_v50, %v576_v48  ;;  %s2324_s23 = sld [smem:[#allocation7 + $0x3d]] }
 0x1d2   : >> { %v616_v60 = vstv %s2240_s1  ;;  %v620_v61 = vstv %s2242_s19  ;;  %v624_v7 = vstv %s2250_s2  ;;  %v628_v8 = vstv %s2252_s3  ;;  %s2334_s0 = sld [smem:[#allocation7 + $0x3f]] }
 0x1d3   : >> { %v632_v9 = vstv %s2254_s4  ;;  %v636_v10 = vstv %s2260_s5  ;;  %v580_v11 = vadd.f32 %v579_v55, %v560_v53  ;;  %v584_v12 = vadd.f32 %v583_v56, %v564_v54  ;;  %s2336_s1 = sld [smem:[#allocation7 + $0x40]]  ;;  %v706_v56 = vpop.permute.xlu1 %705 }
 0x1d4   : >> { %v609_v14 = vmul.f32 %v608_v51, %v606_v52  ;;  %v613_v15 = vmul.f32 %v612_v63, %v606_v52  ;;  %v588_v16 = vadd.f32 %v587_v58, %v568_v57  ;;  %v592_v17 = vadd.f32 %v591_v59, %v572_v13  ;;  %s2338_s19 = sld [smem:[#allocation7 + $0x41]] }
 0x1d5   : >> { %v617_v18 = vmul.f32 %v616_v60, %v606_v52  ;;  %v621_v19 = vmul.f32 %v620_v61, %v606_v52  ;;  %v625_v21 = vmul.f32 %v1994_v2, %v624_v7  ;;  %v629_v22 = vmul.f32 %v1994_v2, %v628_v8  ;;  %s2342_s2 = sld [smem:[#allocation7 + $0x42]]  ;;  %v736_v8 = vpop.permute.xlu0 %735 }
 0x1d6   : >> { %v633_v23 = vmul.f32 %v1994_v2, %v632_v9  ;;  %v610_v24 = vadd.f32 %v609_v14, %v580_v11  ;;  %v614_v25 = vadd.f32 %v613_v15, %v584_v12  ;;  %v637_v26 = vmul.f32 %v1994_v2, %v636_v10  ;;  %s2348_s3 = sld [smem:[#allocation7 + $0x43]] }
 0x1d7   : >> { %v644_v27 = vstv %s2262_s27  ;;  %v618_v62 = vadd.f32 %v617_v18, %v588_v16  ;;  %v622_v31 = vadd.f32 %v621_v19, %v592_v17  ;;  %v648_v34 = vstv %s2264_s28  ;;  %s2350_s4 = sld [smem:[#allocation7 + $0x44]] }
 0x1d8   : >> { %v642_v29 = vsel %vm387_vm1, %v640_v20, 0.0  ;;  %v652_v30 = vstv %s2266_s29  ;;  %v656_v32 = vstv %s2271_s30  ;;  %v674_v33 = vstv %s2275_s6  ;;  %s2352_s5 = sld [smem:[#allocation7 + $0x45]] }
 0x1d9   : >> { %v678_v2 = vstv %s2280_s10  ;;  %v672_v35 = vsel %vm386_vm0, %v670_v28, 0.0  ;;  %v626_v36 = vadd.f32 %v625_v21, %v610_v24  ;;  %v630_v37 = vadd.f32 %v629_v22, %v614_v25  ;;  %s2354_s27 = sld [smem:[#allocation7 + $0x46]] }
 0x1da   : >> { %v645_v38 = vmul.f32 %v644_v27, %v642_v29  ;;  %v649_v39 = vmul.f32 %v648_v34, %v642_v29  ;;  %v634_v40 = vadd.f32 %v633_v23, %v618_v62  ;;  %v638_v41 = vadd.f32 %v637_v26, %v622_v31  ;;  %s2359_s28 = sld [smem:[#allocation7 + $0x47]] }
 0x1db   : >> { %v653_v42 = vmul.f32 %v652_v30, %v642_v29  ;;  %v657_v43 = vmul.f32 %v656_v32, %v642_v29  ;;  %v682_v44 = vstv %s2284_s17  ;;  %v686_v0 = vstv %s2290_s13  ;;  %s2363_s29 = sld [smem:[#allocation7 + $0x48]] }
 0x1dc   : >> { %v690_v45 = vstv %s2292_s14  ;;  %v694_v46 = vstv %s2294_s15  ;;  %v698_v47 = vstv %s2298_s8  ;;  %v702_v48 = vstv %s2304_s11  ;;  %s2368_s30 = sld [smem:[#allocation7 + $0x49]] }
 0x1dd   : >> { %v646_v49 = vadd.f32 %v645_v38, %v626_v36  ;;  %v650_v50 = vadd.f32 %v649_v39, %v630_v37  ;;  %v675_v51 = vmul.f32 %v674_v33, %v672_v35  ;;  %v679_v63 = vmul.f32 %v678_v2, %v672_v35  ;;  %s2372_s6 = sld [smem:[#allocation7 + $0x4a]]  ;;  %v772_v38 = vpop.permute.xlu1 %771 }
 0x1de   : >> { %v654_v52 = vadd.f32 %v653_v42, %v634_v40  ;;  %v658_v53 = vadd.f32 %v657_v43, %v638_v41  ;;  %v683_v54 = vmul.f32 %v682_v44, %v672_v35  ;;  %v687_v55 = vmul.f32 %v686_v0, %v672_v35  ;;  %s2378_s10 = sld [smem:[#allocation7 + $0x4b]] }
 0x1df   : >> { %v691_v57 = vmul.f32 %v2001_v3, %v690_v45  ;;  %v695_v13 = vmul.f32 %v2001_v3, %v694_v46  ;;  %v699_v58 = vmul.f32 %v2001_v3, %v698_v47  ;;  %v676_v59 = vadd.f32 %v675_v51, %v646_v49  ;;  %s2380_s17 = sld [smem:[#allocation7 + $0x4c]]  ;;  %v802_v45 = vpop.permute.xlu0 %801 }
 0x1e0   : >> { %v680_v60 = vadd.f32 %v679_v63, %v650_v50  ;;  %v703_v61 = vmul.f32 %v2001_v3, %v702_v48  ;;  %v710_v7 = vstv %s2306_s12  ;;  %v684_v9 = vadd.f32 %v683_v54, %v654_v52  ;;  %s2382_s13 = sld [smem:[#allocation7 + $0x4d]] }
 0x1e1   : >> { %v688_v10 = vadd.f32 %v687_v55, %v658_v53  ;;  %v714_v11 = vstv %s2308_s16  ;;  %v708_v12 = vsel %vm387_vm1, %v706_v56, 0.0  ;;  %v718_v14 = vstv %s2310_s20  ;;  %s2386_s14 = sld [smem:[#allocation7 + $0x4e]] }
 0x1e2   : >> { %v722_v15 = vstv %s2315_s21  ;;  %v740_v16 = vstv %s2319_s22  ;;  %v744_v3 = vstv %s2324_s23  ;;  %v738_v17 = vsel %vm386_vm0, %v736_v8, 0.0  ;;  %s2392_s15 = sld [smem:[#allocation7 + $0x4f]] }
 0x1e3   : >> { %v692_v18 = vadd.f32 %v691_v57, %v676_v59  ;;  %v696_v19 = vadd.f32 %v695_v13, %v680_v60  ;;  %v711_v20 = vmul.f32 %v710_v7, %v708_v12  ;;  %v715_v21 = vmul.f32 %v714_v11, %v708_v12  ;;  %s2394_s8 = sld [smem:[#allocation7 + $0x50]] }
 0x1e4   : >> { %v700_v22 = vadd.f32 %v699_v58, %v684_v9  ;;  %v704_v23 = vadd.f32 %v703_v61, %v688_v10  ;;  %v719_v24 = vmul.f32 %v718_v14, %v708_v12  ;;  %v723_v25 = vmul.f32 %v722_v15, %v708_v12  ;;  %s2396_s11 = sld [smem:[#allocation7 + $0x51]] }
 0x1e5   : >> { %v748_v26 = vstv %s2328_s25  ;;  %v752_v27 = vstv %s2334_s0  ;;  %v756_v28 = vstv %s2336_s1  ;;  %v760_v62 = vstv %s2338_s19  ;;  %s2398_s12 = sld [smem:[#allocation7 + $0x52]] }
 0x1e6   : >> { %v764_v31 = vstv %s2342_s2  ;;  %v768_v34 = vstv %s2348_s3  ;;  %v712_v29 = vadd.f32 %v711_v20, %v692_v18  ;;  %v716_v30 = vadd.f32 %v715_v21, %v696_v19  ;;  %s2403_s16 = sld [smem:[#allocation7 + $0x53]]  ;;  %v838_v19 = vpop.permute.xlu1 %837 }
 0x1e7   : >> { %v741_v32 = vmul.f32 %v740_v16, %v738_v17  ;;  %v745_v33 = vmul.f32 %v744_v3, %v738_v17  ;;  %v720_v2 = vadd.f32 %v719_v24, %v700_v22  ;;  %v724_v35 = vadd.f32 %v723_v25, %v704_v23  ;;  %s2407_s20 = sld [smem:[#allocation7 + $0x54]] }
 0x1e8   : >> { %v749_v36 = vmul.f32 %v748_v26, %v738_v17  ;;  %v753_v37 = vmul.f32 %v752_v27, %v738_v17  ;;  %v757_v39 = vmul.f32 %v2004_v4, %v756_v28  ;;  %v761_v40 = vmul.f32 %v2004_v4, %v760_v62  ;;  %s2412_s21 = sld [smem:[#allocation7 + $0x55]]  ;;  %v868_v27 = vpop.permute.xlu0 %867 }
 0x1e9   : >> { %v765_v41 = vmul.f32 %v2004_v4, %v764_v31  ;;  %v742_v42 = vadd.f32 %v741_v32, %v712_v29  ;;  %v746_v43 = vadd.f32 %v745_v33, %v716_v30  ;;  %v769_v44 = vmul.f32 %v2004_v4, %v768_v34  ;;  %s2416_s22 = sld [smem:[#allocation7 + $0x56]] }
 0x1ea   : >> { %v776_v0 = vstv %s2350_s4  ;;  %v750_v46 = vadd.f32 %v749_v36, %v720_v2  ;;  %v754_v47 = vadd.f32 %v753_v37, %v724_v35  ;;  %v780_v48 = vstv %s2352_s5  ;;  %s2422_s23 = sld [smem:[#allocation7 + $0x57]] }
 0x1eb   : >> { %v774_v49 = vsel %vm387_vm1, %v772_v38, 0.0  ;;  %v784_v50 = vstv %s2354_s27  ;;  %v788_v51 = vstv %s2359_s28  ;;  %v806_v63 = vstv %s2363_s29  ;;  %s2424_s25 = sld [smem:[#allocation7 + $0x58]] }
 0x1ec   : >> { %v810_v4 = vstv %s2368_s30  ;;  %v804_v52 = vsel %vm386_vm0, %v802_v45, 0.0  ;;  %v758_v53 = vadd.f32 %v757_v39, %v742_v42  ;;  %v762_v54 = vadd.f32 %v761_v40, %v746_v43  ;;  %s2426_s0 = sld [smem:[#allocation7 + $0x59]] }
 0x1ed   : >> { %v777_v55 = vmul.f32 %v776_v0, %v774_v49  ;;  %v781_v56 = vmul.f32 %v780_v48, %v774_v49  ;;  %v766_v57 = vadd.f32 %v765_v41, %v750_v46  ;;  %v770_v13 = vadd.f32 %v769_v44, %v754_v47  ;;  %s2430_s1 = sld [smem:[#allocation7 + $0x5a]] }
 0x1ee   : >> { %v785_v58 = vmul.f32 %v784_v50, %v774_v49  ;;  %v789_v59 = vmul.f32 %v788_v51, %v774_v49  ;;  %v814_v60 = vstv %s2372_s6  ;;  %v818_v61 = vstv %s2378_s10  ;;  %s2436_s19 = sld [smem:[#allocation7 + $0x5b]] }
 0x1ef   : >> { %v822_v7 = vstv %s2380_s17  ;;  %v826_v8 = vstv %s2382_s13  ;;  %v830_v9 = vstv %s2386_s14  ;;  %v834_v10 = vstv %s2392_s15  ;;  %s2438_s2 = sld [smem:[#allocation7 + $0x5c]] }
 0x1f0   : >> { %v778_v11 = vadd.f32 %v777_v55, %v758_v53  ;;  %v782_v12 = vadd.f32 %v781_v56, %v762_v54  ;;  %v807_v14 = vmul.f32 %v806_v63, %v804_v52  ;;  %v811_v15 = vmul.f32 %v810_v4, %v804_v52  ;;  %s2440_s3 = sld [smem:[#allocation7 + $0x5d]]  ;;  %v904_v53 = vpop.permute.xlu1 %903 }
 0x1f1   : >> { %v786_v16 = vadd.f32 %v785_v58, %v766_v57  ;;  %v790_v3 = vadd.f32 %v789_v59, %v770_v13  ;;  %v815_v17 = vmul.f32 %v814_v60, %v804_v52  ;;  %v819_v18 = vmul.f32 %v818_v61, %v804_v52  ;;  %s2442_s4 = sld [smem:[#allocation7 + $0x5e]]  ;;  %v934_v60 = vpop.permute.xlu0 %933 }
 0x1f2   : >> { %v823_v20 = vmul.f32 %v2011_v5, %v822_v7  ;;  %v827_v21 = vmul.f32 %v2011_v5, %v826_v8  ;;  %v831_v22 = vmul.f32 %v2011_v5, %v830_v9  ;;  %s2447_s5 = sld [smem:[#allocation7 + $0x5f]]  ;;  %v808_v23 = vadd.f32 %v807_v14, %v778_v11 }
 0x1f3   : >> { %v812_v24 = vadd.f32 %v811_v15, %v782_v12  ;;  %v835_v25 = vmul.f32 %v2011_v5, %v834_v10  ;;  %v842_v26 = vstv %s2394_s8  ;;  %s2451_s27 = sld [smem:[#allocation7 + $0x60]]  ;;  %v816_v28 = vadd.f32 %v815_v17, %v786_v16 }
 0x1f4   : >> { %v820_v62 = vadd.f32 %v819_v18, %v790_v3  ;;  %v846_v31 = vstv %s2396_s11  ;;  %v840_v34 = vsel %vm387_vm1, %v838_v19, 0.0  ;;  %s2456_s28 = sld [smem:[#allocation7 + $0x61]]  ;;  %v850_v29 = vstv %s2398_s12 }
 0x1f5   : >> { %v854_v30 = vstv %s2403_s16  ;;  %s2460_s29 = sld [smem:[#allocation7 + $0x62]]  ;;  %v872_v32 = vstv %s2407_s20  ;;  %v876_v5 = vstv %s2412_s21  ;;  %v870_v33 = vsel %vm386_vm0, %v868_v27, 0.0 }
 0x1f6   : >> { %s2466_s30 = sld [smem:[#allocation7 + $0x63]]  ;;  %v824_v2 = vadd.f32 %v823_v20, %v808_v23  ;;  %v828_v35 = vadd.f32 %v827_v21, %v812_v24  ;;  %v843_v36 = vmul.f32 %v842_v26, %v840_v34  ;;  %v847_v37 = vmul.f32 %v846_v31, %v840_v34 }
 0x1f7   : >> { %s2468_s6 = sld [smem:[#allocation7 + $0x64]]  ;;  %v832_v38 = vadd.f32 %v831_v22, %v816_v28  ;;  %v836_v39 = vadd.f32 %v835_v25, %v820_v62  ;;  %v851_v40 = vmul.f32 %v850_v29, %v840_v34  ;;  %v855_v41 = vmul.f32 %v854_v30, %v840_v34 }
 0x1f8   : >> { %s2470_s10 = sld [smem:[#allocation7 + $0x65]]  ;;  %v880_v42 = vstv %s2416_s22  ;;  %v884_v43 = vstv %s2422_s23  ;;  %v888_v44 = vstv %s2424_s25  ;;  %v892_v0 = vstv %s2426_s0 }
 0x1f9   : >> { %s2474_s17 = sld [smem:[#allocation7 + $0x66]]  ;;  %v896_v45 = vstv %s2430_s1  ;;  %v900_v46 = vstv %s2436_s19  ;;  %v844_v47 = vadd.f32 %v843_v36, %v824_v2  ;;  %v848_v48 = vadd.f32 %v847_v37, %v828_v35  ;;  %v1730_v2 = vld [vmem:[%s1978_s9 + $0x32] sm:$0xff] }
 0x1fa   : >> { %s2480_s13 = sld [smem:[#allocation7 + $0x67]]  ;;  %v873_v49 = vmul.f32 %v872_v32, %v870_v33  ;;  %v877_v50 = vmul.f32 %v876_v5, %v870_v33  ;;  %v852_v51 = vadd.f32 %v851_v40, %v832_v38  ;;  %v856_v63 = vadd.f32 %v855_v41, %v836_v39 }
 0x1fb   : >> { %s2482_s14 = sld [smem:[#allocation7 + $0x68]]  ;;  %v881_v4 = vmul.f32 %v880_v42, %v870_v33  ;;  %v885_v52 = vmul.f32 %v884_v43, %v870_v33  ;;  %v889_v54 = vmul.f32 %v2014_v6, %v888_v44  ;;  %v893_v55 = vmul.f32 %v2014_v6, %v892_v0  ;;  %v970_v33 = vpop.permute.xlu1 %969  ;;  %v1000_v42 = vpop.permute.xlu0 %999 }
 0x1fc   : >> { %s2484_s15 = sld [smem:[#allocation7 + $0x69]]  ;;  %v897_v56 = vmul.f32 %v2014_v6, %v896_v45  ;;  %v874_v57 = vadd.f32 %v873_v49, %v844_v47  ;;  %v878_v13 = vadd.f32 %v877_v50, %v848_v48  ;;  %v901_v58 = vmul.f32 %v2014_v6, %v900_v46 }
 0x1fd   : >> { %s2486_s8 = sld [smem:[#allocation7 + $0x6a]]  ;;  %v908_v59 = vstv %s2438_s2  ;;  %v882_v61 = vadd.f32 %v881_v4, %v852_v51  ;;  %v886_v7 = vadd.f32 %v885_v52, %v856_v63  ;;  %v912_v8 = vstv %s2440_s3 }
 0x1fe   : >> { %s2491_s11 = sld [smem:[#allocation7 + $0x6b]]  ;;  %v906_v9 = vsel %vm387_vm1, %v904_v53, 0.0  ;;  %v916_v10 = vstv %s2442_s4  ;;  %v920_v11 = vstv %s2447_s5  ;;  %v938_v12 = vstv %s2451_s27 }
 0x1ff   : >> { %s2495_s12 = sld [smem:[#allocation7 + $0x6c]]  ;;  %v942_v6 = vstv %s2456_s28  ;;  %v936_v14 = vsel %vm386_vm0, %v934_v60, 0.0  ;;  %v890_v15 = vadd.f32 %v889_v54, %v874_v57  ;;  %v894_v16 = vadd.f32 %v893_v55, %v878_v13 }
 0x200   : >> { %s2500_s16 = sld [smem:[#allocation7 + $0x6d]]  ;;  %v909_v3 = vmul.f32 %v908_v59, %v906_v9  ;;  %v913_v17 = vmul.f32 %v912_v8, %v906_v9  ;;  %v898_v18 = vadd.f32 %v897_v56, %v882_v61  ;;  %v902_v19 = vadd.f32 %v901_v58, %v886_v7 }
 0x201   : >> { %s2504_s20 = sld [smem:[#allocation7 + $0x6e]]  ;;  %v917_v20 = vmul.f32 %v916_v10, %v906_v9  ;;  %v921_v21 = vmul.f32 %v920_v11, %v906_v9  ;;  %v946_v22 = vstv %s2460_s29  ;;  %v950_v23 = vstv %s2466_s30 }
 0x202   : >> { %s2510_s21 = sld [smem:[#allocation7 + $0x6f]]  ;;  %v954_v24 = vstv %s2468_s6  ;;  %v958_v25 = vstv %s2470_s10  ;;  %v962_v26 = vstv %s2474_s17  ;;  %v966_v27 = vstv %s2480_s13 }
 0x203   : >> { %s2512_s22 = sld [smem:[#allocation7 + $0x70]]  ;;  %v910_v28 = vadd.f32 %v909_v3, %v890_v15  ;;  %v914_v62 = vadd.f32 %v913_v17, %v894_v16  ;;  %v939_v31 = vmul.f32 %v938_v12, %v936_v14  ;;  %v943_v34 = vmul.f32 %v942_v6, %v936_v14  ;;  %v1036_v15 = vpop.permute.xlu1 %1035  ;;  %v1731_v16 = vld [vmem:[%s1978_s9 + $0x48] sm:$0xff] }
 0x204   : >> { %s2514_s23 = sld [smem:[#allocation7 + $0x71]]  ;;  %v918_v29 = vadd.f32 %v917_v20, %v898_v18  ;;  %v922_v30 = vadd.f32 %v921_v21, %v902_v19  ;;  %v947_v32 = vmul.f32 %v946_v22, %v936_v14  ;;  %v951_v5 = vmul.f32 %v950_v23, %v936_v14  ;;  %v1066_v23 = vpop.permute.xlu0 %1065 }
 0x205   : >> { %s2518_s25 = sld [smem:[#allocation7 + $0x72]]  ;;  %v955_v35 = vmul.f32 %v1730_v2, %v954_v24  ;;  %v959_v36 = vmul.f32 %v1730_v2, %v958_v25  ;;  %v963_v37 = vmul.f32 %v1730_v2, %v962_v26  ;;  %v940_v38 = vadd.f32 %v939_v31, %v910_v28 }
 0x206   : >> { %s2524_s0 = sld [smem:[#allocation7 + $0x73]]  ;;  %v944_v39 = vadd.f32 %v943_v34, %v914_v62  ;;  %v967_v40 = vmul.f32 %v1730_v2, %v966_v27  ;;  %v974_v41 = vstv %s2482_s14  ;;  %v948_v43 = vadd.f32 %v947_v32, %v918_v29 }
 0x207   : >> { %s2526_s1 = sld [smem:[#allocation7 + $0x74]]  ;;  %v952_v44 = vadd.f32 %v951_v5, %v922_v30  ;;  %v978_v0 = vstv %s2484_s15  ;;  %v972_v45 = vsel %vm387_vm1, %v970_v33, 0.0  ;;  %v982_v46 = vstv %s2486_s8 }
 0x208   : >> { %s2528_s19 = sld [smem:[#allocation7 + $0x75]]  ;;  %v986_v47 = vstv %s2491_s11  ;;  %v1004_v48 = vstv %s2495_s12  ;;  %v1008_v49 = vstv %s2500_s16  ;;  %v1002_v50 = vsel %vm386_vm0, %v1000_v42, 0.0 }
 0x209   : >> { %s2530_s2 = sld [smem:[#allocation7 + $0x76]]  ;;  %v956_v51 = vadd.f32 %v955_v35, %v940_v38  ;;  %v960_v63 = vadd.f32 %v959_v36, %v944_v39  ;;  %v975_v4 = vmul.f32 %v974_v41, %v972_v45  ;;  %v979_v52 = vmul.f32 %v978_v0, %v972_v45 }
 0x20a   : >> { %s2533_s3 = sld [smem:[#allocation7 + $0x77]]  ;;  %v964_v53 = vadd.f32 %v963_v37, %v948_v43  ;;  %v968_v54 = vadd.f32 %v967_v40, %v952_v44  ;;  %v983_v55 = vmul.f32 %v982_v46, %v972_v45  ;;  %v987_v56 = vmul.f32 %v986_v47, %v972_v45 }
 0x20b   : >> { %s2536_s4 = sld [smem:[#allocation7 + $0x78]]  ;;  %v1012_v57 = vstv %s2504_s20  ;;  %v1016_v13 = vstv %s2510_s21  ;;  %v1020_v58 = vstv %s2512_s22  ;;  %v1024_v59 = vstv %s2514_s23 }
 0x20c   : >> { %s2541_s5 = sld [smem:[#allocation7 + $0x79]]  ;;  %v1028_v60 = vstv %s2518_s25  ;;  %v1032_v61 = vstv %s2524_s0  ;;  %v976_v7 = vadd.f32 %v975_v4, %v956_v51  ;;  %v980_v8 = vadd.f32 %v979_v52, %v960_v63  ;;  %v1102_v51 = vpop.permute.xlu1 %1101  ;;  %v1732_v63 = vld [vmem:[%s1978_s9 + $0x49] sm:$0xff] }
 0x20d   : >> { %s2545_s27 = sld [smem:[#allocation7 + $0x7a]]  ;;  %v1005_v9 = vmul.f32 %v1004_v48, %v1002_v50  ;;  %v1009_v10 = vmul.f32 %v1008_v49, %v1002_v50  ;;  %v984_v11 = vadd.f32 %v983_v55, %v964_v53  ;;  %v988_v12 = vadd.f32 %v987_v56, %v968_v54 }
 0x20e   : >> { %s2551_s28 = sld [smem:[#allocation7 + $0x7b]]  ;;  %v1013_v6 = vmul.f32 %v1012_v57, %v1002_v50  ;;  %v1017_v14 = vmul.f32 %v1016_v13, %v1002_v50  ;;  %v1021_v3 = vmul.f32 %v1731_v16, %v1020_v58  ;;  %v1025_v17 = vmul.f32 %v1731_v16, %v1024_v59 }
 0x20f   : >> { %s2553_s29 = sld [smem:[#allocation7 + $0x7c]]  ;;  %v1029_v18 = vmul.f32 %v1731_v16, %v1028_v60  ;;  %v1006_v19 = vadd.f32 %v1005_v9, %v976_v7  ;;  %v1010_v20 = vadd.f32 %v1009_v10, %v980_v8  ;;  %v1033_v21 = vmul.f32 %v1731_v16, %v1032_v61 }
 0x210   : >> { %s2555_s30 = sld [smem:[#allocation7 + $0x7d]]  ;;  %v1040_v22 = vstv %s2526_s1  ;;  %v1014_v24 = vadd.f32 %v1013_v6, %v984_v11  ;;  %v1018_v25 = vadd.f32 %v1017_v14, %v988_v12  ;;  %v1044_v26 = vstv %s2528_s19 }
 0x211   : >> { %s2559_s6 = sld [smem:[#allocation7 + $0x7e]]  ;;  %v1038_v27 = vsel %vm387_vm1, %v1036_v15, 0.0  ;;  %v1048_v28 = vstv %s2530_s2  ;;  %v1052_v62 = vstv %s2533_s3  ;;  %v1070_v31 = vstv %s2536_s4 }
 0x212   : >> { %s2565_s10 = sld [smem:[#allocation7 + $0x7f]]  ;;  %v1074_v34 = vstv %s2541_s5  ;;  %v1068_v29 = vsel %vm386_vm0, %v1066_v23, 0.0  ;;  %v1022_v30 = vadd.f32 %v1021_v3, %v1006_v19  ;;  %v1026_v32 = vadd.f32 %v1025_v17, %v1010_v20 }
 0x213   : >> { %s2567_s17 = sld [smem:[#allocation7 + $0x80]]  ;;  %v1041_v5 = vmul.f32 %v1040_v22, %v1038_v27  ;;  %v1045_v33 = vmul.f32 %v1044_v26, %v1038_v27  ;;  %v1030_v2 = vadd.f32 %v1029_v18, %v1014_v24  ;;  %v1034_v35 = vadd.f32 %v1033_v21, %v1018_v25 }
 0x214   : >> { %s2569_s13 = sld [smem:[#allocation7 + $0x81]]  ;;  %v1049_v36 = vmul.f32 %v1048_v28, %v1038_v27  ;;  %v1053_v37 = vmul.f32 %v1052_v62, %v1038_v27  ;;  %v1078_v38 = vstv %s2545_s27  ;;  %v1082_v39 = vstv %s2551_s28  ;;  %v1733_v28 = vld [vmem:[%s1978_s9 + $0x4a] sm:$0xff]  ;;  %s2712_s9 = sshll.u32 %s1801_s7, 3 }
 0x215   : >> { %s2571_s14 = sld [smem:[#allocation7 + $0x82]]  ;;  %v1086_v40 = vstv %s2553_s29  ;;  %v1042_v44 = vadd.f32 %v1041_v5, %v1022_v30  ;;  %v1046_v0 = vadd.f32 %v1045_v33, %v1026_v32  ;;  %v1071_v45 = vmul.f32 %v1070_v31, %v1068_v29  ;;  %s1187_s2 = scalar_lea.vmem %s1919_s24, %s2712_s9 }
 0x216   : >> { %s2574_s15 = sld [smem:[#allocation7 + $0x83]]  ;;  %v1090_v41 = vstv %s2555_s30  ;;  %v1075_v46 = vmul.f32 %v1074_v34, %v1068_v29  ;;  %v1050_v47 = vadd.f32 %v1049_v36, %v1030_v2  ;;  %v1054_v48 = vadd.f32 %v1053_v37, %v1034_v35  ;;  %s393_s7 = sadd.s32 1, %s1801_s7  }
 0x217   : >> { %s2577_s8 = sld [smem:[#allocation7 + $0x8c]]  ;;  %v1094_v42 = vstv %s2559_s6  ;;  %v1079_v49 = vmul.f32 %v1078_v38, %v1068_v29  ;;  %v1083_v50 = vmul.f32 %v1082_v39, %v1068_v29  ;;  %v1087_v4 = vmul.f32 %v1732_v63, %v1086_v40  ;;  %p390_p5 = scmp.ge.s32.totalorder %s393_s7, 2  }
 0x218   : >> { %s2582_s11 = sld [smem:[#allocation7 + $0x8d]]  ;;  %v1098_v43 = vstv %s2565_s10  ;;  %v1091_v52 = vmul.f32 %v1732_v63, %v1090_v41  ;;  %v1095_v53 = vmul.f32 %v1732_v63, %v1094_v42  ;;  %v1072_v54 = vadd.f32 %v1071_v45, %v1042_v44 }
 0x219   : >> { %s2586_s12 = sld [smem:[#allocation7 + $0x8e]]  ;;  %v1076_v55 = vadd.f32 %v1075_v46, %v1046_v0  ;;  %v1099_v56 = vmul.f32 %v1732_v63, %v1098_v43  ;;  %v1106_v57 = vstv %s2567_s17  ;;  %v1080_v13 = vadd.f32 %v1079_v49, %v1050_v47 }
 0x21a   : >> { %s2592_s16 = sld [smem:[#allocation7 + $0x8f]]  ;;  %v1084_v58 = vadd.f32 %v1083_v50, %v1054_v48  ;;  %v1110_v59 = vstv %s2569_s13  ;;  %v1104_v60 = vsel %vm387_vm1, %v1102_v51, 0.0  ;;  %v1088_v14 = vadd.f32 %v1087_v4, %v1072_v54 }
 0x21b   : >> { %s2594_s20 = sld [smem:[#allocation7 + $0x88]]  ;;  %v1114_v61 = vstv %s2571_s14  ;;  %v1092_v15 = vadd.f32 %v1091_v52, %v1076_v55  ;;  %v1107_v16 = vmul.f32 %v1106_v57, %v1104_v60  ;;  %v1111_v3 = vmul.f32 %v1110_v59, %v1104_v60 }
 0x21c   : >> { %s2596_s21 = sld [smem:[#allocation7 + $0x89]]  ;;  %v1118_v7 = vstv %s2574_s15  ;;  %v1096_v17 = vadd.f32 %v1095_v53, %v1080_v13  ;;  %v1100_v18 = vadd.f32 %v1099_v56, %v1084_v58  ;;  %v1115_v19 = vmul.f32 %v1114_v61, %v1104_v60 }
 0x21d   : >> { %s2600_s22 = sld [smem:[#allocation7 + $0x8a]]  ;;  %v1172_v8 = vstv %s2577_s8  ;;  %v1119_v20 = vmul.f32 %v1118_v7, %v1104_v60  ;;  %v1108_v29 = vadd.f32 %v1107_v16, %v1088_v14  ;;  %v1112_v30 = vadd.f32 %v1111_v3, %v1092_v15 }
 0x21e   : >> { %s2606_s23 = sld [smem:[#allocation7 + $0x8b]]  ;;  %v1176_v9 = vstv %s2582_s11  ;;  %v1116_v33 = vadd.f32 %v1115_v19, %v1096_v17  ;;  %vm1289_vm6 = vcmask (%p390_p5), 1041408   ;;  %vm1291_vm7 = vcmask (%p390_p5), 1042432  }
 0x21f   : >> { %s2608_s25 = sld [smem:[#allocation7 + $0x84]]  ;;  %v1180_v21 = vstv %s2586_s12  ;;  %v1120_v2 = vadd.f32 %v1119_v20, %v1100_v18  ;;  %vm1293_vm8 = vcmask (%p390_p5), 1043456   ;;  %vm1295_vm9 = vcmask (%p390_p5), 1044480  }
 0x220   : >> { %s2610_s0 = sld [smem:[#allocation7 + $0x85]]  ;;  %v1184_v22 = vstv %s2592_s16  ;;  %vm1297_vm10 = vcmask (%p390_p5), 1045504   ;;  %vm1299_vm11 = vcmask (%p390_p5), 1046528  }
 0x221   : >> { %s2612_s1 = sld [smem:[#allocation7 + $0x86]]  ;;  %v1152_v10 = vstv %s2594_s20 }
 0x222   : >> { %s2615_s19 = sld [smem:[#allocation7 + $0x87]]  ;;  %v1156_v11 = vstv %s2596_s21  ;;  %v1153_v62 = vmul.f32 %v1733_v28, %v1152_v10 }
 0x223   : >> { %v1160_v12 = vstv %s2600_s22  ;;  %v1157_v31 = vmul.f32 %v1733_v28, %v1156_v11 }
 0x224   : >> { %v1164_v6 = vstv %s2606_s23  ;;  %v1161_v32 = vmul.f32 %v1733_v28, %v1160_v12 }
 0x225   : >> { %v1136_v24 = vstv %s2608_s25  ;;  %v1165_v5 = vmul.f32 %v1733_v28, %v1164_v6 }
 0x226   : >> { %v1140_v25 = vstv %s2610_s0 }
 0x227   : >> { %v1144_v26 = vstv %s2612_s1 }
 0x228   : >> { %v1148_v27 = vstv %s2615_s19 }
 0x236   : >> { %v1168_v23 = vpop.permute.xlu1 %1167 }
 0x237   : >> { %v1132_v34 = vpop.permute.xlu0 %1131  ;;  %v1170_v35 = vsel %vm387_vm1, %v1168_v23, 0.0 }
 0x238   : >> { %v1134_v36 = vsel %vm386_vm0, %v1132_v34, 0.0  ;;  %v1173_v0 = vmul.f32 %v1172_v8, %v1170_v35  ;;  %v1177_v45 = vmul.f32 %v1176_v9, %v1170_v35  ;;  %v1181_v46 = vmul.f32 %v1180_v21, %v1170_v35 }
 0x239   : >> { %v1137_v37 = vmul.f32 %v1136_v24, %v1134_v36  ;;  %v1141_v38 = vmul.f32 %v1140_v25, %v1134_v36  ;;  %v1145_v39 = vmul.f32 %v1144_v26, %v1134_v36  ;;  %v1149_v40 = vmul.f32 %v1148_v27, %v1134_v36 }
 0x23a   : >> { %v1185_v47 = vmul.f32 %v1184_v22, %v1170_v35 }
 0x23b   : >> { %v1138_v41 = vadd.f32 %v1137_v37, %v1108_v29  ;;  %v1142_v42 = vadd.f32 %v1141_v38, %v1112_v30  ;;  %v1146_v43 = vadd.f32 %v1145_v39, %v1116_v33  ;;  %v1150_v44 = vadd.f32 %v1149_v40, %v1120_v2 }
 0x23d   : >> { %v1154_v48 = vadd.f32 %v1153_v62, %v1138_v41  ;;  %v1158_v49 = vadd.f32 %v1157_v31, %v1142_v42  ;;  %v1162_v50 = vadd.f32 %v1161_v32, %v1146_v43  ;;  %v1166_v51 = vadd.f32 %v1165_v5, %v1150_v44 }
 0x23e   : > { %392 = sbr.rel (!%p390_p5) target bundleno = 93 (0x5d), region = 123 }
 0x23f   : >> { %v1174_v63 = vadd.f32 %v1173_v0, %v1154_v48  ;;  %v1178_v4 = vadd.f32 %v1177_v45, %v1158_v49  ;;  %v1182_v52 = vadd.f32 %v1181_v46, %v1162_v50  ;;  %v1186_v53 = vadd.f32 %v1185_v47, %v1166_v51 }
 0x241   : >> { %1188 = vst.msk [vmem:[%s1187_s2] sm:$0xff] %vm298_vm3, %v1174_v63  ;;  %1665 = vst.msk [vmem:[%s1187_s2 + $0x10] sm:$0xff] %vm298_vm3, %v1178_v4 }
 0x242   : >> { %1667 = vst.msk [vmem:[%s1187_s2 + $0x20] sm:$0xff] %vm298_vm3, %v1182_v52  ;;  %1669 = vst.msk [vmem:[%s1187_s2 + $0x30] sm:$0xff] %vm298_vm3, %v1186_v53 }
 0x249   : > { %v1197_v54 = vld [vmem:[%s1919_s24] sm:$0xff]  ;;  %v1198_v55 = vld [vmem:[%s1919_s24 + $0x8] sm:$0xff]  ;;  %v1670_v56 = vld [vmem:[%s1919_s24 + $0x10] sm:$0xff] }
 0x24a   : > { %v1199_v57 = vsel %vm298_vm3, %v1197_v54, 0.0  ;;  %v1200_v13 = vsel %vm298_vm3, %v1198_v55, 0.0  ;;  %v1208_v58 = vmul.f32 %v1197_v54, %v1197_v54  ;;  %v1209_v59 = vmul.f32 %v1198_v55, %v1198_v55  ;;  %v1671_v60 = vld [vmem:[%s1919_s24 + $0x18] sm:$0xff]  ;;  %v1672_v61 = vld [vmem:[%s1919_s24 + $0x20] sm:$0xff]  ;;  %v1673_v10 = vld [vmem:[%s1919_s24 + $0x28] sm:$0xff] }
 0x24b   : > { %v1201_v7 = vadd.f32 %v1200_v13, %v1199_v57  ;;  %v1222_v1 = vsel %vm298_vm3, %v1670_v56, 0.0  ;;  %v1223_v8 = vsel %vm298_vm3, %v1671_v60, 0.0  ;;  %v1231_v9 = vmul.f32 %v1670_v56, %v1670_v56  ;;  %v1674_v18 = vld [vmem:[%s1919_s24 + $0x30] sm:$0xff]  ;;  %v1675_v27 = vld [vmem:[%s1919_s24 + $0x38] sm:$0xff] }
 0x24c   : > { %v1210_v11 = vsel %vm298_vm3, %v1208_v58, 0.0  ;;  %v1211_v12 = vsel %vm298_vm3, %v1209_v59, 0.0  ;;  %v1224_v6 = vadd.f32 %v1223_v8, %v1222_v1  ;;  %v1232_v14 = vmul.f32 %v1671_v60, %v1671_v60 }
 0x24d   : > { %v1202_v15 = vrot.slane %v1201_v7, 4  ;;  %v1212_v16 = vadd.f32 %v1211_v12, %v1210_v11  ;;  %v1233_v3 = vsel %vm298_vm3, %v1231_v9, 0.0  ;;  %v1245_v17 = vsel %vm298_vm3, %v1672_v61, 0.0 }
 0x24e   : > { %v1225_v19 = vrot.slane %v1224_v6, 4  ;;  %v1234_v20 = vsel %vm298_vm3, %v1232_v14, 0.0  ;;  %v1246_v21 = vsel %vm298_vm3, %v1673_v10, 0.0  ;;  %v1254_v22 = vmul.f32 %v1672_v61, %v1672_v61 }
 0x24f   : > { %v1203_v23 = vadd.f32 %v1202_v15, %v1201_v7  ;;  %v1213_v24 = vrot.slane %v1212_v16, 4  ;;  %v1235_v25 = vadd.f32 %v1234_v20, %v1233_v3  ;;  %v1247_v26 = vadd.f32 %v1246_v21, %v1245_v17 }
 0x250   : > { %v1226_v28 = vadd.f32 %v1225_v19, %v1224_v6  ;;  %v1255_v62 = vmul.f32 %v1673_v10, %v1673_v10  ;;  %v1256_v31 = vsel %vm298_vm3, %v1254_v22, 0.0  ;;  %v1268_v34 = vsel %vm298_vm3, %v1674_v18, 0.0 }
 0x251   : > { %v1204_v29 = vrot.slane %v1203_v23, 2  ;;  %v1214_v30 = vadd.f32 %v1213_v24, %v1212_v16  ;;  %v1236_v32 = vrot.slane %v1235_v25, 4  ;;  %v1248_v5 = vrot.slane %v1247_v26, 4 }
 0x252   : > { %v1227_v33 = vrot.slane %v1226_v28, 2  ;;  %v1257_v2 = vsel %vm298_vm3, %v1255_v62, 0.0  ;;  %v1269_v35 = vsel %vm298_vm3, %v1675_v27, 0.0  ;;  %v1277_v36 = vmul.f32 %v1674_v18, %v1674_v18 }
 0x253   : > { %v1205_v37 = vadd.f32 %v1204_v29, %v1203_v23  ;;  %v1215_v38 = vrot.slane %v1214_v30, 2  ;;  %v1237_v39 = vadd.f32 %v1236_v32, %v1235_v25  ;;  %v1249_v40 = vadd.f32 %v1248_v5, %v1247_v26 }
 0x254   : > { %v1228_v41 = vadd.f32 %v1227_v33, %v1226_v28  ;;  %v1258_v42 = vadd.f32 %v1257_v2, %v1256_v31  ;;  %v1270_v43 = vadd.f32 %v1269_v35, %v1268_v34  ;;  %v1278_v44 = vmul.f32 %v1675_v27, %v1675_v27 }
 0x255   : > { %v1206_v0 = vrot.slane %v1205_v37, 1  ;;  %v1238_v45 = vrot.slane %v1237_v39, 2  ;;  %v1250_v46 = vrot.slane %v1249_v40, 2  ;;  %v1279_v50 = vsel %vm298_vm3, %v1277_v36, 0.0 }
 0x256   : > { %v1229_v47 = vrot.slane %v1228_v41, 1  ;;  %v1259_v48 = vrot.slane %v1258_v42, 4  ;;  %v1271_v49 = vrot.slane %v1270_v43, 4  ;;  %v1216_v63 = vadd.f32 %v1215_v38, %v1214_v30 }
 0x257   : > { %v1207_v51 = vadd.f32 %v1206_v0, %v1205_v37  ;;  %v1239_v4 = vadd.f32 %v1238_v45, %v1237_v39  ;;  %v1251_v52 = vadd.f32 %v1250_v46, %v1249_v40  ;;  %v1280_v56 = vsel %vm298_vm3, %v1278_v44, 0.0 }
 0x258   : > { %v1230_v53 = vadd.f32 %v1229_v47, %v1228_v41  ;;  %v1260_v54 = vadd.f32 %v1259_v48, %v1258_v42  ;;  %v1272_v55 = vadd.f32 %v1271_v49, %v1270_v43  ;;  %v1281_v13 = vadd.f32 %v1280_v56, %v1279_v50 }
 0x259   : > { %v1252_v57 = vrot.slane %v1251_v52, 1  ;;  %v1217_v60 = vrot.slane %v1216_v63, 1  ;;  %v1240_v1 = vrot.slane %v1239_v4, 1 }
 0x25a   : > { %v1261_v58 = vrot.slane %v1260_v54, 2  ;;  %v1273_v59 = vrot.slane %v1272_v55, 2  ;;  %v1282_v7 = vrot.slane %v1281_v13, 4  ;;  %v1288_v10 = vsel %vm289_vm2, %v1207_v51, %v1230_v53 }
 0x25b   : > { %v1253_v61 = vadd.f32 %v1252_v57, %v1251_v52  ;;  %v1218_v14 = vadd.f32 %v1217_v60, %v1216_v63  ;;  %v1241_v3 = vadd.f32 %v1240_v1, %v1239_v4 }
 0x25c   : > { %v1262_v8 = vadd.f32 %v1261_v58, %v1260_v54  ;;  %v1274_v9 = vadd.f32 %v1273_v59, %v1272_v55  ;;  %v1283_v11 = vadd.f32 %v1282_v7, %v1281_v13 }
 0x25d   : > { %v1290_v16 = vsel %vm1289_vm6, %v1288_v10, %v1253_v61 }
 0x25e   : > { %v1263_v12 = vrot.slane %v1262_v8, 1  ;;  %v1275_v6 = vrot.slane %v1274_v9, 1  ;;  %v1284_v15 = vrot.slane %v1283_v11, 2 }
 0x260   : > { %v1276_v17 = vadd.f32 %v1275_v6, %v1274_v9  ;;  %v1264_v18 = vadd.f32 %v1263_v12, %v1262_v8  ;;  %v1285_v19 = vadd.f32 %v1284_v15, %v1283_v11 }
 0x262   : > { %v1292_v20 = vsel %vm1291_vm7, %v1290_v16, %v1276_v17  ;;  %v1286_v21 = vrot.slane %v1285_v19, 1 }
 0x263   : > { %v1294_v22 = vsel %vm1293_vm8, %v1292_v20, %v1218_v14 }
 0x264   : > { %v1296_v23 = vsel %vm1295_vm9, %v1294_v22, %v1241_v3  ;;  %v1287_v24 = vadd.f32 %v1286_v21, %v1285_v19 }
 0x265   : > { %v1298_v25 = vsel %vm1297_vm10, %v1296_v23, %v1264_v18 }
 0x266   : > { %v1300_v26 = vsel %vm1299_vm11, %v1298_v25, %v1287_v24 }
 0x267   : > { %1301 = vst.msk [vmem:[%s1924_s26] sm:$0xff] %vm298_vm3, %v1300_v26 }
 0x268 PF: > { %s18_s18 = sadd.s32 1, %s1797_s18  }
 0x269   : > { %p15_p9 = scmp.ge.s32.totalorder %s18_s18, 4  }
 0x26b   :  { %17 = sbr.rel (!%p15_p9) target bundleno = 9 (0x9), region = 134 }
 0x270   :  { %1337 = vsyncpa [#allocation4], 1 }
 0x271   :  { %1339 = vsyncpa [#allocation4 + $0x1], 1 }
 0x272   :  { %1340 = vsyncpa [#allocation6], 1 }

// kernel: up_forward.3
= control target key start
LH: loop header
LB: loop body
LE: loop exit
PB: predicated region body
PF: predicated region fallthrough
CT: control target
= control target key end

     0   :  { %s5137_s0 = inlined_call_operand.vmem [shape: f32[2,32,8], index: 0, kind: input, shape index: {}]   ;;  %s5138_s1 = inlined_call_operand.vmem [shape: f32[2,4,16,16], index: 1, kind: input, shape index: {}]   ;;  %s5139_s2 = inlined_call_operand.vmem [shape: f32[18,8], index: 2, kind: input, shape index: {}]   ;;  %s5140_s3 = inlined_call_operand.vmem [shape: f32[8,16], index: 3, kind: input, shape index: {}]   ;;  %s5141_s4 = inlined_call_operand.vmem [shape: f32[288], index: 4, kind: input, shape index: {}]   ;;  %s5142_s5 = inlined_call_operand.vmem [shape: f32[2,4,16,16], index: 5, kind: output, shape index: {0}]   ;;  %s5143_s6 = inlined_call_operand.vmem [shape: f32[2,8,16], index: 6, kind: output, shape index: {1}]  }
   0x1   :  { %5235 = sst [smem:[#allocation85_spill]] %s5137_s0 }
   0x2   :  { %5236 = sst [smem:[#allocation86_spill]] %s5138_s1 }
   0x3   :  { %5237 = sst [smem:[#allocation87_spill]] %s5139_s2 }
   0x4   :  { %5238 = sst [smem:[#allocation88_spill]] %s5140_s3 }
   0x5   :  { %5239 = sst [smem:[#allocation89_spill]] %s5141_s4 }
   0x6   :  { %5240 = sst [smem:[#allocation90_spill]] %s5142_s5 }
   0x7   :  { %5241 = sst [smem:[#allocation91_spill]] %s5143_s6 }
   0x8   :  { %12 = vsyncpa [#allocation4], 0  ;;  %s3313_s21 = smov 0  }
   0x9 LB: > { %5242 = sst [smem:[#allocation6_spill]] %s3266_s21  ;;  %s3319_s22 = sadd.s32 4294967295, %s3266_s21   ;;  %s3266_s21 = sphi %s3313_s21, %s18_s21  }
   0xa   : > { %p2726_p0 = scmp.ge.s32.totalorder %s3266_s21, 1  ;;  %p190_p1 = scmp.lt.s32.totalorder %s3266_s21, 3 }
   0xb   : > { %s5243_s4 = sld [smem:[#allocation89_spill]]  ;;  %p3194_p3 = scmp.eq.s32.totalorder %s3319_s22, 0 }
   0xc   : > { %p3326_p2 = pnand %p2726_p0, %p190_p1 }
   0xe   : > { %p3190_p4 = pneg %p3326_p2 }
  0x10   : > { %p3191_p5 = pnand %p3194_p3, %p3190_p4 }
  0x11   : > { %s209_s25 = sshll.u32 %s5243_s4, 4  ;;  %s210_s25 = int_to_ptr.vmem [resolvable:$true] %s209_s25 }
  0x12   : > { %s3237_s27 = scalar_lea.vmem %s210_s25, 48  ;;  %p3239_p7 = pneg %p3191_p5 }
  0x13   : > { %p3238_p6 = scmp.ne.s32.totalorder %s210_s25, %s3237_s27  ;;  %s3244_s28 = scalar_lea.vmem %s210_s25, 64 }
  0x14   : > { %p3245_p10 = scmp.lt.s32.totalorder %s210_s25, %s210_s25  ;;  %p3246_p11 = scmp.lt.s32.totalorder %s3244_s28, %s3237_s27 }
  0x15   : > { %p3240_p8 = pnand %p3239_p7, %p3238_p6 }
  0x16   : > { %p3247_p12 = por %p3246_p11, %p3245_p10 }
  0x17   : > { %p3241_p9 = pneg %p3240_p8 }
  0x19   : > { %p3248_p13 = pnand %p3247_p12, %p3241_p9 }
  0x1b   : > { %3251 = shalt.err (!%p3248_p13)
}
  0x1c   : > { %s3272_s29 = smov [#allocation3]   ;;  %238 = sbr.rel (%p3326_p2) target bundleno = 1115 (0x45b), region = 40 }
  0x1d   : > { %3193 = dma.vmem_to_smem (!%p3191_p5), %s210_s25, 48, %s3272_s29, [#allocation4]  }
  0x21   : > { %3261 = dma.done.wait (%p3194_p3), [#allocation4], 48  }
  0x22   : > { %3263 = vsyncadd (%p3194_p3), [#allocation4], 4294967248 }
  0x23   : > { %244 = sfence }
  0x24   : > { %s5245_s3 = sld [smem:[#allocation88_spill]]  ;;  %p278_p0 = scmp.lt.s32.totalorder %s3319_s22, 1  ;;  %vm301_vm0 = vcmask 1040384   ;;  %vm310_vm1 = vcmask 130048   ;;  %vm371_vm2 = vcmask 64512   ;;  %v3273_v33 = vmov 0.0  }
  0x25   : > { %s5246_s0 = sld [smem:[#allocation85_spill]]  ;;  %vm3274_vm3 = vmmov 0   ;;  %vm313_vm4 = vcmask 123904   ;;  %v817_v41 = vlaneseq  ;;  %s3442_s30 = smov 0  }
  0x26   : > { %s5565_s22 = smov (!%p278_p0, %s3319_s22), 1  ;;  %s5247_s1 = sld [smem:[#allocation86_spill]] }
  0x27   : > { %s3108_s8 = sshll.u32 %s5565_s22, 5  ;;  %s3109_s9 = sshll.u32 %s5565_s22, 6  ;;  %v3426_v42 = vand.u32 127, %v817_v41 }
  0x28   : > { %s5248_s5 = sld [smem:[#allocation90_spill]]  ;;  %s2737_s19 = sshll.u32 %s5565_s22, 3 }
  0x29   : > { %s5250_s6 = sld [smem:[#allocation91_spill]]  ;;  %vm819_vm5 = vcmp.ge.s32.totalorder %v3426_v42, 1  ;;  %vm820_vm6 = vcmp.lt.s32.totalorder %v3426_v42, 15 }
  0x2a   : > { %v370_v0 = vld [vmem:[%s5245_s3] sm:$0xff]  ;;  %s5252_s2 = sld [smem:[#allocation87_spill]] }
  0x2b   : > { %3132 = vmatprep.subr.mxu0 %v370_v0  ;;  %3184 = vmatprep.subr.mxu1 %v370_v0  ;;  %s282_s12 = scalar_lea.vmem %s5246_s0, %s3108_s8 }
  0x2c   : > { %3133 = vmatpush3.msra.mxu0 %v370_v0  ;;  %3185 = vmatpush3.msra.mxu1 %v370_v0  ;;  %s287_s15 = scalar_lea.vmem %s5247_s1, %s3109_s9  ;;  %v366_v15 = vld [vmem:[%s282_s12] sm:$0xff]  ;;  %v367_v20 = vld [vmem:[%s282_s12 + $0x8] sm:$0xff]  ;;  %v368_v21 = vld [vmem:[%s282_s12 + $0x10] sm:$0xff] }
  0x2d   : > { %v297_v1 = vld [vmem:[%s287_s15] sm:$0xff]  ;;  %v298_v2 = vld [vmem:[%s287_s15 + $0x8] sm:$0xff]  ;;  %v2738_v3 = vld [vmem:[%s287_s15 + $0x10] sm:$0xff]  ;;  %3134 = vmatprep.mubr.msk.f32.mxu0 %vm371_vm2, %v366_v15  ;;  %3137 = vmatprep.mubr.msk.f32.mxu1 %vm371_vm2, %v368_v21 }
  0x2e   : > { %s3355_s18 = scalar_lea.vmem %s5248_s5, %s3109_s9  ;;  %v302_v4 = vrot.slane %v297_v1, 7  ;;  %v303_v5 = vrot.slane %v298_v2, 7  ;;  %v2739_v6 = vld [vmem:[%s287_s15 + $0x18] sm:$0xff]  ;;  %v320_v7 = vrot.slane %v2738_v3, 7  ;;  %v2740_v8 = vld [vmem:[%s287_s15 + $0x20] sm:$0xff]  ;;  %v2741_v9 = vld [vmem:[%s287_s15 + $0x28] sm:$0xff]  ;;  %3135 = vmatmul.mubr.msk.f32.vlgmr.msra.gmra.mxu0 %vm371_vm2, %v367_v20  ;;  %3151 = vmatprep.subr.mxu0 %v3273_v33 }
  0x2f   : > { %5249 = sst [smem:[#allocation7_spill]] %s3355_s18  ;;  %s3360_s24 = scalar_lea.vmem %s5250_s6, %s2737_s19  ;;  %v321_v10 = vrot.slane %v2739_v6, 7  ;;  %v337_v11 = vrot.slane %v2740_v8, 7  ;;  %v338_v12 = vrot.slane %v2741_v9, 7  ;;  %v2742_v13 = vld [vmem:[%s287_s15 + $0x30] sm:$0xff]  ;;  %v2743_v14 = vld [vmem:[%s287_s15 + $0x38] sm:$0xff]  ;;  %3140 = vmatprep.subr.mxu1 %v3273_v33  ;;  %3153 = vmatprep.mubr.msk.f32.mxu0 %vm3274_vm3, %v3273_v33 }
  0x30   : > { %5251 = sst [smem:[#allocation8_spill]] %s3360_s24  ;;  %v304_v16 = vsel %vm301_vm0, %v302_v4, %v303_v5  ;;  %v308_v17 = vsel %vm301_vm0, 0.0, %v302_v4  ;;  %v3365_v18 = vsel %vm301_vm0, %v303_v5, 0.0  ;;  %v326_v19 = vsel %vm301_vm0, 0.0, %v320_v7  ;;  %v369_v22 = vld [vmem:[%s282_s12 + $0x18] sm:$0xff]  ;;  %v469_v34 = vld [vmem:[%s5252_s2] sm:$0xff] }
  0x31   : > { %311 = vst.msk [vmem:[#allocation2] sm:$0xff] %vm310_vm1, %v308_v17  ;;  %312 = vst.msk [vmem:[#allocation2 + $0x8] sm:$0xff] %vm310_vm1, %v304_v16  ;;  %v322_v23 = vsel %vm301_vm0, %v320_v7, %v321_v10  ;;  %v327_v24 = vsel %vm301_vm0, %v321_v10, 0.0  ;;  %v339_v25 = vsel %vm301_vm0, %v337_v11, %v338_v12  ;;  %v343_v26 = vsel %vm301_vm0, 0.0, %v337_v11  ;;  %3138 = vmatmul.mubr.msk.f32.vlgmr.msra.gmra.mxu1 %vm371_vm2, %v369_v22  ;;  %v470_v39 = vld [vmem:[%s5252_s2 + $0x8] sm:$0xff] }
  0x32   : > { %329 = vst.msk [vmem:[#allocation2 + $0x18] sm:$0xff] %vm310_vm1, %v326_v19  ;;  %330 = vst.msk [vmem:[#allocation2 + $0x20] sm:$0xff] %vm310_vm1, %v322_v23  ;;  %v344_v27 = vsel %vm301_vm0, %v338_v12, 0.0  ;;  %v354_v28 = vrot.slane %v2742_v13, 7  ;;  %v355_v29 = vrot.slane %v2743_v14, 7  ;;  %3142 = vmatprep.mubr.msk.f32.mxu1 %vm3274_vm3, %v3273_v33 }
  0x33   : > { %346 = vst.msk [vmem:[#allocation2 + $0x30] sm:$0xff] %vm310_vm1, %v343_v26  ;;  %347 = vst.msk [vmem:[#allocation2 + $0x38] sm:$0xff] %vm310_vm1, %v339_v25  ;;  %v471_v40 = vld [vmem:[%s5252_s2 + $0x10] sm:$0x3] }
  0x34   : > { %v356_v30 = vsel %vm301_vm0, %v354_v28, %v355_v29  ;;  %v360_v31 = vsel %vm301_vm0, 0.0, %v354_v28  ;;  %v361_v32 = vsel %vm301_vm0, %v355_v29, 0.0  ;;  %314 = vst.msk [vmem:[#allocation2 + $0x10] sm:$0x3] %vm313_vm4, %v3365_v18  ;;  %331 = vst.msk [vmem:[#allocation2 + $0x28] sm:$0x3] %vm313_vm4, %v327_v24 }
  0x35   : > { %363 = vst.msk [vmem:[#allocation2 + $0x48] sm:$0xff] %vm310_vm1, %v360_v31  ;;  %364 = vst.msk [vmem:[#allocation2 + $0x50] sm:$0xff] %vm310_vm1, %v356_v30 }
  0x36   : > { %348 = vst.msk [vmem:[#allocation2 + $0x40] sm:$0x3] %vm313_vm4, %v344_v27  ;;  %365 = vst.msk [vmem:[#allocation2 + $0x58] sm:$0x3] %vm313_vm4, %v361_v32 }
  0xee   : > { %v3136_v35 = vpop.f32.mrf.mxu0 }
  0xef   : > { %3152 = vmatpush3.msra.mxu0 %v3136_v35 }
  0xf0   : > { %v450_v37 = vpop.f32.mrf.mxu0  ;;  %3173 = vmatprep.subr.mxu0 %v3273_v33  ;;  %3154 = vmatmul.mubr.msk.f32.vlgmr.msra.gmra.mxu0 %vm371_vm2, %v469_v34 }
  0xf1   : > { %v3139_v36 = vpop.f32.mrf.mxu1  ;;  %3141 = vmatpush3.msra.mxu1 %v450_v37  ;;  %3156 = vmatprep.mubr.msk.f32.mxu0 %vm3274_vm3, %v3273_v33 }
  0xf2   : > { %3174 = vmatpush3.msra.mxu0 %v3139_v36  ;;  %3162 = vmatprep.subr.mxu1 %v3273_v33 }
  0xf3   : > { %v460_v38 = vpop.f32.mrf.mxu1  ;;  %3143 = vmatmul.mubr.msk.f32.vlgmr.msra.gmra.mxu1 %vm371_vm2, %v469_v34 }
  0xf4   : > { %3163 = vmatpush3.msra.mxu1 %v460_v38  ;;  %3145 = vmatprep.mubr.msk.f32.mxu1 %vm3274_vm3, %v3273_v33 }
  0xf5   : > { %3157 = vmatmul.mubr.msk.f32.gmra.mxu0 %vm371_vm2, %v470_v39 }
  0xf6   : > { %3159 = vmatprep.mubr.msk.f32.mxu0 %vm3274_vm3, %v3273_v33 }
  0xf7   : > { %3146 = vmatmul.mubr.msk.f32.gmra.mxu1 %vm371_vm2, %v470_v39 }
  0xf8   : > { %3148 = vmatprep.mubr.msk.f32.mxu1 %vm3274_vm3, %v3273_v33 }
  0xf9   : > { %3160 = vmatmul.mubr.msk.f32.gmra.mxu0 %vm371_vm2, %v471_v40 }
  0xfa   : > { %3175 = vmatprep.mubr.msk.f32.mxu0 %vm3274_vm3, %v3273_v33 }
  0xfb   : > { %3149 = vmatmul.mubr.msk.f32.gmra.mxu1 %vm371_vm2, %v471_v40 }
  0xfc   : > { %3164 = vmatprep.mubr.msk.f32.mxu1 %vm3274_vm3, %v3273_v33 }
  0xfd   : > { %3176 = vmatmul.mubr.msk.f32.vlgmr.msra.gmra.mxu0 %vm371_vm2, %v469_v34 }
  0xfe   : > { %3178 = vmatprep.mubr.msk.f32.mxu0 %vm3274_vm3, %v3273_v33 }
  0xff   : > { %3165 = vmatmul.mubr.msk.f32.vlgmr.msra.gmra.mxu1 %vm371_vm2, %v469_v34 }
 0x100   : > { %3167 = vmatprep.mubr.msk.f32.mxu1 %vm3274_vm3, %v3273_v33 }
 0x101   : > { %3179 = vmatmul.mubr.msk.f32.gmra.mxu0 %vm371_vm2, %v470_v39 }
 0x102   : > { %3181 = vmatprep.mubr.msk.f32.mxu0 %vm3274_vm3, %v3273_v33 }
 0x103   : > { %3168 = vmatmul.mubr.msk.f32.gmra.mxu1 %vm371_vm2, %v470_v39 }
 0x104   : > { %3170 = vmatprep.mubr.msk.f32.mxu1 %vm3274_vm3, %v3273_v33 }
 0x105   : > { %3182 = vmatmul.mubr.msk.f32.gmra.mxu0 %vm371_vm2, %v471_v40 }
 0x107   : > { %3171 = vmatmul.mubr.msk.f32.gmra.mxu1 %vm371_vm2, %v471_v40 }
 0x1b0   : > { %v631_v43 = vpop.f32.mrf.mxu0 }
 0x1b1   : > { %646 = vst.msk [vmem:[#allocation2 + $0x78] sm:$0xff] %vm310_vm1, %v631_v43 }
 0x1b2   : > { %v3155_v45 = vpop.f32.mrf.mxu0 }
 0x1b3   : > { %v547_v44 = vpop.f32.mrf.mxu1 }
 0x1b4   : > { %562 = vst.msk [vmem:[#allocation2 + $0x60] sm:$0xff] %vm310_vm1, %v547_v44 }
 0x1b5   : > { %v3144_v46 = vpop.f32.mrf.mxu1  ;;  %v636_v47 = vpop.f32.mrf.mxu0 }
 0x1b6   : > { %647 = vst.msk [vmem:[#allocation2 + $0x80] sm:$0xff] %vm310_vm1, %v636_v47 }
 0x1b7   : > { %v552_v48 = vpop.f32.mrf.mxu1  ;;  %v3158_v49 = vpop.f32.mrf.mxu0 }
 0x1b8   : > { %563 = vst.msk [vmem:[#allocation2 + $0x68] sm:$0xff] %vm310_vm1, %v552_v48 }
 0x1b9   : > { %v3147_v50 = vpop.f32.mrf.mxu1  ;;  %v641_v51 = vpop.f32.mrf.mxu0 }
 0x1ba   : > { %648 = vst.msk [vmem:[#allocation2 + $0x88] sm:$0x3] %vm313_vm4, %v641_v51 }
 0x1bb   : > { %v557_v52 = vpop.f32.mrf.mxu1  ;;  %v3161_v53 = vpop.f32.mrf.mxu0 }
 0x1bc   : > { %564 = vst.msk [vmem:[#allocation2 + $0x70] sm:$0x3] %vm313_vm4, %v557_v52 }
 0x1bd   : > { %v3150_v54 = vpop.f32.mrf.mxu1  ;;  %v799_v55 = vpop.f32.mrf.mxu0 }
 0x1be   : > { %814 = vst.msk [vmem:[#allocation2 + $0xa8] sm:$0xff] %vm310_vm1, %v799_v55 }
 0x1bf   : > { %v715_v56 = vpop.f32.mrf.mxu1  ;;  %v3177_v57 = vpop.f32.mrf.mxu0 }
 0x1c0   : > { %730 = vst.msk [vmem:[#allocation2 + $0x90] sm:$0xff] %vm310_vm1, %v715_v56 }
 0x1c1   : > { %v3166_v58 = vpop.f32.mrf.mxu1  ;;  %v804_v59 = vpop.f32.mrf.mxu0 }
 0x1c2   : > { %815 = vst.msk [vmem:[#allocation2 + $0xb0] sm:$0xff] %vm310_vm1, %v804_v59 }
 0x1c3   : > { %v720_v60 = vpop.f32.mrf.mxu1  ;;  %v3180_v61 = vpop.f32.mrf.mxu0 }
 0x1c4   : > { %731 = vst.msk [vmem:[#allocation2 + $0x98] sm:$0xff] %vm310_vm1, %v720_v60 }
 0x1c5   : > { %v3169_v62 = vpop.f32.mrf.mxu1  ;;  %v809_v63 = vpop.f32.mrf.mxu0 }
 0x1c6   : > { %816 = vst.msk [vmem:[#allocation2 + $0xb8] sm:$0x3] %vm313_vm4, %v809_v63 }
 0x1c7   : > { %v725_v0 = vpop.f32.mrf.mxu1  ;;  %v3183_v1 = vpop.f32.mrf.mxu0 }
 0x1c8   : > { %732 = vst.msk [vmem:[#allocation2 + $0xa0] sm:$0x3] %vm313_vm4, %v725_v0 }
 0x1c9   : > { %v3172_v2 = vpop.f32.mrf.mxu1 }
 0x1ca LB: >> { %5253 = sst [smem:[#allocation9_spill]] %s3270_s30  ;;  %s5144_s7 = sshll.u32 %s3270_s30, 3  ;;  %vm830_vm7 = vcmask 1047680   ;;  %s3270_s30 = sphi %s3442_s30, %s826_s30  }
 0x1cb   : >> { %s3450_s8 = scalar_lea.vmem [#allocation2], %s5144_s7  ;;  %s5149_s9 = smov 16  }
 0x1cc   : >> { %5254 = sst [smem:[#allocation10_spill]] %s3450_s8  ;;  %s5147_s11 = smov 113  }
 0x1cd   : >> { %s3599_s10 = sld [smem:[#allocation3]]  ;;  %s5145_s23 = smov 127  }
 0x1ce   : >> { %s3603_s12 = sld [smem:[#allocation3 + $0x1]]  ;;  %s5267_s0 = smov 127  }
 0x1cf   : >> { %v3453_v3 = vld [vmem:[%s3450_s8] sm:$0xff]  ;;  %v3466_v6 = vld [vmem:[%s3450_s8 + $0x18] sm:$0xff]  ;;  %v3483_v9 = vld [vmem:[%s3450_s8 + $0x30] sm:$0xff]  ;;  %s3608_s13 = sld [smem:[#allocation3 + $0x2]]  ;;  %s5269_s4 = smov 113  }
 0x1d0   : >> { %v3456_v4 = vld [vmem:[%s3450_s8 + $0x2] sm:$0xff]  ;;  %831 = vrot.lane.b32.xlu0 %v3453_v3, %s5149_s9  ;;  %v3473_v7 = vld [vmem:[%s3450_s8 + $0x19] sm:$0xff]  ;;  %v3486_v10 = vld [vmem:[%s3450_s8 + $0x31] sm:$0xff]  ;;  %s3610_s14 = sld [smem:[#allocation3 + $0x3]]  ;;  %s5274_s24 = smov 16  }
 0x1d1   : >> { %963 = vrot.lane.b32.xlu1 %v3456_v4, %s5149_s9  ;;  %v3463_v5 = vld [vmem:[%s3450_s8 + $0x1] sm:$0xff]  ;;  %v3493_v11 = vld [vmem:[%s3450_s8 + $0x32] sm:$0xff]  ;;  %v3503_v13 = vld [vmem:[%s3450_s8 + $0x49] sm:$0xff]  ;;  %s3614_s15 = sld [smem:[#allocation3 + $0x4]] }
 0x1d2   : >> { %v3476_v8 = vld [vmem:[%s3450_s8 + $0x1a] sm:$0xff]  ;;  %v3496_v12 = vld [vmem:[%s3450_s8 + $0x48] sm:$0xff]  ;;  %v3559_v34 = vld [vmem:[%s3450_s8 + $0x92] sm:$0xff]  ;;  %s3619_s16 = sld [smem:[#allocation3 + $0x5]] }
 0x1d3   : >> { %v3511_v17 = vld [vmem:[%s3450_s8 + $0x4a] sm:$0xff]  ;;  %v3519_v20 = vld [vmem:[%s3450_s8 + $0x60] sm:$0xff]  ;;  %v3545_v30 = vld [vmem:[%s3450_s8 + $0x78] sm:$0xff]  ;;  %5255 = sst [smem:[#allocation11_spill]] %s3599_s10 }
 0x1d4   : >> { %897 = vrot.lane.b32.xlu0 %v3463_v5, %s5149_s9  ;;  %v3529_v24 = vld [vmem:[%s3450_s8 + $0x61] sm:$0xff]  ;;  %v3553_v33 = vld [vmem:[%s3450_s8 + $0x79] sm:$0xff]  ;;  %v3571_v38 = vld [vmem:[%s3450_s8 + $0x90] sm:$0xff]  ;;  %5256 = sst [smem:[#allocation12_spill]] %s3603_s12 }
 0x1d5   : >> { %1029 = vrot.lane.b32.xlu1 %v3466_v6, %s5149_s9  ;;  %v3537_v27 = vld [vmem:[%s3450_s8 + $0x62] sm:$0xff]  ;;  %v3562_v35 = vld [vmem:[%s3450_s8 + $0x7a] sm:$0xff]  ;;  %v3579_v41 = vld [vmem:[%s3450_s8 + $0x91] sm:$0xff]  ;;  %5257 = sst [smem:[#allocation13_spill]] %s3608_s13 }
 0x1d6   : >> { %v3585_v43 = vld [vmem:[%s3450_s8 + $0xa8] sm:$0xff]  ;;  %5258 = sst [smem:[#allocation14_spill]] %s3610_s14 }
 0x1d7   : >> { %v3606_v53 = vld [vmem:[%s3450_s8 + $0xa9] sm:$0xff]  ;;  %s3623_s17 = sld [smem:[#allocation3 + $0x6]] }
 0x1d8   : >> { %1095 = vrot.lane.b32.xlu0 %v3473_v7, %s5149_s9  ;;  %s3625_s19 = sld [smem:[#allocation3 + $0x7]]  ;;  %v3648_v62 = vld [vmem:[%s3450_s8 + $0xaa] sm:$0xff] }
 0x1d9   : >> { %1161 = vrot.lane.b32.xlu1 %v3476_v8, %s5149_s9  ;;  %s3627_s20 = sld [smem:[#allocation3 + $0xc]] }
 0x1da   : >> { %s3631_s22 = sld [smem:[#allocation3 + $0xd]] }
 0x1db   : >> { %s3637_s25 = sld [smem:[#allocation3 + $0xe]] }
 0x1dc   : >> { %1227 = vrot.lane.b32.xlu0 %v3483_v9, %s5149_s9  ;;  %s3639_s26 = sld [smem:[#allocation3 + $0xf]] }
 0x1dd   : >> { %1293 = vrot.lane.b32.xlu1 %v3486_v10, %s5149_s9  ;;  %s3641_s27 = sld [smem:[#allocation3 + $0x8]] }
 0x1de   : >> { %s3645_s28 = sld [smem:[#allocation3 + $0x9]] }
 0x1df   : >> { %5259 = sst [smem:[#allocation15_spill]] %s3627_s20 }
 0x1e0   : >> { %1359 = vrot.lane.b32.xlu0 %v3493_v11, %s5149_s9  ;;  %5260 = sst [smem:[#allocation16_spill]] %s3631_s22 }
 0x1e1   : >> { %1425 = vrot.lane.b32.xlu1 %v3496_v12, %s5149_s9  ;;  %5261 = sst [smem:[#allocation17_spill]] %s3637_s25 }
 0x1e2   : >> { %5262 = sst [smem:[#allocation18_spill]] %s3639_s26 }
 0x1e3   : >> { %5263 = sst [smem:[#allocation19_spill]] %s3641_s27 }
 0x1e4   : >> { %1491 = vrot.lane.b32.xlu0 %v3503_v13, %s5149_s9  ;;  %5264 = sst [smem:[#allocation20_spill]] %s3645_s28 }
 0x1e5   : >> { %s3650_s29 = sld [smem:[#allocation3 + $0xa]] }
 0x1e6   : >> { %s3652_s7 = sld [smem:[#allocation3 + $0xb]] }
 0x1e7   : >> { %s3659_s1 = sld [smem:[#allocation3 + $0x11]] }
 0x1e8   : >> { %s3665_s2 = sld [smem:[#allocation3 + $0x13]] }
 0x1e9   : >> { %s3667_s3 = sld [smem:[#allocation3 + $0x18]] }
 0x1ea   : >> { %s3671_s5 = sld [smem:[#allocation3 + $0x19]] }
 0x1eb   : >> { %5265 = sst [smem:[#allocation21_spill]] %s3650_s29 }
 0x1ec   : >> { %5266 = sst [smem:[#allocation22_spill]] %s3652_s7 }
 0x1ed   : >> { %s3679_s6 = sld [smem:[#allocation3 + $0x1b]] }
 0x1ee   : >> { %s3681_s21 = sld [smem:[#allocation3 + $0x14]] }
 0x1ef   : >> { %5268 = sst [smem:[#allocation23_spill]] %s3667_s3 }
 0x1f0   : >> { %5270 = sst [smem:[#allocation24_spill]] %s3671_s5 }
 0x1f1   : >> { %s3685_s18 = sld [smem:[#allocation3 + $0x15]] }
 0x1f2   : >> { %s3689_s30 = sld [smem:[#allocation3 + $0x16]] }
 0x1f3   : >> { %5272 = sst [smem:[#allocation26_spill]] %s3679_s6 }
 0x1f4   : >> { %5273 = sst [smem:[#allocation27_spill]] %s3681_s21 }
 0x1f5   : >> { %s3691_s8 = sld [smem:[#allocation3 + $0x17]] }
 0x1f6   : >> { %s3697_s21 = sld [smem:[#allocation3 + $0x1d]] }
 0x1f7   : >> { %5275 = sst [smem:[#allocation28_spill]] %s3685_s18 }
 0x1f8   : >> { %5276 = sst [smem:[#allocation29_spill]] %s3689_s30 }
 0x1f9   : >> { %s3703_s18 = sld [smem:[#allocation3 + $0x1e]] }
 0x1fa   : >> { %s3705_s30 = sld [smem:[#allocation3 + $0x1f]] }
 0x1fb   : >> { %5277 = sst [smem:[#allocation30_spill]] %s3691_s8 }
 0x1fc   : >> { %5278 = sst [smem:[#allocation31_spill]] %s3697_s21 }
 0x1fd   : >> { %s3707_s8 = sld [smem:[#allocation3 + $0x24]] }
 0x1fe   : >> { %s3711_s6 = sld [smem:[#allocation3 + $0x25]] }
 0x1ff   : >> { %5279 = sst [smem:[#allocation32_spill]] %s3703_s18 }
 0x200   : >> { %5280 = sst [smem:[#allocation33_spill]] %s3705_s30 }
 0x201   : >> { %s3715_s5 = sld [smem:[#allocation3 + $0x26]] }
 0x202   : >> { %s3717_s3 = sld [smem:[#allocation3 + $0x27]] }
 0x203   : >> { %5281 = sst [smem:[#allocation34_spill]] %s3707_s8 }
 0x204   : >> { %5282 = sst [smem:[#allocation35_spill]] %s3711_s6 }
 0x205   : >> { %s3719_s18 = sld [smem:[#allocation3 + $0x20]] }
 0x206   : >> { %s3723_s8 = sld [smem:[#allocation3 + $0x21]] }
 0x207   : >> { %5283 = sst [smem:[#allocation36_spill]] %s3715_s5 }
 0x208   : >> { %5284 = sst [smem:[#allocation37_spill]] %s3717_s3 }
 0x209   : >> { %s3727_s6 = sld [smem:[#allocation3 + $0x22]] }
 0x20a   : >> { %s3729_s30 = sld [smem:[#allocation3 + $0x23]] }
 0x20b   : >> { %5285 = sst [smem:[#allocation38_spill]] %s3719_s18 }
 0x20c   : >> { %5286 = sst [smem:[#allocation39_spill]] %s3723_s8 }
 0x20d   : >> { %s3731_s5 = sld [smem:[#allocation3 + $0x28]] }
 0x20e   : >> { %s3735_s18 = sld [smem:[#allocation3 + $0x29]] }
 0x20f   : >> { %5287 = sst [smem:[#allocation40_spill]] %s3727_s6 }
 0x210   : >> { %5288 = sst [smem:[#allocation41_spill]] %s3729_s30 }
 0x211   : >> { %s3741_s8 = sld [smem:[#allocation3 + $0x2a]] }
 0x212   : >> { %s3743_s6 = sld [smem:[#allocation3 + $0x2b]] }
 0x213   : >> { %5289 = sst [smem:[#allocation42_spill]] %s3731_s5 }
 0x214   : >> { %5290 = sst [smem:[#allocation43_spill]] %s3735_s18 }
 0x215   : >> { %s3745_s30 = sld [smem:[#allocation3 + $0x2c]] }
 0x216   : >> { %s3749_s3 = sld [smem:[#allocation3 + $0x2d]] }
 0x217   : >> { %5291 = sst [smem:[#allocation44_spill]] %s3741_s8 }
 0x218   : >> { %5292 = sst [smem:[#allocation45_spill]] %s3743_s6 }
 0x219   : >> { %s3753_s18 = sld [smem:[#allocation3 + $0x2e]] }
 0x21a   : >> { %s3755_s5 = sld [smem:[#allocation3 + $0x2f]] }
 0x21b   : >> { %5293 = sst [smem:[#allocation46_spill]] %s3745_s30 }
 0x21c   : >> { %5294 = sst [smem:[#allocation47_spill]] %s3749_s3 }
 0x21d   : >> { %s3757_s8 = sld [smem:[#allocation3 + $0x30]] }
 0x21e   : >> { %s3761_s30 = sld [smem:[#allocation3 + $0x31]] }
 0x21f   : >> { %5295 = sst [smem:[#allocation48_spill]] %s3753_s18 }
 0x220   : >> { %5296 = sst [smem:[#allocation49_spill]] %s3755_s5 }
 0x221   : >> { %s3765_s3 = sld [smem:[#allocation3 + $0x32]] }
 0x222   : >> { %s3767_s6 = sld [smem:[#allocation3 + $0x33]] }
 0x223   : >> { %5297 = sst [smem:[#allocation50_spill]] %s3757_s8 }
 0x224   : >> { %5298 = sst [smem:[#allocation51_spill]] %s3761_s30 }
 0x225   : >> { %s3769_s18 = sld [smem:[#allocation3 + $0x34]] }
 0x226   : >> { %s3773_s8 = sld [smem:[#allocation3 + $0x35]] }
 0x227   : >> { %5299 = sst [smem:[#allocation52_spill]] %s3765_s3 }
 0x228   : >> { %5300 = sst [smem:[#allocation53_spill]] %s3767_s6 }
 0x229   : >> { %s3779_s30 = sld [smem:[#allocation3 + $0x36]] }
 0x22a   : >> { %s3781_s3 = sld [smem:[#allocation3 + $0x37]] }
 0x22b   : >> { %5301 = sst [smem:[#allocation54_spill]] %s3769_s18 }
 0x22c   : >> { %5302 = sst [smem:[#allocation55_spill]] %s3773_s8 }
 0x22d   : >> { %s3783_s5 = sld [smem:[#allocation3 + $0x38]] }
 0x22e   : >> { %s3787_s6 = sld [smem:[#allocation3 + $0x39]] }
 0x22f   : >> { %5303 = sst [smem:[#allocation56_spill]] %s3779_s30 }
 0x230   : >> { %5304 = sst [smem:[#allocation57_spill]] %s3781_s3 }
 0x231   : >> { %s3791_s8 = sld [smem:[#allocation3 + $0x3a]] }
 0x232   : >> { %s3793_s18 = sld [smem:[#allocation3 + $0x3b]] }
 0x233   : >> { %5305 = sst [smem:[#allocation58_spill]] %s3783_s5 }
 0x234   : >> { %5306 = sst [smem:[#allocation59_spill]] %s3787_s6 }
 0x235   : >> { %s3795_s21 = sld [smem:[#allocation3 + $0x3c]] }
 0x236   : >> { %s3799_s5 = sld [smem:[#allocation3 + $0x3d]] }
 0x237   : >> { %5307 = sst [smem:[#allocation60_spill]] %s3791_s8 }
 0x238   : >> { %5308 = sst [smem:[#allocation61_spill]] %s3793_s18 }
 0x239   : >> { %s3803_s3 = sld [smem:[#allocation3 + $0x3e]] }
 0x23a   : >> { %s3805_s6 = sld [smem:[#allocation3 + $0x3f]] }
 0x23b   : >> { %5309 = sst [smem:[#allocation62_spill]] %s3795_s21 }
 0x23c   : >> { %5310 = sst [smem:[#allocation63_spill]] %s3799_s5 }
 0x23d   : >> { %s3807_s30 = sld [smem:[#allocation3 + $0x40]] }
 0x23e   : >> { %s3811_s21 = sld [smem:[#allocation3 + $0x41]] }
 0x23f   : >> { %5311 = sst [smem:[#allocation64_spill]] %s3803_s3 }
 0x240   : >> { %5312 = sst [smem:[#allocation65_spill]] %s3805_s6 }
 0x241   : >> { %s3818_s5 = sld [smem:[#allocation3 + $0x43]] }
 0x242   : >> { %v832_v14 = vpop.permute.xlu0 %831  ;;  %s3820_s3 = sld [smem:[#allocation3 + $0x44]] }
 0x243   : >> { %v833_v15 = vsel %vm830_vm7, %v832_v14, %v3453_v3  ;;  %v964_v16 = vpop.permute.xlu1 %963  ;;  %s3825_s6 = sld [smem:[#allocation3 + $0x46]] }
 0x244   : >> { %834 = vrot.lane.b32.xlu1 %v833_v15, %s5149_s9  ;;  %v965_v21 = vsel %vm830_vm7, %v964_v16, %v3456_v4  ;;  %5313 = sst [smem:[#allocation66_spill]] %s3811_s21 }
 0x245   : >> { %s3827_s18 = sld [smem:[#allocation3 + $0x47]] }
 0x246   : >> { %v898_v18 = vpop.permute.xlu0 %897  ;;  %s3829_s8 = sld [smem:[#allocation3 + $0x48]] }
 0x247   : >> { %v899_v19 = vsel %vm830_vm7, %v898_v18, %v3463_v5  ;;  %v1030_v22 = vpop.permute.xlu1 %1029  ;;  %5315 = sst [smem:[#allocation68_spill]] %s3818_s5 }
 0x248   : >> { %1557 = vrot.lane.b32.xlu1 %v3511_v17, %s5149_s9  ;;  %900 = vrot.lane.b32.xlu0 %v899_v19, %s5149_s9  ;;  %v1031_v23 = vsel %vm830_vm7, %v1030_v22, %v3466_v6  ;;  %5316 = sst [smem:[#allocation69_spill]] %s3820_s3 }
 0x249   : >> { %5318 = sst [smem:[#allocation71_spill]] %s3825_s6 }
 0x24a   : >> { %v1096_v25 = vpop.permute.xlu0 %1095  ;;  %s3833_s5 = sld [smem:[#allocation3 + $0x4a]] }
 0x24b   : >> { %v1097_v26 = vsel %vm830_vm7, %v1096_v25, %v3473_v7  ;;  %v1162_v28 = vpop.permute.xlu1 %1161  ;;  %5319 = sst [smem:[#allocation72_spill]] %s3827_s18 }
 0x24c   : >> { %1623 = vrot.lane.b32.xlu1 %v3519_v20, %s5149_s9  ;;  %966 = vrot.lane.b32.xlu0 %v965_v21, %s5149_s9  ;;  %v1163_v29 = vsel %vm830_vm7, %v1162_v28, %v3476_v8  ;;  %5320 = sst [smem:[#allocation73_spill]] %s3829_s8 }
 0x24d   : >> { %s3835_s3 = sld [smem:[#allocation3 + $0x4b]] }
 0x24e   : >> { %v1228_v31 = vpop.permute.xlu0 %1227  ;;  %s3841_s6 = sld [smem:[#allocation3 + $0x4e]] }
 0x24f   : >> { %v1229_v32 = vsel %vm830_vm7, %v1228_v31, %v3483_v9  ;;  %v1294_v36 = vpop.permute.xlu1 %1293  ;;  %s3843_s21 = sld [smem:[#allocation3 + $0x4f]] }
 0x250   : >> { %1032 = vrot.lane.b32.xlu0 %v1031_v23, %s5149_s9  ;;  %1689 = vrot.lane.b32.xlu1 %v3529_v24, %s5149_s9  ;;  %v1295_v37 = vsel %vm830_vm7, %v1294_v36, %v3486_v10  ;;  %5322 = sst [smem:[#allocation75_spill]] %s3833_s5 }
 0x251   : >> { %s3845_s18 = sld [smem:[#allocation3 + $0x50]] }
 0x252   : >> { %v1360_v39 = vpop.permute.xlu0 %1359  ;;  %s3847_s8 = sld [smem:[#allocation3 + $0x51]] }
 0x253   : >> { %v1361_v40 = vsel %vm830_vm7, %v1360_v39, %v3493_v11  ;;  %v1426_v44 = vpop.permute.xlu1 %1425  ;;  %5323 = sst [smem:[#allocation76_spill]] %s3835_s3 }
 0x254   : >> { %1098 = vrot.lane.b32.xlu0 %v1097_v26, %s5149_s9  ;;  %1755 = vrot.lane.b32.xlu1 %v3537_v27, %s5149_s9  ;;  %v1427_v45 = vsel %vm830_vm7, %v1426_v44, %v3496_v12  ;;  %s3852_s3 = sld [smem:[#allocation3 + $0x52]] }
 0x255   : >> { %s3855_s5 = sld [smem:[#allocation3 + $0x53]] }
 0x256   : >> { %v1492_v46 = vpop.permute.xlu0 %1491  ;;  %s3904_s25 = sld [smem:[#allocation3 + $0x59]] }
 0x257   : >> { %v1493_v47 = vsel %vm830_vm7, %v1492_v46, %v3503_v13  ;;  %5324 = sst [smem:[#allocation77_spill]] %s3845_s18  ;;  %v867_v46 = vstv %s3623_s17 }
 0x258   : >> { %1164 = vrot.lane.b32.xlu0 %v1163_v29, %s5149_s9  ;;  %1821 = vrot.lane.b32.xlu1 %v3545_v30, %s5149_s9  ;;  %s3860_s18 = sld [smem:[#allocation3 + $0x54]] }
 0x259   : >> { %s5329_s17 = sld [smem:[#allocation31_spill]] }
 0x25a   : >> { %s3944_s20 = sld [smem:[#allocation3 + $0x5e]] }
 0x25b   : >> { %5325 = sst [smem:[#allocation78_spill]] %s3855_s5 }
 0x25c   : >> { %1230 = vrot.lane.b32.xlu0 %v1229_v32, %s5149_s9  ;;  %1887 = vrot.lane.b32.xlu1 %v3553_v33, %s5149_s9  ;;  %s5358_s22 = sld [smem:[#allocation55_spill]] }
 0x25d   : >> { %s3976_s26 = sld [smem:[#allocation3 + $0x62]] }
 0x25e   : >> { %5326 = sst [smem:[#allocation79_spill]] %s3860_s18 }
 0x25f   : >> { %s3968_s18 = sld [smem:[#allocation3 + $0x61]] }
 0x260   : >> { %2151 = vrot.lane.b32.xlu0 %v3559_v34, %s5149_s9  ;;  %1953 = vrot.lane.b32.xlu1 %v3562_v35, %s5149_s9  ;;  %s4040_s5 = sld [smem:[#allocation3 + $0x6a]] }
 0x264   : >> { %1296 = vrot.lane.b32.xlu0 %v1295_v37, %s5149_s9  ;;  %2019 = vrot.lane.b32.xlu1 %v3571_v38, %s5149_s9 }
 0x268   : >> { %1362 = vrot.lane.b32.xlu0 %v1361_v40, %s5149_s9  ;;  %2085 = vrot.lane.b32.xlu1 %v3579_v41, %s5149_s9 }
 0x26c   : >> { %2217 = vrot.lane.b32.xlu0 %v3585_v43, %s5149_s9 }
 0x270   : >> { %1428 = vrot.lane.b32.xlu0 %v1427_v45, %s5149_s9 }
 0x274   : >> { %1494 = vrot.lane.b32.xlu0 %v1493_v47, %s5149_s9  ;;  %v871_v47 = vstv %s3625_s19  ;;  %s5330_s19 = sld [smem:[#allocation32_spill]] }
 0x2b6   : >> { %v835_v48 = vpop.permute.xlu1 %834 }
 0x2b7   : >> { %v836_v55 = vsel %vm830_vm7, %v835_v48, %v3453_v3  ;;  %v843_v48 = vstv %s3599_s10  ;;  %s3936_s10 = sld [smem:[#allocation3 + $0x5d]] }
 0x2ba   : >> { %v1558_v49 = vpop.permute.xlu1 %1557  ;;  %v901_v50 = vpop.permute.xlu0 %900 }
 0x2bb   : >> { %v1559_v51 = vsel %vm830_vm7, %v1558_v49, %v3511_v17  ;;  %v902_v52 = vsel %vm830_vm7, %v901_v50, %v3463_v5  ;;  %v847_v49 = vstv %s3603_s12  ;;  %v851_v50 = vstv %s3608_s13  ;;  %s5359_s13 = sld [smem:[#allocation56_spill]] }
 0x2bc   : >> { %1560 = vrot.lane.b32.xlu1 %v1559_v51, %s5149_s9  ;;  %904 = vrot.lane.b32.xlu0 %v902_v52, %s5147_s11  ;;  %v855_v51 = vstv %s3610_s14  ;;  %s3886_s14 = sld [smem:[#allocation3 + $0x57]] }
 0x2bd   : >> { %5391 = sst [smem:[#allocation56_spill]] %s4040_s5 }
 0x2be   : >> { %v967_v54 = vpop.permute.xlu0 %966  ;;  %v1624_v57 = vpop.permute.xlu1 %1623  ;;  %s4174_s5 = sld [smem:[#allocation3 + $0x78]] }
 0x2bf   : >> { %v968_v56 = vsel %vm830_vm7, %v967_v54, %v3456_v4  ;;  %v1625_v59 = vsel %vm830_vm7, %v1624_v57, %v3519_v20 }
 0x2c0   : >> { %838 = vrot.lane.b32.xlu1 %v836_v55, %s5147_s11  ;;  %2283 = vrot.lane.b32.xlu0 %v3606_v53, %s5149_s9 }
 0x2c2   : >> { %v1033_v58 = vpop.permute.xlu0 %1032  ;;  %v1690_v63 = vpop.permute.xlu1 %1689  ;;  %5331 = sst [smem:[#allocation31_spill]] %s3886_s14 }
 0x2c3   : >> { %v1034_v60 = vsel %vm830_vm7, %v1033_v58, %v3466_v6  ;;  %v1691_v15 = vsel %vm830_vm7, %v1690_v63, %v3529_v24  ;;  %v929_v58 = vstv %s3659_s1  ;;  %s3892_s1 = sld [smem:[#allocation3 + $0x58]] }
 0x2c4   : >> { %874 = vrot.lane.b32.xlu1 %v836_v55, %s5145_s23  ;;  %970 = vrot.lane.b32.xlu0 %v968_v56, %s5147_s11  ;;  %s3654_s23 = sld [smem:[#allocation3 + $0x10]]  ;;  %v3870_v55 = vmul.f32 %v867_v46, %v3453_v3 }
 0x2c5   : >> { %s3918_s14 = sld [smem:[#allocation3 + $0x5b]] }
 0x2c6   : >> { %v1099_v61 = vpop.permute.xlu0 %1098  ;;  %v1756_v2 = vpop.permute.xlu1 %1755 }
 0x2c7   : >> { %v1100_v1 = vsel %vm830_vm7, %v1099_v61, %v3473_v7  ;;  %v1757_v22 = vsel %vm830_vm7, %v1756_v2, %v3537_v27  ;;  %v879_v2 = vstv %s3641_s27  ;;  %s5343_s27 = sld [smem:[#allocation44_spill]] }
 0x2c8   : >> { %1626 = vrot.lane.b32.xlu1 %v1625_v59, %s5149_s9  ;;  %1036 = vrot.lane.b32.xlu0 %v1034_v60, %s5147_s11  ;;  %s3663_s11 = sld [smem:[#allocation3 + $0x12]] }
 0x2ca   : >> { %v1165_v0 = vpop.permute.xlu0 %1164  ;;  %v1822_v16 = vpop.permute.xlu1 %1821  ;;  %v925_v57 = vstv %s3654_s23  ;;  %s5335_s23 = sld [smem:[#allocation33_spill]] }
 0x2cb   : >> { %v1823_v19 = vsel %vm830_vm7, %v1822_v16, %v3545_v30  ;;  %v1166_v26 = vsel %vm830_vm7, %v1165_v0, %v3476_v8  ;;  %v937_v0 = vstv %s3665_s2  ;;  %v3896_v16 = vmul.f32 %v3463_v5, %v925_v57  ;;  %5344 = sst [smem:[#allocation32_spill]] %s3918_s14 }
 0x2cc   : >> { %940 = vrot.lane.b32.xlu1 %v902_v52, %s5267_s0  ;;  %2349 = vrot.lane.b32.xlu0 %v3648_v62, %s5149_s9  ;;  %s3675_s9 = sld [smem:[#allocation3 + $0x1a]] }
 0x2cd   : >> { %s5357_s2 = sld [smem:[#allocation54_spill]] }
 0x2ce   : >> { %v1231_v14 = vpop.permute.xlu0 %1230  ;;  %v1888_v25 = vpop.permute.xlu1 %1887  ;;  %v933_v59 = vstv %s3663_s11  ;;  %5370 = sst [smem:[#allocation54_spill]] %s3968_s18 }
 0x2cf   : >> { %v1232_v23 = vsel %vm830_vm7, %v1231_v14, %v3483_v9  ;;  %v1889_v31 = vsel %vm830_vm7, %v1888_v25, %v3553_v33  ;;  %v887_v14 = vstv %s3650_s29  ;;  %v999_v25 = vstv %s5330_s19  ;;  %s5341_s29 = sld [smem:[#allocation42_spill]] }
 0x2d0   : >> { %1006 = vrot.lane.b32.xlu1 %v968_v56, %s5267_s0  ;;  %1102 = vrot.lane.b32.xlu0 %v1100_v1, %s5269_s4  ;;  %v3875_v56 = vmul.f32 %v871_v47, %v3453_v3  ;;  %5354 = sst [smem:[#allocation42_spill]] %s3936_s10 }
 0x2d1   : >> { %s5376_s18 = sld [smem:[#allocation59_spill]] }
 0x2d2   : >> { %5271 = sst [smem:[#allocation25_spill]] %s3675_s9  ;;  %v3677_v18 = vpop.permute.xlu0 %2151  ;;  %v1954_v27 = vpop.permute.xlu1 %1953 }
 0x2d3   : >> { %s3693_s9 = sld [smem:[#allocation3 + $0x1c]]  ;;  %v1955_v29 = vsel %vm830_vm7, %v1954_v27, %v3562_v35 }
 0x2d4   : >> { %1692 = vrot.lane.b32.xlu1 %v1691_v15, %s5274_s24  ;;  %1138 = vrot.lane.b32.xlu0 %v1100_v1, %s5267_s0  ;;  %v891_v15 = vstv %s3652_s7  ;;  %s3912_s7 = sld [smem:[#allocation3 + $0x5a]] }
 0x2d5   : >> { %s4000_s14 = sld [smem:[#allocation3 + $0x65]] }
 0x2d6   : >> { %v1297_v21 = vpop.permute.xlu0 %1296  ;;  %v2020_v35 = vpop.permute.xlu1 %2019  ;;  %s4008_s11 = sld [smem:[#allocation3 + $0x66]] }
 0x2d7   : >> { %v1298_v36 = vsel %vm830_vm7, %v1297_v21, %v3486_v10  ;;  %v2021_v44 = vsel %vm830_vm7, %v2020_v35, %v3571_v38  ;;  %v2153_v38 = vsel %vm830_vm7, %v3677_v18, %v3559_v34  ;;  %v859_v34 = vstv %s3614_s15  ;;  %s3872_s15 = sld [smem:[#allocation3 + $0x55]] }
 0x2d8   : >> { %1072 = vrot.lane.b32.xlu1 %v1034_v60, %s5267_s0  ;;  %1824 = vrot.lane.b32.xlu0 %v1823_v19, %s5274_s24  ;;  %v3864_v52 = vmul.f32 %v859_v34, %v3453_v3  ;;  %v3899_v18 = vmul.f32 %v3463_v5, %v929_v58  ;;  %v3902_v19 = vmul.f32 %v3463_v5, %v933_v59  ;;  %s4014_s19 = sld [smem:[#allocation3 + $0x67]] }
 0x2d9   : >> { %v3907_v21 = vmul.f32 %v3463_v5, %v937_v0  ;;  %s4032_s10 = sld [smem:[#allocation3 + $0x69]] }
 0x2da   : >> { %v1363_v28 = vpop.permute.xlu0 %1362  ;;  %v2086_v37 = vpop.permute.xlu1 %2085 }
 0x2db   : >> { %v1364_v32 = vsel %vm830_vm7, %v1363_v28, %v3493_v11  ;;  %v2087_v39 = vsel %vm830_vm7, %v2086_v37, %v3579_v41  ;;  %v3934_v37 = vmul.f32 %v3456_v4, %v999_v25  ;;  %v1127_v25 = vstv %s5358_s22  ;;  %s5393_s22 = sld [smem:[#allocation77_spill]] }
 0x2dc   : >> { %1758 = vrot.lane.b32.xlu1 %v1757_v22, %s5274_s24  ;;  %1234 = vrot.lane.b32.xlu0 %v1232_v23, %s5269_s4  ;;  %v991_v22 = vstv %s3693_s9  ;;  %s5348_s9 = sld [smem:[#allocation45_spill]]  ;;  %v1395_v5 = vstv %s4008_s11 }
 0x2dd   : >> { %5327 = sst [smem:[#allocation80_spill]] %s3872_s15 }
 0x2de   : >> { %v2218_v30 = vpop.permute.xlu0 %2217  ;;  %s4110_s15 = sld [smem:[#allocation3 + $0x73]] }
 0x2df   : >> { %s5442_s11 = sld [smem:[#allocation24_spill]] }
 0x2e0   : >> { %1168 = vrot.lane.b32.xlu1 %v1166_v26, %s5269_s4  ;;  %1270 = vrot.lane.b32.xlu0 %v1232_v23, %s5267_s0  ;;  %v995_v23 = vstv %s5329_s17  ;;  %s3924_s17 = sld [smem:[#allocation3 + $0x5c]] }
 0x2e2   : >> { %v1429_v33 = vpop.permute.xlu0 %1428  ;;  %v1069_v34 = vstv %s5348_s9 }
 0x2e3   : >> { %v1430_v41 = vsel %vm830_vm7, %v1429_v33, %v3496_v12  ;;  %v3931_v33 = vmul.f32 %v3456_v4, %v995_v23  ;;  %v1123_v23 = vstv %s5357_s2  ;;  %s5378_s2 = sld [smem:[#allocation68_spill]] }
 0x2e4   : >> { %1204 = vrot.lane.b32.xlu1 %v1166_v26, %s5267_s0  ;;  %1956 = vrot.lane.b32.xlu0 %v1955_v29, %s5274_s24  ;;  %v1003_v29 = vstv %s5335_s23  ;;  %s5372_s23 = sld [smem:[#allocation66_spill]] }
 0x2e6   : >> { %v1495_v40 = vpop.permute.xlu0 %1494  ;;  %5349 = sst [smem:[#allocation33_spill]] %s3924_s17 }
 0x2e7   : >> { %v1496_v45 = vsel %vm830_vm7, %v1495_v40, %v3503_v13  ;;  %v2219_v13 = vsel %vm830_vm7, %v2218_v30, %v3585_v43  ;;  %v863_v43 = vstv %s3619_s16  ;;  %s3880_s16 = sld [smem:[#allocation3 + $0x56]]  ;;  %v1057_v40 = vstv %s5341_s29 }
 0x2e8   : >> { %1890 = vrot.lane.b32.xlu1 %v1889_v31, %s5274_s24  ;;  %1366 = vrot.lane.b32.xlu0 %v1364_v32, %s5269_s4  ;;  %v3867_v54 = vmul.f32 %v863_v43, %v3453_v3  ;;  %v883_v3 = vstv %s3645_s28  ;;  %s5342_s28 = sld [smem:[#allocation43_spill]]  ;;  %v3960_v58 = vmul.f32 %v3466_v6, %v1057_v40  ;;  %v3992_v43 = vmul.f32 %v3473_v7, %v1123_v23 }
 0x2e9   : >> { %5356 = sst [smem:[#allocation43_spill]] %s3944_s20  ;;  %v1201_v47 = vstv %s5378_s2  ;;  %v1329_v30 = vstv %s3912_s7  ;;  %v1399_v31 = vstv %s4014_s19 }
 0x2ea   : >> { %s3950_s17 = sld [smem:[#allocation3 + $0x5f]]  ;;  %v1193_v40 = vstv %s5372_s23  ;;  %v4094_v28 = vmul.f32 %v3486_v10, %v1329_v30 }
 0x2eb   : >> { %s5364_s29 = sld [smem:[#allocation57_spill]] }
 0x2ec   : >> { %1300 = vrot.lane.b32.xlu1 %v1298_v36, %s5269_s4  ;;  %1402 = vrot.lane.b32.xlu0 %v1364_v32, %s5267_s0  ;;  %s5402_s2 = sld [smem:[#allocation33_spill]] }
 0x2ed   : >> { %5328 = sst [smem:[#allocation81_spill]] %s3880_s16 }
 0x2ee   : >> { %s3982_s16 = sld [smem:[#allocation3 + $0x63]] }
 0x2ef   : >> { %s4138_s20 = sld [smem:[#allocation3 + $0x74]] }
 0x2f0   : >> { %1336 = vrot.lane.b32.xlu1 %v1298_v36, %s5267_s0  ;;  %2088 = vrot.lane.b32.xlu0 %v2087_v39, %s5274_s24  ;;  %v3928_v36 = vmul.f32 %v3456_v4, %v991_v22  ;;  %v3939_v39 = vmul.f32 %v3456_v4, %v1003_v29  ;;  %5360 = sst [smem:[#allocation44_spill]] %s3950_s17  ;;  %v3971_v22 = vmul.f32 %v3466_v6, %v1069_v34  ;;  %v1131_v29 = vstv %s5359_s13 }
 0x2f1   : >> { %s5377_s17 = sld [smem:[#allocation60_spill]]  ;;  %v1263_v4 = vstv %s3841_s6 }
 0x2f2   : >> { %s3988_s13 = sld [smem:[#allocation3 + $0x64]] }
 0x2f3   : >> { %s5396_s6 = sld [smem:[#allocation78_spill]] }
 0x2f4   : >> { %2022 = vrot.lane.b32.xlu1 %v2021_v44, %s5274_s24  ;;  %1498 = vrot.lane.b32.xlu0 %v1496_v45, %s5269_s4  ;;  %v1061_v44 = vstv %s5342_s28  ;;  %5374 = sst [smem:[#allocation55_spill]] %s3982_s16 }
 0x2f5   : >> { %v3963_v59 = vmul.f32 %v3466_v6, %v1061_v44  ;;  %v3995_v44 = vmul.f32 %v3473_v7, %v1127_v25  ;;  %v4027_v25 = vmul.f32 %v3476_v8, %v1193_v40  ;;  %s4064_s16 = sld [smem:[#allocation3 + $0x6d]] }
 0x2f6   : >> { %s4072_s28 = sld [smem:[#allocation3 + $0x70]] }
 0x2f7   : >> { %s5409_s9 = sld [smem:[#allocation55_spill]] }
 0x2f8   : >> { %1432 = vrot.lane.b32.xlu1 %v1430_v41, %s5269_s4  ;;  %1534 = vrot.lane.b32.xlu0 %v1496_v45, %s5267_s0  ;;  %s3816_s4 = sld [smem:[#allocation3 + $0x42]]  ;;  %v1065_v45 = vstv %s5343_s27 }
 0x2f9   : >> { %s3956_s27 = sld [smem:[#allocation3 + $0x60]]  ;;  %v3966_v0 = vmul.f32 %v3466_v6, %v1065_v45  ;;  %v3998_v45 = vmul.f32 %v3473_v7, %v1131_v29  ;;  %v1189_v6 = vstv %s3807_s30 }
 0x2fa   : >> { %s4020_s30 = sld [smem:[#allocation3 + $0x68]]  ;;  %v4024_v57 = vmul.f32 %v3476_v8, %v1189_v6  ;;  %v1325_v6 = vstv %s3904_s25 }
 0x2fb   : >> { %s4084_s25 = sld [smem:[#allocation3 + $0x6e]] }
 0x2fc   : >> { %1468 = vrot.lane.b32.xlu1 %v1430_v41, %s5267_s0  ;;  %2220 = vrot.lane.b32.xlu0 %v2219_v13, %s5274_s24  ;;  %s3823_s0 = sld [smem:[#allocation3 + $0x45]]  ;;  %v1267_v41 = vstv %s3843_s21  ;;  %v1453_v61 = vstv %s4072_s28 }
 0x2fd   : >> { %s4104_s21 = sld [smem:[#allocation3 + $0x72]] }
 0x2fe   : >> { %5314 = sst [smem:[#allocation67_spill]] %s3816_s4 }
 0x2ff   : >> { %s3831_s4 = sld [smem:[#allocation3 + $0x49]] }
 0x300   : >> { %2154 = vrot.lane.b32.xlu1 %v2153_v38, %s5274_s24  ;;  %s3837_s24 = sld [smem:[#allocation3 + $0x4c]]  ;;  %v1135_v38 = vstv %s5364_s29 }
 0x301   : >> { %5365 = sst [smem:[#allocation45_spill]] %s3956_s27  ;;  %v4003_v34 = vmul.f32 %v3473_v7, %v1135_v38  ;;  %v4035_v38 = vmul.f32 %v3476_v8, %v1201_v47  ;;  %v4067_v47 = vmul.f32 %v3483_v9, %v1267_v41  ;;  %v1387_v41 = vstv %s3988_s13 }
 0x302   : >> { %5317 = sst [smem:[#allocation70_spill]] %s3823_s0  ;;  %v4121_v1 = vmul.f32 %v3493_v11, %v1387_v41 }
 0x303   : >> { %s3839_s0 = sld [smem:[#allocation3 + $0x4d]] }
 0x304   : >> { %s5373_s12 = sld [smem:[#allocation67_spill]] }
 0x305   : >> { %5321 = sst [smem:[#allocation74_spill]] %s3831_s4 }
 0x306   : >> { %s5375_s27 = sld [smem:[#allocation58_spill]]  ;;  %v1255_v7 = vstv %s3837_s24 }
 0x307   : >> { %s4046_s29 = sld [smem:[#allocation3 + $0x6b]]  ;;  %v4056_v46 = vmul.f32 %v3483_v9, %v1255_v7 }
 0x308   : >> { %s5394_s24 = sld [smem:[#allocation32_spill]] }
 0x309   : >> { %v1259_v23 = vstv %s3839_s0  ;;  %s4052_s0 = sld [smem:[#allocation3 + $0x6c]] }
 0x30a   : >> { %v1197_v13 = vstv %s5373_s12  ;;  %v4059_v40 = vmul.f32 %v3483_v9, %v1259_v23  ;;  %5400 = sst [smem:[#allocation67_spill]] %s4064_s16  ;;  %v4091_v23 = vmul.f32 %v3486_v10, %v1325_v6 }
 0x30b   : >> { %v4030_v29 = vmul.f32 %v3476_v8, %v1197_v13  ;;  %v4062_v13 = vmul.f32 %v3483_v9, %v1263_v4  ;;  %v1321_v8 = vstv %s3892_s1  ;;  %s4078_s4 = sld [smem:[#allocation3 + $0x71]] }
 0x30c   : >> { %5404 = sst [smem:[#allocation58_spill]] %s4084_s25  ;;  %v4088_v7 = vmul.f32 %v3486_v10, %v1321_v8  ;;  %v1391_v8 = vstv %s4000_s14  ;;  %s5410_s14 = smov 113  }
 0x30d   : >> { %5392 = sst [smem:[#allocation57_spill]] %s4046_s29  ;;  %v4124_v63 = vmul.f32 %v3493_v11, %v1391_v8 }
 0x30e   : >> { %v1333_v27 = vstv %s5394_s24  ;;  %s5406_s1 = sld [smem:[#allocation45_spill]] }
 0x30f   : >> { %5395 = sst [smem:[#allocation66_spill]] %s4052_s0  ;;  %v4099_v9 = vmul.f32 %v3486_v10, %v1333_v27 }
 0x310   : >> { %s4096_s24 = sld [smem:[#allocation3 + $0x6f]] }
 0x311   : >> { %s5408_s12 = sld [smem:[#allocation54_spill]]  ;;  %v1457_v8 = vstv %s4078_s4  ;;  %s5418_s4 = smov 127  }
 0x312   : >> { %5416 = sst [smem:[#allocation60_spill]] %s4138_s20 }
 0x313   : >> { %s4145_s23 = sld [smem:[#allocation3 + $0x75]] }
 0x314   : >> { %s4156_s28 = sld [smem:[#allocation3 + $0x76]] }
 0x315   : >> { %s4167_s7 = sld [smem:[#allocation3 + $0x77]] }
 0x316   : >> { %5407 = sst [smem:[#allocation59_spill]] %s4096_s24 }
 0x317   : >> { %s5427_s16 = sld [smem:[#allocation15_spill]] }
 0x318   : >> { %s5428_s0 = sld [smem:[#allocation16_spill]] }
 0x319   : >> { %5417 = sst [smem:[#allocation68_spill]] %s4145_s23 }
 0x31a   : >> { %5419 = sst [smem:[#allocation77_spill]] %s4156_s28 }
 0x31b   : >> { %5426 = sst [smem:[#allocation32_spill]] %s4167_s7 }
 0x31c   : >> { %s5429_s24 = sld [smem:[#allocation17_spill]] }
 0x31d   : >> { %s5430_s29 = sld [smem:[#allocation18_spill]] }
 0x31e   : >> { %s5439_s25 = sld [smem:[#allocation29_spill]] }
 0x31f   : >> { %s5443_s19 = sld [smem:[#allocation25_spill]] }
 0x320   : >> { %s5444_s13 = sld [smem:[#allocation26_spill]] }
 0x32e   : >> { %v1561_v6 = vpop.permute.xlu1 %1560  ;;  %v905_v35 = vpop.permute.xlu0 %904 }
 0x32f   : >> { %v1562_v10 = vsel %vm830_vm7, %v1561_v6, %v3511_v17  ;;  %v4127_v17 = vmul.f32 %v3493_v11, %v1395_v5  ;;  %v4130_v6 = vmul.f32 %v3493_v11, %v1399_v31  ;;  %v4162_v11 = vmul.f32 %v3496_v12, %v1453_v61 }
 0x330   : >> { %1564 = vrot.lane.b32.xlu1 %v1562_v10, %s5410_s14  ;;  %v1461_v61 = vstv %s4104_s21  ;;  %s5438_s21 = sld [smem:[#allocation28_spill]] }
 0x331   : >> { %5412 = vst [vmem:[#allocation82_spill] sm:$0xff] %v4130_v6  ;;  %5422 = vst [vmem:[#allocation83_spill] sm:$0xff] %v4162_v11 }
 0x332   : >> { %v839_v30 = vpop.permute.xlu1 %838  ;;  %v2284_v26 = vpop.permute.xlu0 %2283 }
 0x333   : >> { %v841_v5 = vsel %vm819_vm5, %v839_v30, 0.0  ;;  %v2285_v30 = vsel %vm830_vm7, %v2284_v26, %v3606_v53  ;;  %v1465_v26 = vstv %s4110_s15  ;;  %s5431_s15 = smov 16  }
 0x334   : >> { %v844_v4 = vmul.f32 %v843_v48, %v841_v5  ;;  %v848_v41 = vmul.f32 %v847_v49, %v841_v5  ;;  %v852_v32 = vmul.f32 %v851_v50, %v841_v5  ;;  %v856_v27 = vmul.f32 %v855_v51, %v841_v5  ;;  %1600 = vrot.lane.b32.xlu1 %v1562_v10, %s5418_s4 }
 0x335   : >> { %v4165_v48 = vmul.f32 %v3496_v12, %v1457_v8  ;;  %v907_v50 = vsel %vm819_vm5, %v905_v35, 0.0 }
 0x336   : >> { %v861_v49 = vadd.f32 %v3864_v52, %v844_v4  ;;  %v875_v53 = vpop.permute.xlu1 %874  ;;  %v971_v51 = vpop.permute.xlu0 %970  ;;  %v865_v10 = vadd.f32 %v3867_v54, %v848_v41  ;;  %v869_v8 = vadd.f32 %v3870_v55, %v852_v32  ;;  %v873_v5 = vadd.f32 %v3875_v56, %v856_v27 }
 0x337   : >> { %5424 = vst [vmem:[#allocation84_spill] sm:$0xff] %v4165_v48  ;;  %v877_v52 = vsel %vm820_vm6, %v875_v53, 0.0  ;;  %v5432_v48 = vstv %s5427_s16  ;;  %v5433_v54 = vstv %s5428_s0  ;;  %v5434_v55 = vstv %s5429_s24  ;;  %s5436_s16 = sld [smem:[#allocation23_spill]] }
 0x338   : >> { %v880_v35 = vmul.f32 %v879_v2, %v877_v52  ;;  %v884_v4 = vmul.f32 %v883_v3, %v877_v52  ;;  %v888_v31 = vmul.f32 %v887_v14, %v877_v52  ;;  %v892_v60 = vmul.f32 %v891_v15, %v877_v52  ;;  %2286 = vrot.lane.b32.xlu1 %v2285_v30, %s5431_s15  ;;  %s5437_s0 = sld [smem:[#allocation27_spill]] }
 0x339   : >> { %v910_v11 = vmul.f32 %v5432_v48, %v907_v50  ;;  %v914_v41 = vmul.f32 %v5433_v54, %v907_v50  ;;  %v918_v32 = vmul.f32 %v5434_v55, %v907_v50  ;;  %v5435_v56 = vstv %s5430_s29  ;;  %s4208_s29 = sld [smem:[#allocation3 + $0x79]] }
 0x33a   : >> { %v922_v27 = vmul.f32 %v5435_v56, %v907_v50  ;;  %v881_v6 = vadd.f32 %v880_v35, %v861_v49  ;;  %v885_v53 = vadd.f32 %v884_v4, %v865_v10  ;;  %v889_v2 = vadd.f32 %v888_v31, %v869_v8  ;;  %v1627_v14 = vpop.permute.xlu1 %1626  ;;  %v1037_v15 = vpop.permute.xlu0 %1036  ;;  %s5440_s24 = sld [smem:[#allocation30_spill]] }
 0x33b   : >> { %v893_v3 = vadd.f32 %v892_v60, %v873_v5  ;;  %v973_v30 = vsel %vm819_vm5, %v971_v51, 0.0  ;;  %v1628_v48 = vsel %vm830_vm7, %v1627_v14, %v3519_v20  ;;  %v4203_v52 = vmul.f32 %v3496_v12, %v1461_v61 }
 0x33c   : >> { %v4206_v49 = vmul.f32 %v3496_v12, %v1465_v26  ;;  %v911_v60 = vadd.f32 %v910_v11, %v881_v6  ;;  %v915_v31 = vadd.f32 %v914_v41, %v885_v53  ;;  %v919_v50 = vadd.f32 %v918_v32, %v889_v2  ;;  %1630 = vrot.lane.b32.xlu0 %v1628_v48, %s5410_s14 }
 0x33d   : >> { %v923_v10 = vadd.f32 %v922_v27, %v893_v3  ;;  %v1473_v51 = vstv %s4138_s20  ;;  %v1477_v20 = vstv %s4145_s23  ;;  %v1481_v61 = vstv %s4156_s28  ;;  %s5456_s28 = sld [smem:[#allocation41_spill]] }
 0x33e   : >> { %v1485_v8 = vstv %s4167_s7  ;;  %v927_v12 = vadd.f32 %v3896_v16, %v911_v60  ;;  %v5441_v26 = vstv %s5436_s16  ;;  %v941_v6 = vpop.permute.xlu1 %940  ;;  %v1039_v11 = vsel %vm819_vm5, %v1037_v15, 0.0  ;;  %v2350_v35 = vpop.permute.xlu0 %2349  ;;  %s5448_s16 = sld [smem:[#allocation34_spill]] }
 0x33f   : >> { %v976_v5 = vmul.f32 %v5441_v26, %v973_v30  ;;  %v1503_v4 = vstv %s4174_s5  ;;  %v931_v54 = vadd.f32 %v3899_v18, %v915_v31  ;;  %v935_v41 = vadd.f32 %v3902_v19, %v919_v50  ;;  %s4235_s7 = sld [smem:[#allocation3 + $0x7a]] }
 0x340   : >> { %v939_v55 = vadd.f32 %v3907_v21, %v923_v10  ;;  %v943_v16 = vsel %vm820_vm6, %v941_v6, 0.0  ;;  %v5445_v32 = vstv %s5437_s0  ;;  %v5446_v27 = vstv %s5438_s21  ;;  %1666 = vrot.lane.b32.xlu0 %v1628_v48, %s5418_s4  ;;  %s4245_s0 = sld [smem:[#allocation3 + $0x7b]] }
 0x341   : >> { %v946_v56 = vmul.f32 %v5445_v32, %v943_v16  ;;  %v950_v53 = vmul.f32 %v5446_v27, %v943_v16  ;;  %v5447_v2 = vstv %s5439_s25  ;;  %v5449_v14 = vstv %s5440_s24  ;;  %s5453_s21 = sld [smem:[#allocation38_spill]] }
 0x342   : >> { %v954_v3 = vmul.f32 %v5447_v2, %v943_v16  ;;  %v958_v15 = vmul.f32 %v5449_v14, %v943_v16  ;;  %v5450_v18 = vstv %s5442_s11  ;;  %v5451_v21 = vstv %s5443_s19  ;;  %s5454_s25 = sld [smem:[#allocation39_spill]]  ;;  %v1007_v32 = vpop.permute.xlu1 %1006  ;;  %v1103_v27 = vpop.permute.xlu0 %1102 }
 0x343   : >> { %v980_v19 = vmul.f32 %v5450_v18, %v973_v30  ;;  %v984_v60 = vmul.f32 %v5451_v21, %v973_v30  ;;  %v5452_v31 = vstv %s5444_s13  ;;  %v2351_v10 = vsel %vm830_vm7, %v2350_v35, %v3648_v62  ;;  %s5455_s24 = sld [smem:[#allocation40_spill]] }
 0x344   : >> { %v988_v50 = vmul.f32 %v5452_v31, %v973_v30  ;;  %v947_v26 = vadd.f32 %v946_v56, %v927_v12  ;;  %v951_v6 = vadd.f32 %v950_v53, %v931_v54  ;;  %v955_v48 = vadd.f32 %v954_v3, %v935_v41  ;;  %s5458_s11 = sld [smem:[#allocation35_spill]]  ;;  %2352 = vrot.lane.b32.xlu0 %v2351_v10, %s5431_s15 }
 0x345   : >> { %v959_v16 = vadd.f32 %v958_v15, %v939_v55  ;;  %v5457_v2 = vstv %s5448_s16  ;;  %v1009_v30 = vsel %vm820_vm6, %v1007_v32, 0.0  ;;  %v1105_v62 = vsel %vm819_vm5, %v1103_v27, 0.0  ;;  %s5459_s19 = sld [smem:[#allocation36_spill]] }
 0x346   : >> { %v1042_v14 = vmul.f32 %v5457_v2, %v1039_v11  ;;  %v1507_v35 = vstv %s4208_s29  ;;  %v977_v18 = vadd.f32 %v976_v5, %v947_v26  ;;  %v981_v21 = vadd.f32 %v980_v19, %v951_v6  ;;  %s5460_s13 = sld [smem:[#allocation37_spill]]  ;;  %v1693_v10 = vpop.permute.xlu1 %1692  ;;  %v1139_v26 = vpop.permute.xlu0 %1138 }
 0x347   : >> { %v985_v12 = vadd.f32 %v984_v60, %v955_v48  ;;  %v989_v54 = vadd.f32 %v988_v50, %v959_v16  ;;  %v5461_v41 = vstv %s5453_s21  ;;  %v5464_v31 = vstv %s5456_s28  ;;  %s4263_s16 = sld [smem:[#allocation3 + $0x7c]] }
 0x348   : >> { %v1012_v55 = vmul.f32 %v5461_v41, %v1009_v30  ;;  %v5462_v56 = vstv %s5454_s25  ;;  %v1024_v32 = vmul.f32 %v5464_v31, %v1009_v30  ;;  %v993_v5 = vadd.f32 %v3928_v36, %v977_v18  ;;  %s5465_s23 = sld [smem:[#allocation50_spill]] }
 0x349   : >> { %v1016_v53 = vmul.f32 %v5462_v56, %v1009_v30  ;;  %v5463_v3 = vstv %s5455_s24  ;;  %v997_v19 = vadd.f32 %v3931_v33, %v981_v21  ;;  %s5466_s20 = sld [smem:[#allocation51_spill]]  ;;  %v1001_v60 = vadd.f32 %v3934_v37, %v985_v12 }
 0x34a   : >> { %v1020_v15 = vmul.f32 %v5463_v3, %v1009_v30  ;;  %v1005_v50 = vadd.f32 %v3939_v39, %v989_v54  ;;  %s4269_s15 = sld [smem:[#allocation3 + $0x7d]]  ;;  %v5467_v6 = vstv %s5458_s11  ;;  %v1694_v33 = vsel %vm830_vm7, %v1693_v10, %v3529_v24 }
 0x34b   : >> { %v1046_v48 = vmul.f32 %v5467_v6, %v1039_v11  ;;  %v5468_v16 = vstv %s5459_s19  ;;  %v1013_v30 = vadd.f32 %v1012_v55, %v993_v5  ;;  %v1017_v18 = vadd.f32 %v1016_v53, %v997_v19  ;;  %s5470_s28 = sld [smem:[#allocation52_spill]]  ;;  %1696 = vrot.lane.b32.xlu1 %v1694_v33, %s5410_s14  ;;  %v1073_v55 = vpop.permute.xlu1 %1072  ;;  %v1825_v53 = vpop.permute.xlu0 %1824 }
 0x34c   : >> { %v1050_v27 = vmul.f32 %v5468_v16, %v1039_v11  ;;  %v5469_v2 = vstv %s5460_s13  ;;  %v1021_v37 = vadd.f32 %v1020_v15, %v1001_v60  ;;  %s5471_s21 = sld [smem:[#allocation53_spill]]  ;;  %v1025_v39 = vadd.f32 %v1024_v32, %v1005_v50 }
 0x34d   : >> { %v1054_v36 = vmul.f32 %v5469_v2, %v1039_v11  ;;  %v1511_v56 = vstv %s4235_s7  ;;  %v1515_v3 = vstv %s4245_s0  ;;  %v1043_v31 = vadd.f32 %v1042_v14, %v1013_v30  ;;  %s5474_s25 = sld [smem:[#allocation46_spill]] }
 0x34e   : >> { %v5472_v21 = vstv %s5465_s23  ;;  %v1047_v6 = vadd.f32 %v1046_v48, %v1017_v18  ;;  %v1051_v11 = vadd.f32 %v1050_v27, %v1021_v37  ;;  %s5475_s24 = sld [smem:[#allocation47_spill]]  ;;  %v1075_v15 = vsel %vm820_vm6, %v1073_v55, 0.0 }
 0x34f   : >> { %v1108_v12 = vmul.f32 %v5472_v21, %v1105_v62  ;;  %v5473_v54 = vstv %s5466_s20  ;;  %v1055_v24 = vadd.f32 %v1054_v36, %v1025_v39  ;;  %s5476_s11 = sld [smem:[#allocation48_spill]]  ;;  %v1141_v60 = vsel %vm820_vm6, %v1139_v26, 0.0  ;;  %1732 = vrot.lane.b32.xlu1 %v1694_v33, %s5418_s4  ;;  %v1235_v21 = vpop.permute.xlu0 %1234 }
 0x350   : >> { %v1112_v41 = vmul.f32 %v5473_v54, %v1105_v62  ;;  %s5477_s19 = sld [smem:[#allocation49_spill]]  ;;  %v1059_v50 = vadd.f32 %v3960_v58, %v1043_v31  ;;  %v1063_v10 = vadd.f32 %v3963_v59, %v1047_v6  ;;  %v1067_v48 = vadd.f32 %v3966_v0, %v1051_v11  ;;  %v1759_v59 = vpop.permute.xlu1 %1758 }
 0x351   : >> { %s4286_s13 = sld [smem:[#allocation3 + $0x7e]]  ;;  %v5478_v32 = vstv %s5470_s28  ;;  %v1071_v16 = vadd.f32 %v3971_v22, %v1055_v24  ;;  %v5486_v37 = vstv %s5375_s27  ;;  %v5487_v39 = vstv %s5376_s18 }
 0x352   : >> { %v1116_v5 = vmul.f32 %v5478_v32, %v1105_v62  ;;  %v5479_v19 = vstv %s5471_s21  ;;  %s5480_s20 = sld [smem:[#allocation10_spill]]  ;;  %v1144_v0 = vmul.f32 %v5486_v37, %v1141_v60  ;;  %v1148_v22 = vmul.f32 %v5487_v39, %v1141_v60 }
 0x353   : >> { %v1120_v14 = vmul.f32 %v5479_v19, %v1105_v62  ;;  %s4301_s23 = sld [smem:[#allocation3 + $0x7f]]  ;;  %v5481_v27 = vstv %s5474_s25  ;;  %v1519_v33 = vstv %s4263_s16  ;;  %v1523_v54 = vstv %s4269_s15 }
 0x354   : >> { %v1078_v62 = vmul.f32 %v5481_v27, %v1075_v15  ;;  %v5482_v2 = vstv %s5475_s24  ;;  %s5484_s28 = sld [smem:[#allocation61_spill]] }
 0x355   : >> { %v1082_v36 = vmul.f32 %v5482_v2, %v1075_v15  ;;  %v5483_v26 = vstv %s5476_s11  ;;  %s5490_s18 = sld [smem:[#allocation73_spill]] }
 0x356   : >> { %v1086_v30 = vmul.f32 %v5483_v26, %v1075_v15  ;;  %v5485_v58 = vstv %s5477_s19  ;;  %v1079_v31 = vadd.f32 %v1078_v62, %v1059_v50  ;;  %v1237_v26 = vsel %vm819_vm5, %v1235_v21, 0.0  ;;  %s5491_s27 = sld [smem:[#allocation74_spill]] }
 0x357   : >> { %v1090_v18 = vmul.f32 %v5485_v58, %v1075_v15  ;;  %v1083_v6 = vadd.f32 %v1082_v36, %v1063_v10  ;;  %v5488_v15 = vstv %s5377_s17  ;;  %v1271_v36 = vpop.permute.xlu0 %1270  ;;  %s5492_s17 = sld [smem:[#allocation62_spill]] }
 0x358   : >> { %v1087_v11 = vadd.f32 %v1086_v30, %v1067_v48  ;;  %v4318_v55 = vld [vmem:[%s5480_s20 + $0x62] sm:$0xff]  ;;  %v1152_v19 = vmul.f32 %v5488_v15, %v1141_v60  ;;  %v1109_v58 = vadd.f32 %v1108_v12, %v1079_v31  ;;  %v1169_v48 = vpop.permute.xlu1 %1168  ;;  %s5493_s16 = sld [smem:[#allocation63_spill]] }
 0x359   : >> { %v1091_v24 = vadd.f32 %v1090_v18, %v1071_v16  ;;  %v1760_v32 = vsel %vm830_vm7, %v1759_v59, %v4318_v55  ;;  %v1113_v50 = vadd.f32 %v1112_v41, %v1083_v6  ;;  %v4331_v16 = vld [vmem:[%s5480_s20 + $0x78] sm:$0xff]  ;;  %v4336_v30 = vld [vmem:[%s5480_s20 + $0x49] sm:$0xff]  ;;  %s5494_s15 = sld [smem:[#allocation64_spill]]  ;;  %v1171_v37 = vsel %vm819_vm5, %v1169_v48, 0.0 }
 0x35a   : >> { %v5489_v27 = vstv %s5484_s28  ;;  %v1117_v62 = vadd.f32 %v1116_v5, %v1087_v11  ;;  %1762 = vrot.lane.b32.xlu0 %v1760_v32, %s5410_s14  ;;  %1798 = vrot.lane.b32.xlu1 %v1760_v32, %s5418_s4  ;;  %v4339_v12 = vmul.f32 %v4336_v30, %v1519_v33  ;;  %v4342_v41 = vmul.f32 %v4336_v30, %v1523_v54  ;;  %s5495_s21 = sld [smem:[#allocation65_spill]] }
 0x35b   : >> { %v1156_v2 = vmul.f32 %v5489_v27, %v1141_v60  ;;  %v1121_v10 = vadd.f32 %v1120_v14, %v1091_v24  ;;  %v1826_v60 = vsel %vm830_vm7, %v1825_v53, %v4331_v16  ;;  %v1527_v5 = vstv %s4286_s13  ;;  %s4349_s25 = sld [smem:[#allocation3 + $0x80]] }
 0x35c   : >> { %v1125_v14 = vadd.f32 %v3992_v43, %v1109_v58  ;;  %v1129_v18 = vadd.f32 %v3995_v44, %v1113_v50  ;;  %v1133_v53 = vadd.f32 %v3998_v45, %v1117_v62  ;;  %v5496_v39 = vstv %s5490_s18  ;;  %s5498_s24 = sld [smem:[#allocation75_spill]]  ;;  %v1205_v62 = vpop.permute.xlu1 %1204 }
 0x35d   : >> { %v1137_v59 = vadd.f32 %v4003_v34, %v1121_v10  ;;  %v1240_v21 = vmul.f32 %v5496_v39, %v1237_v26  ;;  %v5497_v33 = vstv %s5491_s27  ;;  %s5499_s11 = sld [smem:[#allocation76_spill]]  ;;  %v1531_v43 = vstv %s4301_s23 }
 0x35e   : >> { %v1244_v54 = vmul.f32 %v5497_v33, %v1237_v26  ;;  %v1145_v31 = vadd.f32 %v1144_v0, %v1125_v14  ;;  %v1149_v6 = vadd.f32 %v1148_v22, %v1129_v18  ;;  %v1153_v44 = vadd.f32 %v1152_v19, %v1133_v53  ;;  %1828 = vrot.lane.b32.xlu0 %v1826_v60, %s5410_s14  ;;  %s5502_s19 = sld [smem:[#allocation69_spill]]  ;;  %v1957_v0 = vpop.permute.xlu0 %1956 }
 0x35f   : >> { %v1157_v11 = vadd.f32 %v1156_v2, %v1137_v59  ;;  %v5500_v45 = vstv %s5492_s17  ;;  %v5501_v24 = vstv %s5493_s16  ;;  %v5503_v15 = vstv %s5494_s15  ;;  %s5504_s28 = sld [smem:[#allocation70_spill]]  ;;  %1864 = vrot.lane.b32.xlu1 %v1826_v60, %s5418_s4 }
 0x360   : >> { %v1174_v34 = vmul.f32 %v5500_v45, %v1171_v37  ;;  %v1178_v32 = vmul.f32 %v5501_v24, %v1171_v37  ;;  %v1182_v27 = vmul.f32 %v5503_v15, %v1171_v37  ;;  %v5505_v58 = vstv %s5495_s21  ;;  %s5506_s18 = sld [smem:[#allocation71_spill]] }
 0x361   : >> { %v1186_v50 = vmul.f32 %v5505_v58, %v1171_v37  ;;  %s5507_s27 = sld [smem:[#allocation72_spill]]  ;;  %v1207_v22 = vsel %vm820_vm6, %v1205_v62, 0.0  ;;  %v1273_v14 = vsel %vm820_vm6, %v1271_v36, 0.0 }
 0x362   : >> { %v5508_v19 = vstv %s5498_s24  ;;  %s4376_s17 = sld [smem:[#allocation3 + $0x81]]  ;;  %v1175_v18 = vadd.f32 %v1174_v34, %v1145_v31  ;;  %v1179_v53 = vadd.f32 %v1178_v32, %v1149_v6  ;;  %v1183_v59 = vadd.f32 %v1182_v27, %v1153_v44  ;;  %v1891_v44 = vpop.permute.xlu1 %1890  ;;  %v4391_v34 = vld [vmem:[%s5480_s20 + $0x79] sm:$0xff] }
 0x363   : >> { %v1248_v2 = vmul.f32 %v5508_v19, %v1237_v26  ;;  %v5509_v10 = vstv %s5499_s11  ;;  %v1187_v60 = vadd.f32 %v1186_v50, %v1157_v11  ;;  %v1367_v11 = vpop.permute.xlu0 %1366  ;;  %v1892_v32 = vsel %vm830_vm7, %v1891_v44, %v4391_v34  ;;  %s5519_s16 = sld [smem:[#allocation80_spill]] }
 0x364   : >> { %v1252_v48 = vmul.f32 %v5509_v10, %v1237_v26  ;;  %v5510_v37 = vstv %s5502_s19  ;;  %v1191_v62 = vadd.f32 %v4024_v57, %v1175_v18  ;;  %v1195_v36 = vadd.f32 %v4027_v25, %v1179_v53  ;;  %1894 = vrot.lane.b32.xlu0 %v1892_v32, %s5410_s14  ;;  %1930 = vrot.lane.b32.xlu1 %v1892_v32, %s5418_s4  ;;  %s5520_s15 = sld [smem:[#allocation81_spill]] }
 0x365   : >> { %v1210_v39 = vmul.f32 %v5510_v37, %v1207_v22  ;;  %v5511_v33 = vstv %s5504_s28  ;;  %v1199_v31 = vadd.f32 %v4030_v29, %v1183_v59  ;;  %v1203_v6 = vadd.f32 %v4035_v38, %v1187_v60  ;;  %s4444_s21 = sld [smem:[#allocation3 + $0x83]] }
 0x366   : >> { %v1214_v45 = vmul.f32 %v5511_v33, %v1207_v22  ;;  %v5512_v24 = vstv %s5506_s18  ;;  %v5514_v27 = vstv %s5393_s22  ;;  %v1369_v57 = vsel %vm819_vm5, %v1367_v11, 0.0  ;;  %v4409_v33 = vld [vmem:[%s5480_s20 + $0x7a] sm:$0xff]  ;;  %s5518_s22 = sld [smem:[#allocation79_spill]] }
 0x367   : >> { %v1218_v15 = vmul.f32 %v5512_v24, %v1207_v22  ;;  %v5513_v58 = vstv %s5507_s27  ;;  %v1276_v50 = vmul.f32 %v5514_v27, %v1273_v14  ;;  %v1539_v25 = vstv %s4349_s25  ;;  %s5545_s24 = sld [smem:[#allocation58_spill]] }
 0x368   : >> { %v1222_v26 = vmul.f32 %v5513_v58, %v1207_v22  ;;  %v1211_v22 = vadd.f32 %v1210_v39, %v1191_v62  ;;  %v1215_v19 = vadd.f32 %v1214_v45, %v1195_v36  ;;  %v5515_v38 = vstv %s3847_s8  ;;  %s5521_s8 = sld [smem:[#allocation31_spill]]  ;;  %v1403_v62 = vpop.permute.xlu0 %1402 }
 0x369   : >> { %v1219_v29 = vadd.f32 %v1218_v15, %v1199_v31  ;;  %v1280_v18 = vmul.f32 %v5515_v38, %v1273_v14  ;;  %v5516_v53 = vstv %s3852_s3  ;;  %v5517_v60 = vstv %s5396_s6  ;;  %s4420_s3 = sld [smem:[#allocation3 + $0x82]] }
 0x36a   : >> { %v1223_v10 = vadd.f32 %v1222_v26, %v1203_v6  ;;  %v1284_v59 = vmul.f32 %v5516_v53, %v1273_v14  ;;  %v1288_v37 = vmul.f32 %v5517_v60, %v1273_v14  ;;  %v1958_v39 = vsel %vm830_vm7, %v1957_v0, %v4409_v33  ;;  %v1301_v26 = vpop.permute.xlu1 %1300  ;;  %s5529_s6 = sld [smem:[#allocation43_spill]] }
 0x36b   : >> { %v1241_v45 = vadd.f32 %v1240_v21, %v1211_v22  ;;  %v1245_v24 = vadd.f32 %v1244_v54, %v1215_v19  ;;  %v1249_v15 = vadd.f32 %v1248_v2, %v1219_v29  ;;  %v1303_v14 = vsel %vm819_vm5, %v1301_v26, 0.0  ;;  %1960 = vrot.lane.b32.xlu0 %v1958_v39, %s5410_s14  ;;  %1996 = vrot.lane.b32.xlu1 %v1958_v39, %s5418_s4  ;;  %s5546_s11 = sld [smem:[#allocation59_spill]] }
 0x36c   : >> { %v1253_v58 = vadd.f32 %v1252_v48, %v1223_v10  ;;  %v5522_v36 = vstv %s5406_s1  ;;  %v5523_v6 = vstv %s5408_s12  ;;  %v1543_v11 = vstv %s4376_s17  ;;  %s5528_s12 = sld [smem:[#allocation42_spill]]  ;;  %v2089_v60 = vpop.permute.xlu0 %2088 }
 0x36d   : >> { %v1372_v31 = vmul.f32 %v5522_v36, %v1369_v57  ;;  %v1376_v44 = vmul.f32 %v5523_v6, %v1369_v57  ;;  %v1257_v21 = vadd.f32 %v4056_v46, %v1241_v45  ;;  %v1261_v54 = vadd.f32 %v4059_v40, %v1245_v24  ;;  %s5530_s1 = sld [smem:[#allocation44_spill]] }
 0x36e   : >> { %v1265_v0 = vadd.f32 %v4062_v13, %v1249_v15  ;;  %v1269_v2 = vadd.f32 %v4067_v47, %v1253_v58  ;;  %v5524_v48 = vstv %s5518_s22  ;;  %v5525_v27 = vstv %s5519_s16  ;;  %v1337_v53 = vpop.permute.xlu1 %1336  ;;  %s4541_s7 = sld [smem:[#allocation3 + $0x84]] }
 0x36f   : >> { %v1306_v32 = vmul.f32 %v5524_v48, %v1303_v14  ;;  %v1310_v22 = vmul.f32 %v5525_v27, %v1303_v14  ;;  %v5526_v19 = vstv %s5520_s15  ;;  %v5527_v10 = vstv %s5521_s8  ;;  %s4543_s0 = sld [smem:[#allocation3 + $0x85]] }
 0x370   : >> { %v1314_v29 = vmul.f32 %v5526_v19, %v1303_v14  ;;  %v1318_v38 = vmul.f32 %v5527_v10, %v1303_v14  ;;  %v1277_v46 = vadd.f32 %v1276_v50, %v1257_v21  ;;  %v1281_v40 = vadd.f32 %v1280_v18, %v1261_v54  ;;  %v1499_v19 = vpop.permute.xlu0 %1498  ;;  %s4545_s13 = sld [smem:[#allocation3 + $0x86]] }
 0x371   : >> { %v1285_v13 = vadd.f32 %v1284_v59, %v1265_v0  ;;  %v1289_v47 = vadd.f32 %v1288_v37, %v1269_v2  ;;  %v1339_v45 = vsel %vm820_vm6, %v1337_v53, 0.0  ;;  %v5531_v24 = vstv %s3976_s26  ;;  %s5537_s26 = sld [smem:[#allocation56_spill]] }
 0x372   : >> { %v1380_v15 = vmul.f32 %v5531_v24, %v1369_v57  ;;  %v5532_v58 = vstv %s5409_s9  ;;  %v1405_v39 = vsel %vm820_vm6, %v1403_v62, 0.0  ;;  %v1307_v50 = vadd.f32 %v1306_v32, %v1277_v46  ;;  %s5538_s9 = sld [smem:[#allocation57_spill]] }
 0x373   : >> { %v1384_v26 = vmul.f32 %v5532_v58, %v1369_v57  ;;  %v1311_v18 = vadd.f32 %v1310_v22, %v1281_v40  ;;  %v1315_v59 = vadd.f32 %v1314_v29, %v1285_v13  ;;  %v1319_v37 = vadd.f32 %v1318_v38, %v1289_v47  ;;  %v2023_v22 = vpop.permute.xlu1 %2022  ;;  %v4459_v29 = vld [vmem:[%s5480_s20 + $0x90] sm:$0xff]  ;;  %s4547_s23 = sld [smem:[#allocation3 + $0x87]] }
 0x374   : >> { %v5533_v14 = vstv %s5402_s2  ;;  %v5534_v6 = vstv %s5528_s12  ;;  %v5535_v54 = vstv %s5529_s6  ;;  %v5536_v2 = vstv %s5530_s1  ;;  %s5544_s2 = sld [smem:[#allocation67_spill]] }
 0x375   : >> { %v1342_v36 = vmul.f32 %v5533_v14, %v1339_v45  ;;  %v1346_v21 = vmul.f32 %v5534_v6, %v1339_v45  ;;  %v1350_v0 = vmul.f32 %v5535_v54, %v1339_v45  ;;  %v1354_v57 = vmul.f32 %v5536_v2, %v1339_v45  ;;  %s4549_s25 = sld [smem:[#allocation3 + $0x88]] }
 0x376   : >> { %v1323_v48 = vadd.f32 %v4088_v7, %v1307_v50  ;;  %v1327_v62 = vadd.f32 %v4091_v23, %v1311_v18  ;;  %v1331_v32 = vadd.f32 %v4094_v28, %v1315_v59  ;;  %v1335_v27 = vadd.f32 %v4099_v9, %v1319_v37  ;;  %v3224_v18 = vld [vmem:[%s5480_s20 + $0x91] sm:$0xff]  ;;  %s4551_s28 = sld [smem:[#allocation3 + $0x89]] }
 0x377   : >> { %v2024_v10 = vsel %vm830_vm7, %v2023_v22, %v4459_v29  ;;  %v5539_v38 = vstv %s4020_s30  ;;  %v1501_v7 = vsel %vm819_vm5, %v1499_v19, 0.0  ;;  %v1547_v23 = vstv %s4420_s3  ;;  %s5543_s30 = sld [smem:[#allocation66_spill]] }
 0x378   : >> { %v1408_v46 = vmul.f32 %v5539_v38, %v1405_v39  ;;  %v1343_v40 = vadd.f32 %v1342_v36, %v1323_v48  ;;  %v1347_v13 = vadd.f32 %v1346_v21, %v1327_v62  ;;  %v1351_v28 = vadd.f32 %v1350_v0, %v1331_v32  ;;  %2026 = vrot.lane.b32.xlu0 %v2024_v10, %s5410_s14  ;;  %v1433_v21 = vpop.permute.xlu1 %1432  ;;  %s4553_s18 = sld [smem:[#allocation3 + $0x8a]] }
 0x379   : >> { %v1355_v9 = vadd.f32 %v1354_v57, %v1335_v27  ;;  %v5540_v47 = vstv %s4032_s10  ;;  %v5541_v45 = vstv %s5537_s26  ;;  %v5542_v58 = vstv %s5538_s9  ;;  %2062 = vrot.lane.b32.xlu1 %v2024_v10, %s5418_s4  ;;  %s4555_s27 = sld [smem:[#allocation3 + $0x8b]] }
 0x37a   : >> { %v1412_v53 = vmul.f32 %v5540_v47, %v1405_v39  ;;  %v1416_v24 = vmul.f32 %v5541_v45, %v1405_v39  ;;  %v1420_v50 = vmul.f32 %v5542_v58, %v1405_v39  ;;  %v2090_v59 = vsel %vm830_vm7, %v2089_v60, %v3224_v18  ;;  %v5557_v18 = vld [vmem:[#allocation84_spill] sm:$0xff]  ;;  %s4557_s17 = sld [smem:[#allocation3 + $0x8c]] }
 0x37b   : >> { %v1373_v37 = vadd.f32 %v1372_v31, %v1343_v40  ;;  %v1377_v14 = vadd.f32 %v1376_v44, %v1347_v13  ;;  %v1381_v36 = vadd.f32 %v1380_v15, %v1351_v28  ;;  %v1385_v6 = vadd.f32 %v1384_v26, %v1355_v9  ;;  %v5547_v44 = vld [vmem:[#allocation82_spill] sm:$0xff]  ;;  %v1535_v26 = vpop.permute.xlu0 %1534  ;;  %s4559_s22 = sld [smem:[#allocation3 + $0x8d]] }
 0x37c   : >> { %v1435_v54 = vsel %vm819_vm5, %v1433_v21, 0.0  ;;  %v1504_v0 = vmul.f32 %v1503_v4, %v1501_v7  ;;  %v1508_v39 = vmul.f32 %v1507_v35, %v1501_v7  ;;  %v1551_v2 = vstv %s4444_s21  ;;  %2092 = vrot.lane.b32.xlu0 %v2090_v59, %s5410_s14  ;;  %v1469_v38 = vpop.permute.xlu1 %1468  ;;  %s4561_s16 = sld [smem:[#allocation3 + $0x8e]] }
 0x37d   : >> { %v1389_v57 = vadd.f32 %v4121_v1, %v1373_v37  ;;  %v1393_v60 = vadd.f32 %v4124_v63, %v1377_v14  ;;  %v1397_v31 = vadd.f32 %v4127_v17, %v1381_v36  ;;  %v1401_v15 = vadd.f32 %v5547_v44, %v1385_v6  ;;  %2128 = vrot.lane.b32.xlu1 %v2090_v59, %s5418_s4  ;;  %s4563_s15 = sld [smem:[#allocation3 + $0x8f]] }
 0x37e   : >> { %v5548_v48 = vstv %s5543_s30  ;;  %v5549_v32 = vstv %s5544_s2  ;;  %v5550_v27 = vstv %s5545_s24  ;;  %v5551_v22 = vstv %s5546_s11  ;;  %s4565_s8 = sld [smem:[#allocation3 + $0x90]] }
 0x37f   : >> { %v1438_v62 = vmul.f32 %v5548_v48, %v1435_v54  ;;  %v1442_v4 = vmul.f32 %v5549_v32, %v1435_v54  ;;  %v1446_v35 = vmul.f32 %v5550_v27, %v1435_v54  ;;  %v1450_v1 = vmul.f32 %v5551_v22, %v1435_v54  ;;  %v2221_v6 = vpop.permute.xlu0 %2220  ;;  %s4567_s3 = sld [smem:[#allocation3 + $0x91]] }
 0x380   : >> { %v1409_v63 = vadd.f32 %v1408_v46, %v1389_v57  ;;  %v1413_v17 = vadd.f32 %v1412_v53, %v1393_v60  ;;  %v1417_v19 = vadd.f32 %v1416_v24, %v1397_v31  ;;  %v1421_v10 = vadd.f32 %v1420_v50, %v1401_v15  ;;  %v2155_v36 = vpop.permute.xlu1 %2154  ;;  %v3226_v15 = vld [vmem:[%s5480_s20 + $0xa8] sm:$0xff]  ;;  %s4569_s12 = sld [smem:[#allocation3 + $0x92]] }
 0x381   : >> { %v1471_v40 = vsel %vm820_vm6, %v1469_v38, 0.0  ;;  %v1512_v13 = vmul.f32 %v1511_v56, %v1501_v7  ;;  %v1516_v28 = vmul.f32 %v1515_v3, %v1501_v7  ;;  %v1537_v9 = vsel %vm820_vm6, %v1535_v26, 0.0  ;;  %v5556_v3 = vld [vmem:[#allocation83_spill] sm:$0xff]  ;;  %s4571_s6 = sld [smem:[#allocation3 + $0x93]] }
 0x382   : >> { %v1439_v47 = vadd.f32 %v1438_v62, %v1409_v63  ;;  %v1443_v45 = vadd.f32 %v1442_v4, %v1413_v17  ;;  %v1447_v46 = vadd.f32 %v1446_v35, %v1417_v19  ;;  %v1451_v53 = vadd.f32 %v1450_v1, %v1421_v10  ;;  %s4573_s1 = sld [smem:[#allocation3 + $0x94]]  ;;  %v3227_v19 = vld [vmem:[%s5480_s20 + $0x4a] sm:$0xff] }
 0x383   : >> { %v1474_v24 = vmul.f32 %v1473_v51, %v1471_v40  ;;  %v1478_v58 = vmul.f32 %v1477_v20, %v1471_v40  ;;  %v1482_v50 = vmul.f32 %v1481_v61, %v1471_v40  ;;  %v1486_v56 = vmul.f32 %v1485_v8, %v1471_v40  ;;  %v3225_v51 = vld [vmem:[%s5480_s20 + $0x92] sm:$0xff]  ;;  %s4575_s21 = sld [smem:[#allocation3 + $0x95]] }
 0x384   : >> { %v1455_v7 = vadd.f32 %v5556_v3, %v1439_v47  ;;  %v1459_v59 = vadd.f32 %v5557_v18, %v1443_v45  ;;  %v1463_v37 = vadd.f32 %v4203_v52, %v1447_v46  ;;  %v1467_v14 = vadd.f32 %v4206_v49, %v1451_v53  ;;  %s4577_s26 = sld [smem:[#allocation3 + $0x96]] }
 0x385   : >> { %v2156_v20 = vsel %vm830_vm7, %v2155_v36, %v3225_v51  ;;  %v1528_v61 = vmul.f32 %v4336_v30, %v1527_v5  ;;  %v1532_v8 = vmul.f32 %v4336_v30, %v1531_v43  ;;  %v1540_v21 = vmul.f32 %v1539_v25, %v1537_v9  ;;  %s4579_s9 = sld [smem:[#allocation3 + $0x97]] }
 0x386   : >> { %v1475_v54 = vadd.f32 %v1474_v24, %v1455_v7  ;;  %v1479_v57 = vadd.f32 %v1478_v58, %v1459_v59  ;;  %v1483_v60 = vadd.f32 %v1482_v50, %v1463_v37  ;;  %v1487_v52 = vadd.f32 %v1486_v56, %v1467_v14  ;;  %2158 = vrot.lane.b32.xlu0 %v2156_v20, %s5410_s14  ;;  %s4581_s30 = sld [smem:[#allocation3 + $0x98]] }
 0x387   : >> { %v1544_v49 = vmul.f32 %v1543_v11, %v1537_v9  ;;  %v1548_v31 = vmul.f32 %v1547_v23, %v1537_v9  ;;  %v1552_v44 = vmul.f32 %v1551_v2, %v1537_v9  ;;  %2194 = vrot.lane.b32.xlu1 %v2156_v20, %s5418_s4  ;;  %v2222_v5 = vsel %vm830_vm7, %v2221_v6, %v3226_v15  ;;  %s4583_s2 = sld [smem:[#allocation3 + $0x99]] }
 0x388   : >> { %v1505_v26 = vadd.f32 %v1504_v0, %v1475_v54  ;;  %v1509_v30 = vadd.f32 %v1508_v39, %v1479_v57  ;;  %v1513_v43 = vadd.f32 %v1512_v13, %v1483_v60  ;;  %v1517_v25 = vadd.f32 %v1516_v28, %v1487_v52  ;;  %s4585_s24 = sld [smem:[#allocation3 + $0x9a]] }
 0x389   : >> { %s4587_s11 = sld [smem:[#allocation3 + $0x9b]]  ;;  %v1593_v0 = vstv %s4553_s18  ;;  %v1597_v39 = vstv %s4555_s27  ;;  %v1569_v35 = vstv %s4541_s7  ;;  %v1573_v22 = vstv %s4543_s0 }
 0x38a   : >> { %v1521_v48 = vadd.f32 %v4339_v12, %v1505_v26  ;;  %v1525_v62 = vadd.f32 %v4342_v41, %v1509_v30  ;;  %v1529_v32 = vadd.f32 %v1528_v61, %v1513_v43  ;;  %v1533_v4 = vadd.f32 %v1532_v8, %v1517_v25  ;;  %2224 = vrot.lane.b32.xlu0 %v2222_v5, %s5410_s14  ;;  %s4590_s5 = sld [smem:[#allocation3 + $0x9c]] }
 0x38b   : >> { %2260 = vrot.lane.b32.xlu1 %v2222_v5, %s5418_s4  ;;  %v1585_v12 = vstv %s4549_s25  ;;  %v1589_v41 = vstv %s4551_s28  ;;  %s4595_s10 = sld [smem:[#allocation3 + $0x9d]]  ;;  %v1577_v1 = vstv %s4545_s13  ;;  %v1594_v13 = vmul.f32 %v3227_v19, %v1593_v0 }
 0x38c   : >> { %v1541_v11 = vadd.f32 %v1540_v21, %v1521_v48  ;;  %v1545_v23 = vadd.f32 %v1544_v49, %v1525_v62  ;;  %v1549_v2 = vadd.f32 %v1548_v31, %v1529_v32  ;;  %v1553_v27 = vadd.f32 %v1552_v44, %v1533_v4  ;;  %s4601_s29 = sld [smem:[#allocation3 + $0x9e]]  ;;  %v3228_v31 = vld [vmem:[%s5480_s20 + $0xa9] sm:$0xff] }
 0x38d   : >> { %v1581_v63 = vstv %s4547_s23  ;;  %v1586_v10 = vmul.f32 %v3227_v19, %v1585_v12  ;;  %s4604_s19 = sld [smem:[#allocation3 + $0x9f]]  ;;  %v1590_v40 = vmul.f32 %v3227_v19, %v1589_v41  ;;  %v1598_v28 = vmul.f32 %v3227_v19, %v1597_v39  ;;  %v3229_v12 = vld [vmem:[%s5480_s20 + $0x60] sm:$0xff] }
 0x38e   : >> { %s4608_s7 = sld [smem:[#allocation3 + $0xa0]]  ;;  %v1605_v53 = vstv %s4557_s17  ;;  %v1609_v24 = vstv %s4559_s22  ;;  %v1613_v58 = vstv %s4561_s16  ;;  %v1617_v50 = vstv %s4563_s15 }
 0x38f   : >> { %s4610_s0 = sld [smem:[#allocation3 + $0xa1]]  ;;  %v1635_v15 = vstv %s4565_s8  ;;  %v1639_v5 = vstv %s4567_s3  ;;  %v1643_v26 = vstv %s4569_s12  ;;  %v1647_v30 = vstv %s4571_s6 }
 0x390   : >> { %s4616_s13 = sld [smem:[#allocation3 + $0xa2]]  ;;  %v1651_v25 = vstv %s4573_s1  ;;  %v1655_v48 = vstv %s4575_s21  ;;  %v1659_v32 = vstv %s4577_s26  ;;  %v1663_v4 = vstv %s4579_s9 }
 0x391   : >> { %s4618_s23 = sld [smem:[#allocation3 + $0xa3]]  ;;  %v1652_v41 = vmul.f32 %v3229_v12, %v1651_v25  ;;  %v1656_v0 = vmul.f32 %v3229_v12, %v1655_v48  ;;  %v1664_v19 = vmul.f32 %v3229_v12, %v1663_v4 }
 0x392   : >> { %s4622_s25 = sld [smem:[#allocation3 + $0xa4]] }
 0x393   : >> { %s4624_s28 = sld [smem:[#allocation3 + $0xa5]] }
 0x394   : >> { %s4626_s18 = sld [smem:[#allocation3 + $0xa6]] }
 0x395   : >> { %s4628_s27 = sld [smem:[#allocation3 + $0xa7]] }
 0x396   : >> { %s4630_s17 = sld [smem:[#allocation3 + $0xa8]] }
 0x397   : >> { %s4636_s22 = sld [smem:[#allocation3 + $0xa9]] }
 0x398   : >> { %s4642_s16 = sld [smem:[#allocation3 + $0xaa]] }
 0x399   : >> { %s4646_s15 = sld [smem:[#allocation3 + $0xab]] }
 0x39a   : >> { %s4652_s8 = sld [smem:[#allocation3 + $0xac]] }
 0x39b   : >> { %s4654_s3 = sld [smem:[#allocation3 + $0xad]] }
 0x39c   : >> { %s4657_s12 = sld [smem:[#allocation3 + $0xae]]  ;;  %v1767_v4 = vstv %s4630_s17 }
 0x39d   : >> { %s4659_s6 = sld [smem:[#allocation3 + $0xaf]] }
 0x39e   : >> { %s4664_s1 = sld [smem:[#allocation3 + $0xb0]] }
 0x39f   : >> { %s4669_s21 = sld [smem:[#allocation3 + $0xb1]] }
 0x3a0   : >> { %s4675_s26 = sld [smem:[#allocation3 + $0xb2]] }
 0x3a1   : >> { %s4677_s9 = sld [smem:[#allocation3 + $0xb3]] }
 0x3a2   : >> { %v1565_v17 = vpop.permute.xlu1 %1564  ;;  %s4753_s17 = sld [smem:[#allocation3 + $0xc6]] }
 0x3a3   : >> { %v1567_v38 = vsel %vm819_vm5, %v1565_v17, 0.0 }
 0x3a4   : >> { %v1570_v9 = vmul.f32 %v1569_v35, %v1567_v38  ;;  %v1574_v47 = vmul.f32 %v1573_v22, %v1567_v38  ;;  %v1578_v45 = vmul.f32 %v1577_v1, %v1567_v38  ;;  %v1582_v46 = vmul.f32 %v1581_v63, %v1567_v38 }
 0x3a5   : >> { %v1660_v1 = vmul.f32 %v3229_v12, %v1659_v32  ;;  %v1749_v32 = vstv %s4628_s27  ;;  %s4750_s27 = sld [smem:[#allocation3 + $0xc5]] }
 0x3a6   : >> { %v1571_v56 = vadd.f32 %v1570_v9, %v1541_v11  ;;  %v1575_v3 = vadd.f32 %v1574_v47, %v1545_v23  ;;  %v1579_v7 = vadd.f32 %v1578_v45, %v1549_v2  ;;  %v1583_v18 = vadd.f32 %v1582_v46, %v1553_v27  ;;  %v1601_v59 = vpop.permute.xlu1 %1600 }
 0x3a7   : >> { %v1603_v37 = vsel %vm820_vm6, %v1601_v59, 0.0  ;;  %v1717_v9 = vstv %s4608_s7  ;;  %v1721_v47 = vstv %s4610_s0  ;;  %v1725_v45 = vstv %s4616_s13  ;;  %s4721_s7 = sld [smem:[#allocation3 + $0xbe]] }
 0x3a8   : >> { %v1587_v14 = vadd.f32 %v1586_v10, %v1571_v56  ;;  %v1591_v36 = vadd.f32 %v1590_v40, %v1575_v3  ;;  %v1595_v6 = vadd.f32 %v1594_v13, %v1579_v7  ;;  %v1599_v51 = vadd.f32 %v1598_v28, %v1583_v18  ;;  %s4727_s0 = sld [smem:[#allocation3 + $0xbf]] }
 0x3a9   : >> { %v1606_v20 = vmul.f32 %v1605_v53, %v1603_v37  ;;  %v1610_v61 = vmul.f32 %v1609_v24, %v1603_v37  ;;  %v1614_v8 = vmul.f32 %v1613_v58, %v1603_v37  ;;  %v1618_v21 = vmul.f32 %v1617_v50, %v1603_v37  ;;  %v3230_v37 = vld [vmem:[%s5480_s20 + $0xaa] sm:$0xff]  ;;  %s4732_s13 = sld [smem:[#allocation3 + $0xc0]] }
 0x3aa   : >> { %v2287_v54 = vpop.permute.xlu1 %2286  ;;  %v1671_v10 = vstv %s4581_s30  ;;  %v1675_v40 = vstv %s4583_s2  ;;  %v1679_v13 = vstv %s4585_s24  ;;  %v1683_v28 = vstv %s4587_s11  ;;  %s4679_s30 = sld [smem:[#allocation3 + $0xb4]] }
 0x3ab   : >> { %v1607_v57 = vadd.f32 %v1606_v20, %v1587_v14  ;;  %v1611_v60 = vadd.f32 %v1610_v61, %v1591_v36  ;;  %v1615_v52 = vadd.f32 %v1614_v8, %v1595_v6  ;;  %v1619_v49 = vadd.f32 %v1618_v21, %v1599_v51  ;;  %s4686_s2 = sld [smem:[#allocation3 + $0xb5]]  ;;  %v3231_v61 = vld [vmem:[%s5480_s20 + $0x61] sm:$0xff] }
 0x3ac   : >> { %v2288_v44 = vsel %vm830_vm7, %v2287_v54, %v3228_v31  ;;  %v1729_v46 = vstv %s4618_s23  ;;  %v1701_v36 = vstv %s4590_s5  ;;  %v1705_v6 = vstv %s4595_s10  ;;  %s4692_s24 = sld [smem:[#allocation3 + $0xb6]] }
 0x3ad   : >> { %2326 = vrot.lane.b32.xlu1 %v2288_v44, %s5418_s4  ;;  %2290 = vrot.lane.b32.xlu0 %v2288_v44, %s5410_s14  ;;  %v1709_v51 = vstv %s4601_s29  ;;  %v1713_v20 = vstv %s4604_s19  ;;  %v1718_v8 = vmul.f32 %v3231_v61, %v1717_v9  ;;  %v1722_v21 = vmul.f32 %v3231_v61, %v1721_v47  ;;  %s4696_s11 = sld [smem:[#allocation3 + $0xb7]] }
 0x3ae   : >> { %v1631_v43 = vpop.permute.xlu0 %1630  ;;  %v1726_v54 = vmul.f32 %v3231_v61, %v1725_v45  ;;  %v1741_v31 = vstv %s4624_s28  ;;  %s4708_s5 = sld [smem:[#allocation3 + $0xba]]  ;;  %v1775_v9 = vstv %s4642_s16  ;;  %v1779_v47 = vstv %s4646_s15 }
 0x3af   : >> { %v1633_v62 = vsel %vm819_vm5, %v1631_v43, 0.0  ;;  %s4710_s10 = sld [smem:[#allocation3 + $0xbb]] }
 0x3b0   : >> { %v1636_v11 = vmul.f32 %v1635_v15, %v1633_v62  ;;  %v1640_v23 = vmul.f32 %v1639_v5, %v1633_v62  ;;  %v1644_v2 = vmul.f32 %v1643_v26, %v1633_v62  ;;  %v1648_v27 = vmul.f32 %v1647_v30, %v1633_v62  ;;  %s4717_s29 = sld [smem:[#allocation3 + $0xbc]] }
 0x3b1   : >> { %v1745_v62 = vstv %s4626_s18  ;;  %s4719_s19 = sld [smem:[#allocation3 + $0xbd]] }
 0x3b2   : >> { %v1637_v39 = vadd.f32 %v1636_v11, %v1607_v57  ;;  %v1641_v35 = vadd.f32 %v1640_v23, %v1611_v60  ;;  %v1645_v22 = vadd.f32 %v1644_v2, %v1615_v52  ;;  %v1667_v63 = vpop.permute.xlu0 %1666  ;;  %v1649_v17 = vadd.f32 %v1648_v27, %v1619_v49  ;;  %s4736_s23 = sld [smem:[#allocation3 + $0xc1]] }
 0x3b3   : >> { %v1669_v38 = vsel %vm820_vm6, %v1667_v63, 0.0  ;;  %v1730_v52 = vmul.f32 %v3231_v61, %v1729_v46  ;;  %v1737_v49 = vstv %s4622_s25  ;;  %v1783_v11 = vstv %s4652_s8  ;;  %s4738_s25 = sld [smem:[#allocation3 + $0xc2]] }
 0x3b4   : >> { %v1653_v53 = vadd.f32 %v1652_v41, %v1637_v39  ;;  %v1657_v24 = vadd.f32 %v1656_v0, %v1641_v35  ;;  %v1661_v58 = vadd.f32 %v1660_v1, %v1645_v22  ;;  %v1672_v50 = vmul.f32 %v1671_v10, %v1669_v38  ;;  %s4745_s28 = sld [smem:[#allocation3 + $0xc3]] }
 0x3b5   : >> { %v1665_v3 = vadd.f32 %v1664_v19, %v1649_v17  ;;  %v1676_v7 = vmul.f32 %v1675_v40, %v1669_v38  ;;  %v1680_v18 = vmul.f32 %v1679_v13, %v1669_v38  ;;  %v1684_v59 = vmul.f32 %v1683_v28, %v1669_v38  ;;  %s4747_s18 = sld [smem:[#allocation3 + $0xc4]] }
 0x3b6   : >> { %v2353_v56 = vpop.permute.xlu0 %2352  ;;  %v1673_v57 = vadd.f32 %v1672_v50, %v1653_v53  ;;  %v1787_v39 = vstv %s4654_s3  ;;  %v1791_v35 = vstv %s4657_s12  ;;  %v1795_v22 = vstv %s4659_s6  ;;  %s4761_s16 = sld [smem:[#allocation3 + $0xc8]] }
 0x3b7   : >> { %v2354_v14 = vsel %vm830_vm7, %v2353_v56, %v3230_v37  ;;  %v1677_v44 = vadd.f32 %v1676_v7, %v1657_v24  ;;  %v1681_v15 = vadd.f32 %v1680_v18, %v1661_v58  ;;  %v1685_v5 = vadd.f32 %v1684_v59, %v1665_v3  ;;  %s4765_s15 = sld [smem:[#allocation3 + $0xc9]] }
 0x3b8   : >> { %2392 = vrot.lane.b32.xlu1 %v2354_v14, %s5418_s4  ;;  %2356 = vrot.lane.b32.xlu0 %v2354_v14, %s5410_s14  ;;  %s4700_s14 = sld [smem:[#allocation3 + $0xb8]]  ;;  %v1771_v28 = vstv %s4636_s22  ;;  %v1784_v45 = vmul.f32 %v4318_v55, %v1783_v11  ;;  %v1788_v24 = vmul.f32 %v4318_v55, %v1787_v39  ;;  %v1792_v58 = vmul.f32 %v4318_v55, %v1791_v35 }
 0x3b9   : >> { %s4702_s4 = sld [smem:[#allocation3 + $0xb9]]  ;;  %v1796_v50 = vmul.f32 %v4318_v55, %v1795_v22  ;;  %v1807_v55 = vstv %s4669_s21 }
 0x3ba   : >> { %s4757_s22 = sld [smem:[#allocation3 + $0xc7]] }
 0x3bb   : >> { %s4769_s8 = sld [smem:[#allocation3 + $0xca]] }
 0x3bc   : >> { %s4771_s3 = sld [smem:[#allocation3 + $0xcb]] }
 0x3bd   : >> { %v1697_v60 = vpop.permute.xlu1 %1696  ;;  %s4773_s12 = sld [smem:[#allocation3 + $0xcc]] }
 0x3be   : >> { %v1699_v26 = vsel %vm819_vm5, %v1697_v60, 0.0  ;;  %v1849_v11 = vstv %s4700_s14  ;;  %s4777_s6 = sld [smem:[#allocation3 + $0xcd]] }
 0x3bf   : >> { %v1702_v30 = vmul.f32 %v1701_v36, %v1699_v26  ;;  %v1706_v43 = vmul.f32 %v1705_v6, %v1699_v26  ;;  %v1710_v25 = vmul.f32 %v1709_v51, %v1699_v26  ;;  %v1714_v48 = vmul.f32 %v1713_v20, %v1699_v26  ;;  %s4787_s21 = sld [smem:[#allocation3 + $0xcf]] }
 0x3c0   : >> { %v1803_v51 = vstv %s4664_s1  ;;  %v1811_v20 = vstv %s4675_s26  ;;  %s4782_s1 = sld [smem:[#allocation3 + $0xce]] }
 0x3c1   : >> { %v1703_v23 = vadd.f32 %v1702_v30, %v1673_v57  ;;  %v1707_v2 = vadd.f32 %v1706_v43, %v1677_v44  ;;  %v1711_v27 = vadd.f32 %v1710_v25, %v1681_v15  ;;  %v1715_v12 = vadd.f32 %v1714_v48, %v1685_v5  ;;  %v1733_v41 = vpop.permute.xlu1 %1732  ;;  %s4791_s26 = sld [smem:[#allocation3 + $0xd0]] }
 0x3c2   : >> { %v1735_v0 = vsel %vm820_vm6, %v1733_v41, 0.0  ;;  %v1833_v15 = vstv %s4679_s30  ;;  %s4797_s30 = sld [smem:[#allocation3 + $0xd2]] }
 0x3c3   : >> { %v1719_v1 = vadd.f32 %v1718_v8, %v1703_v23  ;;  %v1723_v63 = vadd.f32 %v1722_v21, %v1707_v2  ;;  %v1727_v17 = vadd.f32 %v1726_v54, %v1711_v27  ;;  %v1731_v19 = vadd.f32 %v1730_v52, %v1715_v12  ;;  %s4813_s14 = sld [smem:[#allocation3 + $0xd6]] }
 0x3c4   : >> { %v1738_v10 = vmul.f32 %v1737_v49, %v1735_v0  ;;  %v1742_v38 = vmul.f32 %v1741_v31, %v1735_v0  ;;  %v1746_v40 = vmul.f32 %v1745_v62, %v1735_v0  ;;  %v1750_v13 = vmul.f32 %v1749_v32, %v1735_v0 }
 0x3c5   : >> { %v1815_v52 = vstv %s4677_s9  ;;  %v1837_v62 = vstv %s4686_s2  ;;  %v1841_v32 = vstv %s4692_s24  ;;  %v1853_v27 = vstv %s4702_s4  ;;  %s4794_s9 = sld [smem:[#allocation3 + $0xd1]] }
 0x3c6   : >> { %v1739_v46 = vadd.f32 %v1738_v10, %v1719_v1  ;;  %v1743_v56 = vadd.f32 %v1742_v38, %v1723_v63  ;;  %v1747_v3 = vadd.f32 %v1746_v40, %v1727_v17  ;;  %v1751_v7 = vadd.f32 %v1750_v13, %v1731_v19  ;;  %s4801_s2 = sld [smem:[#allocation3 + $0xd3]] }
 0x3c7   : >> { %v1857_v12 = vstv %s4708_s5  ;;  %v1850_v17 = vmul.f32 %v4331_v16, %v1849_v11  ;;  %v1861_v19 = vstv %s4710_s10  ;;  %v1854_v38 = vmul.f32 %v4331_v16, %v1853_v27  ;;  %s4805_s24 = sld [smem:[#allocation3 + $0xd4]] }
 0x3c8   : >> { %v1858_v40 = vmul.f32 %v4331_v16, %v1857_v12  ;;  %v1869_v13 = vstv %s4717_s29  ;;  %s4815_s4 = sld [smem:[#allocation3 + $0xd7]]  ;;  %v1939_v12 = vstv %s4765_s15 }
 0x3c9   : >> { %s4817_s5 = sld [smem:[#allocation3 + $0xd8]] }
 0x3ca   : >> { %s4820_s10 = sld [smem:[#allocation3 + $0xd9]] }
 0x3cb   : >> { %s4825_s29 = sld [smem:[#allocation3 + $0xda]] }
 0x3cc   : >> { %v1763_v53 = vpop.permute.xlu0 %1762  ;;  %v1799_v59 = vpop.permute.xlu1 %1798  ;;  %s4875_s15 = sld [smem:[#allocation3 + $0xe7]] }
 0x3cd   : >> { %v1765_v18 = vsel %vm819_vm5, %v1763_v53, 0.0  ;;  %v1801_v61 = vsel %vm820_vm6, %v1799_v59, 0.0  ;;  %v1862_v53 = vmul.f32 %v4331_v16, %v1861_v19 }
 0x3ce   : >> { %v1768_v37 = vmul.f32 %v1767_v4, %v1765_v18  ;;  %v1772_v14 = vmul.f32 %v1771_v28, %v1765_v18  ;;  %v1776_v36 = vmul.f32 %v1775_v9, %v1765_v18  ;;  %v1780_v6 = vmul.f32 %v1779_v47, %v1765_v18 }
 0x3cf   : >> { %v1804_v31 = vmul.f32 %v1803_v51, %v1801_v61  ;;  %v1808_v44 = vmul.f32 %v1807_v55, %v1801_v61  ;;  %v1812_v30 = vmul.f32 %v1811_v20, %v1801_v61  ;;  %v1816_v48 = vmul.f32 %v1815_v52, %v1801_v61 }
 0x3d0   : >> { %v1769_v8 = vadd.f32 %v1768_v37, %v1739_v46  ;;  %v1773_v21 = vadd.f32 %v1772_v14, %v1743_v56  ;;  %v1777_v54 = vadd.f32 %v1776_v36, %v1747_v3  ;;  %v1781_v57 = vadd.f32 %v1780_v6, %v1751_v7  ;;  %v1829_v60 = vpop.permute.xlu0 %1828 }
 0x3d1   : >> { %v1831_v43 = vsel %vm819_vm5, %v1829_v60, 0.0  ;;  %v1845_v4 = vstv %s4696_s11  ;;  %v1865_v63 = vpop.permute.xlu1 %1864  ;;  %v1873_v47 = vstv %s4719_s19  ;;  %v1899_v18 = vstv %s4732_s13  ;;  %s4809_s11 = sld [smem:[#allocation3 + $0xd5]] }
 0x3d2   : >> { %v1785_v49 = vadd.f32 %v1784_v45, %v1769_v8  ;;  %v1789_v5 = vadd.f32 %v1788_v24, %v1773_v21  ;;  %v1793_v26 = vadd.f32 %v1792_v58, %v1777_v54  ;;  %v1797_v25 = vadd.f32 %v1796_v50, %v1781_v57  ;;  %s4830_s19 = sld [smem:[#allocation3 + $0xdb]] }
 0x3d3   : >> { %v1834_v2 = vmul.f32 %v1833_v15, %v1831_v43  ;;  %v1838_v39 = vmul.f32 %v1837_v62, %v1831_v43  ;;  %v1842_v35 = vmul.f32 %v1841_v32, %v1831_v43  ;;  %v1846_v1 = vmul.f32 %v1845_v4, %v1831_v43  ;;  %s4843_s13 = sld [smem:[#allocation3 + $0xde]] }
 0x3d4   : >> { %v1805_v23 = vadd.f32 %v1804_v31, %v1785_v49  ;;  %v1809_v41 = vadd.f32 %v1808_v44, %v1789_v5  ;;  %v1813_v0 = vadd.f32 %v1812_v30, %v1793_v26  ;;  %v1817_v22 = vadd.f32 %v1816_v48, %v1797_v25 }
 0x3d5   : >> { %v1867_v45 = vsel %vm820_vm6, %v1865_v63, 0.0  ;;  %v1877_v24 = vstv %s4721_s7  ;;  %v1881_v50 = vstv %s4727_s0  ;;  %v1903_v51 = vstv %s4736_s23  ;;  %s4835_s7 = sld [smem:[#allocation3 + $0xdc]] }
 0x3d6   : >> { %v1835_v10 = vadd.f32 %v1834_v2, %v1805_v23  ;;  %v1839_v28 = vadd.f32 %v1838_v39, %v1809_v41  ;;  %v1843_v9 = vadd.f32 %v1842_v35, %v1813_v0  ;;  %v1847_v46 = vadd.f32 %v1846_v1, %v1817_v22  ;;  %v1895_v58 = vpop.permute.xlu0 %1894  ;;  %v1931_v5 = vpop.permute.xlu1 %1930  ;;  %s4838_s0 = sld [smem:[#allocation3 + $0xdd]] }
 0x3d7   : >> { %v1870_v3 = vmul.f32 %v1869_v13, %v1867_v45  ;;  %v1874_v7 = vmul.f32 %v1873_v47, %v1867_v45  ;;  %v1878_v37 = vmul.f32 %v1877_v24, %v1867_v45  ;;  %v1897_v14 = vsel %vm819_vm5, %v1895_v58, 0.0  ;;  %s4845_s23 = sld [smem:[#allocation3 + $0xdf]] }
 0x3d8   : >> { %v1851_v56 = vadd.f32 %v1850_v17, %v1835_v10  ;;  %v1855_v59 = vadd.f32 %v1854_v38, %v1839_v28  ;;  %v1859_v16 = vadd.f32 %v1858_v40, %v1843_v9  ;;  %v1863_v36 = vadd.f32 %v1862_v53, %v1847_v46 }
 0x3d9   : >> { %v1882_v6 = vmul.f32 %v1881_v50, %v1867_v45  ;;  %v1907_v55 = vstv %s4738_s25  ;;  %v1911_v20 = vstv %s4745_s28  ;;  %v1915_v61 = vstv %s4747_s18  ;;  %s4849_s25 = sld [smem:[#allocation3 + $0xe0]] }
 0x3da   : >> { %v1871_v8 = vadd.f32 %v1870_v3, %v1851_v56  ;;  %v1900_v21 = vmul.f32 %v1899_v18, %v1897_v14  ;;  %v1919_v54 = vstv %s4750_s27  ;;  %v1923_v57 = vstv %s4753_s17  ;;  %s4853_s28 = sld [smem:[#allocation3 + $0xe1]] }
 0x3db   : >> { %v1875_v60 = vadd.f32 %v1874_v7, %v1855_v59  ;;  %v1879_v52 = vadd.f32 %v1878_v37, %v1859_v16  ;;  %v1904_v49 = vmul.f32 %v1903_v51, %v1897_v14  ;;  %v1908_v31 = vmul.f32 %v1907_v55, %v1897_v14  ;;  %s4857_s18 = sld [smem:[#allocation3 + $0xe2]] }
 0x3dc   : >> { %v1883_v44 = vadd.f32 %v1882_v6, %v1863_v36  ;;  %v1912_v15 = vmul.f32 %v1911_v20, %v1897_v14  ;;  %v1927_v26 = vstv %s4757_s22  ;;  %v1901_v30 = vadd.f32 %v1900_v21, %v1871_v8  ;;  %s4859_s27 = sld [smem:[#allocation3 + $0xe3]] }
 0x3dd   : >> { %v1916_v43 = vmul.f32 %v4391_v34, %v1915_v61  ;;  %v1920_v25 = vmul.f32 %v4391_v34, %v1919_v54  ;;  %v1924_v48 = vmul.f32 %v4391_v34, %v1923_v57  ;;  %v1905_v62 = vadd.f32 %v1904_v49, %v1875_v60  ;;  %v1961_v23 = vpop.permute.xlu0 %1960  ;;  %v1997_v18 = vpop.permute.xlu1 %1996  ;;  %s4861_s17 = sld [smem:[#allocation3 + $0xe4]] }
 0x3de   : >> { %v1909_v32 = vadd.f32 %v1908_v31, %v1879_v52  ;;  %v1935_v4 = vstv %s4761_s16  ;;  %v1933_v11 = vsel %vm820_vm6, %v1931_v5, 0.0  ;;  %v1913_v2 = vadd.f32 %v1912_v15, %v1883_v44  ;;  %s4865_s22 = sld [smem:[#allocation3 + $0xe5]] }
 0x3df   : >> { %v1928_v27 = vmul.f32 %v4391_v34, %v1927_v26  ;;  %v1943_v41 = vstv %s4769_s8  ;;  %v1947_v0 = vstv %s4771_s3  ;;  %v1917_v39 = vadd.f32 %v1916_v43, %v1901_v30  ;;  %s4870_s16 = sld [smem:[#allocation3 + $0xe6]] }
 0x3e0   : >> { %v1936_v35 = vmul.f32 %v1935_v4, %v1933_v11  ;;  %v1965_v22 = vstv %s4773_s12  ;;  %v1963_v1 = vsel %vm819_vm5, %v1961_v23, 0.0  ;;  %v1921_v34 = vadd.f32 %v1920_v25, %v1905_v62  ;;  %s4879_s8 = sld [smem:[#allocation3 + $0xe8]] }
 0x3e1   : >> { %v1925_v63 = vadd.f32 %v1924_v48, %v1909_v32  ;;  %v1940_v17 = vmul.f32 %v1939_v12, %v1933_v11  ;;  %v1944_v19 = vmul.f32 %v1943_v41, %v1933_v11  ;;  %v1929_v10 = vadd.f32 %v1928_v27, %v1913_v2  ;;  %s4882_s3 = sld [smem:[#allocation3 + $0xe9]] }
 0x3e2   : >> { %v1948_v38 = vmul.f32 %v1947_v0, %v1933_v11  ;;  %v1969_v40 = vstv %s4777_s6  ;;  %v1973_v13 = vstv %s4782_s1  ;;  %v1977_v28 = vstv %s4787_s21  ;;  %s4885_s12 = sld [smem:[#allocation3 + $0xea]] }
 0x3e3   : >> { %v1981_v9 = vstv %s4791_s26  ;;  %v1937_v47 = vadd.f32 %v1936_v35, %v1917_v39  ;;  %v1966_v45 = vmul.f32 %v1965_v22, %v1963_v1  ;;  %v1985_v46 = vstv %s4794_s9  ;;  %s4889_s6 = sld [smem:[#allocation3 + $0xeb]] }
 0x3e4   : >> { %v1989_v53 = vstv %s4797_s30  ;;  %v1941_v24 = vadd.f32 %v1940_v17, %v1921_v34  ;;  %v1945_v58 = vadd.f32 %v1944_v19, %v1925_v63  ;;  %v1970_v50 = vmul.f32 %v1969_v40, %v1963_v1  ;;  %s4891_s1 = sld [smem:[#allocation3 + $0xec]] }
 0x3e5   : >> { %v1974_v56 = vmul.f32 %v1973_v13, %v1963_v1  ;;  %v1949_v3 = vadd.f32 %v1948_v38, %v1929_v10  ;;  %v1978_v7 = vmul.f32 %v1977_v28, %v1963_v1  ;;  %v1982_v59 = vmul.f32 %v4409_v33, %v1981_v9  ;;  %s4896_s21 = sld [smem:[#allocation3 + $0xed]] }
 0x3e6   : >> { %v1993_v16 = vstv %s4801_s2  ;;  %v1967_v37 = vadd.f32 %v1966_v45, %v1937_v47  ;;  %v1986_v14 = vmul.f32 %v4409_v33, %v1985_v46  ;;  %v1990_v36 = vmul.f32 %v4409_v33, %v1989_v53  ;;  %s4900_s26 = sld [smem:[#allocation3 + $0xee]] }
 0x3e7   : >> { %v2001_v6 = vstv %s4805_s24  ;;  %v1971_v51 = vadd.f32 %v1970_v50, %v1941_v24  ;;  %v1975_v55 = vadd.f32 %v1974_v56, %v1945_v58  ;;  %v2005_v20 = vstv %s4809_s11  ;;  %s4904_s9 = sld [smem:[#allocation3 + $0xef]] }
 0x3e8   : >> { %v1999_v61 = vsel %vm820_vm6, %v1997_v18, 0.0  ;;  %v1979_v8 = vadd.f32 %v1978_v7, %v1949_v3  ;;  %v1994_v21 = vmul.f32 %v4409_v33, %v1993_v16  ;;  %v2009_v54 = vstv %s4813_s14  ;;  %s4906_s30 = sld [smem:[#allocation3 + $0xf0]] }
 0x3e9   : >> { %v2013_v60 = vstv %s4815_s4  ;;  %v1983_v52 = vadd.f32 %v1982_v59, %v1967_v37  ;;  %v2002_v49 = vmul.f32 %v2001_v6, %v1999_v61  ;;  %v2006_v31 = vmul.f32 %v2005_v20, %v1999_v61  ;;  %s4908_s2 = sld [smem:[#allocation3 + $0xf1]] }
 0x3ea   : >> { %v2027_v57 = vpop.permute.xlu0 %2026  ;;  %v2031_v44 = vstv %s4817_s5  ;;  %v1987_v15 = vadd.f32 %v1986_v14, %v1971_v51  ;;  %v1991_v33 = vadd.f32 %v1990_v36, %v1975_v55  ;;  %v2010_v5 = vmul.f32 %v2009_v54, %v1999_v61  ;;  %s4913_s24 = sld [smem:[#allocation3 + $0xf2]] }
 0x3eb   : >> { %v2029_v26 = vsel %vm819_vm5, %v2027_v57, 0.0  ;;  %v1995_v30 = vadd.f32 %v1994_v21, %v1979_v8  ;;  %v2014_v43 = vmul.f32 %v2013_v60, %v1999_v61  ;;  %v2035_v25 = vstv %s4820_s10  ;;  %v2063_v1 = vpop.permute.xlu1 %2062  ;;  %s4920_s11 = sld [smem:[#allocation3 + $0xf3]] }
 0x3ec   : >> { %v2039_v48 = vstv %s4825_s29  ;;  %v2043_v62 = vstv %s4830_s19  ;;  %v2003_v32 = vadd.f32 %v2002_v49, %v1983_v52  ;;  %v2032_v4 = vmul.f32 %v2031_v44, %v2029_v26  ;;  %s4923_s14 = sld [smem:[#allocation3 + $0xf4]] }
 0x3ed   : >> { %v2047_v11 = vstv %s4835_s7  ;;  %v2051_v23 = vstv %s4838_s0  ;;  %v2007_v2 = vadd.f32 %v2006_v31, %v1987_v15  ;;  %v2011_v27 = vadd.f32 %v2010_v5, %v1991_v33  ;;  %s4926_s4 = sld [smem:[#allocation3 + $0xf5]]  ;;  %v3232_v15 = vld [vmem:[%s5480_s20 + $0x91] sm:$0xff] }
 0x3ee   : >> { %v2055_v12 = vstv %s4843_s13  ;;  %v2059_v41 = vstv %s4845_s23  ;;  %v2015_v0 = vadd.f32 %v2014_v43, %v1995_v30  ;;  %v2036_v39 = vmul.f32 %v2035_v25, %v2029_v26  ;;  %v2093_v46 = vpop.permute.xlu0 %2092  ;;  %s4930_s5 = sld [smem:[#allocation3 + $0xf6]] }
 0x3ef   : >> { %v2040_v35 = vmul.f32 %v2039_v48, %v2029_v26  ;;  %v2044_v22 = vmul.f32 %v2043_v62, %v2029_v26  ;;  %v2033_v34 = vadd.f32 %v2032_v4, %v2003_v32  ;;  %v2048_v63 = vmul.f32 %v4459_v29, %v2047_v11  ;;  %s4935_s10 = sld [smem:[#allocation3 + $0xf7]]  ;;  %v2129_v31 = vpop.permute.xlu1 %2128 }
 0x3f0   : >> { %v2052_v17 = vmul.f32 %v4459_v29, %v2051_v23  ;;  %v2056_v19 = vmul.f32 %v4459_v29, %v2055_v12  ;;  %v2060_v10 = vmul.f32 %v4459_v29, %v2059_v41  ;;  %v2067_v38 = vstv %s4849_s25  ;;  %s4937_s29 = sld [smem:[#allocation3 + $0xf8]] }
 0x3f1   : >> { %v2071_v40 = vstv %s4853_s28  ;;  %v2065_v13 = vsel %vm820_vm6, %v2063_v1, 0.0  ;;  %v2037_v28 = vadd.f32 %v2036_v39, %v2007_v2  ;;  %v2041_v9 = vadd.f32 %v2040_v35, %v2011_v27  ;;  %s4940_s19 = sld [smem:[#allocation3 + $0xf9]] }
 0x3f2   : >> { %v2045_v47 = vadd.f32 %v2044_v22, %v2015_v0  ;;  %v2075_v45 = vstv %s4857_s18  ;;  %v2079_v53 = vstv %s4859_s27  ;;  %v2049_v29 = vadd.f32 %v2048_v63, %v2033_v34  ;;  %s4944_s7 = sld [smem:[#allocation3 + $0xfa]] }
 0x3f3   : >> { %v2068_v24 = vmul.f32 %v2067_v38, %v2065_v13  ;;  %v2097_v58 = vstv %s4861_s17  ;;  %v2101_v50 = vstv %s4865_s22  ;;  %v2072_v56 = vmul.f32 %v2071_v40, %v2065_v13  ;;  %s4948_s0 = sld [smem:[#allocation3 + $0xfb]] }
 0x3f4   : >> { %v2076_v3 = vmul.f32 %v2075_v45, %v2065_v13  ;;  %v2105_v7 = vstv %s4870_s16  ;;  %v2095_v18 = vsel %vm819_vm5, %v2093_v46, 0.0  ;;  %v2053_v59 = vadd.f32 %v2052_v17, %v2037_v28  ;;  %s4950_s13 = sld [smem:[#allocation3 + $0xfc]] }
 0x3f5   : >> { %v2057_v16 = vadd.f32 %v2056_v19, %v2041_v9  ;;  %v2061_v37 = vadd.f32 %v2060_v10, %v2045_v47  ;;  %v2080_v14 = vmul.f32 %v2079_v53, %v2065_v13  ;;  %v2109_v36 = vstv %s4875_s15  ;;  %s4952_s23 = sld [smem:[#allocation3 + $0xfd]] }
 0x3f6   : >> { %v2069_v6 = vadd.f32 %v2068_v24, %v2049_v29  ;;  %v2098_v51 = vmul.f32 %v2097_v58, %v2095_v18  ;;  %v2113_v55 = vstv %s4879_s8  ;;  %v2117_v20 = vstv %s4882_s3  ;;  %s4955_s25 = sld [smem:[#allocation3 + $0xfe]] }
 0x3f7   : >> { %v2102_v61 = vmul.f32 %v2101_v50, %v2095_v18  ;;  %v2106_v8 = vmul.f32 %v2105_v7, %v2095_v18  ;;  %v2121_v21 = vstv %s4885_s12  ;;  %v2125_v54 = vstv %s4889_s6  ;;  %s4961_s28 = sld [smem:[#allocation3 + $0xff]] }
 0x3f8   : >> { %v2073_v57 = vadd.f32 %v2072_v56, %v2053_v59  ;;  %v2077_v60 = vadd.f32 %v2076_v3, %v2057_v16  ;;  %v2081_v52 = vadd.f32 %v2080_v14, %v2061_v37  ;;  %v2110_v49 = vmul.f32 %v2109_v36, %v2095_v18  ;;  %v2159_v23 = vpop.permute.xlu0 %2158  ;;  %s4964_s18 = sld [smem:[#allocation3 + $0x100]]  ;;  %v3233_v3 = vld [vmem:[%s5480_s20 + $0x92] sm:$0xff] }
 0x3f9   : >> { %v2099_v44 = vadd.f32 %v2098_v51, %v2069_v6  ;;  %v2114_v33 = vmul.f32 %v3232_v15, %v2113_v55  ;;  %v2118_v5 = vmul.f32 %v3232_v15, %v2117_v20  ;;  %v2122_v26 = vmul.f32 %v3232_v15, %v2121_v21  ;;  %s4967_s27 = sld [smem:[#allocation3 + $0x101]]  ;;  %v2195_v50 = vpop.permute.xlu1 %2194 }
 0x3fa   : >> { %v2126_v30 = vmul.f32 %v3232_v15, %v2125_v54  ;;  %v2133_v43 = vstv %s4891_s1  ;;  %v2137_v25 = vstv %s4896_s21  ;;  %v2131_v48 = vsel %vm820_vm6, %v2129_v31, 0.0  ;;  %s4971_s17 = sld [smem:[#allocation3 + $0x102]] }
 0x3fb   : >> { %v2103_v62 = vadd.f32 %v2102_v61, %v2073_v57  ;;  %v2107_v32 = vadd.f32 %v2106_v8, %v2077_v60  ;;  %v2111_v4 = vadd.f32 %v2110_v49, %v2081_v52  ;;  %v2141_v11 = vstv %s4900_s26  ;;  %s4976_s22 = sld [smem:[#allocation3 + $0x103]] }
 0x3fc   : >> { %v2145_v2 = vstv %s4904_s9  ;;  %v2115_v27 = vadd.f32 %v2114_v33, %v2099_v44  ;;  %v2134_v12 = vmul.f32 %v2133_v43, %v2131_v48  ;;  %v2163_v41 = vstv %s4906_s30  ;;  %s4978_s16 = sld [smem:[#allocation3 + $0x104]]  ;;  %v2225_v61 = vpop.permute.xlu0 %2224 }
 0x3fd   : >> { %v2167_v0 = vstv %s4908_s2  ;;  %v2138_v39 = vmul.f32 %v2137_v25, %v2131_v48  ;;  %v2142_v35 = vmul.f32 %v2141_v11, %v2131_v48  ;;  %v2171_v22 = vstv %s4913_s24  ;;  %s4981_s15 = sld [smem:[#allocation3 + $0x105]] }
 0x3fe   : >> { %v2161_v1 = vsel %vm819_vm5, %v2159_v23, 0.0  ;;  %v2119_v34 = vadd.f32 %v2118_v5, %v2103_v62  ;;  %v2123_v63 = vadd.f32 %v2122_v26, %v2107_v32  ;;  %v2127_v17 = vadd.f32 %v2126_v30, %v2111_v4  ;;  %s4985_s8 = sld [smem:[#allocation3 + $0x106]] }
 0x3ff   : >> { %v2146_v19 = vmul.f32 %v2145_v2, %v2131_v48  ;;  %v2175_v10 = vstv %s4920_s11  ;;  %v2135_v38 = vadd.f32 %v2134_v12, %v2115_v27  ;;  %v2164_v40 = vmul.f32 %v2163_v41, %v2161_v1  ;;  %s4989_s3 = sld [smem:[#allocation3 + $0x107]] }
 0x400   : >> { %v2179_v13 = vstv %s4923_s14  ;;  %v2183_v28 = vstv %s4926_s4  ;;  %v2168_v9 = vmul.f32 %v2167_v0, %v2161_v1  ;;  %v2172_v47 = vmul.f32 %v2171_v22, %v2161_v1  ;;  %s4991_s12 = sld [smem:[#allocation3 + $0x110]]  ;;  %v2261_v0 = vpop.permute.xlu1 %2260 }
 0x401   : >> { %v2187_v45 = vstv %s4930_s5  ;;  %v2191_v46 = vstv %s4935_s10  ;;  %v2139_v53 = vadd.f32 %v2138_v39, %v2119_v34  ;;  %v2143_v29 = vadd.f32 %v2142_v35, %v2123_v63  ;;  %s4993_s6 = sld [smem:[#allocation3 + $0x111]]  ;;  %v3234_v35 = vld [vmem:[%s5480_s20 + $0xa8] sm:$0xff] }
 0x402   : >> { %v2147_v24 = vadd.f32 %v2146_v19, %v2127_v17  ;;  %v2176_v58 = vmul.f32 %v2175_v10, %v2161_v1  ;;  %v2165_v56 = vadd.f32 %v2164_v40, %v2135_v38  ;;  %v2180_v7 = vmul.f32 %v3233_v3, %v2179_v13  ;;  %s4996_s1 = sld [smem:[#allocation3 + $0x112]] }
 0x403   : >> { %v2184_v18 = vmul.f32 %v3233_v3, %v2183_v28  ;;  %v2188_v59 = vmul.f32 %v3233_v3, %v2187_v45  ;;  %v2192_v16 = vmul.f32 %v3233_v3, %v2191_v46  ;;  %v2199_v37 = vstv %s4937_s29  ;;  %s5002_s21 = sld [smem:[#allocation3 + $0x113]] }
 0x404   : >> { %v2203_v14 = vstv %s4940_s19  ;;  %v2197_v36 = vsel %vm820_vm6, %v2195_v50, 0.0  ;;  %v2169_v6 = vadd.f32 %v2168_v9, %v2139_v53  ;;  %v2173_v51 = vadd.f32 %v2172_v47, %v2143_v29  ;;  %s5005_s26 = sld [smem:[#allocation3 + $0x108]] }
 0x405   : >> { %v2177_v55 = vadd.f32 %v2176_v58, %v2147_v24  ;;  %v2207_v20 = vstv %s4944_s7  ;;  %v2211_v8 = vstv %s4948_s0  ;;  %s5008_s9 = sld [smem:[#allocation3 + $0x109]]  ;;  %v2181_v21 = vadd.f32 %v2180_v7, %v2165_v56 }
 0x406   : >> { %v2200_v54 = vmul.f32 %v2199_v37, %v2197_v36  ;;  %v2229_v57 = vstv %s4950_s13  ;;  %v2233_v60 = vstv %s4952_s23  ;;  %s5012_s30 = sld [smem:[#allocation3 + $0x10a]]  ;;  %v2204_v52 = vmul.f32 %v2203_v14, %v2197_v36 }
 0x407   : >> { %v2208_v49 = vmul.f32 %v2207_v20, %v2197_v36  ;;  %v2237_v31 = vstv %s4955_s25  ;;  %v2227_v44 = vsel %vm819_vm5, %v2225_v61, 0.0  ;;  %s5017_s2 = sld [smem:[#allocation3 + $0x10b]]  ;;  %v2185_v15 = vadd.f32 %v2184_v18, %v2169_v6 }
 0x408   : >> { %v2189_v33 = vadd.f32 %v2188_v59, %v2173_v51  ;;  %v2193_v5 = vadd.f32 %v2192_v16, %v2177_v55  ;;  %v2212_v26 = vmul.f32 %v2211_v8, %v2197_v36  ;;  %s5019_s24 = sld [smem:[#allocation3 + $0x10c]]  ;;  %v2241_v30 = vstv %s4961_s28 }
 0x409   : >> { %s5022_s11 = sld [smem:[#allocation3 + $0x10d]]  ;;  %v2201_v43 = vadd.f32 %v2200_v54, %v2181_v21  ;;  %v2230_v25 = vmul.f32 %v2229_v57, %v2227_v44  ;;  %v2245_v48 = vstv %s4964_s18  ;;  %v2249_v62 = vstv %s4967_s27 }
 0x40a   : >> { %s5026_s14 = sld [smem:[#allocation3 + $0x10e]]  ;;  %v2234_v32 = vmul.f32 %v2233_v60, %v2227_v44  ;;  %v2238_v4 = vmul.f32 %v2237_v31, %v2227_v44  ;;  %v2253_v11 = vstv %s4971_s17  ;;  %v2257_v23 = vstv %s4976_s22 }
 0x40b   : >> { %s5030_s4 = sld [smem:[#allocation3 + $0x10f]]  ;;  %v2205_v2 = vadd.f32 %v2204_v52, %v2185_v15  ;;  %v2209_v27 = vadd.f32 %v2208_v49, %v2189_v33  ;;  %v2213_v12 = vadd.f32 %v2212_v26, %v2193_v5  ;;  %v2242_v41 = vmul.f32 %v2241_v30, %v2227_v44  ;;  %v3235_v44 = vld [vmem:[%s5480_s20 + $0xa9] sm:$0xff] }
 0x40c   : >> { %s5032_s5 = sld [smem:[#allocation3 + $0x11c]]  ;;  %v2231_v39 = vadd.f32 %v2230_v25, %v2201_v43  ;;  %v2246_v22 = vmul.f32 %v3234_v35, %v2245_v48  ;;  %v2250_v1 = vmul.f32 %v3234_v35, %v2249_v62  ;;  %v2254_v34 = vmul.f32 %v3234_v35, %v2253_v11 }
 0x40d   : >> { %s5034_s10 = sld [smem:[#allocation3 + $0x11d]]  ;;  %v2258_v63 = vmul.f32 %v3234_v35, %v2257_v23  ;;  %v2265_v17 = vstv %s4978_s16  ;;  %v2269_v19 = vstv %s4981_s15  ;;  %v2263_v10 = vsel %vm820_vm6, %v2261_v0, 0.0 }
 0x40e   : >> { %s5037_s29 = sld [smem:[#allocation3 + $0x11e]]  ;;  %v2235_v38 = vadd.f32 %v2234_v32, %v2205_v2  ;;  %v2239_v40 = vadd.f32 %v2238_v4, %v2209_v27  ;;  %v2243_v13 = vadd.f32 %v2242_v41, %v2213_v12  ;;  %v2273_v28 = vstv %s4985_s8 }
 0x40f   : >> { %s5043_s19 = sld [smem:[#allocation3 + $0x11f]]  ;;  %v2277_v9 = vstv %s4989_s3  ;;  %v2247_v47 = vadd.f32 %v2246_v22, %v2231_v39  ;;  %v2266_v45 = vmul.f32 %v2265_v17, %v2263_v10  ;;  %v2295_v46 = vstv %s5005_s26 }
 0x410   : >> { %s5046_s7 = sld [smem:[#allocation3 + $0x114]]  ;;  %v2299_v53 = vstv %s5008_s9  ;;  %v2270_v29 = vmul.f32 %v2269_v19, %v2263_v10  ;;  %v2274_v24 = vmul.f32 %v2273_v28, %v2263_v10  ;;  %v2303_v58 = vstv %s5012_s30 }
 0x411   : >> { %s5049_s0 = sld [smem:[#allocation3 + $0x115]]  ;;  %v2307_v50 = vstv %s5017_s2  ;;  %v2251_v56 = vadd.f32 %v2250_v1, %v2235_v38  ;;  %v2255_v3 = vadd.f32 %v2254_v34, %v2239_v40  ;;  %v2259_v7 = vadd.f32 %v2258_v63, %v2243_v13  ;;  %v3236_v38 = vld [vmem:[%s5480_s20 + $0xaa] sm:$0xff] }
 0x412   : >> { %s5053_s13 = sld [smem:[#allocation3 + $0x116]]  ;;  %v2278_v18 = vmul.f32 %v2277_v9, %v2263_v10  ;;  %v2331_v16 = vstv %s4991_s12  ;;  %v2335_v37 = vstv %s4993_s6  ;;  %v2311_v14 = vstv %s5019_s24 }
 0x413   : >> { %s5057_s23 = sld [smem:[#allocation3 + $0x118]]  ;;  %v2267_v6 = vadd.f32 %v2266_v45, %v2247_v47  ;;  %v2315_v51 = vstv %s5022_s11  ;;  %v2319_v55 = vstv %s5026_s14  ;;  %v2323_v20 = vstv %s5030_s4 }
 0x414   : >> { %s5059_s25 = sld [smem:[#allocation3 + $0x119]]  ;;  %v2271_v57 = vadd.f32 %v2270_v29, %v2251_v56  ;;  %v2275_v60 = vadd.f32 %v2274_v24, %v2255_v3  ;;  %v2279_v52 = vadd.f32 %v2278_v18, %v2259_v7  ;;  %v2339_v49 = vstv %s4996_s1 }
 0x415   : >> { %s5066_s28 = sld [smem:[#allocation3 + $0x11a]]  ;;  %v2312_v15 = vmul.f32 %v3235_v44, %v2311_v14  ;;  %v2316_v33 = vmul.f32 %v3235_v44, %v2315_v51  ;;  %v2320_v5 = vmul.f32 %v3235_v44, %v2319_v55  ;;  %v2324_v30 = vmul.f32 %v3235_v44, %v2323_v20 }
 0x416   : >> { %s5071_s18 = sld [smem:[#allocation3 + $0x11b]]  ;;  %v2343_v62 = vstv %s5002_s21  ;;  %v2397_v32 = vstv %s5032_s5  ;;  %v2401_v4 = vstv %s5034_s10  ;;  %v2405_v11 = vstv %s5037_s29 }
 0x417   : >> { %s5073_s27 = sld [smem:[#allocation3 + $0x117]]  ;;  %v2409_v2 = vstv %s5043_s19  ;;  %v2361_v27 = vstv %s5046_s7  ;;  %v2365_v0 = vstv %s5049_s0 }
 0x418   : >> { %v2369_v19 = vstv %s5053_s13  ;;  %s5558_s20 = sld [smem:[#allocation9_spill]] }
 0x419   : >> { %v2377_v12 = vstv %s5057_s23  ;;  %s5559_s17 = sld [smem:[#allocation7_spill]] }
 0x41a   : >> { %v2381_v39 = vstv %s5059_s25  ;;  %v2378_v40 = vmul.f32 %v3236_v38, %v2377_v12 }
 0x41b   : >> { %v2385_v35 = vstv %s5066_s28  ;;  %v2382_v45 = vmul.f32 %v3236_v38, %v2381_v39 }
 0x41c   : >> { %v2389_v63 = vstv %s5071_s18 }
 0x41d   : >> { %v2373_v10 = vstv %s5073_s27  ;;  %v2390_v29 = vmul.f32 %v3236_v38, %v2389_v63 }
 0x41e   : >> { %s5560_s22 = sshll.u32 %s5558_s20, 3  ;;  %s826_s30 = sadd.s32 1, %s5558_s20  }
 0x41f   : >> { %v2291_v59 = vpop.permute.xlu0 %2290  ;;  %v2327_v31 = vpop.permute.xlu1 %2326  ;;  %s2412_s16 = scalar_lea.vmem %s5559_s17, %s5560_s22  ;;  %p823_p1 = scmp.ge.s32.totalorder %s826_s30, 2  }
 0x420   : >> { %v2293_v36 = vsel %vm819_vm5, %v2291_v59, 0.0  ;;  %v2329_v23 = vsel %vm820_vm6, %v2327_v31, 0.0  ;;  %s5561_s15 = sld [smem:[#allocation7_spill]] (%p823_p1)  ;;  %vm2514_vm8 = vcmask (%p823_p1), 1041408   ;;  %vm2516_vm9 = vcmask (%p823_p1), 1042432  }
 0x421   : >> { %v2296_v61 = vmul.f32 %v2295_v46, %v2293_v36  ;;  %v2300_v8 = vmul.f32 %v2299_v53, %v2293_v36  ;;  %v2304_v21 = vmul.f32 %v2303_v58, %v2293_v36  ;;  %v2308_v54 = vmul.f32 %v2307_v50, %v2293_v36  ;;  %s5562_s8 = sld [smem:[#allocation8_spill]] (%p823_p1) }
 0x422   : >> { %v2332_v17 = vmul.f32 %v2331_v16, %v2329_v23  ;;  %v2336_v13 = vmul.f32 %v2335_v37, %v2329_v23  ;;  %v2340_v28 = vmul.f32 %v2339_v49, %v2329_v23  ;;  %v2344_v9 = vmul.f32 %v2343_v62, %v2329_v23 }
 0x423   : >> { %v2297_v26 = vadd.f32 %v2296_v61, %v2267_v6  ;;  %v2301_v43 = vadd.f32 %v2300_v8, %v2271_v57  ;;  %v2305_v25 = vadd.f32 %v2304_v21, %v2275_v60  ;;  %v2309_v48 = vadd.f32 %v2308_v54, %v2279_v52 }
 0x424   : >> { %v2386_v53 = vmul.f32 %v3236_v38, %v2385_v35  ;;  %vm2518_vm10 = vcmask (%p823_p1), 1043456   ;;  %vm2520_vm11 = vcmask (%p823_p1), 1044480   ;;  %vm2522_vm12 = vcmask (%p823_p1), 1045504  }
 0x425   : >> { %v2313_v41 = vadd.f32 %v2312_v15, %v2297_v26  ;;  %v2317_v22 = vadd.f32 %v2316_v33, %v2301_v43  ;;  %v2321_v1 = vadd.f32 %v2320_v5, %v2305_v25  ;;  %v2325_v34 = vadd.f32 %v2324_v30, %v2309_v48 }
 0x426   : > { %vm2524_vm13 = vcmask (%p823_p1), 1046528  }
 0x427   : >> { %v2333_v24 = vadd.f32 %v2332_v17, %v2313_v41  ;;  %v2337_v56 = vadd.f32 %v2336_v13, %v2317_v22  ;;  %v2341_v3 = vadd.f32 %v2340_v28, %v2321_v1  ;;  %v2345_v7 = vadd.f32 %v2344_v9, %v2325_v34 }
 0x42a   : >> { %v2393_v47 = vpop.permute.xlu1 %2392  ;;  %v2357_v46 = vpop.permute.xlu0 %2356 }
 0x42b   : >> { %v2359_v58 = vsel %vm819_vm5, %v2357_v46, 0.0  ;;  %v2395_v50 = vsel %vm820_vm6, %v2393_v47, 0.0 }
 0x42c   : >> { %v2362_v18 = vmul.f32 %v2361_v27, %v2359_v58  ;;  %v2366_v59 = vmul.f32 %v2365_v0, %v2359_v58  ;;  %v2370_v16 = vmul.f32 %v2369_v19, %v2359_v58  ;;  %v2374_v37 = vmul.f32 %v2373_v10, %v2359_v58 }
 0x42d   : >> { %v2398_v55 = vmul.f32 %v2397_v32, %v2395_v50  ;;  %v2402_v20 = vmul.f32 %v2401_v4, %v2395_v50  ;;  %v2406_v61 = vmul.f32 %v2405_v11, %v2395_v50  ;;  %v2410_v8 = vmul.f32 %v2409_v2, %v2395_v50 }
 0x42e   : >> { %v2363_v14 = vadd.f32 %v2362_v18, %v2333_v24  ;;  %v2367_v36 = vadd.f32 %v2366_v59, %v2337_v56  ;;  %v2371_v6 = vadd.f32 %v2370_v16, %v2341_v3  ;;  %v2375_v51 = vadd.f32 %v2374_v37, %v2345_v7 }
 0x430   : >> { %v2379_v21 = vadd.f32 %v2378_v40, %v2363_v14  ;;  %v2383_v54 = vadd.f32 %v2382_v45, %v2367_v36  ;;  %v2387_v57 = vadd.f32 %v2386_v53, %v2371_v6  ;;  %v2391_v60 = vadd.f32 %v2390_v29, %v2375_v51 }
 0x431   : > { %825 = sbr.rel (!%p823_p1) target bundleno = 458 (0x1ca), region = 138 }
 0x432   : >> { %v2399_v52 = vadd.f32 %v2398_v55, %v2379_v21  ;;  %v2403_v49 = vadd.f32 %v2402_v20, %v2383_v54  ;;  %v2407_v31 = vadd.f32 %v2406_v61, %v2387_v57  ;;  %v2411_v44 = vadd.f32 %v2410_v8, %v2391_v60 }
 0x434   : >> { %2413 = vst.msk [vmem:[%s2412_s16] sm:$0xff] %vm310_vm1, %v2399_v52  ;;  %3095 = vst.msk [vmem:[%s2412_s16 + $0x10] sm:$0xff] %vm310_vm1, %v2403_v49 }
 0x435   : >> { %3097 = vst.msk [vmem:[%s2412_s16 + $0x20] sm:$0xff] %vm310_vm1, %v2407_v31  ;;  %3099 = vst.msk [vmem:[%s2412_s16 + $0x30] sm:$0xff] %vm310_vm1, %v2411_v44 }
 0x43c   : > { %v2422_v15 = vld [vmem:[%s5561_s15] sm:$0xff]  ;;  %v2423_v33 = vld [vmem:[%s5561_s15 + $0x8] sm:$0xff]  ;;  %v3100_v5 = vld [vmem:[%s5561_s15 + $0x10] sm:$0xff] }
 0x43d   : > { %v2424_v26 = vsel %vm310_vm1, %v2422_v15, 0.0  ;;  %v2425_v30 = vsel %vm310_vm1, %v2423_v33, 0.0  ;;  %v2433_v43 = vmul.f32 %v2422_v15, %v2422_v15  ;;  %v2434_v25 = vmul.f32 %v2423_v33, %v2423_v33  ;;  %v3101_v48 = vld [vmem:[%s5561_s15 + $0x18] sm:$0xff]  ;;  %v3102_v62 = vld [vmem:[%s5561_s15 + $0x20] sm:$0xff]  ;;  %v3103_v23 = vld [vmem:[%s5561_s15 + $0x28] sm:$0xff] }
 0x43e   : > { %v2426_v32 = vadd.f32 %v2425_v30, %v2424_v26  ;;  %v2447_v42 = vsel %vm310_vm1, %v3100_v5, 0.0  ;;  %v2448_v4 = vsel %vm310_vm1, %v3101_v48, 0.0  ;;  %v2456_v11 = vmul.f32 %v3100_v5, %v3100_v5  ;;  %v3104_v1 = vld [vmem:[%s5561_s15 + $0x30] sm:$0xff]  ;;  %v3105_v28 = vld [vmem:[%s5561_s15 + $0x38] sm:$0xff] }
 0x43f   : > { %v2435_v2 = vsel %vm310_vm1, %v2433_v43, 0.0  ;;  %v2436_v27 = vsel %vm310_vm1, %v2434_v25, 0.0  ;;  %v2449_v12 = vadd.f32 %v2448_v4, %v2447_v42  ;;  %v2457_v41 = vmul.f32 %v3101_v48, %v3101_v48 }
 0x440   : > { %v2427_v0 = vrot.slane %v2426_v32, 4  ;;  %v2437_v39 = vadd.f32 %v2436_v27, %v2435_v2  ;;  %v2458_v35 = vsel %vm310_vm1, %v2456_v11, 0.0  ;;  %v2470_v22 = vsel %vm310_vm1, %v3102_v62, 0.0 }
 0x441   : > { %v2450_v34 = vrot.slane %v2449_v12, 4  ;;  %v2459_v63 = vsel %vm310_vm1, %v2457_v41, 0.0  ;;  %v2471_v17 = vsel %vm310_vm1, %v3103_v23, 0.0  ;;  %v2479_v19 = vmul.f32 %v3102_v62, %v3102_v62 }
 0x442   : > { %v2428_v10 = vadd.f32 %v2427_v0, %v2426_v32  ;;  %v2438_v38 = vrot.slane %v2437_v39, 4  ;;  %v2460_v40 = vadd.f32 %v2459_v63, %v2458_v35  ;;  %v2472_v13 = vadd.f32 %v2471_v17, %v2470_v22 }
 0x443   : > { %v2451_v9 = vadd.f32 %v2450_v34, %v2449_v12  ;;  %v2480_v47 = vmul.f32 %v3103_v23, %v3103_v23  ;;  %v2481_v45 = vsel %vm310_vm1, %v2479_v19, 0.0  ;;  %v2493_v46 = vsel %vm310_vm1, %v3104_v1, 0.0 }
 0x444   : > { %v2429_v53 = vrot.slane %v2428_v10, 2  ;;  %v2439_v29 = vadd.f32 %v2438_v38, %v2437_v39  ;;  %v2461_v24 = vrot.slane %v2460_v40, 4  ;;  %v2473_v58 = vrot.slane %v2472_v13, 4 }
 0x445   : > { %v2452_v50 = vrot.slane %v2451_v9, 2  ;;  %v2482_v56 = vsel %vm310_vm1, %v2480_v47, 0.0  ;;  %v2494_v3 = vsel %vm310_vm1, %v3105_v28, 0.0  ;;  %v2502_v7 = vmul.f32 %v3104_v1, %v3104_v1 }
 0x446   : > { %v2430_v18 = vadd.f32 %v2429_v53, %v2428_v10  ;;  %v2440_v59 = vrot.slane %v2439_v29, 2  ;;  %v2462_v16 = vadd.f32 %v2461_v24, %v2460_v40  ;;  %v2474_v37 = vadd.f32 %v2473_v58, %v2472_v13 }
 0x447   : > { %v2453_v14 = vadd.f32 %v2452_v50, %v2451_v9  ;;  %v2483_v36 = vadd.f32 %v2482_v56, %v2481_v45  ;;  %v2495_v6 = vadd.f32 %v2494_v3, %v2493_v46  ;;  %v2503_v51 = vmul.f32 %v3105_v28, %v3105_v28 }
 0x448   : > { %v2431_v55 = vrot.slane %v2430_v18, 1  ;;  %v2463_v20 = vrot.slane %v2462_v16, 2  ;;  %v2475_v61 = vrot.slane %v2474_v37, 2  ;;  %v2504_v57 = vsel %vm310_vm1, %v2502_v7, 0.0 }
 0x449   : > { %v2454_v8 = vrot.slane %v2453_v14, 1  ;;  %v2484_v21 = vrot.slane %v2483_v36, 4  ;;  %v2496_v54 = vrot.slane %v2495_v6, 4  ;;  %v2441_v52 = vadd.f32 %v2440_v59, %v2439_v29 }
 0x44a   : > { %v2432_v60 = vadd.f32 %v2431_v55, %v2430_v18  ;;  %v2464_v49 = vadd.f32 %v2463_v20, %v2462_v16  ;;  %v2476_v31 = vadd.f32 %v2475_v61, %v2474_v37  ;;  %v2505_v5 = vsel %vm310_vm1, %v2503_v51, 0.0 }
 0x44b   : > { %v2455_v44 = vadd.f32 %v2454_v8, %v2453_v14  ;;  %v2485_v15 = vadd.f32 %v2484_v21, %v2483_v36  ;;  %v2497_v33 = vadd.f32 %v2496_v54, %v2495_v6  ;;  %v2506_v30 = vadd.f32 %v2505_v5, %v2504_v57 }
 0x44c   : > { %v2477_v26 = vrot.slane %v2476_v31, 1  ;;  %v2442_v48 = vrot.slane %v2441_v52, 1  ;;  %v2465_v42 = vrot.slane %v2464_v49, 1 }
 0x44d   : > { %v2486_v43 = vrot.slane %v2485_v15, 2  ;;  %v2498_v25 = vrot.slane %v2497_v33, 2  ;;  %v2507_v32 = vrot.slane %v2506_v30, 4  ;;  %v2513_v23 = vsel %vm301_vm0, %v2432_v60, %v2455_v44 }
 0x44e   : > { %v2478_v62 = vadd.f32 %v2477_v26, %v2476_v31  ;;  %v2443_v41 = vadd.f32 %v2442_v48, %v2441_v52  ;;  %v2466_v35 = vadd.f32 %v2465_v42, %v2464_v49 }
 0x44f   : > { %v2487_v4 = vadd.f32 %v2486_v43, %v2485_v15  ;;  %v2499_v11 = vadd.f32 %v2498_v25, %v2497_v33  ;;  %v2508_v2 = vadd.f32 %v2507_v32, %v2506_v30 }
 0x450   : > { %v2515_v39 = vsel %vm2514_vm8, %v2513_v23, %v2478_v62 }
 0x451   : > { %v2488_v27 = vrot.slane %v2487_v4, 1  ;;  %v2500_v12 = vrot.slane %v2499_v11, 1  ;;  %v2509_v0 = vrot.slane %v2508_v2, 2 }
 0x453   : > { %v2501_v22 = vadd.f32 %v2500_v12, %v2499_v11  ;;  %v2489_v1 = vadd.f32 %v2488_v27, %v2487_v4  ;;  %v2510_v34 = vadd.f32 %v2509_v0, %v2508_v2 }
 0x455   : > { %v2517_v63 = vsel %vm2516_vm9, %v2515_v39, %v2501_v22  ;;  %v2511_v17 = vrot.slane %v2510_v34, 1 }
 0x456   : > { %v2519_v19 = vsel %vm2518_vm10, %v2517_v63, %v2443_v41 }
 0x457   : > { %v2521_v10 = vsel %vm2520_vm11, %v2519_v19, %v2466_v35  ;;  %v2512_v38 = vadd.f32 %v2511_v17, %v2510_v34 }
 0x458   : > { %v2523_v40 = vsel %vm2522_vm12, %v2521_v10, %v2489_v1 }
 0x459   : > { %v2525_v13 = vsel %vm2524_vm13, %v2523_v40, %v2512_v38 }
 0x45a   : > { %2526 = vst.msk [vmem:[%s5562_s8] sm:$0xff] %vm310_vm1, %v2525_v13 }
 0x45b PF: > { %s5563_s3 = sld [smem:[#allocation6_spill]] }
 0x461   : > { %s18_s21 = sadd.s32 1, %s5563_s3  }
 0x462   : > { %p15_p2 = scmp.ge.s32.totalorder %s18_s21, 4  }
 0x464   :  { %17 = sbr.rel (!%p15_p2) target bundleno = 9 (0x9), region = 149 }
 0x469   :  { %2562 = vsyncpa [#allocation4], 1 }
 0x46a   :  { %2564 = vsyncpa [#allocation4 + $0x1], 1 }

</bundles_post_ra>
